<compile_context>
chip_gen: v7x
topology: tpu7x:2x2x1
jax: 0.10.0
libtpu: 0.0.40
codegen_flags: <defaults>
</compile_context>

<pallas_src>
import functools

import numpy as np

import jax
import jax.numpy as jnp
from jax.experimental import pallas as pl
from jax.experimental.pallas import tpu as pltpu


CPAD = 128                  # lane padding for channels / fc widths / logits
H_IN = 28
K = 5
OH1, OW1 = 24, 24           # conv1 output spatial (pre-pool)
PH1, PW1 = 12, 12           # conv1 output after 2x2 pool
OH2, OW2 = 8, 8             # conv2 output spatial (pre-pool)
PH2, PW2 = 4, 4             # conv2 output after 2x2 pool
FEAT = PH2 * PW2 * CPAD     # 2048 (padded NHWC feature width)


# ----------------------------------------------------------------------------
# Pallas kernels
# ----------------------------------------------------------------------------
def _conv1_kernel(x_ref, wb_ref, b_ref, se_ref, so_ref, o_ref, *, tb):
    """Conv1 (5x5 VALID) + bias + ReLU + 2x2/2 max-pool, fully fused.

    x_ref  : (tb, 28, 28*Cin)     bf16, lanes = (w, cin)
    wb_ref : (5, 28*Cin, 24*128)  bf16 banded weights, lanes = (ow, cout_pad)
    b_ref  : (1, 24*128)          f32  bias tiled over ow
    se/so  : (tb*12, tb*24)       bf16 0/1 row selectors (even / odd oh rows)
    o_ref  : (tb*12, 12*128)      bf16, rows = (b, oh2), lanes = (ow2, cout_pad)
    """
    x = x_ref[...]
    wc = x.shape[-1]
    acc = None
    for i in range(K):                                   # accumulate 5 MXU dots
        xs = x[:, i:i + OH1, :].reshape(tb * OH1, wc)
        part = jnp.dot(xs, wb_ref[i], preferred_element_type=jnp.float32)
        acc = part if acc is None else acc + part
    acc = jnp.maximum(acc + b_ref[...], 0.0)             # (tb*24, 24*128) f32

    # max-pool along W: ow pairs are adjacent 128-lane blocks.
    parts = []
    for k in range(PW1):
        lo = acc[:, (2 * k) * CPAD:(2 * k + 1) * CPAD]
        hi = acc[:, (2 * k + 1) * CPAD:(2 * k + 2) * CPAD]
        parts.append(jnp.maximum(lo, hi))
    wpool = jnp.concatenate(parts, axis=1).astype(jnp.bfloat16)   # (tb*24, 12*128)

    # max-pool along H: exact 0/1 row-selection matmuls (even vs odd oh rows).
    even = jnp.dot(se_ref[...], wpool, preferred_element_type=jnp.float32)
    odd = jnp.dot(so_ref[...], wpool, preferred_element_type=jnp.float32)
    o_ref[...] = jnp.maximum(even, odd).astype(jnp.bfloat16)


def _conv2_kernel(x_ref, w_ref, b_ref, s_ref, o_ref, *, tb):
    """Conv2 (5x5 VALID) + bias + ReLU + 2x2/2 max-pool + NHWC feature flatten.

    x_ref : (tb, 12, 12, 128)  bf16 (conv1 pooled output, channels padded)
    w_ref : (25*128, 128)      bf16, rows = (kh, kw, cin_pad), cols = cout_pad
    b_ref : (1, 128)           f32
    s_ref : (4, tb*16, tb*64)  bf16 0/1 row selectors for the 4 pool taps
    o_ref : (tb*16, 128)       bf16, rows = (b, oh2, ow2)  == NHWC feature layout
    """
    x = x_ref[...]
    # in-VMEM im2col: 25 window slices, each 128-lane aligned, concatenated on lanes.
    pieces = [x[:, i:i + OH2, j:j + OW2, :] for i in range(K) for j in range(K)]
    patches = jnp.concatenate(pieces, axis=-1)            # (tb, 8, 8, 3200)
    patches = patches.reshape(tb * OH2 * OW2, K * K * CPAD)
    acc = jnp.dot(patches, w_ref[...], preferred_element_type=jnp.float32)
    acc = jnp.maximum(acc + b_ref[...], 0.0).astype(jnp.bfloat16)   # (tb*64, 128)

    taps = [jnp.dot(s_ref[t], acc, preferred_element_type=jnp.float32)
            for t in range(4)]
    pooled = jnp.maximum(jnp.maximum(taps[0], taps[1]),
                         jnp.maximum(taps[2], taps[3]))
    o_ref[...] = pooled.astype(jnp.bfloat16)


def _head_kernel(f_ref, w1_ref, b1_ref, w2_ref, b2_ref, w3_ref, b3_ref,
                 wd1_ref, bd1_ref, wd2_ref, bd2_ref, oc_ref, od_ref):
    """All five Linear layers fused; intermediate activations never leave VMEM.

    f_ref : (tm, 2048) bf16 feature;  w* : (K, 128) bf16;  b* : (1, 128) f32
    oc/od : (tm, 128) f32 padded class / domain logits
    """
    f = f_ref[...]
    h = jnp.dot(f, w1_ref[...], preferred_element_type=jnp.float32) + b1_ref[...]
    h = jnp.maximum(h, 0.0).astype(jnp.bfloat16)
    h = jnp.dot(h, w2_ref[...], preferred_element_type=jnp.float32) + b2_ref[...]
    h = jnp.maximum(h, 0.0).astype(jnp.bfloat16)
    oc_ref[...] = jnp.dot(h, w3_ref[...], preferred_element_type=jnp.float32) + b3_ref[...]

    d = jnp.dot(f, wd1_ref[...], preferred_element_type=jnp.float32) + bd1_ref[...]
    d = jnp.maximum(d, 0.0).astype(jnp.bfloat16)
    od_ref[...] = jnp.dot(d, wd2_ref[...], preferred_element_type=jnp.float32) + bd2_ref[...]


# ----------------------------------------------------------------------------
# Trace-time constants: 0/1 pooling row-selectors (block-diagonal per image).
# ----------------------------------------------------------------------------
def _h_pool_selectors(tb):
    rows = tb * PH1
    se = np.zeros((rows, tb * OH1), np.float32)
    so = np.zeros((rows, tb * OH1), np.float32)
    for t in range(tb):
        for k in range(PH1):
            se[t * PH1 + k, t * OH1 + 2 * k] = 1.0
            so[t * PH1 + k, t * OH1 + 2 * k + 1] = 1.0
    return jnp.asarray(se, jnp.bfloat16), jnp.asarray(so, jnp.bfloat16)


def _pool2_selectors(tb):
    sel = np.zeros((4, tb * PH2 * PW2, tb * OH2 * OW2), np.float32)
    for t in range(tb):
        for oh2 in range(PH2):
            for ow2 in range(PW2):
                r = t * PH2 * PW2 + oh2 * PW2 + ow2
                for dh in range(2):
                    for dw in range(2):
                        c = t * OH2 * OW2 + (2 * oh2 + dh) * OW2 + (2 * ow2 + dw)
                        sel[dh * 2 + dw, r, c] = 1.0
    return jnp.asarray(sel, jnp.bfloat16)


# ----------------------------------------------------------------------------
# pallas_call wrappers (batch-tiled, "parallel" grids)
# ----------------------------------------------------------------------------
def conv1_pool(x_bhw, wb, b_flat):
    B = x_bhw.shape[0]
    wc = x_bhw.shape[-1]
    tb = min(8, B)
    nb = pl.cdiv(B, tb)
    se, so = _h_pool_selectors(tb)
    out = pl.pallas_call(
        functools.partial(_conv1_kernel, tb=tb),
        out_shape=jax.ShapeDtypeStruct((B * PH1, PW1 * CPAD), jnp.bfloat16),
        grid=(nb,),
        in_specs=[
            pl.BlockSpec((tb, H_IN, wc), lambda i: (i, 0, 0)),
            pl.BlockSpec((K, wc, OW1 * CPAD), lambda i: (0, 0, 0)),
            pl.BlockSpec((1, OW1 * CPAD), lambda i: (0, 0)),
            pl.BlockSpec((tb * PH1, tb * OH1), lambda i: (0, 0)),
            pl.BlockSpec((tb * PH1, tb * OH1), lambda i: (0, 0)),
        ],
        out_specs=pl.BlockSpec((tb * PH1, PW1 * CPAD), lambda i: (i, 0)),
        compiler_params=pltpu.CompilerParams(dimension_semantics=("parallel",)),
    )(x_bhw, wb, b_flat, se, so)
    return out.reshape(B, PH1, PW1, CPAD)          # free, contiguous reshape


def conv2_pool(x_nhwc, w2d, b2):
    B = x_nhwc.shape[0]
    tb = min(4, B)
    nb = pl.cdiv(B, tb)
    sel = _pool2_selectors(tb)
    out = pl.pallas_call(
        functools.partial(_conv2_kernel, tb=tb),
        out_shape=jax.ShapeDtypeStruct((B * PH2 * PW2, CPAD), jnp.bfloat16),
        grid=(nb,),
        in_specs=[
            pl.BlockSpec((tb, PH1, PW1, CPAD), lambda i: (i, 0, 0, 0)),
            pl.BlockSpec((K * K * CPAD, CPAD), lambda i: (0, 0)),
            pl.BlockSpec((1, CPAD), lambda i: (0, 0)),
            pl.BlockSpec((4, tb * PH2 * PW2, tb * OH2 * OW2), lambda i: (0, 0, 0)),
        ],
        out_specs=pl.BlockSpec((tb * PH2 * PW2, CPAD), lambda i: (i, 0)),
        compiler_params=pltpu.CompilerParams(dimension_semantics=("parallel",)),
    )(x_nhwc, w2d, b2, sel)
    return out.reshape(B, FEAT)                    # free, contiguous reshape


def heads(feature, p):
    B = feature.shape[0]
    tm = min(128, B)
    nm = pl.cdiv(B, tm)
    class_out, domain_out = pl.pallas_call(
        _head_kernel,
        out_shape=(jax.ShapeDtypeStruct((B, CPAD), jnp.float32),
                   jax.ShapeDtypeStruct((B, CPAD), jnp.float32)),
        grid=(nm,),
        in_specs=[
            pl.BlockSpec((tm, FEAT), lambda i: (i, 0)),
            pl.BlockSpec((FEAT, CPAD), lambda i: (0, 0)),
            pl.BlockSpec((1, CPAD), lambda i: (0, 0)),
            pl.BlockSpec((CPAD, CPAD), lambda i: (0, 0)),
            pl.BlockSpec((1, CPAD), lambda i: (0, 0)),
            pl.BlockSpec((CPAD, CPAD), lambda i: (0, 0)),
            pl.BlockSpec((1, CPAD), lambda i: (0, 0)),
            pl.BlockSpec((FEAT, CPAD), lambda i: (0, 0)),
            pl.BlockSpec((1, CPAD), lambda i: (0, 0)),
            pl.BlockSpec((CPAD, CPAD), lambda i: (0, 0)),
            pl.BlockSpec((1, CPAD), lambda i: (0, 0)),
        ],
        out_specs=(pl.BlockSpec((tm, CPAD), lambda i: (i, 0)),
                   pl.BlockSpec((tm, CPAD), lambda i: (i, 0))),
        compiler_params=pltpu.CompilerParams(dimension_semantics=("parallel",)),
    )(feature, p["fc1_w"], p["fc1_b"], p["fc2_w"], p["fc2_b"], p["fc3_w"], p["fc3_b"],
      p["dc1_w"], p["dc1_b"], p["dc2_w"], p["dc2_b"])
    return class_out[:, :10], domain_out[:, :2]


# ----------------------------------------------------------------------------
# Parameter construction (PyTorch-shaped) and one-time layout preparation
# ----------------------------------------------------------------------------
def _init_linear(key, fan_in, fan_out):
    kw, kb = jax.random.split(key)
    bound = 1.0 / float(fan_in) ** 0.5
    w = jax.random.uniform(kw, (fan_out, fan_in), jnp.float32, -bound, bound)
    b = jax.random.uniform(kb, (fan_out,), jnp.float32, -bound, bound)
    return w, b


def _init_conv(key, cin, cout, k):
    kw, kb = jax.random.split(key)
    fan_in = cin * k * k
    bound = 1.0 / float(fan_in) ** 0.5
    w = jax.random.uniform(kw, (cout, cin, k, k), jnp.float32, -bound, bound)
    b = jax.random.uniform(kb, (cout,), jnp.float32, -bound, bound)
    return w, b


def init_params(key):
    keys = jax.random.split(key, 7)
    p = {}
    p["conv1_w"], p["conv1_b"] = _init_conv(keys[0], 3, 32, 5)
    p["conv2_w"], p["conv2_b"] = _init_conv(keys[1], 32, 48, 5)
    p["fc1_w"], p["fc1_b"] = _init_linear(keys[2], 48 * 4 * 4, 100)
    p["fc2_w"], p["fc2_b"] = _init_linear(keys[3], 100, 100)
    p["fc3_w"], p["fc3_b"] = _init_linear(keys[4], 100, 10)
    p["dc1_w"], p["dc1_b"] = _init_linear(keys[5], 48 * 4 * 4, 100)
    p["dc2_w"], p["dc2_b"] = _init_linear(keys[6], 100, 2)
    return p


def _banded_conv1(w_oihw):
    # wb[i, win*Cin + cin, ow*128 + co] = w[co, cin, i, win - ow] (0 <= win-ow <= 4)
    cout, cin, kh, kw = w_oihw.shape
    wb = np.zeros((kh, H_IN * cin, OW1 * CPAD), np.float32)
    for ow in range(OW1):
        for j in range(kw):
            win = ow + j
            wb[:, win * cin:(win + 1) * cin, ow * CPAD:ow * CPAD + cout] = (
                np.transpose(w_oihw[:, :, :, j], (2, 1, 0)))
    return wb


def _pad_linear(w, b):
    out_f, in_f = w.shape
    wp = np.zeros((CPAD, CPAD), np.float32)
    wp[:in_f, :out_f] = w.T
    bp = np.zeros((1, CPAD), np.float32)
    bp[0, :out_f] = b
    return wp, bp


def _pad_first_fc(w, b):
    # PyTorch fc rows index (c, h, w) of the NCHW flatten; reorder to our NHWC
    # (h, w, c_pad) feature layout and pad to 128-wide lanes.
    out_f = w.shape[0]
    w4 = np.transpose(w.reshape(out_f, 48, PH2, PW2), (2, 3, 1, 0))   # (h, w, c, o)
    wp = np.zeros((PH2, PW2, CPAD, CPAD), np.float32)
    wp[:, :, :48, :out_f] = w4
    bp = np.zeros((1, CPAD), np.float32)
    bp[0, :out_f] = b
    return wp.reshape(FEAT, CPAD), bp


def prepare_params(raw):
    """One-time host-side layout work (per the perf review): fold/transpose/pad."""
    r = {k: np.asarray(v, np.float32) for k, v in raw.items()}
    p = {}

    w1 = r["conv1_w"]                                    # (32, 3, 5, 5)
    w1_folded = w1.sum(axis=1, keepdims=True)            # exact: expand() copies the channel
    b1p = np.zeros((CPAD,), np.float32)
    b1p[:w1.shape[0]] = r["conv1_b"]
    p["conv1_wb_c1"] = jnp.asarray(_banded_conv1(w1_folded), jnp.bfloat16)
    p["conv1_wb_c3"] = jnp.asarray(_banded_conv1(w1), jnp.bfloat16)
    p["conv1_b"] = jnp.asarray(np.tile(b1p, OW1)[None, :], jnp.float32)

    w2 = r["conv2_w"]                                    # (48, 32, 5, 5)
    w2d = np.zeros((K * K * CPAD, CPAD), np.float32)
    for i in range(K):
        for j in range(K):
            rbase = (i * K + j) * CPAD
            w2d[rbase:rbase + w2.shape[1], :w2.shape[0]] = w2[:, :, i, j].T
    b2p = np.zeros((1, CPAD), np.float32)
    b2p[0, :w2.shape[0]] = r["conv2_b"]
    p["conv2_w"] = jnp.asarray(w2d, jnp.bfloat16)
    p["conv2_b"] = jnp.asarray(b2p, jnp.float32)

    for name in ("fc1", "dc1"):
        wp, bp = _pad_first_fc(r[name + "_w"], r[name + "_b"])
        p[name + "_w"] = jnp.asarray(wp, jnp.bfloat16)
        p[name + "_b"] = jnp.asarray(bp, jnp.float32)
    for name in ("fc2", "fc3", "dc2"):
        wp, bp = _pad_linear(r[name + "_w"], r[name + "_b"])
        p[name + "_w"] = jnp.asarray(wp, jnp.bfloat16)
        p[name + "_b"] = jnp.asarray(bp, jnp.float32)
    return p


# ----------------------------------------------------------------------------
# Forward pass (mirrors MNISTmodel_plain.forward)
# ----------------------------------------------------------------------------
def forward(params, input_data, alpha):
    # ReverseLayerF is the identity in the forward pass (alpha only scales the
    # reversed gradient in backward), so the domain head consumes feature as-is.
    del alpha
    B, C = input_data.shape[0], input_data.shape[1]
    x = input_data.astype(jnp.float32)
    if C == 1:
        # .expand(B,3,28,28) folded into conv1 weights -> single-channel input.
        xb = x.reshape(B, H_IN, H_IN).astype(jnp.bfloat16)
        wb1 = params["conv1_wb_c1"]
    elif C == 3:
        xb = jnp.transpose(x, (0, 2, 3, 1)).reshape(B, H_IN, H_IN * 3).astype(jnp.bfloat16)
        wb1 = params["conv1_wb_c3"]
    else:
        raise ValueError(f"expected 1 or 3 input channels, got {C}")

    h = conv1_pool(xb, wb1, params["conv1_b"])                    # (B, 12, 12, 128)
    feature = conv2_pool(h, params["conv2_w"], params["conv2_b"])  # (B, 2048)
    return heads(feature, params)


# ----------------------------------------------------------------------------
# Pure-JAX float32 reference (for a sanity check against the original module)
# ----------------------------------------------------------------------------
def reference_forward(raw, input_data, alpha):
    del alpha
    B = input_data.shape[0]
    x = jnp.broadcast_to(input_data.astype(jnp.float32), (B, 3, 28, 28))
    x = jnp.transpose(x, (0, 2, 3, 1))

    def conv(v, w, b):
        y = jax.lax.conv_general_dilated(
            v, jnp.transpose(w, (2, 3, 1, 0)), (1, 1), "VALID",
            dimension_numbers=("NHWC", "HWIO", "NHWC"))
        return jax.nn.relu(y + b)

    def pool(v):
        return jax.lax.reduce_window(v, -jnp.inf, jax.lax.max,
                                     (1, 2, 2, 1), (1, 2, 2, 1), "VALID")

    h = pool(conv(x, raw["conv1_w"], raw["conv1_b"]))
    h = pool(conv(h, raw["conv2_w"], raw["conv2_b"]))
    feat = jnp.transpose(h, (0, 3, 1, 2)).reshape(B, 48 * 4 * 4)

    def lin(v, w, b):
        return v @ w.T + b

    c = jax.nn.relu(lin(feat, raw["fc1_w"], raw["fc1_b"]))
    c = jax.nn.relu(lin(c, raw["fc2_w"], raw["fc2_b"]))
    c = lin(c, raw["fc3_w"], raw["fc3_b"])
    d = jax.nn.relu(lin(feat, raw["dc1_w"], raw["dc1_b"]))
    d = lin(d, raw["dc2_w"], raw["dc2_b"])
    return c, d


if __name__ == "__main__":
    key = jax.random.PRNGKey(0)
    raw = init_params(key)
    params = prepare_params(raw)

    # MNIST-style single-channel input; forward's .expand() broadcasts to 3 channels.
    x = jax.random.normal(jax.random.PRNGKey(0), (2, 1, 28, 28), jnp.float32)
    alpha = jnp.float32(0.5)

    class_out, domain_out = jax.jit(forward)(params, x, alpha)
    class_out = jax.block_until_ready(class_out)
    domain_out = jax.block_until_ready(domain_out)

    assert class_out.shape == (2, 10), class_out.shape
    assert domain_out.shape == (2, 2), domain_out.shape
    assert bool(jnp.all(jnp.isfinite(class_out))) and bool(jnp.all(jnp.isfinite(domain_out)))

    # sanity check vs the float32 reference (bf16 MXU inputs -> small tolerance)
    ref_c, ref_d = jax.jit(reference_forward)(raw, x, alpha)
    err = max(float(jnp.max(jnp.abs(class_out - ref_c))),
              float(jnp.max(jnp.abs(domain_out - ref_d))))
    assert err < 1e-1, f"mismatch vs reference: max abs err = {err}"

    print("KERNEL_OK")
</pallas_src>

<mosaic_0001>
module attributes {stable_mosaic.version = 11 : i64} {
  func.func @_conv2_kernel(%arg0: i32, %arg1: memref<2x12x12x128xbf16, #tpu.memory_space<vmem>>, %arg2: memref<3200x128xbf16, #tpu.memory_space<vmem>>, %arg3: memref<1x128xf32, #tpu.memory_space<vmem>>, %arg4: memref<4x32x128xbf16, #tpu.memory_space<vmem>>, %arg5: memref<32x128xbf16, #tpu.memory_space<vmem>>) attributes {dimension_semantics = [#tpu.dimension_semantics<parallel>], iteration_bounds = array<i64: 1>, scalar_prefetch = 0 : i64, scratch_operands = 0 : i64, tpu.core_type = #tpu.core_type<tc>, window_params = [{transform_indices = @transform_0, window_bounds = array<i64: 2, 12, 12, 128>}, {pipeline_mode = #tpu.pipeline_mode<synchronous>, transform_indices = @transform_1, window_bounds = array<i64: 3200, 128>}, {pipeline_mode = #tpu.pipeline_mode<synchronous>, transform_indices = @transform_2, window_bounds = array<i64: 1, 128>}, {pipeline_mode = #tpu.pipeline_mode<synchronous>, transform_indices = @transform_3, window_bounds = array<i64: 4, 32, 128>}, {transform_indices = @transform_4, window_bounds = array<i64: 32, 128>}]} {
    %c0 = arith.constant 0 : index
    %c0_0 = arith.constant 0 : index
    %c0_1 = arith.constant 0 : index
    %c0_2 = arith.constant 0 : index
    %0 = vector.load %arg1[%c0, %c0_0, %c0_1, %c0_2] : memref<2x12x12x128xbf16, #tpu.memory_space<vmem>>, vector<2x12x12x128xbf16>
    %1 = vector.extract_strided_slice %0 {offsets = [0, 0, 0, 0], sizes = [2, 8, 8, 128], strides = [1, 1, 1, 1]} : vector<2x12x12x128xbf16> to vector<2x8x8x128xbf16>
    %2 = vector.extract_strided_slice %0 {offsets = [0, 0, 1, 0], sizes = [2, 8, 8, 128], strides = [1, 1, 1, 1]} : vector<2x12x12x128xbf16> to vector<2x8x8x128xbf16>
    %3 = vector.extract_strided_slice %0 {offsets = [0, 0, 2, 0], sizes = [2, 8, 8, 128], strides = [1, 1, 1, 1]} : vector<2x12x12x128xbf16> to vector<2x8x8x128xbf16>
    %4 = vector.extract_strided_slice %0 {offsets = [0, 0, 3, 0], sizes = [2, 8, 8, 128], strides = [1, 1, 1, 1]} : vector<2x12x12x128xbf16> to vector<2x8x8x128xbf16>
    %5 = vector.extract_strided_slice %0 {offsets = [0, 0, 4, 0], sizes = [2, 8, 8, 128], strides = [1, 1, 1, 1]} : vector<2x12x12x128xbf16> to vector<2x8x8x128xbf16>
    %6 = vector.extract_strided_slice %0 {offsets = [0, 1, 0, 0], sizes = [2, 8, 8, 128], strides = [1, 1, 1, 1]} : vector<2x12x12x128xbf16> to vector<2x8x8x128xbf16>
    %7 = vector.extract_strided_slice %0 {offsets = [0, 1, 1, 0], sizes = [2, 8, 8, 128], strides = [1, 1, 1, 1]} : vector<2x12x12x128xbf16> to vector<2x8x8x128xbf16>
    %8 = vector.extract_strided_slice %0 {offsets = [0, 1, 2, 0], sizes = [2, 8, 8, 128], strides = [1, 1, 1, 1]} : vector<2x12x12x128xbf16> to vector<2x8x8x128xbf16>
    %9 = vector.extract_strided_slice %0 {offsets = [0, 1, 3, 0], sizes = [2, 8, 8, 128], strides = [1, 1, 1, 1]} : vector<2x12x12x128xbf16> to vector<2x8x8x128xbf16>
    %10 = vector.extract_strided_slice %0 {offsets = [0, 1, 4, 0], sizes = [2, 8, 8, 128], strides = [1, 1, 1, 1]} : vector<2x12x12x128xbf16> to vector<2x8x8x128xbf16>
    %11 = vector.extract_strided_slice %0 {offsets = [0, 2, 0, 0], sizes = [2, 8, 8, 128], strides = [1, 1, 1, 1]} : vector<2x12x12x128xbf16> to vector<2x8x8x128xbf16>
    %12 = vector.extract_strided_slice %0 {offsets = [0, 2, 1, 0], sizes = [2, 8, 8, 128], strides = [1, 1, 1, 1]} : vector<2x12x12x128xbf16> to vector<2x8x8x128xbf16>
    %13 = vector.extract_strided_slice %0 {offsets = [0, 2, 2, 0], sizes = [2, 8, 8, 128], strides = [1, 1, 1, 1]} : vector<2x12x12x128xbf16> to vector<2x8x8x128xbf16>
    %14 = vector.extract_strided_slice %0 {offsets = [0, 2, 3, 0], sizes = [2, 8, 8, 128], strides = [1, 1, 1, 1]} : vector<2x12x12x128xbf16> to vector<2x8x8x128xbf16>
    %15 = vector.extract_strided_slice %0 {offsets = [0, 2, 4, 0], sizes = [2, 8, 8, 128], strides = [1, 1, 1, 1]} : vector<2x12x12x128xbf16> to vector<2x8x8x128xbf16>
    %16 = vector.extract_strided_slice %0 {offsets = [0, 3, 0, 0], sizes = [2, 8, 8, 128], strides = [1, 1, 1, 1]} : vector<2x12x12x128xbf16> to vector<2x8x8x128xbf16>
    %17 = vector.extract_strided_slice %0 {offsets = [0, 3, 1, 0], sizes = [2, 8, 8, 128], strides = [1, 1, 1, 1]} : vector<2x12x12x128xbf16> to vector<2x8x8x128xbf16>
    %18 = vector.extract_strided_slice %0 {offsets = [0, 3, 2, 0], sizes = [2, 8, 8, 128], strides = [1, 1, 1, 1]} : vector<2x12x12x128xbf16> to vector<2x8x8x128xbf16>
    %19 = vector.extract_strided_slice %0 {offsets = [0, 3, 3, 0], sizes = [2, 8, 8, 128], strides = [1, 1, 1, 1]} : vector<2x12x12x128xbf16> to vector<2x8x8x128xbf16>
    %20 = vector.extract_strided_slice %0 {offsets = [0, 3, 4, 0], sizes = [2, 8, 8, 128], strides = [1, 1, 1, 1]} : vector<2x12x12x128xbf16> to vector<2x8x8x128xbf16>
    %21 = vector.extract_strided_slice %0 {offsets = [0, 4, 0, 0], sizes = [2, 8, 8, 128], strides = [1, 1, 1, 1]} : vector<2x12x12x128xbf16> to vector<2x8x8x128xbf16>
    %22 = vector.extract_strided_slice %0 {offsets = [0, 4, 1, 0], sizes = [2, 8, 8, 128], strides = [1, 1, 1, 1]} : vector<2x12x12x128xbf16> to vector<2x8x8x128xbf16>
    %23 = vector.extract_strided_slice %0 {offsets = [0, 4, 2, 0], sizes = [2, 8, 8, 128], strides = [1, 1, 1, 1]} : vector<2x12x12x128xbf16> to vector<2x8x8x128xbf16>
    %24 = vector.extract_strided_slice %0 {offsets = [0, 4, 3, 0], sizes = [2, 8, 8, 128], strides = [1, 1, 1, 1]} : vector<2x12x12x128xbf16> to vector<2x8x8x128xbf16>
    %25 = vector.extract_strided_slice %0 {offsets = [0, 4, 4, 0], sizes = [2, 8, 8, 128], strides = [1, 1, 1, 1]} : vector<2x12x12x128xbf16> to vector<2x8x8x128xbf16>
    %26 = tpu.concatenate %1, %2, %3, %4, %5, %6, %7, %8, %9, %10, %11, %12, %13, %14, %15, %16 in 3 : vector<2x8x8x128xbf16>, vector<2x8x8x128xbf16>, vector<2x8x8x128xbf16>, vector<2x8x8x128xbf16>, vector<2x8x8x128xbf16>, vector<2x8x8x128xbf16>, vector<2x8x8x128xbf16>, vector<2x8x8x128xbf16>, vector<2x8x8x128xbf16>, vector<2x8x8x128xbf16>, vector<2x8x8x128xbf16>, vector<2x8x8x128xbf16>, vector<2x8x8x128xbf16>, vector<2x8x8x128xbf16>, vector<2x8x8x128xbf16>, vector<2x8x8x128xbf16> -> vector<2x8x8x2048xbf16>
    %27 = tpu.concatenate %17, %18, %19, %20, %21, %22, %23, %24, %25 in 3 : vector<2x8x8x128xbf16>, vector<2x8x8x128xbf16>, vector<2x8x8x128xbf16>, vector<2x8x8x128xbf16>, vector<2x8x8x128xbf16>, vector<2x8x8x128xbf16>, vector<2x8x8x128xbf16>, vector<2x8x8x128xbf16>, vector<2x8x8x128xbf16> -> vector<2x8x8x1152xbf16>
    %28 = tpu.concatenate %26, %27 in 3 : vector<2x8x8x2048xbf16>, vector<2x8x8x1152xbf16> -> vector<2x8x8x3200xbf16>
    %29 = vector.shape_cast %28 : vector<2x8x8x3200xbf16> to vector<128x3200xbf16>
    %c0_3 = arith.constant 0 : index
    %c0_4 = arith.constant 0 : index
    %30 = vector.load %arg2[%c0_3, %c0_4] : memref<3200x128xbf16, #tpu.memory_space<vmem>>, vector<3200x128xbf16>
    %cst = arith.constant dense<0.000000e+00> : vector<128x128xf32>
    %31 = tpu.matmul %29, %30, %cst {dimension_numbers = #tpu.dot_dimension_numbers<[1], [0], [0], [1], [0, 0, 1, 1], [], []>} : vector<128x3200xbf16>, vector<3200x128xbf16>, vector<128x128xf32> -> vector<128x128xf32>
    %c0_5 = arith.constant 0 : index
    %c0_6 = arith.constant 0 : index
    %32 = vector.load %arg3[%c0_5, %c0_6] : memref<1x128xf32, #tpu.memory_space<vmem>>, vector<1x128xf32>
    %33 = vector.broadcast %32 : vector<1x128xf32> to vector<128x128xf32>
    %34 = arith.addf %31, %33 : vector<128x128xf32>
    %cst_7 = arith.constant 0.000000e+00 : f32
    %35 = vector.broadcast %cst_7 : f32 to vector<128x128xf32>
    %36 = arith.maximumf %34, %35 : vector<128x128xf32>
    %37 = arith.truncf %36 : vector<128x128xf32> to vector<128x128xbf16>
    %c0_8 = arith.constant 0 : index
    %c0_9 = arith.constant 0 : index
    %c0_10 = arith.constant 0 : index
    %38 = vector.load %arg4[%c0_8, %c0_9, %c0_10] : memref<4x32x128xbf16, #tpu.memory_space<vmem>>, vector<1x32x128xbf16>
    %39 = vector.shape_cast %38 : vector<1x32x128xbf16> to vector<32x128xbf16>
    %cst_11 = arith.constant dense<0.000000e+00> : vector<32x128xf32>
    %40 = tpu.matmul %39, %37, %cst_11 {dimension_numbers = #tpu.dot_dimension_numbers<[1], [0], [0], [1], [0, 0, 1, 1], [], []>} : vector<32x128xbf16>, vector<128x128xbf16>, vector<32x128xf32> -> vector<32x128xf32>
    %c1 = arith.constant 1 : index
    %c0_12 = arith.constant 0 : index
    %c0_13 = arith.constant 0 : index
    %41 = vector.load %arg4[%c1, %c0_12, %c0_13] : memref<4x32x128xbf16, #tpu.memory_space<vmem>>, vector<1x32x128xbf16>
    %42 = vector.shape_cast %41 : vector<1x32x128xbf16> to vector<32x128xbf16>
    %cst_14 = arith.constant dense<0.000000e+00> : vector<32x128xf32>
    %43 = tpu.matmul %42, %37, %cst_14 {dimension_numbers = #tpu.dot_dimension_numbers<[1], [0], [0], [1], [0, 0, 1, 1], [], []>} : vector<32x128xbf16>, vector<128x128xbf16>, vector<32x128xf32> -> vector<32x128xf32>
    %c2 = arith.constant 2 : index
    %c0_15 = arith.constant 0 : index
    %c0_16 = arith.constant 0 : index
    %44 = vector.load %arg4[%c2, %c0_15, %c0_16] : memref<4x32x128xbf16, #tpu.memory_space<vmem>>, vector<1x32x128xbf16>
    %45 = vector.shape_cast %44 : vector<1x32x128xbf16> to vector<32x128xbf16>
    %cst_17 = arith.constant dense<0.000000e+00> : vector<32x128xf32>
    %46 = tpu.matmul %45, %37, %cst_17 {dimension_numbers = #tpu.dot_dimension_numbers<[1], [0], [0], [1], [0, 0, 1, 1], [], []>} : vector<32x128xbf16>, vector<128x128xbf16>, vector<32x128xf32> -> vector<32x128xf32>
    %c3 = arith.constant 3 : index
    %c0_18 = arith.constant 0 : index
    %c0_19 = arith.constant 0 : index
    %47 = vector.load %arg4[%c3, %c0_18, %c0_19] : memref<4x32x128xbf16, #tpu.memory_space<vmem>>, vector<1x32x128xbf16>
    %48 = vector.shape_cast %47 : vector<1x32x128xbf16> to vector<32x128xbf16>
    %cst_20 = arith.constant dense<0.000000e+00> : vector<32x128xf32>
    %49 = tpu.matmul %48, %37, %cst_20 {dimension_numbers = #tpu.dot_dimension_numbers<[1], [0], [0], [1], [0, 0, 1, 1], [], []>} : vector<32x128xbf16>, vector<128x128xbf16>, vector<32x128xf32> -> vector<32x128xf32>
    %50 = arith.maximumf %40, %43 : vector<32x128xf32>
    %51 = arith.maximumf %46, %49 : vector<32x128xf32>
    %52 = arith.maximumf %50, %51 : vector<32x128xf32>
    %53 = arith.truncf %52 : vector<32x128xf32> to vector<32x128xbf16>
    %c0_21 = arith.constant 0 : index
    %c0_22 = arith.constant 0 : index
    %54 = vector.load %arg5[%c0_21, %c0_22] : memref<32x128xbf16, #tpu.memory_space<vmem>>, vector<32x128xbf16>
    tpu.vector_store %arg5[%c0_21, %c0_22], %53 {strides = array<i32>} : memref<32x128xbf16, #tpu.memory_space<vmem>>, vector<32x128xbf16>,
    return
  }
  func.func @transform_0(%arg0: i32) -> (i32, i32, i32, i32) {
    %c0_i32 = arith.constant 0 : i32
    %c0_i32_0 = arith.constant 0 : i32
    %c0_i32_1 = arith.constant 0 : i32
    %c0_i32_2 = arith.constant 0 : i32
    return %arg0, %c0_i32, %c0_i32_0, %c0_i32_1 : i32, i32, i32, i32
  }
  func.func @transform_1(%arg0: i32) -> (i32, i32) {
    %c0_i32 = arith.constant 0 : i32
    %c0_i32_0 = arith.constant 0 : i32
    %c0_i32_1 = arith.constant 0 : i32
    return %c0_i32, %c0_i32_0 : i32, i32
  }
  func.func @transform_2(%arg0: i32) -> (i32, i32) {
    %c0_i32 = arith.constant 0 : i32
    %c0_i32_0 = arith.constant 0 : i32
    %c0_i32_1 = arith.constant 0 : i32
    return %c0_i32, %c0_i32_0 : i32, i32
  }
  func.func @transform_3(%arg0: i32) -> (i32, i32, i32) {
    %c0_i32 = arith.constant 0 : i32
    %c0_i32_0 = arith.constant 0 : i32
    %c0_i32_1 = arith.constant 0 : i32
    %c0_i32_2 = arith.constant 0 : i32
    return %c0_i32, %c0_i32_0, %c0_i32_1 : i32, i32, i32
  }
  func.func @transform_4(%arg0: i32) -> (i32, i32) {
    %c0_i32 = arith.constant 0 : i32
    %c0_i32_0 = arith.constant 0 : i32
    return %arg0, %c0_i32 : i32, i32
  }
}

module attributes {stable_mosaic.version = 11 : i64} {
  func.func @_conv1_kernel(%arg0: i32, %arg1: memref<2x28x28xbf16, #tpu.memory_space<vmem>>, %arg2: memref<5x28x3072xbf16, #tpu.memory_space<vmem>>, %arg3: memref<1x3072xf32, #tpu.memory_space<vmem>>, %arg4: memref<24x48xbf16, #tpu.memory_space<vmem>>, %arg5: memref<24x48xbf16, #tpu.memory_space<vmem>>, %arg6: memref<24x1536xbf16, #tpu.memory_space<vmem>>) attributes {dimension_semantics = [#tpu.dimension_semantics<parallel>], iteration_bounds = array<i64: 1>, scalar_prefetch = 0 : i64, scratch_operands = 0 : i64, tpu.core_type = #tpu.core_type<tc>, window_params = [{transform_indices = @transform_0, window_bounds = array<i64: 2, 28, 28>}, {pipeline_mode = #tpu.pipeline_mode<synchronous>, transform_indices = @transform_1, window_bounds = array<i64: 5, 28, 3072>}, {pipeline_mode = #tpu.pipeline_mode<synchronous>, transform_indices = @transform_2, window_bounds = array<i64: 1, 3072>}, {pipeline_mode = #tpu.pipeline_mode<synchronous>, transform_indices = @transform_3, window_bounds = array<i64: 24, 48>}, {pipeline_mode = #tpu.pipeline_mode<synchronous>, transform_indices = @transform_4, window_bounds = array<i64: 24, 48>}, {transform_indices = @transform_5, window_bounds = array<i64: 24, 1536>}]} {
    %c0 = arith.constant 0 : index
    %c0_0 = arith.constant 0 : index
    %c0_1 = arith.constant 0 : index
    %0 = vector.load %arg1[%c0, %c0_0, %c0_1] : memref<2x28x28xbf16, #tpu.memory_space<vmem>>, vector<2x28x28xbf16>
    %1 = vector.extract_strided_slice %0 {offsets = [0, 0, 0], sizes = [2, 24, 28], strides = [1, 1, 1]} : vector<2x28x28xbf16> to vector<2x24x28xbf16>
    %2 = vector.shape_cast %1 : vector<2x24x28xbf16> to vector<48x28xbf16>
    %c0_2 = arith.constant 0 : index
    %c0_3 = arith.constant 0 : index
    %c0_4 = arith.constant 0 : index
    %3 = vector.load %arg2[%c0_2, %c0_3, %c0_4] : memref<5x28x3072xbf16, #tpu.memory_space<vmem>>, vector<1x28x3072xbf16>
    %4 = vector.shape_cast %3 : vector<1x28x3072xbf16> to vector<28x3072xbf16>
    %cst = arith.constant dense<0.000000e+00> : vector<48x3072xf32>
    %5 = tpu.matmul %2, %4, %cst {dimension_numbers = #tpu.dot_dimension_numbers<[1], [0], [0], [1], [0, 0, 1, 1], [], []>} : vector<48x28xbf16>, vector<28x3072xbf16>, vector<48x3072xf32> -> vector<48x3072xf32>
    %6 = vector.extract_strided_slice %0 {offsets = [0, 1, 0], sizes = [2, 24, 28], strides = [1, 1, 1]} : vector<2x28x28xbf16> to vector<2x24x28xbf16>
    %7 = vector.shape_cast %6 : vector<2x24x28xbf16> to vector<48x28xbf16>
    %c1 = arith.constant 1 : index
    %c0_5 = arith.constant 0 : index
    %c0_6 = arith.constant 0 : index
    %8 = vector.load %arg2[%c1, %c0_5, %c0_6] : memref<5x28x3072xbf16, #tpu.memory_space<vmem>>, vector<1x28x3072xbf16>
    %9 = vector.shape_cast %8 : vector<1x28x3072xbf16> to vector<28x3072xbf16>
    %cst_7 = arith.constant dense<0.000000e+00> : vector<48x3072xf32>
    %10 = tpu.matmul %7, %9, %cst_7 {dimension_numbers = #tpu.dot_dimension_numbers<[1], [0], [0], [1], [0, 0, 1, 1], [], []>} : vector<48x28xbf16>, vector<28x3072xbf16>, vector<48x3072xf32> -> vector<48x3072xf32>
    %11 = arith.addf %5, %10 : vector<48x3072xf32>
    %12 = vector.extract_strided_slice %0 {offsets = [0, 2, 0], sizes = [2, 24, 28], strides = [1, 1, 1]} : vector<2x28x28xbf16> to vector<2x24x28xbf16>
    %13 = vector.shape_cast %12 : vector<2x24x28xbf16> to vector<48x28xbf16>
    %c2 = arith.constant 2 : index
    %c0_8 = arith.constant 0 : index
    %c0_9 = arith.constant 0 : index
    %14 = vector.load %arg2[%c2, %c0_8, %c0_9] : memref<5x28x3072xbf16, #tpu.memory_space<vmem>>, vector<1x28x3072xbf16>
    %15 = vector.shape_cast %14 : vector<1x28x3072xbf16> to vector<28x3072xbf16>
    %cst_10 = arith.constant dense<0.000000e+00> : vector<48x3072xf32>
    %16 = tpu.matmul %13, %15, %cst_10 {dimension_numbers = #tpu.dot_dimension_numbers<[1], [0], [0], [1], [0, 0, 1, 1], [], []>} : vector<48x28xbf16>, vector<28x3072xbf16>, vector<48x3072xf32> -> vector<48x3072xf32>
    %17 = arith.addf %11, %16 : vector<48x3072xf32>
    %18 = vector.extract_strided_slice %0 {offsets = [0, 3, 0], sizes = [2, 24, 28], strides = [1, 1, 1]} : vector<2x28x28xbf16> to vector<2x24x28xbf16>
    %19 = vector.shape_cast %18 : vector<2x24x28xbf16> to vector<48x28xbf16>
    %c3 = arith.constant 3 : index
    %c0_11 = arith.constant 0 : index
    %c0_12 = arith.constant 0 : index
    %20 = vector.load %arg2[%c3, %c0_11, %c0_12] : memref<5x28x3072xbf16, #tpu.memory_space<vmem>>, vector<1x28x3072xbf16>
    %21 = vector.shape_cast %20 : vector<1x28x3072xbf16> to vector<28x3072xbf16>
    %cst_13 = arith.constant dense<0.000000e+00> : vector<48x3072xf32>
    %22 = tpu.matmul %19, %21, %cst_13 {dimension_numbers = #tpu.dot_dimension_numbers<[1], [0], [0], [1], [0, 0, 1, 1], [], []>} : vector<48x28xbf16>, vector<28x3072xbf16>, vector<48x3072xf32> -> vector<48x3072xf32>
    %23 = arith.addf %17, %22 : vector<48x3072xf32>
    %24 = vector.extract_strided_slice %0 {offsets = [0, 4, 0], sizes = [2, 24, 28], strides = [1, 1, 1]} : vector<2x28x28xbf16> to vector<2x24x28xbf16>
    %25 = vector.shape_cast %24 : vector<2x24x28xbf16> to vector<48x28xbf16>
    %c4 = arith.constant 4 : index
    %c0_14 = arith.constant 0 : index
    %c0_15 = arith.constant 0 : index
    %26 = vector.load %arg2[%c4, %c0_14, %c0_15] : memref<5x28x3072xbf16, #tpu.memory_space<vmem>>, vector<1x28x3072xbf16>
    %27 = vector.shape_cast %26 : vector<1x28x3072xbf16> to vector<28x3072xbf16>
    %cst_16 = arith.constant dense<0.000000e+00> : vector<48x3072xf32>
    %28 = tpu.matmul %25, %27, %cst_16 {dimension_numbers = #tpu.dot_dimension_numbers<[1], [0], [0], [1], [0, 0, 1, 1], [], []>} : vector<48x28xbf16>, vector<28x3072xbf16>, vector<48x3072xf32> -> vector<48x3072xf32>
    %29 = arith.addf %23, %28 : vector<48x3072xf32>
    %c0_17 = arith.constant 0 : index
    %c0_18 = arith.constant 0 : index
    %30 = vector.load %arg3[%c0_17, %c0_18] : memref<1x3072xf32, #tpu.memory_space<vmem>>, vector<1x3072xf32>
    %31 = vector.broadcast %30 : vector<1x3072xf32> to vector<48x3072xf32>
    %32 = arith.addf %29, %31 : vector<48x3072xf32>
    %cst_19 = arith.constant 0.000000e+00 : f32
    %33 = vector.broadcast %cst_19 : f32 to vector<48x3072xf32>
    %34 = arith.maximumf %32, %33 : vector<48x3072xf32>
    %35 = vector.extract_strided_slice %34 {offsets = [0, 0], sizes = [48, 128], strides = [1, 1]} : vector<48x3072xf32> to vector<48x128xf32>
    %36 = vector.extract_strided_slice %34 {offsets = [0, 128], sizes = [48, 128], strides = [1, 1]} : vector<48x3072xf32> to vector<48x128xf32>
    %37 = arith.maximumf %35, %36 : vector<48x128xf32>
    %38 = vector.extract_strided_slice %34 {offsets = [0, 256], sizes = [48, 128], strides = [1, 1]} : vector<48x3072xf32> to vector<48x128xf32>
    %39 = vector.extract_strided_slice %34 {offsets = [0, 384], sizes = [48, 128], strides = [1, 1]} : vector<48x3072xf32> to vector<48x128xf32>
    %40 = arith.maximumf %38, %39 : vector<48x128xf32>
    %41 = vector.extract_strided_slice %34 {offsets = [0, 512], sizes = [48, 128], strides = [1, 1]} : vector<48x3072xf32> to vector<48x128xf32>
    %42 = vector.extract_strided_slice %34 {offsets = [0, 640], sizes = [48, 128], strides = [1, 1]} : vector<48x3072xf32> to vector<48x128xf32>
    %43 = arith.maximumf %41, %42 : vector<48x128xf32>
    %44 = vector.extract_strided_slice %34 {offsets = [0, 768], sizes = [48, 128], strides = [1, 1]} : vector<48x3072xf32> to vector<48x128xf32>
    %45 = vector.extract_strided_slice %34 {offsets = [0, 896], sizes = [48, 128], strides = [1, 1]} : vector<48x3072xf32> to vector<48x128xf32>
    %46 = arith.maximumf %44, %45 : vector<48x128xf32>
    %47 = vector.extract_strided_slice %34 {offsets = [0, 1024], sizes = [48, 128], strides = [1, 1]} : vector<48x3072xf32> to vector<48x128xf32>
    %48 = vector.extract_strided_slice %34 {offsets = [0, 1152], sizes = [48, 128], strides = [1, 1]} : vector<48x3072xf32> to vector<48x128xf32>
    %49 = arith.maximumf %47, %48 : vector<48x128xf32>
    %50 = vector.extract_strided_slice %34 {offsets = [0, 1280], sizes = [48, 128], strides = [1, 1]} : vector<48x3072xf32> to vector<48x128xf32>
    %51 = vector.extract_strided_slice %34 {offsets = [0, 1408], sizes = [48, 128], strides = [1, 1]} : vector<48x3072xf32> to vector<48x128xf32>
    %52 = arith.maximumf %50, %51 : vector<48x128xf32>
    %53 = vector.extract_strided_slice %34 {offsets = [0, 1536], sizes = [48, 128], strides = [1, 1]} : vector<48x3072xf32> to vector<48x128xf32>
    %54 = vector.extract_strided_slice %34 {offsets = [0, 1664], sizes = [48, 128], strides = [1, 1]} : vector<48x3072xf32> to vector<48x128xf32>
    %55 = arith.maximumf %53, %54 : vector<48x128xf32>
    %56 = vector.extract_strided_slice %34 {offsets = [0, 1792], sizes = [48, 128], strides = [1, 1]} : vector<48x3072xf32> to vector<48x128xf32>
    %57 = vector.extract_strided_slice %34 {offsets = [0, 1920], sizes = [48, 128], strides = [1, 1]} : vector<48x3072xf32> to vector<48x128xf32>
    %58 = arith.maximumf %56, %57 : vector<48x128xf32>
    %59 = vector.extract_strided_slice %34 {offsets = [0, 2048], sizes = [48, 128], strides = [1, 1]} : vector<48x3072xf32> to vector<48x128xf32>
    %60 = vector.extract_strided_slice %34 {offsets = [0, 2176], sizes = [48, 128], strides = [1, 1]} : vector<48x3072xf32> to vector<48x128xf32>
    %61 = arith.maximumf %59, %60 : vector<48x128xf32>
    %62 = vector.extract_strided_slice %34 {offsets = [0, 2304], sizes = [48, 128], strides = [1, 1]} : vector<48x3072xf32> to vector<48x128xf32>
    %63 = vector.extract_strided_slice %34 {offsets = [0, 2432], sizes = [48, 128], strides = [1, 1]} : vector<48x3072xf32> to vector<48x128xf32>
    %64 = arith.maximumf %62, %63 : vector<48x128xf32>
    %65 = vector.extract_strided_slice %34 {offsets = [0, 2560], sizes = [48, 128], strides = [1, 1]} : vector<48x3072xf32> to vector<48x128xf32>
    %66 = vector.extract_strided_slice %34 {offsets = [0, 2688], sizes = [48, 128], strides = [1, 1]} : vector<48x3072xf32> to vector<48x128xf32>
    %67 = arith.maximumf %65, %66 : vector<48x128xf32>
    %68 = vector.extract_strided_slice %34 {offsets = [0, 2816], sizes = [48, 128], strides = [1, 1]} : vector<48x3072xf32> to vector<48x128xf32>
    %69 = vector.extract_strided_slice %34 {offsets = [0, 2944], sizes = [48, 128], strides = [1, 1]} : vector<48x3072xf32> to vector<48x128xf32>
    %70 = arith.maximumf %68, %69 : vector<48x128xf32>
    %71 = tpu.concatenate %37, %40, %43, %46, %49, %52, %55, %58, %61, %64, %67, %70 in 1 : vector<48x128xf32>, vector<48x128xf32>, vector<48x128xf32>, vector<48x128xf32>, vector<48x128xf32>, vector<48x128xf32>, vector<48x128xf32>, vector<48x128xf32>, vector<48x128xf32>, vector<48x128xf32>, vector<48x128xf32>, vector<48x128xf32> -> vector<48x1536xf32>
    %72 = arith.truncf %71 : vector<48x1536xf32> to vector<48x1536xbf16>
    %c0_20 = arith.constant 0 : index
    %c0_21 = arith.constant 0 : index
    %73 = vector.load %arg4[%c0_20, %c0_21] : memref<24x48xbf16, #tpu.memory_space<vmem>>, vector<24x48xbf16>
    %cst_22 = arith.constant dense<0.000000e+00> : vector<24x1536xf32>
    %74 = tpu.matmul %73, %72, %cst_22 {dimension_numbers = #tpu.dot_dimension_numbers<[1], [0], [0], [1], [0, 0, 1, 1], [], []>} : vector<24x48xbf16>, vector<48x1536xbf16>, vector<24x1536xf32> -> vector<24x1536xf32>
    %c0_23 = arith.constant 0 : index
    %c0_24 = arith.constant 0 : index
    %75 = vector.load %arg5[%c0_23, %c0_24] : memref<24x48xbf16, #tpu.memory_space<vmem>>, vector<24x48xbf16>
    %cst_25 = arith.constant dense<0.000000e+00> : vector<24x1536xf32>
    %76 = tpu.matmul %75, %72, %cst_25 {dimension_numbers = #tpu.dot_dimension_numbers<[1], [0], [0], [1], [0, 0, 1, 1], [], []>} : vector<24x48xbf16>, vector<48x1536xbf16>, vector<24x1536xf32> -> vector<24x1536xf32>
    %77 = arith.maximumf %74, %76 : vector<24x1536xf32>
    %78 = arith.truncf %77 : vector<24x1536xf32> to vector<24x1536xbf16>
    %c0_26 = arith.constant 0 : index
    %c0_27 = arith.constant 0 : index
    %79 = vector.load %arg6[%c0_26, %c0_27] : memref<24x1536xbf16, #tpu.memory_space<vmem>>, vector<24x1536xbf16>
    tpu.vector_store %arg6[%c0_26, %c0_27], %78 {strides = array<i32>} : memref<24x1536xbf16, #tpu.memory_space<vmem>>, vector<24x1536xbf16>,
    return
  }
  func.func @transform_0(%arg0: i32) -> (i32, i32, i32) {
    %c0_i32 = arith.constant 0 : i32
    %c0_i32_0 = arith.constant 0 : i32
    %c0_i32_1 = arith.constant 0 : i32
    return %arg0, %c0_i32, %c0_i32_0 : i32, i32, i32
  }
  func.func @transform_1(%arg0: i32) -> (i32, i32, i32) {
    %c0_i32 = arith.constant 0 : i32
    %c0_i32_0 = arith.constant 0 : i32
    %c0_i32_1 = arith.constant 0 : i32
    %c0_i32_2 = arith.constant 0 : i32
    return %c0_i32, %c0_i32_0, %c0_i32_1 : i32, i32, i32
  }
  func.func @transform_2(%arg0: i32) -> (i32, i32) {
    %c0_i32 = arith.constant 0 : i32
    %c0_i32_0 = arith.constant 0 : i32
    %c0_i32_1 = arith.constant 0 : i32
    return %c0_i32, %c0_i32_0 : i32, i32
  }
  func.func @transform_3(%arg0: i32) -> (i32, i32) {
    %c0_i32 = arith.constant 0 : i32
    %c0_i32_0 = arith.constant 0 : i32
    %c0_i32_1 = arith.constant 0 : i32
    return %c0_i32, %c0_i32_0 : i32, i32
  }
  func.func @transform_4(%arg0: i32) -> (i32, i32) {
    %c0_i32 = arith.constant 0 : i32
    %c0_i32_0 = arith.constant 0 : i32
    %c0_i32_1 = arith.constant 0 : i32
    return %c0_i32, %c0_i32_0 : i32, i32
  }
  func.func @transform_5(%arg0: i32) -> (i32, i32) {
    %c0_i32 = arith.constant 0 : i32
    %c0_i32_0 = arith.constant 0 : i32
    return %arg0, %c0_i32 : i32, i32
  }
}

module attributes {stable_mosaic.version = 11 : i64} {
  func.func @_head_kernel(%arg0: i32, %arg1: memref<2x2048xbf16, #tpu.memory_space<vmem>>, %arg2: memref<2048x128xbf16, #tpu.memory_space<vmem>>, %arg3: memref<1x128xf32, #tpu.memory_space<vmem>>, %arg4: memref<128x128xbf16, #tpu.memory_space<vmem>>, %arg5: memref<1x128xf32, #tpu.memory_space<vmem>>, %arg6: memref<128x128xbf16, #tpu.memory_space<vmem>>, %arg7: memref<1x128xf32, #tpu.memory_space<vmem>>, %arg8: memref<2048x128xbf16, #tpu.memory_space<vmem>>, %arg9: memref<1x128xf32, #tpu.memory_space<vmem>>, %arg10: memref<128x128xbf16, #tpu.memory_space<vmem>>, %arg11: memref<1x128xf32, #tpu.memory_space<vmem>>, %arg12: memref<2x128xf32, #tpu.memory_space<vmem>>, %arg13: memref<2x128xf32, #tpu.memory_space<vmem>>) attributes {dimension_semantics = [#tpu.dimension_semantics<parallel>], iteration_bounds = array<i64: 1>, scalar_prefetch = 0 : i64, scratch_operands = 0 : i64, tpu.core_type = #tpu.core_type<tc>, window_params = [{transform_indices = @transform_0, window_bounds = array<i64: 2, 2048>}, {pipeline_mode = #tpu.pipeline_mode<synchronous>, transform_indices = @transform_1, window_bounds = array<i64: 2048, 128>}, {pipeline_mode = #tpu.pipeline_mode<synchronous>, transform_indices = @transform_2, window_bounds = array<i64: 1, 128>}, {pipeline_mode = #tpu.pipeline_mode<synchronous>, transform_indices = @transform_3, window_bounds = array<i64: 128, 128>}, {pipeline_mode = #tpu.pipeline_mode<synchronous>, transform_indices = @transform_4, window_bounds = array<i64: 1, 128>}, {pipeline_mode = #tpu.pipeline_mode<synchronous>, transform_indices = @transform_5, window_bounds = array<i64: 128, 128>}, {pipeline_mode = #tpu.pipeline_mode<synchronous>, transform_indices = @transform_6, window_bounds = array<i64: 1, 128>}, {pipeline_mode = #tpu.pipeline_mode<synchronous>, transform_indices = @transform_7, window_bounds = array<i64: 2048, 128>}, {pipeline_mode = #tpu.pipeline_mode<synchronous>, transform_indices = @transform_8, window_bounds = array<i64: 1, 128>}, {pipeline_mode = #tpu.pipeline_mode<synchronous>, transform_indices = @transform_9, window_bounds = array<i64: 128, 128>}, {pipeline_mode = #tpu.pipeline_mode<synchronous>, transform_indices = @transform_10, window_bounds = array<i64: 1, 128>}, {transform_indices = @transform_11, window_bounds = array<i64: 2, 128>}, {transform_indices = @transform_12, window_bounds = array<i64: 2, 128>}]} {
    %c0 = arith.constant 0 : index
    %c0_0 = arith.constant 0 : index
    %0 = vector.load %arg1[%c0, %c0_0] : memref<2x2048xbf16, #tpu.memory_space<vmem>>, vector<2x2048xbf16>
    %c0_1 = arith.constant 0 : index
    %c0_2 = arith.constant 0 : index
    %1 = vector.load %arg2[%c0_1, %c0_2] : memref<2048x128xbf16, #tpu.memory_space<vmem>>, vector<2048x128xbf16>
    %cst = arith.constant dense<0.000000e+00> : vector<2x128xf32>
    %2 = tpu.matmul %0, %1, %cst {dimension_numbers = #tpu.dot_dimension_numbers<[1], [0], [0], [1], [0, 0, 1, 1], [], []>} : vector<2x2048xbf16>, vector<2048x128xbf16>, vector<2x128xf32> -> vector<2x128xf32>
    %c0_3 = arith.constant 0 : index
    %c0_4 = arith.constant 0 : index
    %3 = vector.load %arg3[%c0_3, %c0_4] : memref<1x128xf32, #tpu.memory_space<vmem>>, vector<1x128xf32>
    %4 = vector.broadcast %3 : vector<1x128xf32> to vector<2x128xf32>
    %5 = arith.addf %2, %4 : vector<2x128xf32>
    %cst_5 = arith.constant 0.000000e+00 : f32
    %6 = vector.broadcast %cst_5 : f32 to vector<2x128xf32>
    %7 = arith.maximumf %5, %6 : vector<2x128xf32>
    %8 = arith.truncf %7 : vector<2x128xf32> to vector<2x128xbf16>
    %c0_6 = arith.constant 0 : index
    %c0_7 = arith.constant 0 : index
    %9 = vector.load %arg4[%c0_6, %c0_7] : memref<128x128xbf16, #tpu.memory_space<vmem>>, vector<128x128xbf16>
    %cst_8 = arith.constant dense<0.000000e+00> : vector<2x128xf32>
    %10 = tpu.matmul %8, %9, %cst_8 {dimension_numbers = #tpu.dot_dimension_numbers<[1], [0], [0], [1], [0, 0, 1, 1], [], []>} : vector<2x128xbf16>, vector<128x128xbf16>, vector<2x128xf32> -> vector<2x128xf32>
    %c0_9 = arith.constant 0 : index
    %c0_10 = arith.constant 0 : index
    %11 = vector.load %arg5[%c0_9, %c0_10] : memref<1x128xf32, #tpu.memory_space<vmem>>, vector<1x128xf32>
    %12 = vector.broadcast %11 : vector<1x128xf32> to vector<2x128xf32>
    %13 = arith.addf %10, %12 : vector<2x128xf32>
    %cst_11 = arith.constant 0.000000e+00 : f32
    %14 = vector.broadcast %cst_11 : f32 to vector<2x128xf32>
    %15 = arith.maximumf %13, %14 : vector<2x128xf32>
    %16 = arith.truncf %15 : vector<2x128xf32> to vector<2x128xbf16>
    %c0_12 = arith.constant 0 : index
    %c0_13 = arith.constant 0 : index
    %17 = vector.load %arg6[%c0_12, %c0_13] : memref<128x128xbf16, #tpu.memory_space<vmem>>, vector<128x128xbf16>
    %cst_14 = arith.constant dense<0.000000e+00> : vector<2x128xf32>
    %18 = tpu.matmul %16, %17, %cst_14 {dimension_numbers = #tpu.dot_dimension_numbers<[1], [0], [0], [1], [0, 0, 1, 1], [], []>} : vector<2x128xbf16>, vector<128x128xbf16>, vector<2x128xf32> -> vector<2x128xf32>
    %c0_15 = arith.constant 0 : index
    %c0_16 = arith.constant 0 : index
    %19 = vector.load %arg7[%c0_15, %c0_16] : memref<1x128xf32, #tpu.memory_space<vmem>>, vector<1x128xf32>
    %20 = vector.broadcast %19 : vector<1x128xf32> to vector<2x128xf32>
    %21 = arith.addf %18, %20 : vector<2x128xf32>
    %c0_17 = arith.constant 0 : index
    %c0_18 = arith.constant 0 : index
    %22 = vector.load %arg12[%c0_17, %c0_18] : memref<2x128xf32, #tpu.memory_space<vmem>>, vector<2x128xf32>
    tpu.vector_store %arg12[%c0_17, %c0_18], %21 {strides = array<i32>} : memref<2x128xf32, #tpu.memory_space<vmem>>, vector<2x128xf32>,
    %c0_19 = arith.constant 0 : index
    %c0_20 = arith.constant 0 : index
    %23 = vector.load %arg8[%c0_19, %c0_20] : memref<2048x128xbf16, #tpu.memory_space<vmem>>, vector<2048x128xbf16>
    %cst_21 = arith.constant dense<0.000000e+00> : vector<2x128xf32>
    %24 = tpu.matmul %0, %23, %cst_21 {dimension_numbers = #tpu.dot_dimension_numbers<[1], [0], [0], [1], [0, 0, 1, 1], [], []>} : vector<2x2048xbf16>, vector<2048x128xbf16>, vector<2x128xf32> -> vector<2x128xf32>
    %c0_22 = arith.constant 0 : index
    %c0_23 = arith.constant 0 : index
    %25 = vector.load %arg9[%c0_22, %c0_23] : memref<1x128xf32, #tpu.memory_space<vmem>>, vector<1x128xf32>
    %26 = vector.broadcast %25 : vector<1x128xf32> to vector<2x128xf32>
    %27 = arith.addf %24, %26 : vector<2x128xf32>
    %cst_24 = arith.constant 0.000000e+00 : f32
    %28 = vector.broadcast %cst_24 : f32 to vector<2x128xf32>
    %29 = arith.maximumf %27, %28 : vector<2x128xf32>
    %30 = arith.truncf %29 : vector<2x128xf32> to vector<2x128xbf16>
    %c0_25 = arith.constant 0 : index
    %c0_26 = arith.constant 0 : index
    %31 = vector.load %arg10[%c0_25, %c0_26] : memref<128x128xbf16, #tpu.memory_space<vmem>>, vector<128x128xbf16>
    %cst_27 = arith.constant dense<0.000000e+00> : vector<2x128xf32>
    %32 = tpu.matmul %30, %31, %cst_27 {dimension_numbers = #tpu.dot_dimension_numbers<[1], [0], [0], [1], [0, 0, 1, 1], [], []>} : vector<2x128xbf16>, vector<128x128xbf16>, vector<2x128xf32> -> vector<2x128xf32>
    %c0_28 = arith.constant 0 : index
    %c0_29 = arith.constant 0 : index
    %33 = vector.load %arg11[%c0_28, %c0_29] : memref<1x128xf32, #tpu.memory_space<vmem>>, vector<1x128xf32>
    %34 = vector.broadcast %33 : vector<1x128xf32> to vector<2x128xf32>
    %35 = arith.addf %32, %34 : vector<2x128xf32>
    %c0_30 = arith.constant 0 : index
    %c0_31 = arith.constant 0 : index
    %36 = vector.load %arg13[%c0_30, %c0_31] : memref<2x128xf32, #tpu.memory_space<vmem>>, vector<2x128xf32>
    tpu.vector_store %arg13[%c0_30, %c0_31], %35 {strides = array<i32>} : memref<2x128xf32, #tpu.memory_space<vmem>>, vector<2x128xf32>,
    return
  }
  func.func @transform_0(%arg0: i32) -> (i32, i32) {
    %c0_i32 = arith.constant 0 : i32
    %c0_i32_0 = arith.constant 0 : i32
    return %arg0, %c0_i32 : i32, i32
  }
  func.func @transform_1(%arg0: i32) -> (i32, i32) {
    %c0_i32 = arith.constant 0 : i32
    %c0_i32_0 = arith.constant 0 : i32
    %c0_i32_1 = arith.constant 0 : i32
    return %c0_i32, %c0_i32_0 : i32, i32
  }
  func.func @transform_2(%arg0: i32) -> (i32, i32) {
    %c0_i32 = arith.constant 0 : i32
    %c0_i32_0 = arith.constant 0 : i32
    %c0_i32_1 = arith.constant 0 : i32
    return %c0_i32, %c0_i32_0 : i32, i32
  }
  func.func @transform_3(%arg0: i32) -> (i32, i32) {
    %c0_i32 = arith.constant 0 : i32
    %c0_i32_0 = arith.constant 0 : i32
    %c0_i32_1 = arith.constant 0 : i32
    return %c0_i32, %c0_i32_0 : i32, i32
  }
  func.func @transform_4(%arg0: i32) -> (i32, i32) {
    %c0_i32 = arith.constant 0 : i32
    %c0_i32_0 = arith.constant 0 : i32
    %c0_i32_1 = arith.constant 0 : i32
    return %c0_i32, %c0_i32_0 : i32, i32
  }
  func.func @transform_5(%arg0: i32) -> (i32, i32) {
    %c0_i32 = arith.constant 0 : i32
    %c0_i32_0 = arith.constant 0 : i32
    %c0_i32_1 = arith.constant 0 : i32
    return %c0_i32, %c0_i32_0 : i32, i32
  }
  func.func @transform_6(%arg0: i32) -> (i32, i32) {
    %c0_i32 = arith.constant 0 : i32
    %c0_i32_0 = arith.constant 0 : i32
    %c0_i32_1 = arith.constant 0 : i32
    return %c0_i32, %c0_i32_0 : i32, i32
  }
  func.func @transform_7(%arg0: i32) -> (i32, i32) {
    %c0_i32 = arith.constant 0 : i32
    %c0_i32_0 = arith.constant 0 : i32
    %c0_i32_1 = arith.constant 0 : i32
    return %c0_i32, %c0_i32_0 : i32, i32
  }
  func.func @transform_8(%arg0: i32) -> (i32, i32) {
    %c0_i32 = arith.constant 0 : i32
    %c0_i32_0 = arith.constant 0 : i32
    %c0_i32_1 = arith.constant 0 : i32
    return %c0_i32, %c0_i32_0 : i32, i32
  }
  func.func @transform_9(%arg0: i32) -> (i32, i32) {
    %c0_i32 = arith.constant 0 : i32
    %c0_i32_0 = arith.constant 0 : i32
    %c0_i32_1 = arith.constant 0 : i32
    return %c0_i32, %c0_i32_0 : i32, i32
  }
  func.func @transform_10(%arg0: i32) -> (i32, i32) {
    %c0_i32 = arith.constant 0 : i32
    %c0_i32_0 = arith.constant 0 : i32
    %c0_i32_1 = arith.constant 0 : i32
    return %c0_i32, %c0_i32_0 : i32, i32
  }
  func.func @transform_11(%arg0: i32) -> (i32, i32) {
    %c0_i32 = arith.constant 0 : i32
    %c0_i32_0 = arith.constant 0 : i32
    return %arg0, %c0_i32 : i32, i32
  }
  func.func @transform_12(%arg0: i32) -> (i32, i32) {
    %c0_i32 = arith.constant 0 : i32
    %c0_i32_0 = arith.constant 0 : i32
    return %arg0, %c0_i32 : i32, i32
  }
}

</mosaic_0001>

<bundles_post_ra>
// kernel: forward.5
= control target key start
LH: loop header
LB: loop body
LE: loop exit
PB: predicated region body
PF: predicated region fallthrough
CT: control target
= control target key end

     0   :  { %18 = vsyncpa [#allocation3], 0  ;;  %v314_v28 = vlaneseq  ;;  %v4291_v36 = vmov 1966171168   ;;  %s5383_s0 = inlined_call_operand.vmem [shape: bf16[2,2048], index: 0, kind: input, shape index: {}]   ;;  %s5384_s1 = inlined_call_operand.vmem [shape: bf16[2048,128], index: 1, kind: input, shape index: {}]   ;;  %s5385_s2 = inlined_call_operand.vmem [shape: f32[1,128], index: 2, kind: input, shape index: {}]   ;;  %s5386_s3 = inlined_call_operand.vmem [shape: bf16[128,128], index: 3, kind: input, shape index: {}]   ;;  %s5387_s4 = inlined_call_operand.vmem [shape: f32[1,128], index: 4, kind: input, shape index: {}]   ;;  %s5388_s5 = inlined_call_operand.vmem [shape: bf16[128,128], index: 5, kind: input, shape index: {}]   ;;  %s5389_s6 = inlined_call_operand.vmem [shape: f32[1,128], index: 6, kind: input, shape index: {}]   ;;  %s5390_s7 = inlined_call_operand.vmem [shape: bf16[2048,128], index: 7, kind: input, shape index: {}]   ;;  %s5391_s8 = inlined_call_operand.vmem [shape: f32[1,128], index: 8, kind: input, shape index: {}]   ;;  %s5392_s9 = inlined_call_operand.vmem [shape: bf16[128,128], index: 9, kind: input, shape index: {}]   ;;  %s5393_s10 = inlined_call_operand.vmem [shape: f32[1,128], index: 10, kind: input, shape index: {}]   ;;  %s5394_s11 = inlined_call_operand.hbm [shape: f32[2,128], index: 11, kind: output, shape index: {0}]   ;;  %s5395_s12 = inlined_call_operand.hbm [shape: f32[2,128], index: 12, kind: output, shape index: {1}]  }
   0x1   :  { %v3961_v0 = vld [vmem:[%s5384_s1 + $0x40] sm:$0xff]   ;;  %v3965_v4 = vld [vmem:[%s5384_s1 + $0x48] sm:$0xff]   ;;  %v3969_v8 = vld [vmem:[%s5384_s1 + $0x50] sm:$0xff]   ;;  %v312_v37 = vunpack.c.l.s4 %v4291_v36 }
   0x2   :  { %v3962_v1 = vld [vmem:[%s5384_s1 + $0xc0] sm:$0xff]   ;;  %3517 = vmatprep.subr.bf16.mxu0 %v3961_v0  ;;  %v3966_v5 = vld [vmem:[%s5384_s1 + $0xc8] sm:$0xff]   ;;  %v3970_v9 = vld [vmem:[%s5384_s1 + $0xd0] sm:$0xff]   ;;  %v315_v33 = vshrl.u32 %v314_v28, 7 }
   0x3   :  { %v3963_v2 = vld [vmem:[%s5384_s1] sm:$0xff]   ;;  %3539 = vmatprep.subr.bf16.mxu1 %v3962_v1  ;;  %v3967_v6 = vld [vmem:[%s5384_s1 + $0x8] sm:$0xff]   ;;  %v3971_v10 = vld [vmem:[%s5384_s1 + $0x10] sm:$0xff]   ;;  %v313_v39 = vunpack.c.0.s8 %v312_v37 }
   0x4   :  { %v3964_v3 = vld [vmem:[%s5384_s1 + $0x80] sm:$0xff]   ;;  %3518 = vmatpush3.bf16.msra.mxu0 %v3963_v2  ;;  %v3968_v7 = vld [vmem:[%s5384_s1 + $0x88] sm:$0xff]   ;;  %v3972_v11 = vld [vmem:[%s5384_s1 + $0x90] sm:$0xff]  }
   0x5   :  { %3540 = vmatpush3.bf16.msra.mxu1 %v3964_v3  ;;  %3519 = vmatprep.subr.bf16.mxu0 %v3965_v4  ;;  %v3973_v12 = vld [vmem:[%s5384_s1 + $0x58] sm:$0xff]   ;;  %v3977_v16 = vld [vmem:[%s5384_s1 + $0x60] sm:$0xff]   ;;  %v3981_v20 = vld [vmem:[%s5384_s1 + $0x68] sm:$0xff]   ;;  %v4466_v41 = vsub.s32 %v313_v39, %v315_v33 }
   0x6   :  { %3541 = vmatprep.subr.bf16.mxu1 %v3966_v5  ;;  %v3974_v13 = vld [vmem:[%s5384_s1 + $0xd8] sm:$0xff]   ;;  %v3978_v17 = vld [vmem:[%s5384_s1 + $0xe0] sm:$0xff]   ;;  %v3982_v21 = vld [vmem:[%s5384_s1 + $0xe8] sm:$0xff]  }
   0x7   :  { %v3975_v14 = vld [vmem:[%s5384_s1 + $0x18] sm:$0xff]   ;;  %v3979_v18 = vld [vmem:[%s5384_s1 + $0x20] sm:$0xff]   ;;  %v3983_v22 = vld [vmem:[%s5384_s1 + $0x28] sm:$0xff]  }
   0x8   :  { %3520 = vmatpush3.bf16.msra.mxu0 %v3967_v6  ;;  %v3976_v15 = vld [vmem:[%s5384_s1 + $0x98] sm:$0xff]   ;;  %v3980_v19 = vld [vmem:[%s5384_s1 + $0xa0] sm:$0xff]   ;;  %v3984_v23 = vld [vmem:[%s5384_s1 + $0xa8] sm:$0xff]  }
   0x9   :  { %3542 = vmatpush3.bf16.msra.mxu1 %v3968_v7  ;;  %3521 = vmatprep.subr.bf16.mxu0 %v3969_v8  ;;  %v3985_v24 = vld [vmem:[%s5384_s1 + $0x70] sm:$0xff]   ;;  %v3989_v29 = vld [vmem:[%s5384_s1 + $0x78] sm:$0xff]   ;;  %v43_v34 = vld [vmem:[%s5383_s0] sm:$0xff] }
   0xa   :  { %3543 = vmatprep.subr.bf16.mxu1 %v3970_v9  ;;  %v3986_v25 = vld [vmem:[%s5384_s1 + $0xf0] sm:$0xff]   ;;  %v3990_v30 = vld [vmem:[%s5384_s1 + $0xf8] sm:$0xff]   ;;  %v3993_v35 = vld [vmem:[%s5384_s1 + $0x140] sm:$0xff]   ;;  %v310_v40 = vcombine.high %v43_v34, %v43_v34  ;;  %v317_v42 = vrot.slane %v43_v34, %v4466_v41 }
   0xb   :  { %v3987_v26 = vld [vmem:[%s5384_s1 + $0x30] sm:$0xff]   ;;  %v3991_v31 = vld [vmem:[%s5384_s1 + $0x38] sm:$0xff]   ;;  %v3994_v38 = vld [vmem:[%s5384_s1 + $0x1c0] sm:$0xff]  }
   0xc   :  { %3522 = vmatpush3.bf16.msra.mxu0 %v3971_v10  ;;  %v3988_v27 = vld [vmem:[%s5384_s1 + $0xb0] sm:$0xff]   ;;  %v3992_v32 = vld [vmem:[%s5384_s1 + $0xb8] sm:$0xff]   ;;  %v4470_v43 = vrot.slane %v310_v40, %v4466_v41  ;;  %v325_v44 = vcombine.high %v317_v42, %v317_v42  ;;  %v4473_v45 = vrot.slane %v317_v42, %v4466_v41  ;;  %v3995_v47 = vld [vmem:[%s5384_s1 + $0x100] sm:$0xff]  }
   0xd   :  { %3544 = vmatpush3.bf16.msra.mxu1 %v3972_v11  ;;  %3523 = vmatprep.subr.bf16.mxu0 %v3973_v12  ;;  %v3996_v49 = vld [vmem:[%s5384_s1 + $0x180] sm:$0xff]   ;;  %v3997_v52 = vld [vmem:[%s5384_s1 + $0x148] sm:$0xff]   ;;  %v4001_v58 = vld [vmem:[%s5384_s1 + $0x150] sm:$0xff]  }
   0xe   :  { %3545 = vmatprep.subr.bf16.mxu1 %v3974_v13  ;;  %v326_v46 = vcombine.high %v4470_v43, %v4470_v43  ;;  %v4481_v48 = vrot.slane %v325_v44, %v4466_v41  ;;  %v4491_v51 = vcombine.high %v4473_v45, %v4473_v45  ;;  %v3998_v54 = vld [vmem:[%s5384_s1 + $0x1c8] sm:$0xff]   ;;  %v4002_v59 = vld [vmem:[%s5384_s1 + $0x1d0] sm:$0xff]   ;;  %v4005_v62 = vld [vmem:[%s5384_s1 + $0x158] sm:$0xff]  }
   0xf   :  { %v3999_v55 = vld [vmem:[%s5384_s1 + $0x108] sm:$0xff]   ;;  %v4003_v60 = vld [vmem:[%s5384_s1 + $0x110] sm:$0xff]   ;;  %v4006_v63 = vld [vmem:[%s5384_s1 + $0x1d8] sm:$0xff]  }
  0x10   :  { %3524 = vmatpush3.bf16.msra.mxu0 %v3975_v14  ;;  %v4487_v50 = vrot.slane %v326_v46, %v4466_v41  ;;  %1224 = vmatprep.mubr.bf16.mxu0 %v4481_v48  ;;  %v4499_v53 = vcombine.high %v4481_v48, %v4481_v48  ;;  %v4000_v57 = vld [vmem:[%s5384_s1 + $0x188] sm:$0xff]   ;;  %v4004_v61 = vld [vmem:[%s5384_s1 + $0x190] sm:$0xff]   ;;  %v4007_v0 = vld [vmem:[%s5384_s1 + $0x118] sm:$0xff]  }
  0x11   :  { %3546 = vmatpush3.bf16.msra.mxu1 %v3976_v15  ;;  %3525 = vmatprep.subr.bf16.mxu0 %v3977_v16  ;;  %v4008_v1 = vld [vmem:[%s5384_s1 + $0x198] sm:$0xff]   ;;  %v4009_v2 = vld [vmem:[%s5384_s1 + $0x160] sm:$0xff]   ;;  %v4013_v6 = vld [vmem:[%s5384_s1 + $0x168] sm:$0xff]  }
  0x12   :  { %3547 = vmatprep.subr.bf16.mxu1 %v3978_v17  ;;  %v4510_v56 = vcombine.high %v4487_v50, %v4487_v50  ;;  %1264 = vmatprep.mubr.bf16.mxu1 %v4499_v53  ;;  %v4010_v3 = vld [vmem:[%s5384_s1 + $0x1e0] sm:$0xff]   ;;  %v4014_v7 = vld [vmem:[%s5384_s1 + $0x1e8] sm:$0xff]   ;;  %v4017_v10 = vld [vmem:[%s5384_s1 + $0x170] sm:$0xff]  }
  0x13   :  { %v4011_v4 = vld [vmem:[%s5384_s1 + $0x120] sm:$0xff]   ;;  %v4015_v8 = vld [vmem:[%s5384_s1 + $0x128] sm:$0xff]   ;;  %v4018_v11 = vld [vmem:[%s5384_s1 + $0x1f0] sm:$0xff]  }
  0x14   :  { %3526 = vmatpush3.bf16.msra.mxu0 %v3979_v18  ;;  %v4012_v5 = vld [vmem:[%s5384_s1 + $0x1a0] sm:$0xff]   ;;  %v4016_v9 = vld [vmem:[%s5384_s1 + $0x1a8] sm:$0xff]   ;;  %v4019_v12 = vld [vmem:[%s5384_s1 + $0x130] sm:$0xff]   ;;  %v4593_v18 = vrot.slane %v4470_v43, %v4466_v41 }
  0x15   :  { %3548 = vmatpush3.bf16.msra.mxu1 %v3980_v19  ;;  %3527 = vmatprep.subr.bf16.mxu0 %v3981_v20  ;;  %v4020_v13 = vld [vmem:[%s5384_s1 + $0x1b0] sm:$0xff]   ;;  %v4021_v14 = vld [vmem:[%s5384_s1 + $0x178] sm:$0xff]   ;;  %v4026_v19 = vld [vmem:[%s5384_s1 + $0x240] sm:$0xff]  }
  0x16   :  { %3549 = vmatprep.subr.bf16.mxu1 %v3982_v21  ;;  %v4022_v15 = vld [vmem:[%s5384_s1 + $0x1f8] sm:$0xff]   ;;  %v4027_v20 = vld [vmem:[%s5384_s1 + $0x2c0] sm:$0xff]   ;;  %v4034_v28 = vld [vmem:[%s5384_s1 + $0x250] sm:$0xff]  }
  0x17   :  { %v4023_v16 = vld [vmem:[%s5384_s1 + $0x138] sm:$0xff]   ;;  %v4028_v21 = vld [vmem:[%s5384_s1 + $0x200] sm:$0xff]   ;;  %v4046_v40 = vld [vmem:[%s5384_s1 + $0x268] sm:$0xff]  }
  0x18   :  { %3528 = vmatpush3.bf16.msra.mxu0 %v3983_v22  ;;  %v4024_v17 = vld [vmem:[%s5384_s1 + $0x1b8] sm:$0xff]   ;;  %v4029_v22 = vld [vmem:[%s5384_s1 + $0x280] sm:$0xff]   ;;  %v4047_v42 = vld [vmem:[%s5384_s1 + $0x2e8] sm:$0xff]  }
  0x19   :  { %3550 = vmatpush3.bf16.msra.mxu1 %v3984_v23  ;;  %3529 = vmatprep.subr.bf16.mxu0 %v3985_v24  ;;  %v4609_v23 = vcombine.high %v4593_v18, %v4593_v18  ;;  %v4030_v24 = vld [vmem:[%s5384_s1 + $0x248] sm:$0xff]   ;;  %v4039_v33 = vld [vmem:[%s5384_s1 + $0x2d8] sm:$0xff]   ;;  %v4042_v36 = vld [vmem:[%s5384_s1 + $0x260] sm:$0xff]  }
  0x1a   :  { %3551 = vmatprep.subr.bf16.mxu1 %v3986_v25  ;;  %v4031_v25 = vld [vmem:[%s5384_s1 + $0x2c8] sm:$0xff]   ;;  %v4040_v34 = vld [vmem:[%s5384_s1 + $0x218] sm:$0xff]   ;;  %v4043_v37 = vld [vmem:[%s5384_s1 + $0x2e0] sm:$0xff]  }
  0x1b   :  { %v4045_v39 = vld [vmem:[%s5384_s1 + $0x2a0] sm:$0xff]   ;;  %v4048_v43 = vld [vmem:[%s5384_s1 + $0x228] sm:$0xff]   ;;  %v4050_v46 = vld [vmem:[%s5384_s1 + $0x270] sm:$0xff]  }
  0x1c   :  { %3530 = vmatpush3.bf16.msra.mxu0 %v3987_v26  ;;  %v4032_v26 = vld [vmem:[%s5384_s1 + $0x208] sm:$0xff]  }
  0x1d   :  { %3552 = vmatpush3.bf16.msra.mxu1 %v3988_v27  ;;  %3531 = vmatprep.subr.bf16.mxu0 %v3989_v29  ;;  %v4033_v27 = vld [vmem:[%s5384_s1 + $0x288] sm:$0xff]   ;;  %v4035_v29 = vld [vmem:[%s5384_s1 + $0x2d0] sm:$0xff]  }
  0x1e   :  { %3553 = vmatprep.subr.bf16.mxu1 %v3990_v30  ;;  %v4036_v30 = vld [vmem:[%s5384_s1 + $0x210] sm:$0xff]   ;;  %v4049_v44 = vld [vmem:[%s5384_s1 + $0x2a8] sm:$0xff]  }
  0x20   :  { %3532 = vmatpush3.bf16.msra.mxu0 %v3991_v31  ;;  %v4037_v31 = vld [vmem:[%s5384_s1 + $0x290] sm:$0xff]  }
  0x21   :  { %3554 = vmatpush3.bf16.msra.mxu1 %v3992_v32  ;;  %3561 = vmatprep.subr.bf16.mxu0 %v3993_v35  ;;  %v4038_v32 = vld [vmem:[%s5384_s1 + $0x258] sm:$0xff]  }
  0x22   :  { %3583 = vmatprep.subr.bf16.mxu1 %v3994_v38  ;;  %v4041_v35 = vld [vmem:[%s5384_s1 + $0x298] sm:$0xff]   ;;  %v4044_v38 = vld [vmem:[%s5384_s1 + $0x220] sm:$0xff]  }
  0x23   :  { %1225 = vmatmul.mubr.bf16.vlgmr.msra.gmra.mrb[0].mxu0 %v4473_v45 }
  0x24   :  { %3562 = vmatpush3.bf16.msra.mxu0 %v3995_v47  ;;  %1265 = vmatmul.mubr.bf16.vlgmr.msra.gmra.mrb[0].mxu1 %v4491_v51  ;;  %v44_v47 = vld [vmem:[%s5383_s0 + $0x8] sm:$0xff] }
  0x25   :  { %3563 = vmatprep.subr.bf16.mxu0 %v3997_v52  ;;  %3584 = vmatpush3.bf16.msra.mxu1 %v3996_v49  ;;  %v4051_v49 = vld [vmem:[%s5384_s1 + $0x2f0] sm:$0xff]   ;;  %v366_v52 = vrot.slane %v44_v47, %v4466_v41 }
  0x26   :  { %1304 = vmatprep.mubr.bf16.mxu0 %v4487_v50  ;;  %3585 = vmatprep.subr.bf16.mxu1 %v3998_v54  ;;  %v359_v54 = vcombine.high %v44_v47, %v44_v47  ;;  %v4093_v47 = vld [vmem:[%s5386_s3 + $0x10] sm:$0xff]  }
  0x27   :  { %1344 = vmatprep.mubr.bf16.mxu1 %v4510_v56 }
  0x28   :  { %3564 = vmatpush3.bf16.msra.mxu0 %v3999_v55  ;;  %v4052_v55 = vld [vmem:[%s5384_s1 + $0x230] sm:$0xff]  }
  0x29   :  { %3565 = vmatprep.subr.bf16.mxu0 %v4001_v58  ;;  %3586 = vmatpush3.bf16.msra.mxu1 %v4000_v57  ;;  %v4053_v57 = vld [vmem:[%s5384_s1 + $0x2b0] sm:$0xff]   ;;  %v374_v58 = vcombine.high %v366_v52, %v366_v52 }
  0x2a   :  { %3587 = vmatprep.subr.bf16.mxu1 %v4002_v59  ;;  %v4690_v59 = vrot.slane %v359_v54, %v4466_v41  ;;  %v4096_v54 = vld [vmem:[%s5386_s3 + $0x28] sm:$0xff]  }
  0x2c   :  { %3566 = vmatpush3.bf16.msra.mxu0 %v4003_v60  ;;  %v4054_v60 = vld [vmem:[%s5384_s1 + $0x278] sm:$0xff]  }
  0x2d   :  { %3567 = vmatprep.subr.bf16.mxu0 %v4005_v62  ;;  %3588 = vmatpush3.bf16.msra.mxu1 %v4004_v61  ;;  %v4055_v61 = vld [vmem:[%s5384_s1 + $0x2f8] sm:$0xff]   ;;  %v4699_v62 = vrot.slane %v374_v58, %v4466_v41 }
  0x2e   :  { %3589 = vmatprep.subr.bf16.mxu1 %v4006_v63  ;;  %v375_v63 = vcombine.high %v4690_v59, %v4690_v59 }
  0x30   :  { %3568 = vmatpush3.bf16.msra.mxu0 %v4007_v0  ;;  %v4056_v0 = vld [vmem:[%s5384_s1 + $0x238] sm:$0xff]  }
  0x31   :  { %3569 = vmatprep.subr.bf16.mxu0 %v4009_v2  ;;  %3590 = vmatpush3.bf16.msra.mxu1 %v4008_v1  ;;  %v4057_v1 = vld [vmem:[%s5384_s1 + $0x2b8] sm:$0xff]   ;;  %v4712_v2 = vcombine.high %v4699_v62, %v4699_v62 }
  0x32   :  { %3591 = vmatprep.subr.bf16.mxu1 %v4010_v3  ;;  %v4715_v3 = vrot.slane %v366_v52, %v4466_v41  ;;  %v4095_v52 = vld [vmem:[%s5386_s3 + $0x20] sm:$0xff]  }
  0x34   :  { %3570 = vmatpush3.bf16.msra.mxu0 %v4011_v4  ;;  %v4058_v4 = vld [vmem:[%s5384_s1 + $0x340] sm:$0xff]  }
  0x35   :  { %3571 = vmatprep.subr.bf16.mxu0 %v4013_v6  ;;  %3592 = vmatpush3.bf16.msra.mxu1 %v4012_v5  ;;  %v4059_v5 = vld [vmem:[%s5384_s1 + $0x3c0] sm:$0xff]   ;;  %v4725_v6 = vrot.slane %v375_v63, %v4466_v41 }
  0x36   :  { %3593 = vmatprep.subr.bf16.mxu1 %v4014_v7  ;;  %v4060_v7 = vld [vmem:[%s5384_s1 + $0x300] sm:$0xff]  }
  0x38   :  { %3572 = vmatpush3.bf16.msra.mxu0 %v4015_v8  ;;  %v4061_v8 = vld [vmem:[%s5384_s1 + $0x380] sm:$0xff]  }
  0x39   :  { %3573 = vmatprep.subr.bf16.mxu0 %v4017_v10  ;;  %3594 = vmatpush3.bf16.msra.mxu1 %v4016_v9  ;;  %v4735_v9 = vcombine.high %v4715_v3, %v4715_v3  ;;  %v4062_v10 = vld [vmem:[%s5384_s1 + $0x348] sm:$0xff]  }
  0x3a   :  { %3595 = vmatprep.subr.bf16.mxu1 %v4018_v11  ;;  %v4063_v11 = vld [vmem:[%s5384_s1 + $0x3c8] sm:$0xff]  }
  0x3c   :  { %3574 = vmatpush3.bf16.msra.mxu0 %v4019_v12  ;;  %v4745_v12 = vcombine.high %v4725_v6, %v4725_v6 }
  0x3d   :  { %3575 = vmatprep.subr.bf16.mxu0 %v4021_v14  ;;  %3596 = vmatpush3.bf16.msra.mxu1 %v4020_v13  ;;  %v4064_v13 = vld [vmem:[%s5384_s1 + $0x308] sm:$0xff]  }
  0x3e   :  { %3597 = vmatprep.subr.bf16.mxu1 %v4022_v15  ;;  %v4065_v14 = vld [vmem:[%s5384_s1 + $0x388] sm:$0xff]   ;;  %v4066_v15 = vld [vmem:[%s5384_s1 + $0x350] sm:$0xff]  }
  0x40   :  { %3576 = vmatpush3.bf16.msra.mxu0 %v4023_v16  ;;  %v4067_v16 = vld [vmem:[%s5384_s1 + $0x3d0] sm:$0xff]  }
  0x41   :  { %3605 = vmatprep.subr.bf16.mxu0 %v4026_v19  ;;  %3598 = vmatpush3.bf16.msra.mxu1 %v4024_v17  ;;  %v4068_v17 = vld [vmem:[%s5384_s1 + $0x310] sm:$0xff]  }
  0x42   :  { %3627 = vmatprep.subr.bf16.mxu1 %v4027_v20  ;;  %v4069_v19 = vld [vmem:[%s5384_s1 + $0x390] sm:$0xff]   ;;  %v4070_v20 = vld [vmem:[%s5384_s1 + $0x358] sm:$0xff]  }
  0x43   :  { %1305 = vmatmul.mubr.bf16.vlgmr.msra.gmra.mrb[4].mxu0 %v4593_v18 }
  0x44   :  { %3606 = vmatpush3.bf16.msra.mxu0 %v4028_v21  ;;  %1345 = vmatmul.mubr.bf16.vlgmr.msra.gmra.mrb[4].mxu1 %v4609_v23  ;;  %v4071_v21 = vld [vmem:[%s5384_s1 + $0x3d8] sm:$0xff]  }
  0x45   :  { %3607 = vmatprep.subr.bf16.mxu0 %v4030_v24  ;;  %3628 = vmatpush3.bf16.msra.mxu1 %v4029_v22  ;;  %v4072_v22 = vld [vmem:[%s5384_s1 + $0x318] sm:$0xff]  }
  0x46   :  { %3629 = vmatprep.subr.bf16.mxu1 %v4031_v25  ;;  %1384 = vmatprep.mubr.bf16.mxu0 %v4699_v62  ;;  %v4073_v24 = vld [vmem:[%s5384_s1 + $0x398] sm:$0xff]   ;;  %v4074_v25 = vld [vmem:[%s5384_s1 + $0x360] sm:$0xff]  }
  0x47   :  { %1424 = vmatprep.mubr.bf16.mxu1 %v4712_v2 }
  0x48   :  { %3608 = vmatpush3.bf16.msra.mxu0 %v4032_v26  ;;  %v4075_v26 = vld [vmem:[%s5384_s1 + $0x3e0] sm:$0xff]  }
  0x49   :  { %3609 = vmatprep.subr.bf16.mxu0 %v4034_v28  ;;  %3630 = vmatpush3.bf16.msra.mxu1 %v4033_v27  ;;  %v4076_v27 = vld [vmem:[%s5384_s1 + $0x320] sm:$0xff]  }
  0x4a   :  { %3631 = vmatprep.subr.bf16.mxu1 %v4035_v29  ;;  %v4077_v28 = vld [vmem:[%s5384_s1 + $0x3a0] sm:$0xff]   ;;  %v4078_v29 = vld [vmem:[%s5384_s1 + $0x368] sm:$0xff]  }
  0x4c   :  { %3610 = vmatpush3.bf16.msra.mxu0 %v4036_v30  ;;  %v4079_v30 = vld [vmem:[%s5384_s1 + $0x3e8] sm:$0xff]  }
  0x4d   :  { %3611 = vmatprep.subr.bf16.mxu0 %v4038_v32  ;;  %3632 = vmatpush3.bf16.msra.mxu1 %v4037_v31  ;;  %v4080_v31 = vld [vmem:[%s5384_s1 + $0x328] sm:$0xff]  }
  0x4e   :  { %3633 = vmatprep.subr.bf16.mxu1 %v4039_v33  ;;  %v4081_v32 = vld [vmem:[%s5384_s1 + $0x3a8] sm:$0xff]   ;;  %v4082_v33 = vld [vmem:[%s5384_s1 + $0x370] sm:$0xff]  }
  0x50   :  { %3612 = vmatpush3.bf16.msra.mxu0 %v4040_v34  ;;  %v4083_v34 = vld [vmem:[%s5384_s1 + $0x3f0] sm:$0xff]  }
  0x51   :  { %3613 = vmatprep.subr.bf16.mxu0 %v4042_v36  ;;  %3634 = vmatpush3.bf16.msra.mxu1 %v4041_v35  ;;  %v4084_v35 = vld [vmem:[%s5384_s1 + $0x330] sm:$0xff]  }
  0x52   :  { %3635 = vmatprep.subr.bf16.mxu1 %v4043_v37  ;;  %v4085_v36 = vld [vmem:[%s5384_s1 + $0x3b0] sm:$0xff]   ;;  %v4086_v37 = vld [vmem:[%s5384_s1 + $0x378] sm:$0xff]  }
  0x54   :  { %3614 = vmatpush3.bf16.msra.mxu0 %v4044_v38  ;;  %v4087_v38 = vld [vmem:[%s5384_s1 + $0x3f8] sm:$0xff]  }
  0x55   :  { %3615 = vmatprep.subr.bf16.mxu0 %v4046_v40  ;;  %3636 = vmatpush3.bf16.msra.mxu1 %v4045_v39  ;;  %v4088_v39 = vld [vmem:[%s5384_s1 + $0x338] sm:$0xff]  }
  0x56   :  { %3637 = vmatprep.subr.bf16.mxu1 %v4047_v42  ;;  %v4089_v40 = vld [vmem:[%s5384_s1 + $0x3b8] sm:$0xff]   ;;  %v4831_v42 = vrot.slane %v4690_v59, %v4466_v41  ;;  %v4092_v41 = vld [vmem:[%s5386_s3 + $0x8] sm:$0xff]  }
  0x58   :  { %3616 = vmatpush3.bf16.msra.mxu0 %v4048_v43  ;;  %v4835_v43 = vcombine.high %v4831_v42, %v4831_v42 }
  0x59   :  { %3617 = vmatprep.subr.bf16.mxu0 %v4050_v46  ;;  %3638 = vmatpush3.bf16.msra.mxu1 %v4049_v44  ;;  %v4091_v44 = vld [vmem:[%s5386_s3] sm:$0xff]   ;;  %v4292_v46 = vmov 0.0  }
  0x5a   :  { %3639 = vmatprep.subr.bf16.mxu1 %v4051_v49  ;;  %v4094_v49 = vld [vmem:[%s5386_s3 + $0x18] sm:$0xff]  }
  0x5c   :  { %3618 = vmatpush3.bf16.msra.mxu0 %v4052_v55  ;;  %v4097_v55 = vld [vmem:[%s5386_s3 + $0x30] sm:$0xff]  }
  0x5d   :  { %3619 = vmatprep.subr.bf16.mxu0 %v4054_v60  ;;  %3640 = vmatpush3.bf16.msra.mxu1 %v4053_v57 }
  0x5e   :  { %3641 = vmatprep.subr.bf16.mxu1 %v4055_v61 }
  0x60   :  { %3620 = vmatpush3.bf16.msra.mxu0 %v4056_v0 }
  0x61   :  { %3649 = vmatprep.subr.bf16.mxu0 %v4058_v4  ;;  %3642 = vmatpush3.bf16.msra.mxu1 %v4057_v1 }
  0x62   :  { %3671 = vmatprep.subr.bf16.mxu1 %v4059_v5 }
  0x63   :  { %1385 = vmatmul.mubr.bf16.vlgmr.msra.gmra.mrb[8].mxu0 %v4715_v3 }
  0x64   :  { %3650 = vmatpush3.bf16.msra.mxu0 %v4060_v7  ;;  %1464 = vmatprep.mubr.bf16.mxu0 %v4725_v6 }
  0x65   :  { %1425 = vmatmul.mubr.bf16.vlgmr.msra.gmra.mrb[8].mxu1 %v4735_v9  ;;  %3651 = vmatprep.subr.bf16.mxu0 %v4062_v10 }
  0x66   :  { %3672 = vmatpush3.bf16.msra.mxu1 %v4061_v8  ;;  %1504 = vmatprep.mubr.bf16.mxu1 %v4745_v12 }
  0x67   :  { %3673 = vmatprep.subr.bf16.mxu1 %v4063_v11 }
  0x68   :  { %3652 = vmatpush3.bf16.msra.mxu0 %v4064_v13 }
  0x69   :  { %3653 = vmatprep.subr.bf16.mxu0 %v4066_v15 }
  0x6a   :  { %3674 = vmatpush3.bf16.msra.mxu1 %v4065_v14 }
  0x6b   :  { %3675 = vmatprep.subr.bf16.mxu1 %v4067_v16 }
  0x6c   :  { %3654 = vmatpush3.bf16.msra.mxu0 %v4068_v17 }
  0x6d   :  { %3655 = vmatprep.subr.bf16.mxu0 %v4070_v20 }
  0x6e   :  { %3676 = vmatpush3.bf16.msra.mxu1 %v4069_v19 }
  0x6f   :  { %3677 = vmatprep.subr.bf16.mxu1 %v4071_v21 }
  0x70   :  { %3656 = vmatpush3.bf16.msra.mxu0 %v4072_v22 }
  0x71   :  { %3657 = vmatprep.subr.bf16.mxu0 %v4074_v25 }
  0x72   :  { %3678 = vmatpush3.bf16.msra.mxu1 %v4073_v24 }
  0x73   :  { %3679 = vmatprep.subr.bf16.mxu1 %v4075_v26 }
  0x74   :  { %3658 = vmatpush3.bf16.msra.mxu0 %v4076_v27 }
  0x75   :  { %3659 = vmatprep.subr.bf16.mxu0 %v4078_v29 }
  0x76   :  { %3680 = vmatpush3.bf16.msra.mxu1 %v4077_v28 }
  0x77   :  { %3681 = vmatprep.subr.bf16.mxu1 %v4079_v30 }
  0x78   :  { %3660 = vmatpush3.bf16.msra.mxu0 %v4080_v31 }
  0x79   :  { %3661 = vmatprep.subr.bf16.mxu0 %v4082_v33 }
  0x7a   :  { %3682 = vmatpush3.bf16.msra.mxu1 %v4081_v32 }
  0x7b   :  { %3683 = vmatprep.subr.bf16.mxu1 %v4083_v34 }
  0x7c   :  { %3662 = vmatpush3.bf16.msra.mxu0 %v4084_v35 }
  0x7d   :  { %3663 = vmatprep.subr.bf16.mxu0 %v4086_v37 }
  0x7e   :  { %3684 = vmatpush3.bf16.msra.mxu1 %v4085_v36 }
  0x7f   :  { %3685 = vmatprep.subr.bf16.mxu1 %v4087_v38 }
  0x80   :  { %3664 = vmatpush3.bf16.msra.mxu0 %v4088_v39 }
  0x81   :  { %3896 = vmatprep.subr.bf16.mxu0 %v4292_v46 }
  0x82   :  { %3686 = vmatpush3.bf16.msra.mxu1 %v4089_v40 }
  0x83   :  { %1465 = vmatmul.mubr.bf16.vlgmr.msra.gmra.mrb[12].mxu0 %v4831_v42  ;;  %3916 = vmatprep.subr.bf16.mxu1 %v4292_v46 }
  0x84   :  { %3897 = vmatpush3.bf16.msra.mxu0 %v4091_v44 }
  0x85   :  { %1505 = vmatmul.mubr.bf16.vlgmr.msra.gmra.mrb[12].mxu1 %v4835_v43  ;;  %3898 = vmatprep.subr.bf16.mxu0 %v4292_v46 }
  0x88   :  { %3899 = vmatpush3.bf16.msra.mxu0 %v4092_v41 }
  0x89   :  { %3900 = vmatprep.subr.bf16.mxu0 %v4292_v46 }
  0x8c   :  { %3901 = vmatpush3.bf16.msra.mxu0 %v4093_v47 }
  0x8d   :  { %3902 = vmatprep.subr.bf16.mxu0 %v4292_v46 }
  0x90   :  { %3903 = vmatpush3.bf16.msra.mxu0 %v4094_v49 }
  0x91   :  { %3904 = vmatprep.subr.bf16.mxu0 %v4292_v46 }
  0x94   :  { %3905 = vmatpush3.bf16.msra.mxu0 %v4095_v52 }
  0x95   :  { %3906 = vmatprep.subr.bf16.mxu0 %v4292_v46 }
  0x98   :  { %3907 = vmatpush3.bf16.msra.mxu0 %v4096_v54 }
  0x99   :  { %3908 = vmatprep.subr.bf16.mxu0 %v4292_v46 }
  0x9c   :  { %3909 = vmatpush3.bf16.msra.mxu0 %v4097_v55 }
  0x9d   :  { %19 = vsyncpa [#allocation5], 0  ;;  %3910 = vmatprep.subr.bf16.mxu0 %v4292_v46  ;;  %v4098_v57 = vld [vmem:[%s5386_s3 + $0x38] sm:$0xff]   ;;  %vm4293_vm0 = vmmov 0   ;;  %v4099_v58 = vld [vmem:[%s5388_s5] sm:$0xff]  }
  0x9e   :  { %3912 = vmatprep.mubr.msk.bf16.mxu0 %vm4293_vm0, %v4292_v46  ;;  %v4100_v59 = vld [vmem:[%s5390_s7 + $0x40] sm:$0xff]   ;;  %3932 = vmatprep.mubr.msk.bf16.mxu1 %vm4293_vm0, %v4292_v46  ;;  %v4102_v60 = vld [vmem:[%s5388_s5 + $0x8] sm:$0xff]   ;;  %v4105_v61 = vld [vmem:[%s5388_s5 + $0x10] sm:$0xff]  }
  0x9f   :  { %3917 = vmatpush3.bf16.msra.mxu1 %v4099_v58  ;;  %v4108_v63 = vld [vmem:[%s5388_s5 + $0x18] sm:$0xff]   ;;  %v4111_v0 = vld [vmem:[%s5388_s5 + $0x20] sm:$0xff]   ;;  %v4114_v1 = vld [vmem:[%s5388_s5 + $0x28] sm:$0xff]  }
  0xa0   :  { %3911 = vmatpush3.bf16.msra.mxu0 %v4098_v57  ;;  %3918 = vmatprep.subr.bf16.mxu1 %v4292_v46  ;;  %v3232_v5 = vld [vmem:[%s5385_s2] ss:$0 sm:$0xff]  ;;  %v4117_v13 = vld [vmem:[%s5388_s5 + $0x30] sm:$0xff]  }
  0xa1   :  { %3711 = vmatprep.subr.bf16.mxu0 %v4100_v59 }
  0xa3   :  { %3919 = vmatpush3.bf16.msra.mxu1 %v4102_v60 }
  0xa4   :  { %3920 = vmatprep.subr.bf16.mxu1 %v4292_v46 }
  0xa7   :  { %3921 = vmatpush3.bf16.msra.mxu1 %v4105_v61 }
  0xa8   :  { %3922 = vmatprep.subr.bf16.mxu1 %v4292_v46 }
  0xab   :  { %3923 = vmatpush3.bf16.msra.mxu1 %v4108_v63 }
  0xac   :  { %3924 = vmatprep.subr.bf16.mxu1 %v4292_v46 }
  0xaf   :  { %3925 = vmatpush3.bf16.msra.mxu1 %v4111_v0 }
  0xb0   :  { %3926 = vmatprep.subr.bf16.mxu1 %v4292_v46 }
  0xb3   :  { %3927 = vmatpush3.bf16.msra.mxu1 %v4114_v1 }
  0xb4   :  { %3928 = vmatprep.subr.bf16.mxu1 %v4292_v46 }
  0xb7   :  { %3929 = vmatpush3.bf16.msra.mxu1 %v4117_v13  ;;  %v4103_v13 = vld [vmem:[%s5390_s7 + $0x48] sm:$0xff]  }
  0xb8   :  { %3930 = vmatprep.subr.bf16.mxu1 %v4292_v46 }
  0xf6   :  { %v3533_v4 = vpop.f32.mrb[0].mxu0 }
  0xf7   :  { %v3534_v7 = vpop.f32.mrb[1].mxu0  ;;  %v3555_v8 = vpop.f32.mrb[0].mxu1 }
  0xf8   :  { %v3535_v10 = vadd.f32 %v3534_v7, %v3533_v4  ;;  %v3536_v11 = vpop.f32.mrb[2].mxu0  ;;  %v3556_v14 = vpop.f32.mrb[1].mxu1 }
  0xf9   :  { %v3537_v15 = vpop.f32.mrb[3].mxu0  ;;  %v3557_v17 = vadd.f32 %v3556_v14, %v3555_v8  ;;  %v3558_v19 = vpop.f32.mrb[2].mxu1  ;;  %v4104_v14 = vld [vmem:[%s5390_s7 + $0x8] sm:$0xff]  }
  0xfa   :  { %v1227_v16 = vadd.f32 %v3535_v10, %v3232_v5  ;;  %v3559_v20 = vpop.f32.mrb[3].mxu1  ;;  %v4101_v10 = vld [vmem:[%s5390_s7] sm:$0xff]   ;;  %v4106_v15 = vld [vmem:[%s5390_s7 + $0x50] sm:$0xff]  }
  0xfb   :  { %v4112_v19 = vld [vmem:[%s5390_s7 + $0x60] sm:$0xff]  }
  0xfc   :  { %v1267_v21 = vadd.f32 %v3557_v17, %v1227_v16  ;;  %v4107_v16 = vld [vmem:[%s5390_s7 + $0x10] sm:$0xff]   ;;  %v4109_v17 = vld [vmem:[%s5390_s7 + $0x58] sm:$0xff]   ;;  %v4113_v20 = vld [vmem:[%s5390_s7 + $0x20] sm:$0xff]  }
 0x116   :  { %v3577_v22 = vpop.f32.mrb[4].mxu0 }
 0x117   :  { %v3578_v24 = vpop.f32.mrb[5].mxu0  ;;  %v3599_v25 = vpop.f32.mrb[4].mxu1 }
 0x118   :  { %v3579_v26 = vadd.f32 %v3578_v24, %v3577_v22  ;;  %v3580_v27 = vpop.f32.mrb[6].mxu0  ;;  %v3600_v28 = vpop.f32.mrb[5].mxu1  ;;  %v4116_v22 = vld [vmem:[%s5390_s7 + $0x28] sm:$0xff]   ;;  %v4118_v24 = vld [vmem:[%s5390_s7 + $0x70] sm:$0xff]  }
 0x119   :  { %v3581_v29 = vpop.f32.mrb[7].mxu0  ;;  %v3601_v31 = vadd.f32 %v3600_v28, %v3599_v25  ;;  %v3602_v32 = vpop.f32.mrb[6].mxu1  ;;  %v4119_v25 = vld [vmem:[%s5390_s7 + $0x30] sm:$0xff]   ;;  %v4121_v27 = vld [vmem:[%s5390_s7 + $0x78] sm:$0xff]  }
 0x11a   :  { %v1307_v30 = vadd.f32 %v3579_v26, %v1267_v21  ;;  %v3603_v33 = vpop.f32.mrb[7].mxu1  ;;  %v4115_v21 = vld [vmem:[%s5390_s7 + $0x68] sm:$0xff]   ;;  %v4120_v26 = vld [vmem:[%s5388_s5 + $0x38] sm:$0xff]   ;;  %v4123_v29 = vld [vmem:[%s5390_s7 + $0xc0] sm:$0xff]  }
 0x11b   :  { %3931 = vmatpush3.bf16.msra.mxu1 %v4120_v26  ;;  %v4122_v28 = vld [vmem:[%s5390_s7 + $0x38] sm:$0xff]   ;;  %v4129_v32 = vld [vmem:[%s5390_s7 + $0x148] sm:$0xff]  }
 0x11c   :  { %v1347_v34 = vadd.f32 %v3601_v31, %v1307_v30  ;;  %3733 = vmatprep.subr.bf16.mxu1 %v4123_v29  ;;  %v4125_v30 = vld [vmem:[%s5390_s7 + $0x140] sm:$0xff]   ;;  %v4130_v33 = vld [vmem:[%s5390_s7 + $0x108] sm:$0xff]  }
 0x11d   :  { %v4126_v31 = vld [vmem:[%s5390_s7 + $0x100] sm:$0xff]  }
 0x136   :  { %v3621_v35 = vpop.f32.mrb[8].mxu0 }
 0x137   :  { %v3622_v36 = vpop.f32.mrb[9].mxu0 }
 0x138   :  { %v3643_v37 = vpop.f32.mrb[8].mxu1  ;;  %v3623_v38 = vadd.f32 %v3622_v36, %v3621_v35  ;;  %v3624_v39 = vpop.f32.mrb[10].mxu0  ;;  %v4138_v35 = vld [vmem:[%s5390_s7 + $0x118] sm:$0xff]   ;;  %v4141_v36 = vld [vmem:[%s5390_s7 + $0x160] sm:$0xff]  }
 0x139   :  { %v3644_v40 = vpop.f32.mrb[9].mxu1  ;;  %v3625_v44 = vpop.f32.mrb[11].mxu0  ;;  %v4146_v39 = vld [vmem:[%s5390_s7 + $0x128] sm:$0xff]  }
 0x13a   :  { %v1387_v41 = vadd.f32 %v3623_v38, %v1347_v34  ;;  %v3645_v47 = vadd.f32 %v3644_v40, %v3643_v37  ;;  %v3646_v49 = vpop.f32.mrb[10].mxu1  ;;  %v4133_v34 = vld [vmem:[%s5390_s7 + $0x150] sm:$0xff]   ;;  %v4142_v37 = vld [vmem:[%s5390_s7 + $0x120] sm:$0xff]   ;;  %v4145_v38 = vld [vmem:[%s5390_s7 + $0x168] sm:$0xff]  }
 0x13b   :  { %v3647_v52 = vpop.f32.mrb[11].mxu1  ;;  %v4149_v40 = vld [vmem:[%s5390_s7 + $0x170] sm:$0xff]   ;;  %v4157_v49 = vld [vmem:[%s5390_s7 + $0x240] sm:$0xff]  }
 0x13c   :  { %v1427_v54 = vadd.f32 %v3645_v47, %v1387_v41  ;;  %v4150_v44 = vld [vmem:[%s5390_s7 + $0x130] sm:$0xff]   ;;  %v4153_v41 = vld [vmem:[%s5390_s7 + $0x178] sm:$0xff]   ;;  %v4158_v52 = vld [vmem:[%s5390_s7 + $0x200] sm:$0xff]  }
 0x13d   :  { %v4154_v47 = vld [vmem:[%s5390_s7 + $0x138] sm:$0xff]  }
 0x156   :  { %v3665_v55 = vpop.f32.mrb[12].mxu0 }
 0x157   :  { %v3666_v57 = vpop.f32.mrb[13].mxu0 }
 0x158   :  { %v3687_v58 = vpop.f32.mrb[12].mxu1  ;;  %v3667_v59 = vadd.f32 %v3666_v57, %v3665_v55  ;;  %v3668_v60 = vpop.f32.mrb[14].mxu0  ;;  %v4162_v55 = vld [vmem:[%s5390_s7 + $0x208] sm:$0xff]   ;;  %v4165_v57 = vld [vmem:[%s5390_s7 + $0x250] sm:$0xff]  }
 0x159   :  { %v3688_v61 = vpop.f32.mrb[13].mxu1  ;;  %v3669_v63 = vpop.f32.mrb[15].mxu0  ;;  %v4174_v60 = vld [vmem:[%s5390_s7 + $0x220] sm:$0xff]  }
 0x15a   :  { %v1467_v0 = vadd.f32 %v3667_v59, %v1427_v54  ;;  %v3689_v1 = vadd.f32 %v3688_v61, %v3687_v58  ;;  %v3690_v4 = vpop.f32.mrb[14].mxu1  ;;  %v4161_v54 = vld [vmem:[%s5390_s7 + $0x248] sm:$0xff]   ;;  %v4170_v58 = vld [vmem:[%s5390_s7 + $0x218] sm:$0xff]   ;;  %v4173_v59 = vld [vmem:[%s5390_s7 + $0x260] sm:$0xff]  }
 0x15b   :  { %v3691_v5 = vpop.f32.mrb[15].mxu1  ;;  %v4177_v61 = vld [vmem:[%s5390_s7 + $0x268] sm:$0xff]   ;;  %v4185_v4 = vld [vmem:[%s5390_s7 + $0x278] sm:$0xff]  }
 0x15c   :  { %v1507_v7 = vadd.f32 %v3689_v1, %v1467_v0  ;;  %v4178_v63 = vld [vmem:[%s5390_s7 + $0x228] sm:$0xff]   ;;  %v4181_v0 = vld [vmem:[%s5390_s7 + $0x270] sm:$0xff]   ;;  %v4186_v5 = vld [vmem:[%s5390_s7 + $0x238] sm:$0xff]  }
 0x15d   :  { %v4182_v1 = vld [vmem:[%s5390_s7 + $0x230] sm:$0xff]  }
 0x15e   :  { %v1512_v8 = vmax.f32 %v1507_v7, 0.0  ;;  %v4189_v7 = vld [vmem:[%s5390_s7 + $0x340] sm:$0xff]  }
 0x160   :  { %v1513_v11 = vpack.c.bf16 %v1512_v8, %v1512_v8  ;;  %v4190_v8 = vld [vmem:[%s5390_s7 + $0x300] sm:$0xff]  }
 0x162   :  { %3913 = vmatmul.mubr.bf16.vlgmr.msra.gmra.mrb[16].mxu0 %v1513_v11  ;;  %v4194_v11 = vld [vmem:[%s5390_s7 + $0x308] sm:$0xff]  }
 0x163   :  { %3712 = vmatpush3.bf16.msra.mxu0 %v4101_v10  ;;  %2802 = vmatprep.mubr.bf16.mxu0 %v4481_v48  ;;  %v4110_v48 = vld [vmem:[%s5390_s7 + $0x18] sm:$0xff]   ;;  %v4193_v10 = vld [vmem:[%s5390_s7 + $0x348] sm:$0xff]  }
 0x164   :  { %3713 = vmatprep.subr.bf16.mxu0 %v4103_v13  ;;  %v4197_v13 = vld [vmem:[%s5390_s7 + $0x350] sm:$0xff]  }
 0x167   :  { %3714 = vmatpush3.bf16.msra.mxu0 %v4104_v14  ;;  %v4202_v14 = vld [vmem:[%s5390_s7 + $0x318] sm:$0xff]  }
 0x168   :  { %3715 = vmatprep.subr.bf16.mxu0 %v4106_v15  ;;  %v4205_v15 = vld [vmem:[%s5390_s7 + $0x360] sm:$0xff]  }
 0x16b   :  { %3716 = vmatpush3.bf16.msra.mxu0 %v4107_v16  ;;  %v4206_v16 = vld [vmem:[%s5390_s7 + $0x320] sm:$0xff]  }
 0x16c   :  { %3717 = vmatprep.subr.bf16.mxu0 %v4109_v17  ;;  %v4209_v17 = vld [vmem:[%s5390_s7 + $0x368] sm:$0xff]  }
 0x16f   :  { %3718 = vmatpush3.bf16.msra.mxu0 %v4110_v48  ;;  %v4210_v48 = vld [vmem:[%s5390_s7 + $0x328] sm:$0xff]  }
 0x170   :  { %3719 = vmatprep.subr.bf16.mxu0 %v4112_v19  ;;  %v4213_v19 = vld [vmem:[%s5390_s7 + $0x370] sm:$0xff]  }
 0x173   :  { %3720 = vmatpush3.bf16.msra.mxu0 %v4113_v20  ;;  %v4214_v20 = vld [vmem:[%s5390_s7 + $0x330] sm:$0xff]  }
 0x174   :  { %3721 = vmatprep.subr.bf16.mxu0 %v4115_v21  ;;  %v4217_v21 = vld [vmem:[%s5390_s7 + $0x378] sm:$0xff]  }
 0x177   :  { %3722 = vmatpush3.bf16.msra.mxu0 %v4116_v22  ;;  %v4218_v22 = vld [vmem:[%s5390_s7 + $0x338] sm:$0xff]  }
 0x178   :  { %3723 = vmatprep.subr.bf16.mxu0 %v4118_v24  ;;  %v3361_v24 = vld [vmem:[%s5387_s4] ss:$0 sm:$0xff] }
 0x17b   :  { %3724 = vmatpush3.bf16.msra.mxu0 %v4119_v25 }
 0x17c   :  { %3725 = vmatprep.subr.bf16.mxu0 %v4121_v27 }
 0x17f   :  { %3726 = vmatpush3.bf16.msra.mxu0 %v4122_v28 }
 0x180   :  { %3755 = vmatprep.subr.bf16.mxu0 %v4125_v30 }
 0x182   :  { %2803 = vmatmul.mubr.bf16.vlgmr.msra.gmra.mrb[20].mxu0 %v4473_v45  ;;  %v4134_v45 = vld [vmem:[%s5390_s7 + $0x110] sm:$0xff]  }
 0x183   :  { %3756 = vmatpush3.bf16.msra.mxu0 %v4126_v31  ;;  %2882 = vmatprep.mubr.bf16.mxu0 %v4487_v50  ;;  %v4137_v50 = vld [vmem:[%s5390_s7 + $0x158] sm:$0xff]   ;;  %v4124_v31 = vld [vmem:[%s5390_s7 + $0x80] sm:$0xff]  }
 0x184   :  { %3757 = vmatprep.subr.bf16.mxu0 %v4129_v32 }
 0x187   :  { %3758 = vmatpush3.bf16.msra.mxu0 %v4130_v33  ;;  %v4128_v33 = vld [vmem:[%s5390_s7 + $0x88] sm:$0xff]  }
 0x188   :  { %3759 = vmatprep.subr.bf16.mxu0 %v4133_v34  ;;  %v4131_v34 = vld [vmem:[%s5390_s7 + $0xd0] sm:$0xff]  }
 0x18b   :  { %3760 = vmatpush3.bf16.msra.mxu0 %v4134_v45  ;;  %v4132_v45 = vld [vmem:[%s5390_s7 + $0x90] sm:$0xff]  }
 0x18c   :  { %3761 = vmatprep.subr.bf16.mxu0 %v4137_v50  ;;  %v4135_v50 = vld [vmem:[%s5390_s7 + $0xd8] sm:$0xff]  }
 0x18f   :  { %3762 = vmatpush3.bf16.msra.mxu0 %v4138_v35  ;;  %v4139_v35 = vld [vmem:[%s5390_s7 + $0xe0] sm:$0xff]  }
 0x190   :  { %3763 = vmatprep.subr.bf16.mxu0 %v4141_v36  ;;  %v4140_v36 = vld [vmem:[%s5390_s7 + $0xa0] sm:$0xff]  }
 0x193   :  { %3764 = vmatpush3.bf16.msra.mxu0 %v4142_v37  ;;  %v4143_v37 = vld [vmem:[%s5390_s7 + $0xe8] sm:$0xff]  }
 0x194   :  { %3765 = vmatprep.subr.bf16.mxu0 %v4145_v38  ;;  %v4144_v38 = vld [vmem:[%s5390_s7 + $0xa8] sm:$0xff]  }
 0x197   :  { %3766 = vmatpush3.bf16.msra.mxu0 %v4146_v39  ;;  %v4147_v39 = vld [vmem:[%s5390_s7 + $0xf0] sm:$0xff]  }
 0x198   :  { %3767 = vmatprep.subr.bf16.mxu0 %v4149_v40  ;;  %v4148_v40 = vld [vmem:[%s5390_s7 + $0xb0] sm:$0xff]  }
 0x19b   :  { %3768 = vmatpush3.bf16.msra.mxu0 %v4150_v44  ;;  %v4151_v44 = vld [vmem:[%s5390_s7 + $0xf8] sm:$0xff]  }
 0x19c   :  { %3769 = vmatprep.subr.bf16.mxu0 %v4153_v41  ;;  %v4152_v41 = vld [vmem:[%s5390_s7 + $0xb8] sm:$0xff]  }
 0x19f   :  { %3770 = vmatpush3.bf16.msra.mxu0 %v4154_v47  ;;  %v4155_v47 = vld [vmem:[%s5390_s7 + $0x1c0] sm:$0xff]  }
 0x1a0   :  { %3799 = vmatprep.subr.bf16.mxu0 %v4157_v49  ;;  %v4156_v49 = vld [vmem:[%s5390_s7 + $0x180] sm:$0xff]  }
 0x1a2   :  { %2883 = vmatmul.mubr.bf16.vlgmr.msra.gmra.mrb[24].mxu0 %v4593_v18  ;;  %v4166_v18 = vld [vmem:[%s5390_s7 + $0x210] sm:$0xff]  }
 0x1a3   :  { %3800 = vmatpush3.bf16.msra.mxu0 %v4158_v52  ;;  %2962 = vmatprep.mubr.bf16.mxu0 %v4699_v62  ;;  %v4169_v62 = vld [vmem:[%s5390_s7 + $0x258] sm:$0xff]   ;;  %v4159_v52 = vld [vmem:[%s5390_s7 + $0x1c8] sm:$0xff]  }
 0x1a4   :  { %3801 = vmatprep.subr.bf16.mxu0 %v4161_v54  ;;  %v4160_v54 = vld [vmem:[%s5390_s7 + $0x188] sm:$0xff]  }
 0x1a7   :  { %3802 = vmatpush3.bf16.msra.mxu0 %v4162_v55  ;;  %v4163_v55 = vld [vmem:[%s5390_s7 + $0x1d0] sm:$0xff]  }
 0x1a8   :  { %3803 = vmatprep.subr.bf16.mxu0 %v4165_v57  ;;  %v4164_v57 = vld [vmem:[%s5390_s7 + $0x190] sm:$0xff]  }
 0x1ab   :  { %3804 = vmatpush3.bf16.msra.mxu0 %v4166_v18  ;;  %v4171_v18 = vld [vmem:[%s5390_s7 + $0x1e0] sm:$0xff]  }
 0x1ac   :  { %3805 = vmatprep.subr.bf16.mxu0 %v4169_v62  ;;  %v4172_v62 = vld [vmem:[%s5390_s7 + $0x1a0] sm:$0xff]  }
 0x1af   :  { %3806 = vmatpush3.bf16.msra.mxu0 %v4170_v58  ;;  %v4175_v58 = vld [vmem:[%s5390_s7 + $0x1e8] sm:$0xff]  }
 0x1b0   :  { %3807 = vmatprep.subr.bf16.mxu0 %v4173_v59  ;;  %v4176_v59 = vld [vmem:[%s5390_s7 + $0x1a8] sm:$0xff]  }
 0x1b3   :  { %3808 = vmatpush3.bf16.msra.mxu0 %v4174_v60  ;;  %v4179_v60 = vld [vmem:[%s5390_s7 + $0x1f0] sm:$0xff]  }
 0x1b4   :  { %3809 = vmatprep.subr.bf16.mxu0 %v4177_v61  ;;  %v4180_v61 = vld [vmem:[%s5390_s7 + $0x1b0] sm:$0xff]  }
 0x1b7   :  { %3810 = vmatpush3.bf16.msra.mxu0 %v4178_v63  ;;  %v4183_v63 = vld [vmem:[%s5390_s7 + $0x1f8] sm:$0xff]  }
 0x1b8   :  { %3811 = vmatprep.subr.bf16.mxu0 %v4181_v0  ;;  %v4184_v0 = vld [vmem:[%s5390_s7 + $0x1b8] sm:$0xff]  }
 0x1bb   :  { %3812 = vmatpush3.bf16.msra.mxu0 %v4182_v1  ;;  %v4187_v1 = vld [vmem:[%s5390_s7 + $0x2c0] sm:$0xff]  }
 0x1bc   :  { %3813 = vmatprep.subr.bf16.mxu0 %v4185_v4  ;;  %v4188_v4 = vld [vmem:[%s5390_s7 + $0x280] sm:$0xff]  }
 0x1bf   :  { %3814 = vmatpush3.bf16.msra.mxu0 %v4186_v5  ;;  %v4191_v5 = vld [vmem:[%s5390_s7 + $0x2c8] sm:$0xff]  }
 0x1c0   :  { %3843 = vmatprep.subr.bf16.mxu0 %v4189_v7  ;;  %v4192_v7 = vld [vmem:[%s5390_s7 + $0x288] sm:$0xff]  }
 0x1c2   :  { %2963 = vmatmul.mubr.bf16.vlgmr.msra.gmra.mrb[28].mxu0 %v4715_v3  ;;  %v4198_v3 = vld [vmem:[%s5390_s7 + $0x310] sm:$0xff]  }
 0x1c3   :  { %3844 = vmatpush3.bf16.msra.mxu0 %v4190_v8  ;;  %3042 = vmatprep.mubr.bf16.mxu0 %v4725_v6  ;;  %v4201_v6 = vld [vmem:[%s5390_s7 + $0x358] sm:$0xff]   ;;  %v4195_v8 = vld [vmem:[%s5390_s7 + $0x2d0] sm:$0xff]  }
 0x1c4   :  { %3845 = vmatprep.subr.bf16.mxu0 %v4193_v10  ;;  %v4196_v10 = vld [vmem:[%s5390_s7 + $0x290] sm:$0xff]  }
 0x1c7   :  { %3846 = vmatpush3.bf16.msra.mxu0 %v4194_v11  ;;  %v4203_v11 = vld [vmem:[%s5390_s7 + $0x2e0] sm:$0xff]  }
 0x1c8   :  { %3847 = vmatprep.subr.bf16.mxu0 %v4197_v13  ;;  %v4204_v13 = vld [vmem:[%s5390_s7 + $0x2a0] sm:$0xff]  }
 0x1cb   :  { %3848 = vmatpush3.bf16.msra.mxu0 %v4198_v3  ;;  %v4207_v3 = vld [vmem:[%s5390_s7 + $0x2e8] sm:$0xff]  }
 0x1cc   :  { %3849 = vmatprep.subr.bf16.mxu0 %v4201_v6  ;;  %v4208_v6 = vld [vmem:[%s5390_s7 + $0x2a8] sm:$0xff]  }
 0x1cf   :  { %3850 = vmatpush3.bf16.msra.mxu0 %v4202_v14  ;;  %v4211_v14 = vld [vmem:[%s5390_s7 + $0x2f0] sm:$0xff]  }
 0x1d0   :  { %3851 = vmatprep.subr.bf16.mxu0 %v4205_v15  ;;  %v4212_v15 = vld [vmem:[%s5390_s7 + $0x2b0] sm:$0xff]  }
 0x1d3   :  { %3852 = vmatpush3.bf16.msra.mxu0 %v4206_v16  ;;  %v4215_v16 = vld [vmem:[%s5390_s7 + $0x2f8] sm:$0xff]  }
 0x1d4   :  { %3853 = vmatprep.subr.bf16.mxu0 %v4209_v17 }
 0x1d7   :  { %3854 = vmatpush3.bf16.msra.mxu0 %v4210_v48 }
 0x1d8   :  { %3855 = vmatprep.subr.bf16.mxu0 %v4213_v19 }
 0x1db   :  { %3856 = vmatpush3.bf16.msra.mxu0 %v4214_v20 }
 0x1dc   :  { %3857 = vmatprep.subr.bf16.mxu0 %v4217_v21  ;;  %v4216_v21 = vld [vmem:[%s5390_s7 + $0x2b8] sm:$0xff]  }
 0x1df   :  { %3858 = vmatpush3.bf16.msra.mxu0 %v4218_v22 }
 0x1e0   :  { %3936 = vmatprep.subr.bf16.mxu0 %v4292_v46 }
 0x1e2   :  { %3043 = vmatmul.mubr.bf16.vlgmr.msra.gmra.mrb[32].mxu0 %v4831_v42  ;;  %v4127_v42 = vld [vmem:[%s5390_s7 + $0xc8] sm:$0xff]  }
 0x1e3   :  { %3952 = vmatprep.mubr.msk.bf16.mxu0 %vm4293_vm0, %v4292_v46 }
 0x235   :  { %v1619_v25 = vpop.f32.mrb[16].mxu0 }
 0x236   :  { %v1620_v26 = vadd.f32 %v3361_v24, %v1619_v25  ;;  %v3914_v27 = vpop.f32.mrb[17].mxu0  ;;  %v4219_v24 = vld [vmem:[%s5390_s7 + $0x3c0] sm:$0xff]  }
 0x237   :  { %v1622_v28 = vpop.f32.mrb[18].mxu0  ;;  %v4220_v25 = vld [vmem:[%s5390_s7 + $0x380] sm:$0xff]   ;;  %v4222_v27 = vld [vmem:[%s5390_s7 + $0x388] sm:$0xff]  }
 0x238   :  { %v1625_v29 = vmax.f32 %v1620_v26, 0.0  ;;  %v3915_v30 = vpop.f32.mrb[19].mxu0  ;;  %v4221_v26 = vld [vmem:[%s5390_s7 + $0x3c8] sm:$0xff]   ;;  %v4223_v28 = vld [vmem:[%s5390_s7 + $0x3d0] sm:$0xff]  }
 0x239   :  { %v4227_v30 = vld [vmem:[%s5390_s7 + $0x3e0] sm:$0xff]  }
 0x23a   :  { %v1626_v32 = vpack.c.bf16 %v1625_v29, %v1625_v29  ;;  %v4224_v29 = vld [vmem:[%s5390_s7 + $0x390] sm:$0xff]  }
 0x23c   :  { %3933 = vmatmul.mubr.bf16.vlgmr.msra.gmra.mrb[16].mxu1 %v1626_v32  ;;  %v4229_v32 = vld [vmem:[%s5390_s7 + $0x3e8] sm:$0xff]  }
 0x23d   :  { %3734 = vmatpush3.bf16.msra.mxu1 %v4124_v31  ;;  %2842 = vmatprep.mubr.bf16.mxu1 %v4499_v53  ;;  %v4136_v53 = vld [vmem:[%s5390_s7 + $0x98] sm:$0xff]   ;;  %v4228_v31 = vld [vmem:[%s5390_s7 + $0x3a0] sm:$0xff]  }
 0x23e   :  { %3735 = vmatprep.subr.bf16.mxu1 %v4127_v42  ;;  %v4230_v42 = vld [vmem:[%s5390_s7 + $0x3a8] sm:$0xff]  }
 0x241   :  { %3736 = vmatpush3.bf16.msra.mxu1 %v4128_v33  ;;  %v4231_v33 = vld [vmem:[%s5390_s7 + $0x3f0] sm:$0xff]  }
 0x242   :  { %3737 = vmatprep.subr.bf16.mxu1 %v4131_v34  ;;  %v4232_v34 = vld [vmem:[%s5390_s7 + $0x3b0] sm:$0xff]  }
 0x245   :  { %3738 = vmatpush3.bf16.msra.mxu1 %v4132_v45  ;;  %v4233_v45 = vld [vmem:[%s5390_s7 + $0x3f8] sm:$0xff]  }
 0x246   :  { %3739 = vmatprep.subr.bf16.mxu1 %v4135_v50 }
 0x249   :  { %3740 = vmatpush3.bf16.msra.mxu1 %v4136_v53 }
 0x24a   :  { %3741 = vmatprep.subr.bf16.mxu1 %v4139_v35 }
 0x24d   :  { %3742 = vmatpush3.bf16.msra.mxu1 %v4140_v36 }
 0x24e   :  { %3743 = vmatprep.subr.bf16.mxu1 %v4143_v37  ;;  %v4234_v37 = vld [vmem:[%s5390_s7 + $0x3b8] sm:$0xff]  }
 0x251   :  { %3744 = vmatpush3.bf16.msra.mxu1 %v4144_v38 }
 0x252   :  { %3745 = vmatprep.subr.bf16.mxu1 %v4147_v39 }
 0x255   :  { %3746 = vmatpush3.bf16.msra.mxu1 %v4148_v40  ;;  %v3727_v17 = vpop.f32.mrb[20].mxu0 }
 0x256   :  { %3747 = vmatprep.subr.bf16.mxu1 %v4151_v44  ;;  %v3728_v48 = vpop.f32.mrb[21].mxu0 }
 0x257   :  { %v5262_v19 = vadd.f32 %v3728_v48, %v3727_v17  ;;  %v3730_v20 = vpop.f32.mrb[22].mxu0 }
 0x258   :  { %v3731_v22 = vpop.f32.mrb[23].mxu0 }
 0x259   :  { %3748 = vmatpush3.bf16.msra.mxu1 %v4152_v41 }
 0x25a   :  { %3777 = vmatprep.subr.bf16.mxu1 %v4155_v47 }
 0x25c   :  { %2843 = vmatmul.mubr.bf16.vlgmr.msra.gmra.mrb[20].mxu1 %v4491_v51  ;;  %v4167_v51 = vld [vmem:[%s5390_s7 + $0x1d8] sm:$0xff]  }
 0x25d   :  { %3778 = vmatpush3.bf16.msra.mxu1 %v4156_v49  ;;  %2922 = vmatprep.mubr.bf16.mxu1 %v4510_v56  ;;  %v4168_v56 = vld [vmem:[%s5390_s7 + $0x198] sm:$0xff]  }
 0x25e   :  { %3779 = vmatprep.subr.bf16.mxu1 %v4159_v52 }
 0x261   :  { %3780 = vmatpush3.bf16.msra.mxu1 %v4160_v54 }
 0x262   :  { %3781 = vmatprep.subr.bf16.mxu1 %v4163_v55 }
 0x265   :  { %3782 = vmatpush3.bf16.msra.mxu1 %v4164_v57  ;;  %v4235_v57 = vld [vmem:[%s5392_s9] sm:$0xff]  }
 0x266   :  { %3783 = vmatprep.subr.bf16.mxu1 %v4167_v51  ;;  %3937 = vmatpush3.bf16.msra.mxu0 %v4235_v57 }
 0x267   :  { %3938 = vmatprep.subr.bf16.mxu0 %v4292_v46 }
 0x269   :  { %3784 = vmatpush3.bf16.msra.mxu1 %v4168_v56  ;;  %v4236_v56 = vld [vmem:[%s5392_s9 + $0x8] sm:$0xff]  }
 0x26a   :  { %3785 = vmatprep.subr.bf16.mxu1 %v4171_v18  ;;  %3939 = vmatpush3.bf16.msra.mxu0 %v4236_v56  ;;  %v4238_v18 = vld [vmem:[%s5392_s9 + $0x18] sm:$0xff]  }
 0x26b   :  { %3940 = vmatprep.subr.bf16.mxu0 %v4292_v46 }
 0x26d   :  { %3786 = vmatpush3.bf16.msra.mxu1 %v4172_v62  ;;  %v4239_v62 = vld [vmem:[%s5392_s9 + $0x20] sm:$0xff]  }
 0x26e   :  { %3787 = vmatprep.subr.bf16.mxu1 %v4175_v58  ;;  %v4240_v58 = vld [vmem:[%s5392_s9 + $0x28] sm:$0xff]  }
 0x271   :  { %3788 = vmatpush3.bf16.msra.mxu1 %v4176_v59  ;;  %v3370_v59 = vld [vmem:[%s5389_s6] ss:$0 sm:$0xff] }
 0x272   :  { %3789 = vmatprep.subr.bf16.mxu1 %v4179_v60 }
 0x275   :  { %3790 = vmatpush3.bf16.msra.mxu1 %v4180_v61  ;;  %v3771_v50 = vpop.f32.mrb[24].mxu0 }
 0x276   :  { %3791 = vmatprep.subr.bf16.mxu1 %v4183_v63  ;;  %v3772_v53 = vpop.f32.mrb[25].mxu0 }
 0x277   :  { %v3773_v35 = vadd.f32 %v3772_v53, %v3771_v50  ;;  %v3774_v36 = vpop.f32.mrb[26].mxu0 }
 0x278   :  { %v3775_v38 = vpop.f32.mrb[27].mxu0 }
 0x279   :  { %3792 = vmatpush3.bf16.msra.mxu1 %v4184_v0 }
 0x27a   :  { %3821 = vmatprep.subr.bf16.mxu1 %v4187_v1  ;;  %v4241_v1 = vld [vmem:[%s5392_s9 + $0x30] sm:$0xff]  }
 0x27c   :  { %2923 = vmatmul.mubr.bf16.vlgmr.msra.gmra.mrb[24].mxu1 %v4609_v23  ;;  %v4199_v23 = vld [vmem:[%s5390_s7 + $0x2d8] sm:$0xff]  }
 0x27d   :  { %3822 = vmatpush3.bf16.msra.mxu1 %v4188_v4  ;;  %3002 = vmatprep.mubr.bf16.mxu1 %v4712_v2  ;;  %v4200_v2 = vld [vmem:[%s5390_s7 + $0x298] sm:$0xff]  }
 0x27e   :  { %3823 = vmatprep.subr.bf16.mxu1 %v4191_v5  ;;  %v4242_v5 = vld [vmem:[%s5392_s9 + $0x38] sm:$0xff]  }
 0x281   :  { %3824 = vmatpush3.bf16.msra.mxu1 %v4192_v7  ;;  %v3379_v7 = vld [vmem:[%s5391_s8] ss:$0 sm:$0xff]  ;;  %s4294_s8 = smov [#allocation2]  }
 0x282   :  { %3825 = vmatprep.subr.bf16.mxu1 %v4195_v8  ;;  %v2805_v8 = vadd.f32 %v5262_v19, %v3379_v7 }
 0x285   :  { %3826 = vmatpush3.bf16.msra.mxu1 %v4196_v10 }
 0x286   :  { %3827 = vmatprep.subr.bf16.mxu1 %v4199_v23 }
 0x289   :  { %3828 = vmatpush3.bf16.msra.mxu1 %v4200_v2 }
 0x28a   :  { %3829 = vmatprep.subr.bf16.mxu1 %v4203_v11 }
 0x28d   :  { %3830 = vmatpush3.bf16.msra.mxu1 %v4204_v13 }
 0x28e   :  { %3831 = vmatprep.subr.bf16.mxu1 %v4207_v3 }
 0x291   :  { %3832 = vmatpush3.bf16.msra.mxu1 %v4208_v6 }
 0x292   :  { %3833 = vmatprep.subr.bf16.mxu1 %v4211_v14 }
 0x295   :  { %3834 = vmatpush3.bf16.msra.mxu1 %v4212_v15  ;;  %v3815_v39 = vpop.f32.mrb[28].mxu0 }
 0x296   :  { %3835 = vmatprep.subr.bf16.mxu1 %v4215_v16  ;;  %v3816_v40 = vpop.f32.mrb[29].mxu0 }
 0x297   :  { %v3817_v44 = vadd.f32 %v3816_v40, %v3815_v39  ;;  %v3818_v41 = vpop.f32.mrb[30].mxu0 }
 0x298   :  { %v3819_v47 = vpop.f32.mrb[31].mxu0 }
 0x299   :  { %3836 = vmatpush3.bf16.msra.mxu1 %v4216_v21 }
 0x29a   :  { %3865 = vmatprep.subr.bf16.mxu1 %v4219_v24 }
 0x29c   :  { %3003 = vmatmul.mubr.bf16.vlgmr.msra.gmra.mrb[28].mxu1 %v4735_v9  ;;  %v4225_v9 = vld [vmem:[%s5390_s7 + $0x3d8] sm:$0xff]  }
 0x29d   :  { %3866 = vmatpush3.bf16.msra.mxu1 %v4220_v25  ;;  %3082 = vmatprep.mubr.bf16.mxu1 %v4745_v12  ;;  %v4226_v12 = vld [vmem:[%s5390_s7 + $0x398] sm:$0xff]  }
 0x29e   :  { %3867 = vmatprep.subr.bf16.mxu1 %v4221_v26 }
 0x2a1   :  { %3868 = vmatpush3.bf16.msra.mxu1 %v4222_v27 }
 0x2a2   :  { %3869 = vmatprep.subr.bf16.mxu1 %v4223_v28 }
 0x2a5   :  { %3870 = vmatpush3.bf16.msra.mxu1 %v4224_v29 }
 0x2a6   :  { %3871 = vmatprep.subr.bf16.mxu1 %v4225_v9 }
 0x2a9   :  { %3872 = vmatpush3.bf16.msra.mxu1 %v4226_v12 }
 0x2aa   :  { %3873 = vmatprep.subr.bf16.mxu1 %v4227_v30 }
 0x2ad   :  { %3874 = vmatpush3.bf16.msra.mxu1 %v4228_v31 }
 0x2ae   :  { %3875 = vmatprep.subr.bf16.mxu1 %v4229_v32 }
 0x2b1   :  { %3876 = vmatpush3.bf16.msra.mxu1 %v4230_v42 }
 0x2b2   :  { %3877 = vmatprep.subr.bf16.mxu1 %v4231_v33 }
 0x2b5   :  { %3878 = vmatpush3.bf16.msra.mxu1 %v4232_v34  ;;  %v3859_v49 = vpop.f32.mrb[32].mxu0 }
 0x2b6   :  { %3879 = vmatprep.subr.bf16.mxu1 %v4233_v45  ;;  %v3860_v52 = vpop.f32.mrb[33].mxu0 }
 0x2b7   :  { %v3861_v54 = vadd.f32 %v3860_v52, %v3859_v49  ;;  %v3862_v55 = vpop.f32.mrb[34].mxu0 }
 0x2b8   :  { %v3863_v51 = vpop.f32.mrb[35].mxu0 }
 0x2b9   :  { %3880 = vmatpush3.bf16.msra.mxu1 %v4234_v37 }
 0x2bc   :  { %3083 = vmatmul.mubr.bf16.vlgmr.msra.gmra.mrb[32].mxu1 %v4835_v43  ;;  %v4237_v43 = vld [vmem:[%s5392_s9 + $0x10] sm:$0xff]   ;;  %s3210_s9 = sshll.u32 %s4294_s8, 4  ;;  %s3211_s9 = int_to_ptr.vmem [resolvable:$true] %s3210_s9 }
 0x2bd   :  { %3941 = vmatpush3.bf16.msra.mxu0 %v4237_v43  ;;  %s4243_s13 = scalar_lea.vmem %s3211_s9, 32  ;;  %p4248_p1 = scmp.lt.s32.totalorder %s3211_s9, %s3211_s9 }
 0x2be   :  { %3942 = vmatprep.subr.bf16.mxu0 %v4292_v46  ;;  %p4244_p0 = scmp.ne.s32.totalorder %s3211_s9, %s4243_s13  ;;  %p4249_p2 = scmp.lt.s32.totalorder %s4243_s13, %s4243_s13 }
 0x2c0   :  { %p4250_p3 = por %p4249_p2, %p4248_p1 }
 0x2c1   :  { %3943 = vmatpush3.bf16.msra.mxu0 %v4238_v18 }
 0x2c2   :  { %3944 = vmatprep.subr.bf16.mxu0 %v4292_v46  ;;  %p4251_p4 = pnand %p4250_p3, %p4244_p0 }
 0x2c5   :  { %3945 = vmatpush3.bf16.msra.mxu0 %v4239_v62 }
 0x2c6   :  { %3946 = vmatprep.subr.bf16.mxu0 %v4292_v46 }
 0x2c9   :  { %3947 = vmatpush3.bf16.msra.mxu0 %v4240_v58 }
 0x2ca   :  { %3948 = vmatprep.subr.bf16.mxu0 %v4292_v46 }
 0x2cd   :  { %3949 = vmatpush3.bf16.msra.mxu0 %v4241_v1 }
 0x2ce   :  { %3950 = vmatprep.subr.bf16.mxu0 %v4292_v46 }
 0x2d1   :  { %3951 = vmatpush3.bf16.msra.mxu0 %v4242_v5 }
 0x30f   :  { %v1732_v60 = vpop.f32.mrb[16].mxu1 }
 0x310   :  { %v1733_v61 = vadd.f32 %v3370_v59, %v1732_v60  ;;  %v3934_v63 = vpop.f32.mrb[17].mxu1 }
 0x311   :  { %v1735_v0 = vpop.f32.mrb[18].mxu1 }
 0x312   :  { %1738 = vst [vmem:[#allocation2] sm:$0x3] %v1733_v61  ;;  %v3935_v4 = vpop.f32.mrb[19].mxu1 }
 0x32f   :  { %v3749_v10 = vpop.f32.mrb[20].mxu1 }
 0x330   :  { %v3750_v23 = vpop.f32.mrb[21].mxu1 }
 0x331   :  { %v3751_v2 = vadd.f32 %v3750_v23, %v3749_v10  ;;  %v3752_v11 = vpop.f32.mrb[22].mxu1 }
 0x332   :  { %v3753_v13 = vpop.f32.mrb[23].mxu1 }
 0x333   :  { %v2845_v3 = vadd.f32 %v3751_v2, %v2805_v8 }
 0x335   :  { %v2885_v6 = vadd.f32 %v3773_v35, %v2845_v3 }
 0x34f   :  { %v3793_v14 = vpop.f32.mrb[24].mxu1 }
 0x350   :  { %v3794_v46 = vpop.f32.mrb[25].mxu1 }
 0x351   :  { %v3795_v15 = vadd.f32 %v3794_v46, %v3793_v14  ;;  %v3796_v16 = vpop.f32.mrb[26].mxu1 }
 0x352   :  { %v3797_v17 = vpop.f32.mrb[27].mxu1 }
 0x353   :  { %v2925_v48 = vadd.f32 %v3795_v15, %v2885_v6 }
 0x355   :  { %v2965_v20 = vadd.f32 %v3817_v44, %v2925_v48 }
 0x36f   :  { %v3837_v21 = vpop.f32.mrb[28].mxu1 }
 0x370   :  { %v3838_v22 = vpop.f32.mrb[29].mxu1 }
 0x371   :  { %v3839_v24 = vadd.f32 %v3838_v22, %v3837_v21  ;;  %v3840_v25 = vpop.f32.mrb[30].mxu1 }
 0x372   :  { %v3841_v26 = vpop.f32.mrb[31].mxu1 }
 0x373   :  { %v3005_v19 = vadd.f32 %v3839_v24, %v2965_v20 }
 0x375   :  { %v3045_v27 = vadd.f32 %v3861_v54, %v3005_v19 }
 0x38f   :  { %v3881_v28 = vpop.f32.mrb[32].mxu1 }
 0x390   :  { %v3882_v29 = vpop.f32.mrb[33].mxu1 }
 0x391   :  { %v3883_v9 = vadd.f32 %v3882_v29, %v3881_v28  ;;  %v3884_v12 = vpop.f32.mrb[34].mxu1 }
 0x392   :  { %v3885_v30 = vpop.f32.mrb[35].mxu1 }
 0x393   :  { %v3085_v31 = vadd.f32 %v3883_v9, %v3045_v27 }
 0x395   :  { %v3090_v32 = vmax.f32 %v3085_v31, 0.0 }
 0x397   :  { %v3091_v42 = vpack.c.bf16 %v3090_v32, %v3090_v32 }
 0x399   :  { %3953 = vmatmul.mubr.bf16.vlgmr.msra.gmra.mrb[36].mxu0 %v3091_v42 }
 0x39a   :  { %4254 = shalt.err (!%p4251_p4)
}
 0x39b   :  { %s4255_s16 = scalar_lea.hbm %s5394_s11, 32 }
 0x39c   :  { %p4256_p5 = scmp.ne.s32.totalorder %s5394_s11, %s4255_s16  ;;  %p4259_p6 = scmp.lt.u32.totalorder %s4255_s16, %s5394_s11 }
 0x39e   :  { %p4261_p7 = pnand %p4259_p6, %p4256_p5 }
 0x3a0   :  { %4264 = shalt.err (!%p4261_p7)
}
 0x3a1   :  { %3213 = dma.vmem_to_hbm [thread:$0]  %s3211_s9, 32, %s5394_s11, [#allocation3]   ;;  %v3508_v33 = vld [vmem:[%s5393_s10] ss:$0 sm:$0xff] }
 0x3a2   :  { %s4295_s22 = smov [#allocation4]  }
 0x3a3   :  { %s3220_s23 = sshll.u32 %s4295_s22, 4  ;;  %s3221_s23 = int_to_ptr.vmem [resolvable:$true] %s3220_s23 }
 0x3a4   :  { %s4265_s24 = scalar_lea.vmem %s3221_s23, 32  ;;  %p4270_p9 = scmp.lt.s32.totalorder %s3221_s23, %s3221_s23 }
 0x3a5   :  { %p4266_p8 = scmp.ne.s32.totalorder %s3221_s23, %s4265_s24  ;;  %p4271_p10 = scmp.lt.s32.totalorder %s4265_s24, %s4265_s24 }
 0x3a7   :  { %p4272_p11 = por %p4271_p10, %p4270_p9 }
 0x3a9   :  { %p4273_p12 = pnand %p4272_p11, %p4266_p8 }
 0x46c   :  { %v3197_v34 = vpop.f32.mrb[36].mxu0 }
 0x46d   :  { %v3198_v45 = vadd.f32 %v3508_v33, %v3197_v34  ;;  %v3954_v50 = vpop.f32.mrb[37].mxu0 }
 0x46e   :  { %v3200_v53 = vpop.f32.mrb[38].mxu0 }
 0x46f   :  { %3203 = vst [vmem:[#allocation4] sm:$0x3] %v3198_v45  ;;  %v3955_v35 = vpop.f32.mrb[39].mxu0 }
 0x470   :  { %4276 = shalt.err (!%p4273_p12)
}
 0x471   :  { %s4277_s10 = scalar_lea.hbm %s5395_s12, 32 }
 0x472   :  { %p4278_p13 = scmp.ne.s32.totalorder %s5395_s12, %s4277_s10  ;;  %p4281_p0 = scmp.lt.u32.totalorder %s4277_s10, %s5395_s12 }
 0x474   :  { %p4283_p1 = pnand %p4281_p0, %p4278_p13 }
 0x476   :  { %4286 = shalt.err (!%p4283_p1)
}
 0x477   :  { %3223 = dma.vmem_to_hbm [thread:$0]  %s3221_s23, 32, %s5395_s12, [#allocation5]  }
 0x478   :  { %4287 = dma.done.wait [#allocation3], 32  }
 0x479   :  { %4288 = vsyncadd [#allocation3], 4294967264 }
 0x47a   :  { %4289 = dma.done.wait [#allocation5], 32  }
 0x47b   :  { %4290 = vsyncadd [#allocation5], 4294967264 }
 0x47c   :  { %3230 = vsyncpa [#allocation3], 1 }
 0x47d   :  { %3231 = vsyncpa [#allocation5], 1 }

// kernel: forward.4
= control target key start
LH: loop header
LB: loop body
LE: loop exit
PB: predicated region body
PF: predicated region fallthrough
CT: control target
= control target key end

     0   :  { %s8803_s1 = inlined_call_operand.vmem [shape: bf16[3200,128], index: 1, kind: input, shape index: {}]   ;;  %s8804_s0 = inlined_call_operand.vmem [shape: bf16[2,12,12,128], index: 0, kind: input, shape index: {}]   ;;  %s8805_s2 = inlined_call_operand.vmem [shape: f32[1,128], index: 2, kind: input, shape index: {}]   ;;  %s8806_s3 = inlined_call_operand.vmem [shape: bf16[4,32,128], index: 3, kind: input, shape index: {}]   ;;  %s8807_s4 = inlined_call_operand.vmem [shape: bf16[32,128], index: 4, kind: output, shape index: {}]  }
   0x1   :  { %v6105_v0 = vld [vmem:[%s8803_s1 + $0x40] sm:$0xff]   ;;  %v6109_v4 = vld [vmem:[%s8803_s1 + $0x48] sm:$0xff]   ;;  %v6113_v8 = vld [vmem:[%s8803_s1 + $0x50] sm:$0xff]  }
   0x2   :  { %v6106_v1 = vld [vmem:[%s8803_s1] sm:$0xff]   ;;  %5169 = vmatprep.subr.bf16.mxu0 %v6105_v0  ;;  %v6110_v5 = vld [vmem:[%s8803_s1 + $0x8] sm:$0xff]   ;;  %v6114_v9 = vld [vmem:[%s8803_s1 + $0x10] sm:$0xff]  }
   0x3   :  { %v6107_v2 = vld [vmem:[%s8803_s1 + $0xc0] sm:$0xff]   ;;  %5170 = vmatpush3.bf16.msra.mxu0 %v6106_v1  ;;  %v6111_v6 = vld [vmem:[%s8803_s1 + $0xc8] sm:$0xff]   ;;  %v6115_v10 = vld [vmem:[%s8803_s1 + $0xd0] sm:$0xff]  }
   0x4   :  { %v6108_v3 = vld [vmem:[%s8803_s1 + $0x80] sm:$0xff]   ;;  %5233 = vmatprep.subr.bf16.mxu1 %v6107_v2  ;;  %5171 = vmatprep.subr.bf16.mxu0 %v6109_v4  ;;  %v6112_v7 = vld [vmem:[%s8803_s1 + $0x88] sm:$0xff]   ;;  %v6116_v11 = vld [vmem:[%s8803_s1 + $0x90] sm:$0xff]  }
   0x5   :  { %5234 = vmatpush3.bf16.msra.mxu1 %v6108_v3  ;;  %v6117_v12 = vld [vmem:[%s8803_s1 + $0x58] sm:$0xff]   ;;  %v6121_v16 = vld [vmem:[%s8803_s1 + $0x60] sm:$0xff]   ;;  %v6125_v20 = vld [vmem:[%s8803_s1 + $0x68] sm:$0xff]  }
   0x6   :  { %5235 = vmatprep.subr.bf16.mxu1 %v6111_v6  ;;  %v6118_v13 = vld [vmem:[%s8803_s1 + $0x18] sm:$0xff]   ;;  %v6122_v17 = vld [vmem:[%s8803_s1 + $0x20] sm:$0xff]   ;;  %v6126_v21 = vld [vmem:[%s8803_s1 + $0x28] sm:$0xff]  }
   0x7   :  { %5172 = vmatpush3.bf16.msra.mxu0 %v6110_v5  ;;  %v6119_v14 = vld [vmem:[%s8803_s1 + $0xd8] sm:$0xff]   ;;  %v6123_v18 = vld [vmem:[%s8803_s1 + $0xe0] sm:$0xff]   ;;  %v6127_v22 = vld [vmem:[%s8803_s1 + $0xe8] sm:$0xff]  }
   0x8   :  { %5173 = vmatprep.subr.bf16.mxu0 %v6113_v8  ;;  %v6120_v15 = vld [vmem:[%s8803_s1 + $0x98] sm:$0xff]   ;;  %v6124_v19 = vld [vmem:[%s8803_s1 + $0xa0] sm:$0xff]   ;;  %v6128_v23 = vld [vmem:[%s8803_s1 + $0xa8] sm:$0xff]  }
   0x9   :  { %5236 = vmatpush3.bf16.msra.mxu1 %v6112_v7  ;;  %v6129_v24 = vld [vmem:[%s8803_s1 + $0x70] sm:$0xff]   ;;  %v6133_v28 = vld [vmem:[%s8803_s1 + $0x78] sm:$0xff]   ;;  %v18_v31 = vld [vmem:[%s8804_s0] sm:$0xf] }
   0xa   :  { %5237 = vmatprep.subr.bf16.mxu1 %v6115_v10  ;;  %v6130_v25 = vld [vmem:[%s8803_s1 + $0x30] sm:$0xff]   ;;  %v6134_v29 = vld [vmem:[%s8803_s1 + $0x38] sm:$0xff]   ;;  %v19_v32 = vld [vmem:[%s8804_s0 + $0x4] sm:$0x3] }
   0xb   :  { %5174 = vmatpush3.bf16.msra.mxu0 %v6114_v9  ;;  %v6131_v26 = vld [vmem:[%s8803_s1 + $0xf0] sm:$0xff]   ;;  %v6135_v30 = vld [vmem:[%s8803_s1 + $0xf8] sm:$0xff]   ;;  %v6514_v33 = vld [vmem:[%s8804_s0 + $0x8] sm:$0xf]  ;;  %v6527_v37 = vcombine.low %v18_v31, %v19_v32 }
   0xc   :  { %5175 = vmatprep.subr.bf16.mxu0 %v6117_v12  ;;  %v6132_v27 = vld [vmem:[%s8803_s1 + $0xb0] sm:$0xff]   ;;  %v21_v34 = vld [vmem:[%s8804_s0 + $0xc] sm:$0x3]  ;;  %v6139_v40 = vld [vmem:[%s8803_s1 + $0xb8] sm:$0xff]   ;;  %v4778_v3 = vcombine.low %v18_v31, %v6514_v33 }
   0xd   :  { %5238 = vmatpush3.bf16.msra.mxu1 %v6116_v11  ;;  %v6522_v35 = vld [vmem:[%s8804_s0 + $0x10] sm:$0xf]  ;;  %v23_v36 = vld [vmem:[%s8804_s0 + $0x14] sm:$0x3]  ;;  %v6530_v38 = vcombine.low %v6514_v33, %v21_v34  ;;  %v147_v41 = vshrl.u32 %v6527_v37, 16  ;;  %v149_v42 = vshll.u32 %v6527_v37, 16 }
   0xe   :  { %5239 = vmatprep.subr.bf16.mxu1 %v6119_v14  ;;  %v6533_v39 = vcombine.low %v6522_v35, %v23_v36  ;;  %v258_v43 = vrot.slane %v6527_v37, 1  ;;  %v6151_v44 = vld [vmem:[%s8803_s1 + $0x140] sm:$0xff]   ;;  %v6552_v53 = vld [vmem:[%s8804_s0 + $0x18] sm:$0xf]  ;;  %v25_v57 = vld [vmem:[%s8804_s0 + $0x1c] sm:$0x3] }
   0xf   :  { %5176 = vmatpush3.bf16.msra.mxu0 %v6118_v13  ;;  %v154_v45 = vshrl.u32 %v6530_v38, 16  ;;  %v156_v46 = vshll.u32 %v6530_v38, 16  ;;  %v151_v49 = vrot.slane %v149_v42, 1  ;;  %v274_v50 = vrot.slane %v147_v41, 1  ;;  %v6560_v62 = vld [vmem:[%s8804_s0 + $0x20] sm:$0xf] }
  0x10   :  { %5177 = vmatprep.subr.bf16.mxu0 %v6121_v16  ;;  %v161_v47 = vshrl.u32 %v6533_v39, 16  ;;  %v163_v48 = vshll.u32 %v6533_v39, 16  ;;  %v275_v51 = vrot.slane %v149_v42, 2  ;;  %v8808_v52 = vrot.slane %v6530_v38, 1  ;;  %v27_v63 = vld [vmem:[%s8804_s0 + $0x24] sm:$0x3] }
  0x11   :  { %5240 = vmatpush3.bf16.msra.mxu1 %v6120_v15  ;;  %v158_v54 = vrot.slane %v156_v46, 1  ;;  %v277_v55 = vrot.slane %v154_v45, 1  ;;  %v278_v56 = vrot.slane %v156_v46, 2  ;;  %v152_v58 = vor.u32 %v151_v49, %v147_v41  ;;  %v6580_v7 = vld [vmem:[%s8804_s0 + $0x28] sm:$0xf]  ;;  %v6153_v13 = vld [vmem:[%s8803_s1 + $0x100] sm:$0xff]  }
  0x12   :  { %5241 = vmatprep.subr.bf16.mxu1 %v6123_v18  ;;  %v276_v59 = vor.u32 %v275_v51, %v274_v50  ;;  %v280_v60 = vrot.slane %v161_v47, 1  ;;  %v281_v61 = vrot.slane %v163_v48, 2  ;;  %v165_v1 = vrot.slane %v163_v48, 1  ;;  %v29_v8 = vld [vmem:[%s8804_s0 + $0x2c] sm:$0x3]  ;;  %v6154_v18 = vld [vmem:[%s8803_s1 + $0x1c0] sm:$0xff]  }
  0x13   :  { %5178 = vmatpush3.bf16.msra.mxu0 %v6122_v17  ;;  %v6565_v0 = vor.u32 %v158_v54, %v154_v45  ;;  %v6567_v2 = vor.u32 %v278_v56, %v277_v55  ;;  %v4780_v5 = vcombine.low %v258_v43, %v8808_v52  ;;  %v6575_v6 = vcombine.low %v6552_v53, %v25_v57  ;;  %v6155_v31 = vld [vmem:[%s8803_s1 + $0x180] sm:$0xff]   ;;  %v6156_v51 = vld [vmem:[%s8803_s1 + $0x148] sm:$0xff]  }
  0x14   :  { %5179 = vmatprep.subr.bf16.mxu0 %v6125_v20  ;;  %v6570_v4 = vor.u32 %v281_v61, %v280_v60  ;;  %v8809_v11 = vrot.slane %v6533_v39, 1  ;;  %v6589_v12 = vcombine.low %v6560_v62, %v27_v63  ;;  %v6607_v20 = vcombine.low %v6580_v7, %v29_v8  ;;  %v6639_v41 = vld [vmem:[%s8804_s0 + $0x60] sm:$0xf]  ;;  %v43_v42 = vld [vmem:[%s8804_s0 + $0x64] sm:$0x3]  ;;  %v6157_v60 = vld [vmem:[%s8803_s1 + $0x108] sm:$0xff]  }
  0x15   :  { %5242 = vmatpush3.bf16.msra.mxu1 %v6124_v19  ;;  %8936 = vst [vmem:[#allocation2_spill] sm:$0xff] %v6567_v2  ;;  %v4779_v9 = vcombine.low %v152_v58, %v6565_v0  ;;  %v4781_v10 = vcombine.low %v276_v59, %v6567_v2  ;;  %v168_v15 = vshrl.u32 %v6575_v6, 16  ;;  %v170_v16 = vshll.u32 %v6575_v6, 16  ;;  %v6675_v58 = vld [vmem:[%s8804_s0 + $0x68] sm:$0xf] }
  0x16   :  { %5243 = vmatprep.subr.bf16.mxu1 %v6127_v22  ;;  %8937 = vst [vmem:[#allocation3_spill] sm:$0xff] %v6570_v4  ;;  %v6599_v17 = vrot.slane %v6575_v6, 1  ;;  %v6604_v19 = vor.u32 %v165_v1, %v161_v47  ;;  %v177_v22 = vshll.u32 %v6589_v12, 16  ;;  %v182_v34 = vshrl.u32 %v6607_v20, 16  ;;  %8948 = vst [vmem:[#allocation14_spill] sm:$0xff] %v6675_v58 }
  0x17   :  { %5180 = vmatpush3.bf16.msra.mxu0 %v6126_v21  ;;  %3185 = vmatprep.mubr.bf16.mxu0 %v4779_v9  ;;  %v175_v21 = vshrl.u32 %v6589_v12, 16  ;;  %v184_v36 = vshll.u32 %v6607_v20, 16  ;;  %v6650_v45 = vcombine.low %v6560_v62, %v6580_v7  ;;  %v45_v59 = vld [vmem:[%s8804_s0 + $0x6c] sm:$0x3]  ;;  %v6699_v8 = vrot.slane %v6607_v20, 1 }
  0x18   :  { %5181 = vmatprep.subr.bf16.mxu0 %v6129_v24  ;;  %8938 = vst [vmem:[#allocation4_spill] sm:$0xff] %v6599_v17  ;;  %3282 = vmatprep.mubr.bf16.mxu1 %v4781_v10  ;;  %v6613_v24 = vcombine.low %v6522_v35, %v6552_v53  ;;  %v179_v32 = vrot.slane %v177_v22, 1  ;;  %v287_v46 = vrot.slane %v177_v22, 2  ;;  %v289_v49 = vrot.slane %v182_v34, 1  ;;  %v6158_v10 = vld [vmem:[%s8803_s1 + $0x1c8] sm:$0xff]  }
  0x19   :  { %5244 = vmatpush3.bf16.msra.mxu1 %v6128_v23  ;;  %v172_v23 = vrot.slane %v170_v16, 1  ;;  %8943 = vst [vmem:[#allocation9_spill] sm:$0xff] %v6650_v45  ;;  %v186_v48 = vrot.slane %v184_v36, 1  ;;  %v290_v50 = vrot.slane %v184_v36, 2  ;;  %v6668_v56 = vcombine.low %v8809_v11, %v6599_v17  ;;  %8951 = vst [vmem:[#allocation17_spill] sm:$0xff] %v6699_v8 }
  0x1a   :  { %5245 = vmatprep.subr.bf16.mxu1 %v6131_v26  ;;  %8939 = vst [vmem:[#allocation5_spill] sm:$0xff] %v6613_v24  ;;  %v284_v26 = vrot.slane %v170_v16, 2  ;;  %v6652_v47 = vor.u32 %v179_v32, %v175_v21  ;;  %v6702_v9 = vcombine.low %v6639_v41, %v43_v42  ;;  %v6731_v32 = vcombine.low %v6675_v58, %v45_v59 }
  0x1b   :  { %5182 = vmatpush3.bf16.msra.mxu0 %v6130_v25  ;;  %v283_v25 = vrot.slane %v168_v15, 1  ;;  %v6644_v43 = vor.u32 %v172_v23, %v168_v15  ;;  %8946 = vst [vmem:[#allocation12_spill] sm:$0xff] %v6668_v56  ;;  %v6683_v61 = vor.u32 %v186_v48, %v182_v34  ;;  %v6685_v63 = vor.u32 %v290_v50, %v289_v49  ;;  %v6161_v34 = vld [vmem:[%s8803_s1 + $0x188] sm:$0xff]   ;;  %v6163_v48 = vld [vmem:[%s8803_s1 + $0x150] sm:$0xff]  }
  0x1c   :  { %5183 = vmatprep.subr.bf16.mxu0 %v6133_v28  ;;  %v31_v28 = vld [vmem:[%s8804_s0 + $0x34] sm:$0x3]  ;;  %v205_v59 = vshll.u32 %v6702_v9, 16 }
  0x1d   :  { %5246 = vmatpush3.bf16.msra.mxu1 %v6132_v27  ;;  %v6618_v27 = vld [vmem:[%s8804_s0 + $0x30] sm:$0xf]  ;;  %8941 = vst [vmem:[#allocation7_spill] sm:$0xff] %v6644_v43  ;;  %v6659_v54 = vcombine.low %v6604_v19, %v6644_v43  ;;  %8949 = vst [vmem:[#allocation15_spill] sm:$0xff] %v6685_v63  ;;  %v6710_v15 = vcombine.low %v6652_v47, %v6683_v61 }
  0x1e   :  { %5247 = vmatprep.subr.bf16.mxu1 %v6135_v30  ;;  %v33_v30 = vld [vmem:[%s8804_s0 + $0x3c] sm:$0x3]  ;;  %v6688_v1 = vcombine.low %v6618_v27, %v31_v28  ;;  %v207_v14 = vrot.slane %v205_v59, 1  ;;  %v299_v11 = vrot.slane %v205_v59, 2 }
  0x1f   :  { %5184 = vmatpush3.bf16.msra.mxu0 %v6134_v29  ;;  %v6626_v29 = vld [vmem:[%s8804_s0 + $0x38] sm:$0xf]  ;;  %8944 = vst [vmem:[#allocation10_spill] sm:$0xff] %v6659_v54  ;;  %8952 = vst [vmem:[#allocation18_spill] sm:$0xff] %v6710_v15 }
  0x20   :  { %5297 = vmatprep.subr.bf16.mxu0 %v6151_v44  ;;  %8940 = vst [vmem:[#allocation6_spill] sm:$0xff] %v6626_v29  ;;  %v6646_v44 = vor.u32 %v284_v26, %v283_v25  ;;  %v6723_v25 = vrot.slane %v6688_v1, 1 }
  0x21   :  { %5248 = vmatpush3.bf16.msra.mxu1 %v6139_v40  ;;  %v286_v40 = vrot.slane %v175_v21, 1  ;;  %v191_v21 = vshll.u32 %v6688_v1, 16 }
  0x22   :  { %3186 = vmatmul.mubr.bf16.vlgmr.msra.gmra.mrb[0].mxu0 %v4778_v3  ;;  %5361 = vmatprep.subr.bf16.mxu1 %v6154_v18  ;;  %8942 = vst [vmem:[#allocation8_spill] sm:$0xff] %v6646_v44  ;;  %v6663_v55 = vcombine.low %v6570_v4, %v6646_v44  ;;  %v6691_v3 = vcombine.low %v6626_v29, %v33_v30  ;;  %v189_v18 = vshrl.u32 %v6688_v1, 16  ;;  %8954 = vst [vmem:[#allocation20_spill] sm:$0xff] %v6723_v25 }
  0x23   :  { %5298 = vmatpush3.bf16.msra.mxu0 %v6153_v13  ;;  %v6670_v57 = vor.u32 %v287_v46, %v286_v40  ;;  %3193 = vmatprep.mubr.bf16.mxu0 %v6659_v54  ;;  %v193_v28 = vrot.slane %v191_v21, 1  ;;  %v6164_v13 = vld [vmem:[%s8803_s1 + $0x110] sm:$0xff]   ;;  %v8970_v4 = vrot.slane %v6527_v37, 2  ;;  %v6176_v37 = vld [vmem:[%s8803_s1 + $0x1e0] sm:$0xff]  }
  0x24   :  { %3283 = vmatmul.mubr.bf16.vlgmr.msra.gmra.mrb[0].mxu1 %v4780_v5  ;;  %8945 = vst [vmem:[#allocation11_spill] sm:$0xff] %v6663_v55  ;;  %5299 = vmatprep.subr.bf16.mxu0 %v6156_v51  ;;  %v6696_v5 = vrot.slane %v6589_v12, 1  ;;  %v196_v22 = vshrl.u32 %v6691_v3, 16  ;;  %v198_v23 = vshll.u32 %v6691_v3, 16  ;;  %v6726_v26 = vrot.slane %v6691_v3, 1 }
  0x25   :  { %5362 = vmatpush3.bf16.msra.mxu1 %v6155_v31  ;;  %8947 = vst [vmem:[#allocation13_spill] sm:$0xff] %v6670_v57  ;;  %3290 = vmatprep.mubr.bf16.mxu1 %v6663_v55  ;;  %v6714_v16 = vcombine.low %v6670_v57, %v6685_v63  ;;  %v292_v30 = vrot.slane %v189_v18, 1  ;;  %v293_v31 = vrot.slane %v191_v21, 2  ;;  %v6743_v49 = vor.u32 %v193_v28, %v189_v18  ;;  %v6760_v18 = vld [vmem:[%s8804_s0 + $0x78] sm:$0xf] }
  0x26   :  { %8950 = vst [vmem:[#allocation16_spill] sm:$0xff] %v6696_v5  ;;  %8955 = vst [vmem:[#allocation21_spill] sm:$0xff] %v6726_v26  ;;  %v6738_v36 = vcombine.low %v6696_v5, %v6699_v8  ;;  %v200_v40 = vrot.slane %v198_v23, 1  ;;  %v295_v42 = vrot.slane %v196_v22, 1  ;;  %v296_v46 = vrot.slane %v198_v23, 2  ;;  %5363 = vmatprep.subr.bf16.mxu1 %v6158_v10 }
  0x27   :  { %8953 = vst [vmem:[#allocation19_spill] sm:$0xff] %v6714_v16  ;;  %5300 = vmatpush3.bf16.msra.mxu0 %v6157_v60  ;;  %v6745_v50 = vor.u32 %v293_v31, %v292_v30  ;;  %v203_v51 = vshrl.u32 %v6702_v9, 16  ;;  %v6752_v60 = vld [vmem:[%s8804_s0 + $0x70] sm:$0xf]  ;;  %v47_v10 = vld [vmem:[%s8804_s0 + $0x74] sm:$0x3] }
  0x28   :  { %8956 = vst [vmem:[#allocation22_spill] sm:$0xff] %v6738_v36  ;;  %8958 = vst [vmem:[#allocation24_spill] sm:$0xff] %v6752_v60  ;;  %v49_v21 = vld [vmem:[%s8804_s0 + $0x7c] sm:$0x3]  ;;  %v6765_v23 = vor.u32 %v200_v40, %v196_v22  ;;  %v6767_v28 = vor.u32 %v296_v46, %v295_v42  ;;  %v210_v30 = vshrl.u32 %v6731_v32, 16  ;;  %v212_v31 = vshll.u32 %v6731_v32, 16  ;;  %5301 = vmatprep.subr.bf16.mxu0 %v6163_v48 }
  0x29   :  { %8957 = vst [vmem:[#allocation23_spill] sm:$0xff] %v6745_v50  ;;  %8959 = vst [vmem:[#allocation25_spill] sm:$0xff] %v6760_v18  ;;  %5364 = vmatpush3.bf16.msra.mxu1 %v6161_v34  ;;  %v298_v52 = vrot.slane %v203_v51, 1  ;;  %v6165_v42 = vld [vmem:[%s8803_s1 + $0x1d0] sm:$0xff]   ;;  %v208_v48 = vor.u32 %v207_v14, %v203_v51  ;;  %v6798_v44 = vcombine.low %v6760_v18, %v49_v21  ;;  %v6832_v63 = vld [vmem:[%s8804_s0 + $0x80] sm:$0xf] }
  0x2a   :  { %3194 = vmatmul.mubr.bf16.gmra.mrb[4].mxu0 %v6613_v24  ;;  %8960 = vst [vmem:[#allocation26_spill] sm:$0xff] %v6765_v23  ;;  %8961 = vst [vmem:[#allocation27_spill] sm:$0xff] %v6767_v28  ;;  %v6780_v22 = vcombine.low %v6745_v50, %v6767_v28  ;;  %v214_v34 = vrot.slane %v212_v31, 1  ;;  %v301_v40 = vrot.slane %v210_v30, 1  ;;  %v6166_v46 = vld [vmem:[%s8803_s1 + $0x190] sm:$0xff]   ;;  %v6795_v50 = vcombine.low %v6752_v60, %v47_v10 }
  0x2b   :  { %3201 = vmatprep.mubr.bf16.mxu0 %v6710_v15  ;;  %v300_v59 = vor.u32 %v299_v11, %v298_v52  ;;  %5302 = vmatpush3.bf16.msra.mxu0 %v6164_v13  ;;  %v6167_v52 = vld [vmem:[%s8803_s1 + $0x158] sm:$0xff]   ;;  %v6806_v11 = vcombine.low %v6618_v27, %v6626_v29  ;;  %v6817_v10 = vcombine.low %v6723_v25, %v6726_v26  ;;  %v6835_v51 = vrot.slane %v6798_v44, 1 }
  0x2c   :  { %3291 = vmatmul.mubr.bf16.gmra.mrb[4].mxu1 %v6668_v56  ;;  %8963 = vst [vmem:[#allocation29_spill] sm:$0xff] %v6780_v22  ;;  %v302_v56 = vrot.slane %v212_v31, 2  ;;  %v6791_v28 = vor.u32 %v214_v34, %v210_v30  ;;  %v6168_v13 = vld [vmem:[%s8803_s1 + $0x118] sm:$0xff]   ;;  %v217_v30 = vshrl.u32 %v6795_v50, 16  ;;  %v219_v31 = vshll.u32 %v6795_v50, 16  ;;  %5365 = vmatprep.subr.bf16.mxu1 %v6165_v42 }
  0x2d   :  { %3298 = vmatprep.mubr.bf16.mxu1 %v6714_v16  ;;  %v6776_v16 = vcombine.low %v6743_v49, %v6765_v23  ;;  %8965 = vst [vmem:[#allocation31_spill] sm:$0xff] %v6806_v11  ;;  %8966 = vst [vmem:[#allocation32_spill] sm:$0xff] %v6817_v10  ;;  %5303 = vmatprep.subr.bf16.mxu0 %v6167_v52  ;;  %v224_v34 = vshrl.u32 %v6798_v44, 16 }
  0x2e   :  { %8964 = vst [vmem:[#allocation30_spill] sm:$0xff] %v6791_v28  ;;  %v6809_v14 = vor.u32 %v302_v56, %v301_v40  ;;  %v4855_v21 = vcombine.low %v208_v48, %v6791_v28  ;;  %v226_v40 = vshll.u32 %v6798_v44, 16  ;;  %5366 = vmatpush3.bf16.msra.mxu1 %v6166_v46  ;;  %v6169_v48 = vld [vmem:[%s8803_s1 + $0x1d8] sm:$0xff]   ;;  %v221_v42 = vrot.slane %v219_v31, 1  ;;  %8967 = vst [vmem:[#allocation33_spill] sm:$0xff] %v6835_v51 }
  0x2f   :  { %8962 = vst [vmem:[#allocation28_spill] sm:$0xff] %v6776_v16  ;;  %5304 = vmatpush3.bf16.msra.mxu0 %v6168_v13  ;;  %v304_v52 = vrot.slane %v217_v30, 1  ;;  %v51_v46 = vld [vmem:[%s8804_s0 + $0x84] sm:$0x3]  ;;  %v307_v55 = vrot.slane %v224_v34, 1  ;;  %5367 = vmatprep.subr.bf16.mxu1 %v6169_v48 }
  0x30   :  { %v4857_v56 = vcombine.low %v300_v59, %v6809_v14  ;;  %v305_v59 = vrot.slane %v219_v31, 2  ;;  %v228_v13 = vrot.slane %v226_v40, 1  ;;  %v6172_v31 = vld [vmem:[%s8803_s1 + $0x198] sm:$0xff]   ;;  %v6174_v48 = vld [vmem:[%s8803_s1 + $0x160] sm:$0xff]  }
  0x31   :  { %5305 = vmatprep.subr.bf16.mxu0 %v6174_v48 }
  0x32   :  { %3202 = vmatmul.mubr.bf16.gmra.mrb[8].mxu0 %v6650_v45  ;;  %v53_v45 = vld [vmem:[%s8804_s0 + $0x8c] sm:$0x3]  ;;  %5368 = vmatpush3.bf16.msra.mxu1 %v6172_v31  ;;  %v6865_v15 = vor.u32 %v305_v59, %v304_v52  ;;  %v8969_v31 = vrot.slane %v6530_v38, 2 }
  0x33   :  { %3209 = vmatprep.mubr.bf16.mxu0 %v6776_v16  ;;  %v6846_v16 = vcombine.low %v6832_v63, %v51_v46  ;;  %v6863_v46 = vor.u32 %v221_v42, %v217_v30  ;;  %5369 = vmatprep.subr.bf16.mxu1 %v6176_v37  ;;  %v6179_v37 = vld [vmem:[%s8803_s1 + $0x128] sm:$0xff]  }
  0x34   :  { %3299 = vmatmul.mubr.bf16.gmra.mrb[8].mxu1 %v6738_v36  ;;  %v6843_v36 = vld [vmem:[%s8804_s0 + $0x88] sm:$0xf]  ;;  %v6875_v2 = vcombine.low %v8970_v4, %v8969_v31  ;;  %v6177_v4 = vld [vmem:[%s8803_s1 + $0x1a0] sm:$0xff]  }
  0x35   :  { %3306 = vmatprep.mubr.bf16.mxu1 %v6780_v22  ;;  %v308_v22 = vrot.slane %v226_v40, 2  ;;  %v6855_v57 = vcombine.low %v6843_v36, %v53_v45  ;;  %v231_v40 = vshrl.u32 %v6846_v16, 16  ;;  %8968 = vst [vmem:[#allocation34_spill] sm:$0xff] %v6863_v46  ;;  %v233_v24 = vshll.u32 %v6846_v16, 16  ;;  %v6175_v45 = vld [vmem:[%s8803_s1 + $0x120] sm:$0xff]  }
  0x36   :  { %v6884_v23 = vrot.slane %v6846_v16, 1  ;;  %5306 = vmatpush3.bf16.msra.mxu0 %v6175_v45  ;;  %5370 = vmatpush3.bf16.msra.mxu1 %v6177_v4  ;;  %v6178_v45 = vld [vmem:[%s8803_s1 + $0x168] sm:$0xff]  }
  0x37   :  { %v6879_v30 = vor.u32 %v308_v22, %v307_v55  ;;  %v238_v42 = vshrl.u32 %v6855_v57, 16  ;;  %v240_v52 = vshll.u32 %v6855_v57, 16  ;;  %v235_v59 = vrot.slane %v233_v24, 1  ;;  %5307 = vmatprep.subr.bf16.mxu0 %v6178_v45 }
  0x38   :  { %v311_v54 = vrot.slane %v233_v24, 2  ;;  %8973 = vst [vmem:[#allocation37_spill] sm:$0xff] %v6884_v23  ;;  %v4854_v24 = vcombine.low %v6639_v41, %v6675_v58  ;;  %v324_v41 = vrot.slane %v6533_v39, 2  ;;  %v6965_v45 = vcombine.low %v6752_v60, %v6760_v18 }
  0x39   :  { %8972 = vst [vmem:[#allocation36_spill] sm:$0xff] %v6879_v30  ;;  %v242_v55 = vrot.slane %v240_v52, 1  ;;  %v313_v22 = vrot.slane %v238_v42, 1  ;;  %v6913_v26 = vor.u32 %v235_v59, %v231_v40  ;;  %v6933_v59 = vld [vmem:[%s8804_s0 + $0x90] sm:$0xf] }
  0x3a   :  { %3210 = vmatmul.mubr.bf16.gmra.mrb[12].mxu0 %v6806_v11  ;;  %v6877_v11 = vor.u32 %v228_v13, %v224_v34  ;;  %v8975_v34 = vrot.slane %v6731_v32, 1  ;;  %v8976_v13 = vrot.slane %v6702_v9, 1 }
  0x3b   :  { %3217 = vmatprep.mubr.bf16.mxu0 %v4855_v21  ;;  %v314_v21 = vrot.slane %v240_v52, 2  ;;  %v6907_v52 = vcombine.low %v6865_v15, %v6879_v30  ;;  %v6921_v30 = vor.u32 %v242_v55, %v238_v42  ;;  %v326_v42 = vrot.slane %v6589_v12, 2  ;;  %5308 = vmatpush3.bf16.msra.mxu0 %v6179_v37 }
  0x3c   :  { %3307 = vmatmul.mubr.bf16.gmra.mrb[12].mxu1 %v6817_v10  ;;  %8971 = vst [vmem:[#allocation35_spill] sm:$0xff] %v6877_v11  ;;  %v310_v10 = vrot.slane %v231_v40, 1  ;;  %v4856_v48 = vcombine.low %v8976_v13, %v8975_v34  ;;  %v6903_v31 = vcombine.low %v6863_v46, %v6877_v11  ;;  %v325_v34 = vrot.slane %v6575_v6, 2  ;;  %v6180_v40 = vld [vmem:[%s8803_s1 + $0x1e8] sm:$0xff]   ;;  %v55_v6 = vld [vmem:[%s8804_s0 + $0x94] sm:$0x3] }
  0x3d   :  { %3314 = vmatprep.mubr.bf16.mxu1 %v4857_v56  ;;  %v6893_v56 = vrot.slane %v6855_v57, 1  ;;  %8978 = vst [vmem:[#allocation40_spill] sm:$0xff] %v6907_v52  ;;  %8979 = vst [vmem:[#allocation41_spill] sm:$0xff] %v6921_v30  ;;  %v6925_v11 = vor.u32 %v314_v21, %v313_v22  ;;  %v6948_v55 = vcombine.low %v6933_v59, %v55_v6  ;;  %5371 = vmatprep.subr.bf16.mxu1 %v6180_v40  ;;  %v6186_v13 = vld [vmem:[%s8803_s1 + $0x130] sm:$0xff]  }
  0x3e   :  { %8977 = vst [vmem:[#allocation39_spill] sm:$0xff] %v6903_v31  ;;  %v6923_v4 = vor.u32 %v311_v54, %v310_v10  ;;  %v6942_v54 = vld [vmem:[%s8804_s0 + $0x98] sm:$0xf]  ;;  %v57_v10 = vld [vmem:[%s8804_s0 + $0x9c] sm:$0x3]  ;;  %v6950_v22 = vcombine.low %v324_v41, %v325_v34  ;;  %v6986_v46 = vcombine.low %v6913_v26, %v6921_v30 }
  0x3f   :  { %8974 = vst [vmem:[#allocation38_spill] sm:$0xff] %v6893_v56  ;;  %8980 = vst [vmem:[#allocation42_spill] sm:$0xff] %v6925_v11  ;;  %v6957_v12 = vcombine.low %v6942_v54, %v57_v10  ;;  %v245_v6 = vshrl.u32 %v6948_v55, 16  ;;  %v247_v21 = vshll.u32 %v6948_v55, 16  ;;  %v6185_v10 = vld [vmem:[%s8803_s1 + $0x170] sm:$0xff]  }
  0x40   :  { %8984 = vst [vmem:[#allocation45_spill] sm:$0xff] %v6986_v46  ;;  %v6990_v28 = vcombine.low %v6923_v4, %v6925_v11  ;;  %5309 = vmatprep.subr.bf16.mxu0 %v6185_v10  ;;  %v6188_v11 = vld [vmem:[%s8803_s1 + $0x1b0] sm:$0xff]   ;;  %v329_v10 = vrot.slane %v6691_v3, 2 }
  0x41   :  { %v252_v37 = vshrl.u32 %v6957_v12, 16  ;;  %v254_v40 = vshll.u32 %v6957_v12, 16  ;;  %v249_v18 = vrot.slane %v247_v21, 1  ;;  %v316_v60 = vrot.slane %v245_v6, 1  ;;  %5310 = vmatpush3.bf16.msra.mxu0 %v6186_v13  ;;  %v6189_v13 = vld [vmem:[%s8803_s1 + $0x178] sm:$0xff]  }
  0x42   :  { %3218 = vmatmul.mubr.bf16.gmra.mrb[16].mxu0 %v4854_v24  ;;  %v6183_v24 = vld [vmem:[%s8803_s1 + $0x1a8] sm:$0xff]   ;;  %8985 = vst [vmem:[#allocation46_spill] sm:$0xff] %v6990_v28  ;;  %5311 = vmatprep.subr.bf16.mxu0 %v6189_v13  ;;  %v334_v13 = vrot.slane %v6846_v16, 2 }
  0x43   :  { %3225 = vmatprep.mubr.bf16.mxu0 %v6903_v31  ;;  %5372 = vmatpush3.bf16.msra.mxu1 %v6183_v24  ;;  %v319_v58 = vrot.slane %v252_v37, 1  ;;  %v320_v29 = vrot.slane %v254_v40, 2  ;;  %v6187_v24 = vld [vmem:[%s8803_s1 + $0x1f0] sm:$0xff]   ;;  %v6996_v30 = vor.u32 %v249_v18, %v245_v6  ;;  %v8986_v18 = vrot.slane %v6530_v38, 2 }
  0x44   :  { %3315 = vmatmul.mubr.bf16.gmra.mrb[16].mxu1 %v4856_v48  ;;  %v327_v48 = vrot.slane %v6607_v20, 2  ;;  %v8981_v20 = vrot.slane %v6795_v50, 1  ;;  %5373 = vmatprep.subr.bf16.mxu1 %v6187_v24  ;;  %v7044_v24 = vcombine.low %v6832_v63, %v6843_v36 }
  0x45   :  { %3322 = vmatprep.mubr.bf16.mxu1 %v6907_v52  ;;  %v7012_v6 = vcombine.low %v8986_v18, %v324_v41  ;;  %v6191_v41 = vld [vmem:[%s8803_s1 + $0x1f8] sm:$0xff]  }
  0x46   :  { %v6978_v52 = vcombine.low %v8981_v20, %v6835_v51  ;;  %v6982_v31 = vcombine.low %v326_v42, %v327_v48  ;;  %v256_v20 = vrot.slane %v254_v40, 1  ;;  %v317_v51 = vrot.slane %v247_v21, 2 }
  0x47   :  { %v7014_v40 = vcombine.low %v325_v34, %v326_v42  ;;  %v332_v34 = vrot.slane %v6795_v50, 2  ;;  %5374 = vmatpush3.bf16.msra.mxu1 %v6188_v11  ;;  %v35_v42 = vld [vmem:[%s8804_s0 + $0x44] sm:$0x3] }
  0x48   :  { %8982 = vst [vmem:[#allocation43_spill] sm:$0xff] %v6978_v52  ;;  %8983 = vst [vmem:[#allocation44_spill] sm:$0xff] %v6982_v31  ;;  %v328_v31 = vrot.slane %v6688_v1, 2  ;;  %v7004_v21 = vor.u32 %v256_v20, %v252_v37  ;;  %v330_v1 = vrot.slane %v6702_v9, 2  ;;  %v7018_v3 = vor.u32 %v317_v51, %v316_v60  ;;  %v6190_v20 = vld [vmem:[%s8803_s1 + $0x138] sm:$0xff]   ;;  %5375 = vmatprep.subr.bf16.mxu1 %v6191_v41 }
  0x49   :  { %v7020_v37 = vor.u32 %v320_v29, %v319_v58  ;;  %v331_v9 = vrot.slane %v6731_v32, 2  ;;  %5312 = vmatpush3.bf16.msra.mxu0 %v6190_v20  ;;  %v6193_v29 = vld [vmem:[%s8803_s1 + $0x1b8] sm:$0xff]   ;;  %v333_v51 = vrot.slane %v6798_v44, 2  ;;  %v7057_v44 = vld [vmem:[%s8804_s0 + $0x40] sm:$0xf]  ;;  %v335_v20 = vrot.slane %v6855_v57, 2 }
  0x4a   :  { %3226 = vmatmul.mubr.bf16.gmra.mrb[20].mxu0 %v6965_v45  ;;  %8987 = vst [vmem:[#allocation47_spill] sm:$0xff] %v7018_v3  ;;  %v7032_v60 = vcombine.low %v327_v48, %v328_v31  ;;  %v7052_v11 = vcombine.low %v6996_v30, %v7004_v21  ;;  %v6200_v48 = vld [vmem:[%s8803_s1 + $0x240] sm:$0xff]   ;;  %v7085_v57 = vrot.slane %v6948_v55, 1 }
  0x4b   :  { %3233 = vmatprep.mubr.bf16.mxu0 %v6986_v46  ;;  %8988 = vst [vmem:[#allocation48_spill] sm:$0xff] %v7020_v37  ;;  %v7037_v58 = vcombine.low %v330_v1, %v331_v9  ;;  %v7065_v1 = vcombine.low %v7018_v3, %v7020_v37  ;;  %v7067_v18 = vcombine.low %v332_v34, %v333_v51 }
  0x4c   :  { %3323 = vmatmul.mubr.bf16.gmra.mrb[20].mxu1 %v6978_v52  ;;  %v7025_v52 = vcombine.low %v328_v31, %v329_v10  ;;  %v7048_v31 = vcombine.low %v6884_v23, %v6893_v56  ;;  %8990 = vst [vmem:[#allocation50_spill] sm:$0xff] %v7052_v11  ;;  %v7070_v41 = vcombine.low %v331_v9, %v332_v34  ;;  %8992 = vst [vmem:[#allocation52_spill] sm:$0xff] %v7085_v57 }
  0x4d   :  { %3330 = vmatprep.mubr.bf16.mxu1 %v6990_v28  ;;  %8991 = vst [vmem:[#allocation51_spill] sm:$0xff] %v7065_v1  ;;  %5425 = vmatprep.subr.bf16.mxu0 %v6200_v48  ;;  %v6202_v28 = vld [vmem:[%s8803_s1 + $0x2c0] sm:$0xff]   ;;  %v7078_v16 = vcombine.low %v333_v51, %v334_v13  ;;  %v7080_v37 = vcombine.low %v334_v13, %v335_v20  ;;  %v7088_v9 = vrot.slane %v6957_v12, 1  ;;  %v337_v51 = vrot.slane %v6957_v12, 2 }
  0x4e   :  { %8989 = vst [vmem:[#allocation49_spill] sm:$0xff] %v7048_v31  ;;  %5376 = vmatpush3.bf16.msra.mxu1 %v6193_v29  ;;  %v7093_v34 = vcombine.low %v7057_v44, %v35_v42  ;;  %v336_v29 = vrot.slane %v6948_v55, 2  ;;  %v4783_v55 = vcombine.low %v6514_v33, %v6522_v35  ;;  %v8996_v12 = vrot.slane %v6530_v38, 1  ;;  %v6201_v33 = vld [vmem:[%s8803_s1 + $0x200] sm:$0xff]  }
  0x4f   :  { %8993 = vst [vmem:[#allocation53_spill] sm:$0xff] %v7088_v9  ;;  %5489 = vmatprep.subr.bf16.mxu1 %v6202_v28  ;;  %v7106_v3 = vcombine.low %v7085_v57, %v7088_v9  ;;  %v8995_v28 = vrot.slane %v6533_v39, 1  ;;  %v7129_v35 = vcombine.low %v6552_v53, %v6560_v62  ;;  %v4803_v38 = vcombine.low %v6599_v17, %v6696_v5  ;;  %v6203_v39 = vld [vmem:[%s8803_s1 + $0x280] sm:$0xff]   ;;  %v6205_v53 = vld [vmem:[%s8803_s1 + $0x208] sm:$0xff]   ;;  %v6232_v5 = vld [vmem:[%s8803_s1 + $0x2b0] sm:$0xff]  }
  0x50   :  { %v8867_v48 = vrot.slane %v7093_v34, 2  ;;  %v7098_v13 = vcombine.low %v335_v20, %v336_v29  ;;  %v6208_v62 = vld [vmem:[%s8803_s1 + $0x288] sm:$0xff]   ;;  %v6233_v17 = vld [vmem:[%s8803_s1 + $0x278] sm:$0xff]  }
  0x51   :  { %8994 = vst [vmem:[#allocation54_spill] sm:$0xff] %v7106_v3  ;;  %v4785_v42 = vcombine.low %v8996_v12, %v8995_v28  ;;  %v59_v28 = vld [vmem:[%s8804_s0 + $0xa4] sm:$0x3]  ;;  %v7166_v12 = vcombine.low %v6644_v43, %v6652_v47 }
  0x52   :  { %3234 = vmatmul.mubr.bf16.gmra.mrb[24].mxu0 %v7044_v24  ;;  %v7118_v20 = vcombine.low %v329_v10, %v8867_v48  ;;  %v6204_v10 = vld [vmem:[%s8803_s1 + $0x248] sm:$0xff]   ;;  %v7215_v48 = vcombine.low %v6683_v61, %v6743_v49 }
  0x53   :  { %3241 = vmatprep.mubr.bf16.mxu0 %v7052_v11  ;;  %8997 = vst [vmem:[#allocation55_spill] sm:$0xff] %v7166_v12 }
  0x54   :  { %3331 = vmatmul.mubr.bf16.gmra.mrb[24].mxu1 %v7048_v31  ;;  %v7102_v31 = vcombine.low %v6933_v59, %v6942_v54  ;;  %8998 = vst [vmem:[#allocation56_spill] sm:$0xff] %v7215_v48 }
  0x55   :  { %3338 = vmatprep.mubr.bf16.mxu1 %v7065_v1  ;;  %v7108_v1 = vcombine.low %v336_v29, %v337_v51  ;;  %v4784_v29 = vcombine.low %v6565_v0, %v6604_v19  ;;  %v6206_v0 = vld [vmem:[%s8803_s1 + $0x2c8] sm:$0xff]   ;;  %v6209_v19 = vld [vmem:[%s8803_s1 + $0x250] sm:$0xff]  }
  0x5a   :  { %3242 = vmatmul.mubr.bf16.gmra.mrb[28].mxu0 %v7102_v31 }
  0x5b   :  { %3379 = vmatprep.mubr.bf16.mxu0 %v4783_v55  ;;  %v7159_v55 = vld [vmem:[%s8804_s0 + $0xa0] sm:$0xf] }
  0x5c   :  { %3339 = vmatmul.mubr.bf16.gmra.mrb[28].mxu1 %v7106_v3 }
  0x5d   :  { %3476 = vmatprep.mubr.bf16.mxu1 %v4785_v42  ;;  %v6210_v42 = vld [vmem:[%s8803_s1 + $0x210] sm:$0xff]  }
  0x62   :  { %3380 = vmatmul.mubr.bf16.vlgmr.msra.gmra.mrb[32].mxu0 %v6875_v2  ;;  %v6211_v2 = vld [vmem:[%s8803_s1 + $0x2d0] sm:$0xff]  }
  0x63   :  { %3387 = vmatprep.mubr.bf16.mxu0 %v7129_v35  ;;  %5426 = vmatpush3.bf16.msra.mxu0 %v6201_v33  ;;  %v4820_v33 = vcombine.low %v6699_v8, %v6723_v25 }
  0x64   :  { %3477 = vmatmul.mubr.bf16.vlgmr.msra.gmra.mrb[32].mxu1 %v4784_v29  ;;  %5427 = vmatprep.subr.bf16.mxu0 %v6204_v10  ;;  %v7173_v29 = vcombine.low %v6580_v7, %v6618_v27  ;;  %v7184_v10 = vcombine.low %v7159_v55, %v59_v28  ;;  %v6215_v7 = vld [vmem:[%s8803_s1 + $0x2d8] sm:$0xff]  }
  0x65   :  { %3484 = vmatprep.mubr.bf16.mxu1 %v4803_v38  ;;  %5490 = vmatpush3.bf16.msra.mxu1 %v6203_v39  ;;  %v6212_v38 = vld [vmem:[%s8803_s1 + $0x290] sm:$0xff]   ;;  %v6213_v39 = vld [vmem:[%s8803_s1 + $0x258] sm:$0xff]  }
  0x66   :  { %5491 = vmatprep.subr.bf16.mxu1 %v6206_v0  ;;  %v8872_v0 = vshll.u32 %v7093_v34, 16  ;;  %v6214_v27 = vld [vmem:[%s8803_s1 + $0x218] sm:$0xff]  }
  0x67   :  { %5428 = vmatpush3.bf16.msra.mxu0 %v6205_v53  ;;  %v8871_v53 = vrot.slane %v7184_v10, 2 }
  0x68   :  { %5429 = vmatprep.subr.bf16.mxu0 %v6209_v19  ;;  %v6217_v19 = vld [vmem:[%s8803_s1 + $0x298] sm:$0xff]  }
  0x69   :  { %5492 = vmatpush3.bf16.msra.mxu1 %v6208_v62  ;;  %v7198_v62 = vrot.slane %v7093_v34, 1  ;;  %v7208_v28 = vcombine.low %v337_v51, %v8871_v53  ;;  %v9000_v51 = vld [vmem:[#allocation21_spill] sm:$0xff]  ;;  %v6221_v53 = vld [vmem:[%s8803_s1 + $0x2a0] sm:$0xff]  }
  0x6a   :  { %5493 = vmatprep.subr.bf16.mxu1 %v6211_v2  ;;  %3388 = vmatmul.mubr.bf16.gmra.mrb[36].mxu0 %v6950_v22  ;;  %v6218_v2 = vld [vmem:[%s8803_s1 + $0x260] sm:$0xff]  }
  0x6b   :  { %3395 = vmatprep.mubr.bf16.mxu0 %v7173_v29  ;;  %5430 = vmatpush3.bf16.msra.mxu0 %v6210_v42  ;;  %v9001_v42 = vld [vmem:[#allocation44_spill] sm:$0xff] }
  0x6c   :  { %3485 = vmatmul.mubr.bf16.gmra.mrb[36].mxu1 %v7166_v12  ;;  %5431 = vmatprep.subr.bf16.mxu0 %v6213_v39  ;;  %v8999_v12 = vld [vmem:[#allocation6_spill] sm:$0xff]  ;;  %v4837_v39 = vcombine.low %v9000_v51, %v7198_v62  ;;  %v9002_v51 = vshrl.u32 %v7093_v34, 16 }
  0x6d   :  { %3492 = vmatprep.mubr.bf16.mxu1 %v4820_v33  ;;  %5494 = vmatpush3.bf16.msra.mxu1 %v6212_v38  ;;  %v6220_v33 = vld [vmem:[%s8803_s1 + $0x2e0] sm:$0xff]   ;;  %v353_v38 = vrot.slane %v8872_v0, 1  ;;  %v7222_v25 = vcombine.low %v8999_v12, %v7057_v44  ;;  %v6222_v0 = vld [vmem:[%s8803_s1 + $0x268] sm:$0xff]  }
  0x6e   :  { %5495 = vmatprep.subr.bf16.mxu1 %v6215_v7  ;;  %v6219_v7 = vld [vmem:[%s8803_s1 + $0x220] sm:$0xff]   ;;  %v6224_v12 = vld [vmem:[%s8803_s1 + $0x2e8] sm:$0xff]  }
  0x6f   :  { %5432 = vmatpush3.bf16.msra.mxu0 %v6214_v27  ;;  %v7242_v8 = vor.u32 %v353_v38, %v9002_v51  ;;  %v6223_v27 = vld [vmem:[%s8803_s1 + $0x228] sm:$0xff]   ;;  %v6229_v38 = vld [vmem:[%s8803_s1 + $0x270] sm:$0xff]  }
  0x70   :  { %5433 = vmatprep.subr.bf16.mxu0 %v6218_v2  ;;  %v7253_v2 = vld [vmem:[%s8804_s0 + $0x48] sm:$0xf]  ;;  %v6231_v51 = vld [vmem:[%s8803_s1 + $0x2f0] sm:$0xff]  }
  0x71   :  { %5496 = vmatpush3.bf16.msra.mxu1 %v6217_v19  ;;  %v6228_v19 = vld [vmem:[%s8803_s1 + $0x2a8] sm:$0xff]  }
  0x72   :  { %5497 = vmatprep.subr.bf16.mxu1 %v6220_v33  ;;  %3396 = vmatmul.mubr.bf16.gmra.mrb[40].mxu0 %v9001_v42  ;;  %v37_v33 = vld [vmem:[%s8804_s0 + $0x4c] sm:$0x3] }
  0x73   :  { %3403 = vmatprep.mubr.bf16.mxu0 %v7222_v25  ;;  %5434 = vmatpush3.bf16.msra.mxu0 %v6219_v7  ;;  %v9005_v7 = vrot.slane %v6795_v50, 1  ;;  %v6235_v50 = vld [vmem:[%s8803_s1 + $0x2f8] sm:$0xff]  }
  0x74   :  { %3493 = vmatmul.mubr.bf16.gmra.mrb[40].mxu1 %v7215_v48  ;;  %5435 = vmatprep.subr.bf16.mxu0 %v6222_v0  ;;  %v9003_v48 = vld [vmem:[#allocation26_spill] sm:$0xff]  ;;  %v9006_v0 = vrot.slane %v6731_v32, 1  ;;  %v6234_v32 = vld [vmem:[%s8803_s1 + $0x238] sm:$0xff]  }
  0x75   :  { %3500 = vmatprep.mubr.bf16.mxu1 %v4837_v39  ;;  %5498 = vmatpush3.bf16.msra.mxu1 %v6221_v53  ;;  %v7267_v3 = vcombine.low %v9003_v48, %v7242_v8  ;;  %v6230_v39 = vld [vmem:[%s8803_s1 + $0x230] sm:$0xff]   ;;  %v7273_v53 = vcombine.low %v7253_v2, %v37_v33  ;;  %v9008_v33 = vld [vmem:[#allocation14_spill] sm:$0xff] }
  0x76   :  { %5499 = vmatprep.subr.bf16.mxu1 %v6224_v12  ;;  %v4861_v12 = vcombine.low %v9006_v0, %v9005_v7  ;;  %v9009_v7 = vld [vmem:[#allocation24_spill] sm:$0xff]  ;;  %v6239_v0 = vld [vmem:[%s8803_s1 + $0x340] sm:$0xff]  }
  0x77   :  { %9004 = vst [vmem:[#allocation6_spill] sm:$0xff] %v7267_v3  ;;  %5436 = vmatpush3.bf16.msra.mxu0 %v6223_v27  ;;  %v404_v43 = vrot.slane %v7273_v53, 2  ;;  %v9007_v27 = vrot.slane %v7093_v34, 2 }
  0x78   :  { %5437 = vmatprep.subr.bf16.mxu0 %v6229_v38  ;;  %v9010_v38 = vcombine.low %v9008_v33, %v9009_v7 }
  0x79   :  { %5500 = vmatpush3.bf16.msra.mxu1 %v6228_v19  ;;  %v7296_v19 = vcombine.low %v9007_v27, %v404_v43  ;;  %v6241_v43 = vld [vmem:[%s8803_s1 + $0x3c0] sm:$0xff]   ;;  %v9011_v27 = vld [vmem:[#allocation25_spill] sm:$0xff] }
  0x7a   :  { %5501 = vmatprep.subr.bf16.mxu1 %v6231_v51  ;;  %3404 = vmatmul.mubr.bf16.gmra.mrb[44].mxu0 %v7025_v52  ;;  %v6236_v51 = vld [vmem:[%s8803_s1 + $0x2b8] sm:$0xff]   ;;  %v7312_v33 = vcombine.low %v9011_v27, %v6832_v63  ;;  %v7347_v27 = vcombine.low %v6942_v54, %v7159_v55  ;;  %v61_v54 = vld [vmem:[%s8804_s0 + $0xac] sm:$0x3] }
  0x7b   :  { %3411 = vmatprep.mubr.bf16.mxu0 %v9010_v38  ;;  %5438 = vmatpush3.bf16.msra.mxu0 %v6230_v39  ;;  %v7327_v38 = vcombine.low %v6843_v36, %v6933_v59  ;;  %v8884_v36 = vshrl.u32 %v7184_v10, 16 }
  0x7c   :  { %3501 = vmatmul.mubr.bf16.gmra.mrb[44].mxu1 %v7267_v3  ;;  %5439 = vmatprep.subr.bf16.mxu0 %v6233_v17  ;;  %v9014_v17 = vld [vmem:[#allocation34_spill] sm:$0xff]  ;;  %v6246_v3 = vld [vmem:[%s8803_s1 + $0x388] sm:$0xff]  }
  0x7d   :  { %3508 = vmatprep.mubr.bf16.mxu1 %v4861_v12  ;;  %5502 = vmatpush3.bf16.msra.mxu1 %v6232_v5  ;;  %v9012_v12 = vld [vmem:[#allocation33_spill] sm:$0xff]  ;;  %v9013_v5 = vld [vmem:[#allocation30_spill] sm:$0xff] }
  0x7e   :  { %5503 = vmatprep.subr.bf16.mxu1 %v6235_v50  ;;  %v4879_v7 = vcombine.low %v9012_v12, %v6884_v23  ;;  %v9015_v39 = vcombine.low %v9013_v5, %v9014_v17  ;;  %v9016_v50 = vld [vmem:[#allocation35_spill] sm:$0xff]  ;;  %v9033_v23 = vld [vmem:[#allocation9_spill] sm:$0xff] }
  0x7f   :  { %5440 = vmatpush3.bf16.msra.mxu0 %v6234_v32  ;;  %v7323_v63 = vcombine.low %v9016_v50, %v6913_v26  ;;  %v4896_v32 = vcombine.low %v6893_v56, %v7085_v57  ;;  %v7361_v17 = vld [vmem:[%s8804_s0 + $0xa8] sm:$0xf]  ;;  %v9029_v57 = vld [vmem:[#allocation18_spill] sm:$0xff]  ;;  %v6253_v56 = vld [vmem:[%s8803_s1 + $0x3d8] sm:$0xff]   ;;  %v9039_v50 = vshll.u32 %v7093_v34, 16 }
  0x80   :  { %5553 = vmatprep.subr.bf16.mxu0 %v6239_v0  ;;  %v9019_v0 = vld [vmem:[#allocation41_spill] sm:$0xff] }
  0x81   :  { %5504 = vmatpush3.bf16.msra.mxu1 %v6236_v51  ;;  %9017 = vst [vmem:[#allocation44_spill] sm:$0xff] %v7323_v63  ;;  %v7336_v51 = vrot.slane %v7184_v10, 1 }
  0x82   :  { %5617 = vmatprep.subr.bf16.mxu1 %v6241_v43  ;;  %3412 = vmatmul.mubr.bf16.gmra.mrb[48].mxu0 %v7037_v58  ;;  %v8883_v58 = vshll.u32 %v7184_v10, 16  ;;  %v7340_v43 = vcombine.low %v9019_v0, %v6996_v30 }
  0x83   :  { %3419 = vmatprep.mubr.bf16.mxu0 %v7312_v33  ;;  %9018 = vst [vmem:[#allocation26_spill] sm:$0xff] %v7336_v51 }
  0x84   :  { %3509 = vmatmul.mubr.bf16.gmra.mrb[48].mxu1 %v9015_v39  ;;  %9020 = vst [vmem:[#allocation14_spill] sm:$0xff] %v7340_v43  ;;  %v360_v59 = vrot.slane %v8883_v58, 1  ;;  %v9023_v58 = vrot.slane %v7184_v10, 2 }
  0x85   :  { %3516 = vmatprep.mubr.bf16.mxu1 %v4879_v7  ;;  %v4913_v7 = vcombine.low %v7088_v9, %v7336_v51  ;;  %v6244_v9 = vld [vmem:[%s8803_s1 + $0x308] sm:$0xff]  }
  0x86   :  { %v7355_v5 = vor.u32 %v360_v59, %v8884_v36 }
  0x88   :  { %v7368_v39 = vcombine.low %v7004_v21, %v7355_v5 }
  0x8a   :  { %3420 = vmatmul.mubr.bf16.gmra.mrb[52].mxu0 %v7067_v18  ;;  %9021 = vst [vmem:[#allocation24_spill] sm:$0xff] %v7368_v39 }
  0x8b   :  { %3427 = vmatprep.mubr.bf16.mxu0 %v7327_v38 }
  0x8c   :  { %3517 = vmatmul.mubr.bf16.gmra.mrb[52].mxu1 %v7323_v63  ;;  %v9026_v63 = vld [vmem:[#allocation3_spill] sm:$0xff] }
  0x8d   :  { %3524 = vmatprep.mubr.bf16.mxu1 %v4896_v32  ;;  %v7371_v32 = vcombine.low %v7361_v17, %v61_v54  ;;  %v6242_v54 = vld [vmem:[%s8803_s1 + $0x380] sm:$0xff]  }
  0x8f   :  { %v405_v59 = vrot.slane %v7371_v32, 2 }
  0x91   :  { %v7380_v36 = vcombine.low %v9023_v58, %v405_v59  ;;  %v9028_v59 = vld [vmem:[#allocation5_spill] sm:$0xff] }
  0x92   :  { %3428 = vmatmul.mubr.bf16.gmra.mrb[56].mxu0 %v7080_v37 }
  0x93   :  { %3435 = vmatprep.mubr.bf16.mxu0 %v7347_v27  ;;  %9024 = vst [vmem:[#allocation25_spill] sm:$0xff] %v7380_v36  ;;  %v629_v36 = vshll.u32 %v6652_v47, 16 }
  0x94   :  { %3525 = vmatmul.mubr.bf16.gmra.mrb[56].mxu1 %v7340_v43  ;;  %v6240_v43 = vld [vmem:[%s8803_s1 + $0x300] sm:$0xff]  }
  0x95   :  { %3532 = vmatprep.mubr.bf16.mxu1 %v4913_v7  ;;  %v9022_v7 = vld [vmem:[#allocation10_spill] sm:$0xff] }
  0x9a   :  { %3436 = vmatmul.mubr.bf16.gmra.mrb[60].mxu0 %v7108_v1 }
  0x9b   :  { %3573 = vmatprep.mubr.bf16.mxu0 %v7012_v6  ;;  %v6245_v6 = vld [vmem:[%s8803_s1 + $0x3c8] sm:$0xff]  }
  0x9c   :  { %3533 = vmatmul.mubr.bf16.gmra.mrb[60].mxu1 %v7368_v39  ;;  %v6243_v39 = vld [vmem:[%s8803_s1 + $0x348] sm:$0xff]  }
  0x9d   :  { %3670 = vmatprep.mubr.bf16.mxu1 %v9022_v7  ;;  %v9025_v7 = vld [vmem:[#allocation2_spill] sm:$0xff] }
  0x9e   :  { %v9027_v58 = vcombine.low %v9025_v7, %v9026_v63  ;;  %v6247_v63 = vld [vmem:[%s8803_s1 + $0x350] sm:$0xff]   ;;  %v9030_v7 = vld [vmem:[#allocation13_spill] sm:$0xff] }
  0xa2   :  { %3574 = vmatmul.mubr.bf16.vlgmr.msra.gmra.mrb[64].mxu0 %v9027_v58  ;;  %v9031_v58 = vld [vmem:[#allocation8_spill] sm:$0xff] }
  0xa3   :  { %3581 = vmatprep.mubr.bf16.mxu0 %v7014_v40  ;;  %5554 = vmatpush3.bf16.msra.mxu0 %v6240_v43  ;;  %v6249_v40 = vld [vmem:[%s8803_s1 + $0x3d0] sm:$0xff]  }
  0xa4   :  { %3671 = vmatmul.mubr.bf16.vlgmr.msra.gmra.mrb[64].mxu1 %v9028_v59  ;;  %5555 = vmatprep.subr.bf16.mxu0 %v6243_v39  ;;  %v4804_v59 = vcombine.low %v9031_v58, %v9030_v7  ;;  %v6248_v43 = vld [vmem:[%s8803_s1 + $0x310] sm:$0xff]  }
  0xa5   :  { %3678 = vmatprep.mubr.bf16.mxu1 %v9029_v57  ;;  %5618 = vmatpush3.bf16.msra.mxu1 %v6242_v54  ;;  %v9032_v54 = vshll.u32 %v7273_v53, 16  ;;  %v6250_v39 = vld [vmem:[%s8803_s1 + $0x390] sm:$0xff]  }
  0xa6   :  { %5619 = vmatprep.subr.bf16.mxu1 %v6245_v6  ;;  %v6251_v6 = vld [vmem:[%s8803_s1 + $0x358] sm:$0xff]  }
  0xa7   :  { %v387_v57 = vrot.slane %v9032_v54, 1  ;;  %5556 = vmatpush3.bf16.msra.mxu0 %v6244_v9  ;;  %v9034_v54 = vld [vmem:[#allocation28_spill] sm:$0xff]  ;;  %v9035_v9 = vshrl.u32 %v7273_v53, 16 }
  0xa8   :  { %5557 = vmatprep.subr.bf16.mxu0 %v6247_v63  ;;  %v6252_v63 = vld [vmem:[%s8803_s1 + $0x318] sm:$0xff]  }
  0xa9   :  { %5620 = vmatpush3.bf16.msra.mxu1 %v6246_v3  ;;  %v7435_v3 = vor.u32 %v387_v57, %v9035_v9  ;;  %v9036_v57 = vld [vmem:[#allocation23_spill] sm:$0xff] }
  0xaa   :  { %5621 = vmatprep.subr.bf16.mxu1 %v6249_v40  ;;  %3582 = vmatmul.mubr.bf16.gmra.mrb[68].mxu0 %v4804_v59  ;;  %v6254_v40 = vld [vmem:[%s8803_s1 + $0x398] sm:$0xff]   ;;  %v9037_v59 = vld [vmem:[#allocation15_spill] sm:$0xff] }
  0xab   :  { %3589 = vmatprep.mubr.bf16.mxu0 %v7032_v60  ;;  %5558 = vmatpush3.bf16.msra.mxu0 %v6248_v43  ;;  %v6257_v60 = vld [vmem:[%s8803_s1 + $0x3e0] sm:$0xff]   ;;  %v4821_v9 = vcombine.low %v9037_v59, %v9036_v57  ;;  %v365_v43 = vrot.slane %v9039_v50, 2  ;;  %v6261_v50 = vld [vmem:[%s8803_s1 + $0x3e8] sm:$0xff]   ;;  %v655_v59 = vshrl.u32 %v6683_v61, 16 }
  0xac   :  { %3679 = vmatmul.mubr.bf16.gmra.mrb[68].mxu1 %v9033_v23  ;;  %v6255_v23 = vld [vmem:[%s8803_s1 + $0x360] sm:$0xff]   ;;  %5559 = vmatprep.subr.bf16.mxu0 %v6251_v6 }
  0xad   :  { %3686 = vmatprep.mubr.bf16.mxu1 %v9034_v54  ;;  %5622 = vmatpush3.bf16.msra.mxu1 %v6250_v39  ;;  %v9038_v54 = vshrl.u32 %v7093_v34, 16  ;;  %v6256_v39 = vld [vmem:[%s8803_s1 + $0x320] sm:$0xff]   ;;  %v6259_v34 = vld [vmem:[%s8803_s1 + $0x368] sm:$0xff]  }
  0xae   :  { %5623 = vmatprep.subr.bf16.mxu1 %v6253_v56  ;;  %v7460_v56 = vcombine.low %v7242_v8, %v7435_v3  ;;  %v6258_v6 = vld [vmem:[%s8803_s1 + $0x3a0] sm:$0xff]  }
  0xaf   :  { %v364_v12 = vrot.slane %v9038_v54, 1  ;;  %5560 = vmatpush3.bf16.msra.mxu0 %v6252_v63  ;;  %v9041_v54 = vld [vmem:[#allocation31_spill] sm:$0xff]  ;;  %v627_v63 = vshrl.u32 %v6652_v47, 16  ;;  %v6263_v47 = vld [vmem:[%s8803_s1 + $0x370] sm:$0xff]  }
  0xb0   :  { %9040 = vst [vmem:[#allocation30_spill] sm:$0xff] %v7460_v56  ;;  %5561 = vmatprep.subr.bf16.mxu0 %v6255_v23  ;;  %v657_v23 = vshll.u32 %v6683_v61, 16  ;;  %v6267_v61 = vld [vmem:[%s8803_s1 + $0x3f0] sm:$0xff]  }
  0xb1   :  { %5624 = vmatpush3.bf16.msra.mxu1 %v6254_v40  ;;  %v7473_v51 = vor.u32 %v365_v43, %v364_v12  ;;  %v631_v40 = vrot.slane %v629_v36, 1  ;;  %v6262_v12 = vld [vmem:[%s8803_s1 + $0x3a8] sm:$0xff]   ;;  %v4840_v43 = vcombine.low %v7057_v44, %v7253_v2  ;;  %v6269_v44 = vld [vmem:[%s8803_s1 + $0x378] sm:$0xff]  }
  0xb2   :  { %5625 = vmatprep.subr.bf16.mxu1 %v6257_v60  ;;  %3590 = vmatmul.mubr.bf16.gmra.mrb[72].mxu0 %v4821_v9  ;;  %v6260_v60 = vld [vmem:[%s8803_s1 + $0x328] sm:$0xff]  }
  0xb3   :  { %3597 = vmatprep.mubr.bf16.mxu0 %v7118_v20  ;;  %5562 = vmatpush3.bf16.msra.mxu0 %v6256_v39  ;;  %v659_v20 = vrot.slane %v657_v23, 1  ;;  %v9042_v36 = vld [vmem:[#allocation27_spill] sm:$0xff]  ;;  %v6265_v39 = vld [vmem:[%s8803_s1 + $0x330] sm:$0xff]   ;;  %v6271_v23 = vld [vmem:[%s8803_s1 + $0x3f8] sm:$0xff]  }
  0xb4   :  { %3687 = vmatmul.mubr.bf16.gmra.mrb[72].mxu1 %v9041_v54  ;;  %5563 = vmatprep.subr.bf16.mxu0 %v6259_v34  ;;  %v4838_v9 = vcombine.low %v9042_v36, %v7473_v51  ;;  %v7502_v34 = vor.u32 %v631_v40, %v627_v63  ;;  %v699_v54 = vshll.u32 %v9036_v57, 16  ;;  %v9045_v40 = vld [vmem:[#allocation39_spill] sm:$0xff] }
  0xb5   :  { %3694 = vmatprep.mubr.bf16.mxu1 %v7460_v56  ;;  %5626 = vmatpush3.bf16.msra.mxu1 %v6258_v6  ;;  %v6268_v6 = vld [vmem:[%s8803_s1 + $0x3b0] sm:$0xff]  }
  0xb6   :  { %5627 = vmatprep.subr.bf16.mxu1 %v6261_v50  ;;  %9043 = vst [vmem:[#allocation34_spill] sm:$0xff] %v7502_v34  ;;  %v7504_v50 = vor.u32 %v659_v20, %v655_v59  ;;  %v6270_v59 = vld [vmem:[%s8803_s1 + $0x338] sm:$0xff]   ;;  %v9081_v56 = vld [vmem:[#allocation4_spill] sm:$0xff] }
  0xb7   :  { %5564 = vmatpush3.bf16.msra.mxu0 %v6260_v60  ;;  %v697_v60 = vshrl.u32 %v9036_v57, 16  ;;  %v6272_v20 = vld [vmem:[%s8803_s1 + $0x3b8] sm:$0xff]   ;;  %v6278_v57 = vld [vmem:[%s8803_s1 + $0x4c0] sm:$0xff]  }
  0xb8   :  { %9044 = vst [vmem:[#allocation41_spill] sm:$0xff] %v7504_v50  ;;  %5565 = vmatprep.subr.bf16.mxu0 %v6263_v47  ;;  %v725_v47 = vshrl.u32 %v9042_v36, 16 }
  0xb9   :  { %5628 = vmatpush3.bf16.msra.mxu1 %v6262_v12  ;;  %v701_v12 = vrot.slane %v699_v54, 1  ;;  %v8899_v54 = vshll.u32 %v7371_v32, 16 }
  0xba   :  { %5629 = vmatprep.subr.bf16.mxu1 %v6267_v61  ;;  %3598 = vmatmul.mubr.bf16.gmra.mrb[76].mxu0 %v4838_v9  ;;  %v727_v61 = vshll.u32 %v9042_v36, 16 }
  0xbb   :  { %3605 = vmatprep.mubr.bf16.mxu0 %v7070_v41  ;;  %5566 = vmatpush3.bf16.msra.mxu0 %v6265_v39  ;;  %v6276_v41 = vld [vmem:[%s8803_s1 + $0x440] sm:$0xff]   ;;  %v6306_v39 = vld [vmem:[%s8803_s1 + $0x4b0] sm:$0xff]  }
  0xbc   :  { %3695 = vmatmul.mubr.bf16.gmra.mrb[76].mxu1 %v4840_v43  ;;  %5567 = vmatprep.subr.bf16.mxu0 %v6269_v44  ;;  %v729_v9 = vrot.slane %v727_v61, 1  ;;  %v7532_v43 = vor.u32 %v701_v12, %v697_v60  ;;  %v9049_v44 = vld [vmem:[#allocation36_spill] sm:$0xff]  ;;  %v9053_v60 = vshrl.u32 %v7184_v10, 16 }
  0xbd   :  { %3702 = vmatprep.mubr.bf16.mxu1 %v9045_v40  ;;  %5630 = vmatpush3.bf16.msra.mxu1 %v6268_v6  ;;  %v9048_v6 = vcombine.low %v6809_v14, %v6865_v15  ;;  %v394_v40 = vrot.slane %v8899_v54, 1  ;;  %v9051_v14 = vld [vmem:[#allocation47_spill] sm:$0xff] }
  0xbe   :  { %5631 = vmatprep.subr.bf16.mxu1 %v6271_v23  ;;  %9046 = vst [vmem:[#allocation10_spill] sm:$0xff] %v7532_v43  ;;  %v7534_v36 = vor.u32 %v729_v9, %v725_v47  ;;  %v4880_v23 = vcombine.low %v9049_v44, %v6923_v4  ;;  %v367_v12 = vrot.slane %v9053_v60, 1  ;;  %v9054_v47 = vshll.u32 %v7184_v10, 16  ;;  %v6279_v9 = vld [vmem:[%s8803_s1 + $0x480] sm:$0xff]   ;;  %v9059_v60 = vld [vmem:[#allocation19_spill] sm:$0xff] }
  0xbf   :  { %5568 = vmatpush3.bf16.msra.mxu0 %v6270_v59  ;;  %v8900_v59 = vshrl.u32 %v7371_v32, 16  ;;  %v4916_v10 = vcombine.low %v7159_v55, %v7361_v17  ;;  %v6280_v55 = vld [vmem:[%s8803_s1 + $0x448] sm:$0xff]  }
  0xc0   :  { %9047 = vst [vmem:[#allocation2_spill] sm:$0xff] %v7534_v36  ;;  %5681 = vmatprep.subr.bf16.mxu0 %v6276_v41  ;;  %v368_v61 = vrot.slane %v9054_v47, 2 }
  0xc1   :  { %5632 = vmatpush3.bf16.msra.mxu1 %v6272_v20  ;;  %v7555_v15 = vor.u32 %v394_v40, %v8900_v59  ;;  %v9056_v20 = vld [vmem:[#allocation48_spill] sm:$0xff]  ;;  %v6281_v40 = vld [vmem:[%s8803_s1 + $0x408] sm:$0xff]   ;;  %v930_v59 = vshll.u32 %v6996_v30, 16 }
  0xc2   :  { %5745 = vmatprep.subr.bf16.mxu1 %v6278_v57  ;;  %3606 = vmatmul.mubr.bf16.gmra.mrb[80].mxu0 %v9048_v6  ;;  %v9057_v57 = vld [vmem:[#allocation11_spill] sm:$0xff]  ;;  %v713_v6 = vshll.u32 %v9003_v48, 16 }
  0xc3   :  { %3613 = vmatprep.mubr.bf16.mxu0 %v7078_v16  ;;  %9050 = vst [vmem:[#allocation3_spill] sm:$0xff] %v7555_v15 }
  0xc4   :  { %3703 = vmatmul.mubr.bf16.gmra.mrb[80].mxu1 %v6965_v45  ;;  %v9052_v45 = vld [vmem:[#allocation42_spill] sm:$0xff] }
  0xc5   :  { %3710 = vmatprep.mubr.bf16.mxu1 %v6986_v46  ;;  %v4897_v16 = vcombine.low %v9052_v45, %v9051_v14 }
  0xca   :  { %3614 = vmatmul.mubr.bf16.gmra.mrb[84].mxu0 %v4880_v23  ;;  %v9058_v23 = vld [vmem:[#allocation12_spill] sm:$0xff] }
  0xcb   :  { %3621 = vmatprep.mubr.bf16.mxu0 %v7098_v13  ;;  %v7568_v13 = vor.u32 %v368_v61, %v367_v12  ;;  %v683_v12 = vshrl.u32 %v6743_v49, 16  ;;  %v711_v61 = vshrl.u32 %v9003_v48, 16  ;;  %v6285_v48 = vld [vmem:[%s8803_s1 + $0x410] sm:$0xff]  }
  0xcc   :  { %3711 = vmatmul.mubr.bf16.gmra.mrb[84].mxu1 %v7044_v24  ;;  %v7565_v24 = vcombine.low %v7355_v5, %v7555_v15 }
  0xcd   :  { %3718 = vmatprep.mubr.bf16.mxu1 %v7052_v11  ;;  %v4914_v41 = vcombine.low %v9056_v20, %v7568_v13 }
  0xce   :  { %9055 = vst [vmem:[#allocation5_spill] sm:$0xff] %v7565_v24 }
  0xd2   :  { %3622 = vmatmul.mubr.bf16.gmra.mrb[88].mxu0 %v4897_v16  ;;  %v6283_v16 = vld [vmem:[%s8803_s1 + $0x488] sm:$0xff]  }
  0xd3   :  { %3629 = vmatprep.mubr.bf16.mxu0 %v7208_v28  ;;  %v685_v28 = vshll.u32 %v6743_v49, 16  ;;  %v9061_v49 = vshll.u32 %v7273_v53, 16 }
  0xd4   :  { %3719 = vmatmul.mubr.bf16.gmra.mrb[88].mxu1 %v7102_v31  ;;  %v6277_v31 = vld [vmem:[%s8803_s1 + $0x400] sm:$0xff]  }
  0xd5   :  { %3726 = vmatprep.mubr.bf16.mxu1 %v7565_v24  ;;  %v687_v47 = vrot.slane %v685_v28, 1  ;;  %v6287_v28 = vld [vmem:[%s8803_s1 + $0x490] sm:$0xff]  }
  0xda   :  { %3630 = vmatmul.mubr.bf16.gmra.mrb[92].mxu0 %v4914_v41  ;;  %v6284_v41 = vld [vmem:[%s8803_s1 + $0x450] sm:$0xff]  }
  0xdb   :  { %3767 = vmatprep.mubr.bf16.mxu0 %v9057_v57 }
  0xdc   :  { %3727 = vmatmul.mubr.bf16.gmra.mrb[92].mxu1 %v4916_v10  ;;  %v6286_v10 = vld [vmem:[%s8803_s1 + $0x4d0] sm:$0xff]  }
  0xdd   :  { %3864 = vmatprep.mubr.bf16.mxu1 %v7129_v35  ;;  %v6282_v35 = vld [vmem:[%s8803_s1 + $0x4c8] sm:$0xff]  }
  0xe2   :  { %3768 = vmatmul.mubr.bf16.vlgmr.msra.gmra.mrb[96].mxu0 %v9058_v23  ;;  %v741_v23 = vshll.u32 %v7242_v8, 16 }
  0xe3   :  { %3775 = vmatprep.mubr.bf16.mxu0 %v9059_v60  ;;  %5682 = vmatpush3.bf16.msra.mxu0 %v6277_v31  ;;  %v399_v31 = vrot.slane %v9061_v49, 2  ;;  %v7637_v60 = vld [vmem:[%s8804_s0 + $0x50] sm:$0xf] }
  0xe4   :  { %3865 = vmatmul.mubr.bf16.vlgmr.msra.gmra.mrb[96].mxu1 %v6950_v22  ;;  %v715_v22 = vrot.slane %v713_v6, 1  ;;  %5683 = vmatprep.subr.bf16.mxu0 %v6280_v55  ;;  %v6288_v55 = vld [vmem:[%s8803_s1 + $0x458] sm:$0xff]  }
  0xe5   :  { %3872 = vmatprep.mubr.bf16.mxu1 %v7173_v29  ;;  %5746 = vmatpush3.bf16.msra.mxu1 %v6279_v9  ;;  %v9060_v29 = vshrl.u32 %v7273_v53, 16  ;;  %v7620_v9 = vor.u32 %v687_v47, %v683_v12  ;;  %v9065_v47 = vld [vmem:[#allocation29_spill] sm:$0xff] }
  0xe6   :  { %5747 = vmatprep.subr.bf16.mxu1 %v6282_v35  ;;  %v7622_v6 = vor.u32 %v715_v22, %v711_v61  ;;  %v6290_v35 = vld [vmem:[%s8803_s1 + $0x4d8] sm:$0xff]  }
  0xe7   :  { %v398_v57 = vrot.slane %v9060_v29, 1  ;;  %5684 = vmatpush3.bf16.msra.mxu0 %v6281_v40  ;;  %9062 = vst [vmem:[#allocation13_spill] sm:$0xff] %v7620_v9  ;;  %v769_v40 = vshll.u32 %v7435_v3, 16  ;;  %v6289_v22 = vld [vmem:[%s8803_s1 + $0x418] sm:$0xff]   ;;  %v743_v29 = vrot.slane %v741_v23, 1  ;;  %v9067_v23 = vld [vmem:[#allocation32_spill] sm:$0xff] }
  0xe8   :  { %9063 = vst [vmem:[#allocation8_spill] sm:$0xff] %v7622_v6  ;;  %5685 = vmatprep.subr.bf16.mxu0 %v6284_v41  ;;  %v6292_v41 = vld [vmem:[%s8803_s1 + $0x460] sm:$0xff]  }
  0xe9   :  { %5748 = vmatpush3.bf16.msra.mxu1 %v6283_v16  ;;  %v9064_v16 = vld [vmem:[#allocation22_spill] sm:$0xff]  ;;  %v7643_v61 = vor.u32 %v399_v31, %v398_v57  ;;  %v767_v57 = vshrl.u32 %v7435_v3, 16  ;;  %v771_v49 = vrot.slane %v769_v40, 1  ;;  %v7682_v40 = vrot.slane %v7273_v53, 1  ;;  %v6300_v53 = vld [vmem:[%s8803_s1 + $0x470] sm:$0xff]  }
  0xea   :  { %5749 = vmatprep.subr.bf16.mxu1 %v6286_v10  ;;  %3776 = vmatmul.mubr.bf16.gmra.mrb[100].mxu0 %v9064_v16  ;;  %v739_v10 = vshrl.u32 %v7242_v8, 16  ;;  %v4844_v16 = vcombine.low %v7253_v2, %v7637_v60  ;;  %v6295_v8 = vld [vmem:[%s8803_s1 + $0x4a0] sm:$0xff]   ;;  %v6298_v2 = vld [vmem:[%s8803_s1 + $0x4e8] sm:$0xff]  }
  0xeb   :  { %3783 = vmatprep.mubr.bf16.mxu0 %v9065_v47  ;;  %5686 = vmatpush3.bf16.msra.mxu0 %v6285_v48  ;;  %v4842_v31 = vcombine.low %v7473_v51, %v7643_v61  ;;  %v6293_v48 = vld [vmem:[%s8803_s1 + $0x420] sm:$0xff]  }
  0xec   :  { %3873 = vmatmul.mubr.bf16.gmra.mrb[100].mxu1 %v9001_v42  ;;  %v6291_v42 = vld [vmem:[%s8803_s1 + $0x498] sm:$0xff]   ;;  %5687 = vmatprep.subr.bf16.mxu0 %v6288_v55  ;;  %v7675_v55 = vor.u32 %v743_v29, %v739_v10  ;;  %v7701_v10 = vld [vmem:[%s8805_s2] ss:$0 sm:$0xff] }
  0xed   :  { %3880 = vmatprep.mubr.bf16.mxu1 %v7222_v25  ;;  %5750 = vmatpush3.bf16.msra.mxu1 %v6287_v28  ;;  %v6294_v25 = vld [vmem:[%s8803_s1 + $0x4e0] sm:$0xff]   ;;  %v6296_v28 = vld [vmem:[%s8803_s1 + $0x468] sm:$0xff]  }
  0xee   :  { %5751 = vmatprep.subr.bf16.mxu1 %v6290_v35  ;;  %9066 = vst [vmem:[#allocation9_spill] sm:$0xff] %v7675_v55  ;;  %v7677_v35 = vor.u32 %v771_v49, %v767_v57  ;;  %v4841_v49 = vcombine.low %v7198_v62, %v7682_v40 }
  0xef   :  { %5688 = vmatpush3.bf16.msra.mxu0 %v6289_v22  ;;  %v6297_v22 = vld [vmem:[%s8803_s1 + $0x428] sm:$0xff]  }
  0xf0   :  { %5689 = vmatprep.subr.bf16.mxu0 %v6292_v41 }
  0xf1   :  { %5752 = vmatpush3.bf16.msra.mxu1 %v6291_v42  ;;  %v6299_v42 = vld [vmem:[%s8803_s1 + $0x4a8] sm:$0xff]  }
  0xf2   :  { %5753 = vmatprep.subr.bf16.mxu1 %v6294_v25  ;;  %3784 = vmatmul.mubr.bf16.gmra.mrb[104].mxu0 %v9067_v23  ;;  %v6305_v25 = vld [vmem:[%s8803_s1 + $0x4f0] sm:$0xff]  }
  0xf3   :  { %3791 = vmatprep.mubr.bf16.mxu0 %v4842_v31  ;;  %5690 = vmatpush3.bf16.msra.mxu0 %v6293_v48  ;;  %v6304_v23 = vld [vmem:[%s8803_s1 + $0x430] sm:$0xff]  }
  0xf4   :  { %3881 = vmatmul.mubr.bf16.gmra.mrb[104].mxu1 %v7025_v52  ;;  %5691 = vmatprep.subr.bf16.mxu0 %v6296_v28 }
  0xf5   :  { %3888 = vmatprep.mubr.bf16.mxu1 %v4844_v16  ;;  %5754 = vmatpush3.bf16.msra.mxu1 %v6295_v8  ;;  %v5185_v41 = vpop.f32.mrb[0].mxu0 }
  0xf6   :  { %5755 = vmatprep.subr.bf16.mxu1 %v6298_v2  ;;  %v5186_v29 = vpop.f32.mrb[1].mxu0 }
  0xf7   :  { %v5249_v52 = vpop.f32.mrb[0].mxu1  ;;  %v5187_v31 = vadd.f32 %v5186_v29, %v5185_v41  ;;  %v5188_v16 = vpop.f32.mrb[2].mxu0  ;;  %5692 = vmatpush3.bf16.msra.mxu0 %v6297_v22  ;;  %v6307_v41 = vld [vmem:[%s8803_s1 + $0x478] sm:$0xff]  }
  0xf8   :  { %v5250_v57 = vpop.f32.mrb[1].mxu1  ;;  %v5189_v28 = vpop.f32.mrb[3].mxu0  ;;  %5693 = vmatprep.subr.bf16.mxu0 %v6300_v53  ;;  %v6309_v22 = vld [vmem:[%s8803_s1 + $0x4f8] sm:$0xff]   ;;  %v9068_v53 = vld [vmem:[#allocation40_spill] sm:$0xff] }
  0xf9   :  { %v5251_v48 = vadd.f32 %v5250_v57, %v5249_v52  ;;  %v5252_v8 = vpop.f32.mrb[2].mxu1  ;;  %5756 = vmatpush3.bf16.msra.mxu1 %v6299_v42  ;;  %v3188_v47 = vadd.f32 %v5187_v31, %v7701_v10  ;;  %v5190_v12 = vadd.f32 %v5189_v28, %v5188_v16  ;;  %v874_v42 = vshll.u32 %v6913_v26, 16 }
  0xfa   :  { %v5253_v2 = vpop.f32.mrb[3].mxu1  ;;  %5757 = vmatprep.subr.bf16.mxu1 %v6305_v25  ;;  %3792 = vmatmul.mubr.bf16.gmra.mrb[108].mxu0 %v4841_v49  ;;  %v902_v52 = vshll.u32 %v9019_v0, 16  ;;  %v6308_v25 = vld [vmem:[%s8803_s1 + $0x438] sm:$0xff]  }
  0xfb   :  { %v5254_v63 = vadd.f32 %v5253_v2, %v5252_v8  ;;  %v3191_v29 = vadd.f32 %v5190_v12, %v7701_v10  ;;  %v7722_v57 = vadd.f32 %v5251_v48, %v3188_v47  ;;  %3799 = vmatprep.mubr.bf16.mxu0 %v9068_v53  ;;  %5694 = vmatpush3.bf16.msra.mxu0 %v6304_v23  ;;  %v872_v48 = vshrl.u32 %v6913_v26, 16  ;;  %v39_v2 = vld [vmem:[%s8804_s0 + $0x54] sm:$0x3] }
  0xfc   :  { %3889 = vmatmul.mubr.bf16.gmra.mrb[108].mxu1 %v7296_v19  ;;  %v6310_v19 = vld [vmem:[%s8803_s1 + $0x4b8] sm:$0xff]   ;;  %5695 = vmatprep.subr.bf16.mxu0 %v6307_v41  ;;  %v876_v8 = vrot.slane %v874_v42, 1  ;;  %v904_v28 = vrot.slane %v902_v52, 1  ;;  %v958_v26 = vshll.u32 %v7004_v21, 16  ;;  %v7749_v24 = vcombine.low %v7637_v60, %v39_v2 }
  0xfd   :  { %3896 = vmatprep.mubr.bf16.mxu1 %v7312_v33  ;;  %5758 = vmatpush3.bf16.msra.mxu1 %v6306_v39  ;;  %v7732_v49 = vadd.f32 %v5254_v63, %v3191_v29  ;;  %v5191_v31 = vpop.f32.mrb[4].mxu0  ;;  %v6311_v33 = vld [vmem:[%s8803_s1 + $0x540] sm:$0xff]   ;;  %v900_v63 = vshrl.u32 %v9019_v0, 16  ;;  %v9072_v60 = vshll.u32 %v7371_v32, 16  ;;  %v956_v2 = vshrl.u32 %v7004_v21, 16 }
  0xfe   :  { %5759 = vmatprep.subr.bf16.mxu1 %v6309_v22  ;;  %v6313_v39 = vld [vmem:[%s8803_s1 + $0x5c0] sm:$0xff]   ;;  %v5192_v47 = vpop.f32.mrb[5].mxu0 }
  0xff   :  { %v5255_v12 = vpop.f32.mrb[4].mxu1  ;;  %v5193_v23 = vadd.f32 %v5192_v47, %v5191_v31  ;;  %v5194_v41 = vpop.f32.mrb[6].mxu0  ;;  %5696 = vmatpush3.bf16.msra.mxu0 %v6308_v25  ;;  %v9069_v31 = vld [vmem:[#allocation43_spill] sm:$0xff]  ;;  %v9070_v25 = vshrl.u32 %v7371_v32, 16  ;;  %v7757_v47 = vor.u32 %v904_v28, %v900_v63 }
 0x100   :  { %v5256_v16 = vpop.f32.mrb[5].mxu1  ;;  %v5195_v53 = vpop.f32.mrb[7].mxu0  ;;  %5809 = vmatprep.subr.bf16.mxu0 %v6311_v33  ;;  %v402_v33 = vrot.slane %v9072_v60, 2 }
 0x101   :  { %v5257_v22 = vadd.f32 %v5256_v16, %v5255_v12  ;;  %v5258_v29 = vpop.f32.mrb[6].mxu1  ;;  %5760 = vmatpush3.bf16.msra.mxu1 %v6310_v19  ;;  %v3196_v42 = vadd.f32 %v5193_v23, %v7701_v10  ;;  %v5196_v0 = vadd.f32 %v5195_v53, %v5194_v41  ;;  %v401_v19 = vrot.slane %v9070_v25, 1 }
 0x102   :  { %v5259_v54 = vpop.f32.mrb[7].mxu1  ;;  %5873 = vmatprep.subr.bf16.mxu1 %v6313_v39  ;;  %3800 = vmatmul.mubr.bf16.gmra.mrb[112].mxu0 %v9069_v31  ;;  %v7755_v12 = vor.u32 %v876_v8, %v872_v48  ;;  %v932_v39 = vrot.slane %v930_v59, 1  ;;  %v960_v48 = vrot.slane %v958_v26, 1  ;;  %v9074_v26 = vld [vmem:[#allocation7_spill] sm:$0xff] }
 0x103   :  { %v5260_v52 = vadd.f32 %v5259_v54, %v5258_v29  ;;  %v3199_v16 = vadd.f32 %v5196_v0, %v7701_v10  ;;  %v7760_v23 = vadd.f32 %v5257_v22, %v3196_v42  ;;  %v9071_v54 = vld [vmem:[#allocation46_spill] sm:$0xff]  ;;  %v601_v25 = vshll.u32 %v9074_v26, 16 }
 0x104   :  { %3897 = vmatmul.mubr.bf16.gmra.mrb[112].mxu1 %v7067_v18  ;;  %3807 = vmatprep.mubr.bf16.mxu0 %v9071_v54  ;;  %v928_v18 = vshrl.u32 %v6996_v30, 16  ;;  %v7773_v30 = vor.u32 %v402_v33, %v401_v19  ;;  %v615_v19 = vshll.u32 %v9031_v58, 16  ;;  %v643_v33 = vshll.u32 %v9030_v7, 16 }
 0x105   :  { %3904 = vmatprep.mubr.bf16.mxu1 %v7327_v38  ;;  %v7770_v63 = vadd.f32 %v5260_v52, %v3199_v16  ;;  %v5197_v28 = vpop.f32.mrb[8].mxu0  ;;  %v7778_v52 = vor.u32 %v960_v48, %v956_v2  ;;  %v986_v16 = vshll.u32 %v7355_v5, 16  ;;  %v9077_v2 = vshll.u32 %v7749_v24, 16 }
 0x106   :  { %v5198_v22 = vpop.f32.mrb[9].mxu0  ;;  %v7776_v54 = vor.u32 %v932_v39, %v928_v18  ;;  %v613_v39 = vshrl.u32 %v9031_v58, 16  ;;  %v617_v11 = vrot.slane %v615_v19, 1 }
 0x107   :  { %9073 = vst [vmem:[#allocation23_spill] sm:$0xff] %v7770_v63  ;;  %v5261_v41 = vpop.f32.mrb[8].mxu1  ;;  %v5199_v53 = vadd.f32 %v5198_v22, %v5197_v28  ;;  %v5200_v42 = vpop.f32.mrb[10].mxu0  ;;  %9075 = vst [vmem:[#allocation31_spill] sm:$0xff] %v7778_v52  ;;  %v1014_v28 = vshll.u32 %v7555_v15, 16  ;;  %v421_v48 = vrot.slane %v9077_v2, 1 }
 0x108   :  { %v5262_v29 = vpop.f32.mrb[9].mxu1  ;;  %v5201_v59 = vpop.f32.mrb[11].mxu0  ;;  %v9082_v52 = vld [vmem:[#allocation16_spill] sm:$0xff] }
 0x109   :  { %v5263_v0 = vadd.f32 %v5262_v29, %v5261_v41  ;;  %v5264_v31 = vpop.f32.mrb[10].mxu1  ;;  %v3204_v60 = vadd.f32 %v5199_v53, %v7701_v10  ;;  %v5202_v8 = vadd.f32 %v5201_v59, %v5200_v42  ;;  %v9076_v41 = vld [vmem:[#allocation49_spill] sm:$0xff]  ;;  %v9079_v53 = vld [vmem:[#allocation51_spill] sm:$0xff]  ;;  %v599_v42 = vshrl.u32 %v9074_v26, 16 }
 0x10a   :  { %v5265_v21 = vpop.f32.mrb[11].mxu1  ;;  %3808 = vmatmul.mubr.bf16.gmra.mrb[116].mxu0 %v9076_v41  ;;  %v984_v59 = vshrl.u32 %v7355_v5, 16  ;;  %v641_v26 = vshrl.u32 %v9030_v7, 16  ;;  %v636_v58 = vshll.u32 %v9082_v52, 16 }
 0x10b   :  { %v5266_v38 = vadd.f32 %v5265_v21, %v5264_v31  ;;  %v3207_v22 = vadd.f32 %v5202_v8, %v7701_v10  ;;  %v7793_v29 = vadd.f32 %v5263_v0, %v3204_v60  ;;  %3815 = vmatprep.mubr.bf16.mxu0 %v9079_v53  ;;  %v603_v31 = vrot.slane %v601_v25, 1 }
 0x10c   :  { %3905 = vmatmul.mubr.bf16.gmra.mrb[116].mxu1 %v7080_v37  ;;  %v62_v37 = vld [vmem:[%s8804_s0 + $0xb0] sm:$0xf]  ;;  %v988_v21 = vrot.slane %v986_v16, 1  ;;  %v4918_v0 = vcombine.low %v7568_v13, %v7773_v30  ;;  %v1012_v60 = vshrl.u32 %v7555_v15, 16  ;;  %v645_v25 = vrot.slane %v643_v33, 1 }
 0x10d   :  { %9078 = vst [vmem:[#allocation27_spill] sm:$0xff] %v7793_v29  ;;  %3912 = vmatprep.mubr.bf16.mxu1 %v7347_v27  ;;  %v7802_v41 = vadd.f32 %v5266_v38, %v3207_v22  ;;  %v5203_v2 = vpop.f32.mrb[12].mxu0  ;;  %v1016_v27 = vrot.slane %v1014_v28, 1  ;;  %v4920_v46 = vcombine.low %v7361_v17, %v62_v37  ;;  %v7812_v28 = vrot.slane %v7371_v32, 1  ;;  %v63_v17 = vld [vmem:[%s8804_s0 + $0xb4] sm:$0x3] }
 0x10e   :  { %v5204_v53 = vpop.f32.mrb[13].mxu0  ;;  %v604_v15 = vor.u32 %v603_v31, %v599_v42  ;;  %v7815_v19 = vor.u32 %v988_v21, %v984_v59  ;;  %v618_v32 = vor.u32 %v617_v11, %v613_v39  ;;  %v7825_v42 = vor.u32 %v645_v25, %v641_v26  ;;  %v9087_v59 = vld [vmem:[#allocation15_spill] sm:$0xff] }
 0x10f   :  { %9080 = vst [vmem:[#allocation39_spill] sm:$0xff] %v7802_v41  ;;  %v5267_v8 = vpop.f32.mrb[12].mxu1  ;;  %v5205_v5 = vadd.f32 %v5204_v53, %v5203_v2  ;;  %v5206_v16 = vpop.f32.mrb[14].mxu0  ;;  %v608_v41 = vshll.u32 %v9081_v56, 16  ;;  %v606_v31 = vshrl.u32 %v9081_v56, 16  ;;  %v671_v21 = vshll.u32 %v9087_v59, 16 }
 0x110   :  { %v5268_v18 = vpop.f32.mrb[13].mxu1  ;;  %v5207_v29 = vpop.f32.mrb[15].mxu0  ;;  %9083 = vst [vmem:[#allocation36_spill] sm:$0xff] %v7815_v19  ;;  %9086 = vst [vmem:[#allocation42_spill] sm:$0xff] %v7825_v42  ;;  %v634_v11 = vshrl.u32 %v9082_v52, 16  ;;  %v9089_v39 = vshrl.u32 %v7749_v24, 16 }
 0x111   :  { %v5269_v38 = vadd.f32 %v5268_v18, %v5267_v8  ;;  %v5270_v22 = vpop.f32.mrb[14].mxu1  ;;  %v3212_v7 = vadd.f32 %v5205_v5, %v7701_v10  ;;  %v5208_v33 = vadd.f32 %v5207_v29, %v5206_v16  ;;  %v7821_v18 = vor.u32 %v1016_v27, %v1012_v60  ;;  %v9085_v8 = vld [vmem:[#allocation54_spill] sm:$0xff] }
 0x112   :  { %v5271_v63 = vpop.f32.mrb[15].mxu1  ;;  %3816 = vmatmul.mubr.bf16.gmra.mrb[120].mxu0 %v9085_v8  ;;  %v610_v53 = vrot.slane %v608_v41, 1  ;;  %v7834_v27 = vcombine.low %v62_v37, %v63_v17  ;;  %v7839_v56 = vor.u32 %v421_v48, %v9089_v39  ;;  %v9092_v41 = vld [vmem:[#allocation17_spill] sm:$0xff]  ;;  %v4795_v37 = vcombine.low %v604_v15, %v7502_v34 }
 0x113   :  { %v5272_v2 = vadd.f32 %v5271_v63, %v5270_v22  ;;  %9084 = vst [vmem:[#allocation47_spill] sm:$0xff] %v7821_v18  ;;  %v3215_v29 = vadd.f32 %v5208_v33, %v7701_v10  ;;  %v7830_v63 = vadd.f32 %v5269_v38, %v3212_v7  ;;  %3823 = vmatprep.mubr.bf16.mxu0 %v4918_v0  ;;  %v9091_v0 = vld [vmem:[#allocation26_spill] sm:$0xff]  ;;  %v664_v16 = vshll.u32 %v9092_v41, 16  ;;  %v9093_v7 = vld [vmem:[#allocation20_spill] sm:$0xff] }
 0x114   :  { %3913 = vmatmul.mubr.bf16.gmra.mrb[120].mxu1 %v7108_v1  ;;  %v638_v1 = vrot.slane %v636_v58, 1  ;;  %v669_v52 = vshrl.u32 %v9087_v59, 16  ;;  %v673_v58 = vrot.slane %v671_v21, 1  ;;  %v692_v33 = vshll.u32 %v9093_v7, 16 }
 0x115   :  { %9088 = vst [vmem:[#allocation48_spill] sm:$0xff] %v7830_v63  ;;  %3920 = vmatprep.mubr.bf16.mxu1 %v4920_v46  ;;  %v7841_v26 = vadd.f32 %v5272_v2, %v3215_v29  ;;  %v5209_v25 = vpop.f32.mrb[16].mxu0  ;;  %v4917_v46 = vcombine.low %v9091_v0, %v7812_v28  ;;  %v4797_v29 = vcombine.low %v618_v32, %v7825_v42  ;;  %v662_v15 = vshrl.u32 %v9092_v41, 16  ;;  %v9096_v63 = vld [vmem:[#allocation21_spill] sm:$0xff] }
 0x116   :  { %v5210_v38 = vpop.f32.mrb[17].mxu0  ;;  %v7850_v39 = vor.u32 %v610_v53, %v606_v31  ;;  %v7853_v18 = vor.u32 %v638_v1, %v634_v11  ;;  %v755_v59 = vshll.u32 %v7473_v51, 16  ;;  %v7859_v32 = vor.u32 %v673_v58, %v669_v52 }
 0x117   :  { %9090 = vst [vmem:[#allocation11_spill] sm:$0xff] %v7841_v26  ;;  %v5273_v5 = vpop.f32.mrb[16].mxu1  ;;  %v5211_v48 = vadd.f32 %v5210_v38, %v5209_v25  ;;  %v5212_v17 = vpop.f32.mrb[18].mxu0  ;;  %v690_v31 = vshrl.u32 %v9093_v7, 16  ;;  %v694_v53 = vrot.slane %v692_v33, 1  ;;  %v720_v11 = vshll.u32 %v9096_v63, 16 }
 0x118   :  { %v5274_v22 = vpop.f32.mrb[17].mxu1  ;;  %v5213_v60 = vpop.f32.mrb[19].mxu0  ;;  %9095 = vst [vmem:[#allocation12_spill] sm:$0xff] %v7859_v32  ;;  %v4796_v52 = vcombine.low %v7850_v39, %v7853_v18  ;;  %v753_v58 = vshrl.u32 %v7473_v51, 16  ;;  %v757_v7 = vrot.slane %v755_v59, 1  ;;  %v748_v33 = vshll.u32 %v7198_v62, 16 }
 0x119   :  { %v5275_v2 = vadd.f32 %v5274_v22, %v5273_v5  ;;  %v5276_v8 = vpop.f32.mrb[18].mxu1  ;;  %v3220_v21 = vadd.f32 %v5211_v48, %v7701_v10  ;;  %v5214_v25 = vadd.f32 %v5213_v60, %v5212_v17  ;;  %v666_v5 = vrot.slane %v664_v16, 1  ;;  %v9094_v22 = vld [vmem:[#allocation25_spill] sm:$0xff] }
 0x11a   :  { %v5277_v26 = vpop.f32.mrb[19].mxu1  ;;  %3824 = vmatmul.mubr.bf16.gmra.mrb[124].mxu0 %v4917_v46  ;;  %v9097_v60 = vshrl.u32 %v7749_v24, 16  ;;  %v9098_v46 = vshll.u32 %v7749_v24, 16  ;;  %v4814_v39 = vcombine.low %v7859_v32, %v7532_v43  ;;  %v7883_v51 = vor.u32 %v694_v53, %v690_v31  ;;  %v9103_v32 = vld [vmem:[#allocation55_spill] sm:$0xff] }
 0x11b   :  { %v5278_v38 = vadd.f32 %v5277_v26, %v5276_v8  ;;  %v3223_v1 = vadd.f32 %v5214_v25, %v7701_v10  ;;  %v7864_v41 = vadd.f32 %v5275_v2, %v3220_v21  ;;  %3961 = vmatprep.mubr.bf16.mxu0 %v4795_v37  ;;  %v4812_v37 = vcombine.low %v7504_v50, %v7620_v9 }
 0x11c   :  { %3921 = vmatmul.mubr.bf16.gmra.mrb[124].mxu1 %v9094_v22  ;;  %v432_v26 = vrot.slane %v9097_v60, 1  ;;  %v433_v16 = vrot.slane %v9098_v46, 2  ;;  %v7878_v8 = vor.u32 %v666_v5, %v662_v15  ;;  %9100 = vst [vmem:[#allocation22_spill] sm:$0xff] %v7883_v51  ;;  %v718_v59 = vshrl.u32 %v9096_v63, 16  ;;  %v6373_v5 = vld [vmem:[%s8804_s0 + $0x40] sm:$0xf] }
 0x11d   :  { %4058 = vmatprep.mubr.bf16.mxu1 %v4797_v29  ;;  %v7874_v48 = vadd.f32 %v5278_v38, %v3223_v1  ;;  %v5215_v17 = vpop.f32.mrb[20].mxu0  ;;  %v797_v29 = vshll.u32 %v7839_v56, 16  ;;  %v746_v38 = vshrl.u32 %v7198_v62, 16  ;;  %v722_v42 = vrot.slane %v720_v11, 1  ;;  %v6314_v11 = vld [vmem:[%s8803_s1 + $0x580] sm:$0xff]  }
 0x11e   :  { %v5216_v21 = vpop.f32.mrb[21].mxu0  ;;  %v7887_v15 = vor.u32 %v433_v16, %v432_v26  ;;  %v7892_v9 = vcombine.low %v6373_v5, %v6373_v5  ;;  %v7894_v53 = vor.u32 %v757_v7, %v753_v58  ;;  %v750_v63 = vrot.slane %v748_v33, 1  ;;  %v6315_v58 = vld [vmem:[%s8803_s1 + $0x548] sm:$0xff]  }
 0x11f   :  { %9099 = vst [vmem:[#allocation19_spill] sm:$0xff] %v7874_v48  ;;  %v5279_v2 = vpop.f32.mrb[20].mxu1  ;;  %v5217_v22 = vadd.f32 %v5216_v21, %v5215_v17  ;;  %v5218_v1 = vpop.f32.mrb[22].mxu0  ;;  %v795_v62 = vshrl.u32 %v7839_v56, 16  ;;  %v6312_v17 = vld [vmem:[%s8803_s1 + $0x500] sm:$0xff]   ;;  %v799_v21 = vrot.slane %v797_v29, 1 }
 0x120   :  { %v5280_v25 = vpop.f32.mrb[21].mxu1  ;;  %v5219_v43 = vpop.f32.mrb[23].mxu0  ;;  %9101 = vst [vmem:[#allocation29_spill] sm:$0xff] %v7894_v53  ;;  %v6317_v7 = vld [vmem:[%s8803_s1 + $0x5c8] sm:$0xff]   ;;  %v430_v29 = vrot.slane %v7749_v24, 1  ;;  %v776_v24 = vshll.u32 %v7682_v40, 16 }
 0x121   :  { %v5281_v60 = vadd.f32 %v5280_v25, %v5279_v2  ;;  %v5282_v46 = vpop.f32.mrb[22].mxu1  ;;  %v3228_v26 = vadd.f32 %v5217_v22, %v7701_v10  ;;  %v5220_v16 = vadd.f32 %v5219_v43, %v5218_v1  ;;  %v9102_v25 = vshll.u32 %v7834_v27, 16 }
 0x122   :  { %v5283_v31 = vpop.f32.mrb[23].mxu1  ;;  %3962 = vmatmul.mubr.bf16.vlgmr.msra.gmra.mrb[128].mxu0 %v9103_v32  ;;  %v783_v43 = vshll.u32 %v7643_v61, 16  ;;  %v7924_v32 = vor.u32 %v722_v42, %v718_v59  ;;  %v4831_v42 = vcombine.low %v7534_v36, %v7894_v53  ;;  %v7939_v59 = vor.u32 %v799_v21, %v795_v62 }
 0x123   :  { %v5284_v2 = vadd.f32 %v5283_v31, %v5282_v46  ;;  %v428_v5 = vrot.slane %v9102_v25, 1  ;;  %v3231_v22 = vadd.f32 %v5220_v16, %v7701_v10  ;;  %v7917_v1 = vadd.f32 %v5281_v60, %v3228_v26  ;;  %3969 = vmatprep.mubr.bf16.mxu0 %v4812_v37  ;;  %5810 = vmatpush3.bf16.msra.mxu0 %v6312_v17  ;;  %v6316_v37 = vld [vmem:[%s8803_s1 + $0x508] sm:$0xff]   ;;  %v6321_v17 = vld [vmem:[%s8803_s1 + $0x5d0] sm:$0xff]  }
 0x124   :  { %4059 = vmatmul.mubr.bf16.vlgmr.msra.gmra.mrb[128].mxu1 %v4796_v52  ;;  %v4813_v46 = vcombine.low %v7878_v8, %v7883_v51  ;;  %v811_v31 = vshll.u32 %v7887_v15, 16  ;;  %v4829_v25 = vcombine.low %v7622_v6, %v7675_v55  ;;  %v7926_v52 = vor.u32 %v750_v63, %v746_v38  ;;  %5811 = vmatprep.subr.bf16.mxu0 %v6315_v58  ;;  %v6319_v63 = vld [vmem:[%s8803_s1 + $0x550] sm:$0xff]  }
 0x125   :  { %9104 = vst [vmem:[#allocation32_spill] sm:$0xff] %v7917_v1  ;;  %4066 = vmatprep.mubr.bf16.mxu1 %v4814_v39  ;;  %5874 = vmatpush3.bf16.msra.mxu1 %v6314_v11  ;;  %v6318_v39 = vld [vmem:[%s8803_s1 + $0x588] sm:$0xff]   ;;  %v7935_v60 = vadd.f32 %v5284_v2, %v3231_v22  ;;  %v5221_v26 = vpop.f32.mrb[24].mxu0  ;;  %v781_v38 = vshrl.u32 %v7643_v61, 16  ;;  %v785_v22 = vrot.slane %v783_v43, 1  ;;  %v774_v33 = vshrl.u32 %v7682_v40, 16 }
 0x126   :  { %5875 = vmatprep.subr.bf16.mxu1 %v6317_v7  ;;  %v5222_v11 = vpop.f32.mrb[25].mxu0  ;;  %v7949_v36 = vshrl.u32 %v430_v29, 16  ;;  %v7951_v62 = vshll.u32 %v430_v29, 16  ;;  %v809_v53 = vshrl.u32 %v7887_v15, 16  ;;  %v813_v55 = vrot.slane %v811_v31, 1  ;;  %v9108_v1 = vld [vmem:[#allocation35_spill] sm:$0xff] }
 0x127   :  { %9105 = vst [vmem:[#allocation40_spill] sm:$0xff] %v7935_v60  ;;  %v5285_v16 = vpop.f32.mrb[24].mxu1  ;;  %v5223_v61 = vadd.f32 %v5222_v11, %v5221_v26  ;;  %v5224_v21 = vpop.f32.mrb[26].mxu0  ;;  %v9106_v6 = vshrl.u32 %v7834_v27, 16  ;;  %v778_v43 = vrot.slane %v776_v24, 1  ;;  %v846_v29 = vshll.u32 %v9108_v1, 16  ;;  %5812 = vmatpush3.bf16.msra.mxu0 %v6316_v37 }
 0x128   :  { %v5286_v2 = vpop.f32.mrb[25].mxu1  ;;  %v5225_v50 = vpop.f32.mrb[27].mxu0  ;;  %v6320_v26 = vld [vmem:[%s8803_s1 + $0x510] sm:$0xff]   ;;  %5813 = vmatprep.subr.bf16.mxu0 %v6319_v63  ;;  %v6323_v24 = vld [vmem:[%s8803_s1 + $0x558] sm:$0xff]   ;;  %v844_v11 = vshrl.u32 %v9108_v1, 16 }
 0x129   :  { %v5287_v58 = vadd.f32 %v5286_v2, %v5285_v16  ;;  %v5288_v7 = vpop.f32.mrb[26].mxu1  ;;  %v7956_v60 = vor.u32 %v428_v5, %v9106_v6  ;;  %5876 = vmatpush3.bf16.msra.mxu1 %v6318_v39  ;;  %v6322_v15 = vld [vmem:[%s8803_s1 + $0x590] sm:$0xff]   ;;  %v3236_v6 = vadd.f32 %v5223_v61, %v7701_v10  ;;  %v5226_v5 = vadd.f32 %v5225_v50, %v5224_v21  ;;  %v6325_v37 = vld [vmem:[%s8803_s1 + $0x5d8] sm:$0xff]  }
 0x12a   :  { %v5289_v34 = vpop.f32.mrb[27].mxu1  ;;  %v860_v16 = vshll.u32 %v9049_v44, 16  ;;  %5877 = vmatprep.subr.bf16.mxu1 %v6321_v17  ;;  %v9109_v39 = vld [vmem:[#allocation56_spill] sm:$0xff]  ;;  %v7978_v50 = vor.u32 %v785_v22, %v781_v38  ;;  %v9111_v63 = vld [vmem:[#allocation33_spill] sm:$0xff]  ;;  %v7985_v21 = vor.u32 %v813_v55, %v809_v53  ;;  %v848_v38 = vrot.slane %v846_v29, 1 }
 0x12b   :  { %9107 = vst [vmem:[#allocation43_spill] sm:$0xff] %v7956_v60  ;;  %v5290_v31 = vadd.f32 %v5289_v34, %v5288_v7  ;;  %3970 = vmatmul.mubr.bf16.gmra.mrb[132].mxu0 %v9109_v39  ;;  %v888_v34 = vshll.u32 %v6923_v4, 16  ;;  %v853_v17 = vshll.u32 %v9111_v63, 16  ;;  %v3239_v2 = vadd.f32 %v5226_v5, %v7701_v10  ;;  %v9114_v7 = vld [vmem:[#allocation37_spill] sm:$0xff] }
 0x12c   :  { %4067 = vmatmul.mubr.bf16.gmra.mrb[132].mxu1 %v4813_v46  ;;  %9110 = vst [vmem:[#allocation46_spill] sm:$0xff] %v7978_v50  ;;  %v7983_v61 = vadd.f32 %v5287_v58, %v3236_v6  ;;  %3977 = vmatprep.mubr.bf16.mxu0 %v4829_v25  ;;  %9113 = vst [vmem:[#allocation49_spill] sm:$0xff] %v7985_v21  ;;  %v881_v39 = vshll.u32 %v9114_v7, 16  ;;  %v806_v46 = vrot.slane %v7951_v62, 1  ;;  %v858_v22 = vshrl.u32 %v9049_v44, 16  ;;  %v6324_v58 = vld [vmem:[%s8803_s1 + $0x518] sm:$0xff]  }
 0x12d   :  { %4074 = vmatprep.mubr.bf16.mxu1 %v4831_v42  ;;  %5814 = vmatpush3.bf16.msra.mxu0 %v6320_v26  ;;  %v6326_v55 = vld [vmem:[%s8803_s1 + $0x598] sm:$0xff]   ;;  %v7997_v53 = vadd.f32 %v5290_v31, %v3239_v2  ;;  %v5227_v25 = vpop.f32.mrb[28].mxu0  ;;  %v7999_v62 = vor.u32 %v778_v43, %v774_v33  ;;  %v862_v1 = vrot.slane %v860_v16, 1  ;;  %v886_v29 = vshrl.u32 %v6923_v4, 16  ;;  %v6327_v44 = vld [vmem:[%s8803_s1 + $0x560] sm:$0xff]  }
 0x12e   :  { %9112 = vst [vmem:[#allocation7_spill] sm:$0xff] %v7983_v61  ;;  %5878 = vmatpush3.bf16.msra.mxu1 %v6322_v15  ;;  %5815 = vmatprep.subr.bf16.mxu0 %v6323_v24  ;;  %v6329_v26 = vld [vmem:[%s8803_s1 + $0x5e0] sm:$0xff]   ;;  %v5228_v15 = vpop.f32.mrb[29].mxu0  ;;  %v890_v5 = vrot.slane %v888_v34, 1  ;;  %v851_v31 = vshrl.u32 %v9111_v63, 16  ;;  %v855_v33 = vrot.slane %v853_v17, 1  ;;  %v4848_v2 = vcombine.low %v7978_v50, %v7985_v21 }
 0x12f   :  { %9115 = vst [vmem:[#allocation51_spill] sm:$0xff] %v7997_v53  ;;  %v5291_v42 = vpop.f32.mrb[28].mxu1  ;;  %5879 = vmatprep.subr.bf16.mxu1 %v6325_v37  ;;  %v879_v43 = vshrl.u32 %v9114_v7, 16  ;;  %v5229_v16 = vadd.f32 %v5228_v15, %v5227_v25  ;;  %v5230_v4 = vpop.f32.mrb[30].mxu0  ;;  %v883_v40 = vrot.slane %v881_v39, 1  ;;  %v8013_v51 = vor.u32 %v806_v46, %v7949_v36  ;;  %v6328_v17 = vld [vmem:[%s8803_s1 + $0x520] sm:$0xff]  }
 0x130   :  { %v5292_v6 = vpop.f32.mrb[29].mxu1  ;;  %v5231_v53 = vpop.f32.mrb[31].mxu0  ;;  %v8015_v48 = vor.u32 %v848_v38, %v844_v11  ;;  %v916_v34 = vshll.u32 %v9052_v45, 16  ;;  %v944_v63 = vshll.u32 %v9051_v14, 16  ;;  %v6330_v7 = vld [vmem:[%s8803_s1 + $0x5a0] sm:$0xff]   ;;  %v6331_v11 = vld [vmem:[%s8803_s1 + $0x568] sm:$0xff]   ;;  %v8036_v25 = vor.u32 %v862_v1, %v858_v22 }
 0x131   :  { %v5293_v24 = vadd.f32 %v5292_v6, %v5291_v42  ;;  %v5294_v37 = vpop.f32.mrb[30].mxu1  ;;  %5816 = vmatpush3.bf16.msra.mxu0 %v6324_v58  ;;  %v3244_v39 = vadd.f32 %v5229_v16, %v7701_v10  ;;  %v5232_v36 = vadd.f32 %v5231_v53, %v5230_v4  ;;  %v6333_v38 = vld [vmem:[%s8803_s1 + $0x5e8] sm:$0xff]   ;;  %v9116_v58 = vld [vmem:[#allocation6_spill] sm:$0xff]  ;;  %v8038_v53 = vor.u32 %v890_v5, %v886_v29  ;;  %v9121_v4 = vld [vmem:[#allocation52_spill] sm:$0xff] }
 0x132   :  { %v5295_v61 = vpop.f32.mrb[31].mxu1  ;;  %5880 = vmatpush3.bf16.msra.mxu1 %v6326_v55  ;;  %5817 = vmatprep.subr.bf16.mxu0 %v6327_v44  ;;  %v9117_v55 = vcombine.low %v7924_v32, %v7926_v52  ;;  %v8048_v15 = vor.u32 %v883_v40, %v879_v43  ;;  %v914_v6 = vshrl.u32 %v9052_v45, 16  ;;  %v918_v16 = vrot.slane %v916_v34, 1  ;;  %v9120_v29 = vld [vmem:[#allocation38_spill] sm:$0xff]  ;;  %v9133_v50 = vld [vmem:[#allocation27_spill] sm:$0xff] }
 0x133   :  { %v5296_v46 = vadd.f32 %v5295_v61, %v5294_v37  ;;  %5881 = vmatprep.subr.bf16.mxu1 %v6329_v26  ;;  %3978 = vmatmul.mubr.bf16.gmra.mrb[136].mxu0 %v9116_v58  ;;  %9118 = vst [vmem:[#allocation4_spill] sm:$0xff] %v8038_v53  ;;  %v8040_v61 = vor.u32 %v855_v33, %v851_v31  ;;  %v942_v22 = vshrl.u32 %v9051_v14, 16  ;;  %v946_v1 = vrot.slane %v944_v63, 1  ;;  %v6334_v31 = vld [vmem:[%s8803_s1 + $0x5a8] sm:$0xff]   ;;  %v6335_v37 = vld [vmem:[%s8803_s1 + $0x570] sm:$0xff]  }
 0x134   :  { %4075 = vmatmul.mubr.bf16.gmra.mrb[136].mxu1 %v9117_v55  ;;  %v3247_v42 = vadd.f32 %v5232_v36, %v7701_v10  ;;  %v8043_v44 = vadd.f32 %v5293_v24, %v3244_v39  ;;  %v9119_v26 = vcombine.low %v7677_v35, %v7939_v59  ;;  %v909_v5 = vshll.u32 %v9120_v29, 16  ;;  %v6332_v10 = vld [vmem:[%s8803_s1 + $0x528] sm:$0xff]  }
 0x135   :  { %4082 = vmatprep.mubr.bf16.mxu1 %v4848_v2  ;;  %5818 = vmatpush3.bf16.msra.mxu0 %v6328_v17  ;;  %v5313_v33 = vpop.f32.mrb[32].mxu0  ;;  %v4845_v14 = vcombine.low %v7435_v3, %v7839_v56  ;;  %v4847_v43 = vcombine.low %v7999_v62, %v8013_v51  ;;  %v937_v24 = vshll.u32 %v9121_v4, 16  ;;  %v6337_v2 = vld [vmem:[%s8803_s1 + $0x5f0] sm:$0xff]   ;;  %v4871_v3 = vcombine.low %v8015_v48, %v7755_v12 }
 0x136   :  { %3985 = vmatprep.mubr.bf16.mxu0 %v9119_v26  ;;  %5882 = vmatpush3.bf16.msra.mxu1 %v6330_v7  ;;  %v8059_v40 = vadd.f32 %v5296_v46, %v3247_v42  ;;  %v5314_v34 = vpop.f32.mrb[33].mxu0  ;;  %v4873_v17 = vcombine.low %v8036_v25, %v8038_v53  ;;  %v907_v7 = vshrl.u32 %v9120_v29, 16  ;;  %v972_v39 = vshll.u32 %v9056_v20, 16 }
 0x137   :  { %v5377_v45 = vpop.f32.mrb[32].mxu1  ;;  %5819 = vmatprep.subr.bf16.mxu0 %v6331_v11  ;;  %5883 = vmatprep.subr.bf16.mxu1 %v6333_v38  ;;  %v5315_v36 = vadd.f32 %v5314_v34, %v5313_v33  ;;  %v5316_v46 = vpop.f32.mrb[34].mxu0  ;;  %v4872_v58 = vcombine.low %v8040_v61, %v8048_v15  ;;  %v935_v55 = vshrl.u32 %v9121_v4, 16  ;;  %v8081_v21 = vor.u32 %v918_v16, %v914_v6  ;;  %v6336_v33 = vld [vmem:[%s8803_s1 + $0x530] sm:$0xff]  }
 0x138   :  { %v5378_v63 = vpop.f32.mrb[33].mxu1  ;;  %v5317_v42 = vpop.f32.mrb[35].mxu0  ;;  %v8083_v48 = vor.u32 %v946_v1, %v942_v22  ;;  %v911_v25 = vrot.slane %v909_v5, 1  ;;  %v1000_v29 = vshll.u32 %v7568_v13, 16  ;;  %v939_v16 = vrot.slane %v937_v24, 1  ;;  %v6339_v22 = vld [vmem:[%s8803_s1 + $0x578] sm:$0xff]  }
 0x139   :  { %v5379_v11 = vadd.f32 %v5378_v63, %v5377_v45  ;;  %v5380_v38 = vpop.f32.mrb[34].mxu1  ;;  %9122 = vst [vmem:[#allocation16_spill] sm:$0xff] %v8081_v21  ;;  %5820 = vmatpush3.bf16.msra.mxu0 %v6332_v10  ;;  %v6338_v45 = vld [vmem:[%s8803_s1 + $0x5b0] sm:$0xff]   ;;  %v3382_v4 = vadd.f32 %v5315_v36, %v7722_v57  ;;  %v5318_v34 = vadd.f32 %v5317_v42, %v5316_v46  ;;  %v6341_v1 = vld [vmem:[%s8803_s1 + $0x5f8] sm:$0xff]   ;;  %v970_v5 = vshrl.u32 %v9056_v20, 16 }
 0x13a   :  { %v5381_v26 = vpop.f32.mrb[35].mxu1  ;;  %9123 = vst [vmem:[#allocation54_spill] sm:$0xff] %v8083_v48  ;;  %5884 = vmatpush3.bf16.msra.mxu1 %v6334_v31  ;;  %5821 = vmatprep.subr.bf16.mxu0 %v6335_v37  ;;  %v974_v10 = vrot.slane %v972_v39, 1  ;;  %v9124_v57 = vshrl.u32 %v7834_v27, 16  ;;  %v9125_v24 = vshll.u32 %v7834_v27, 16  ;;  %v4888_v36 = vcombine.low %v7757_v47, %v7776_v54 }
 0x13b   :  { %v5382_v6 = vadd.f32 %v5381_v26, %v5380_v38  ;;  %5885 = vmatprep.subr.bf16.mxu1 %v6337_v2  ;;  %3986 = vmatmul.mubr.bf16.gmra.mrb[140].mxu0 %v4845_v14  ;;  %v3385_v2 = vadd.f32 %v5318_v34, %v7732_v49  ;;  %v8105_v63 = vadd.f32 %v5379_v11, %v3382_v4  ;;  %v9126_v14 = vld [vmem:[#allocation53_spill] sm:$0xff]  ;;  %v998_v20 = vshrl.u32 %v7568_v13, 16  ;;  %v8129_v26 = vld [vmem:[%s8803_s1 + $0x600] sm:$0xff]  }
 0x13c   :  { %4083 = vmatmul.mubr.bf16.gmra.mrb[140].mxu1 %v4847_v43  ;;  %v435_v31 = vrot.slane %v9124_v57, 1  ;;  %v436_v37 = vrot.slane %v9125_v24, 2  ;;  %3993 = vmatprep.mubr.bf16.mxu0 %v4871_v3  ;;  %v965_v43 = vshll.u32 %v9126_v14, 16  ;;  %v8110_v46 = vor.u32 %v911_v25, %v907_v7  ;;  %v6340_v49 = vld [vmem:[%s8803_s1 + $0x538] sm:$0xff]   ;;  %v6374_v57 = vld [vmem:[%s8804_s0 + $0x20] sm:$0xf] }
 0x13d   :  { %4090 = vmatprep.mubr.bf16.mxu1 %v4873_v17  ;;  %v1002_v39 = vrot.slane %v1000_v29, 1  ;;  %v993_v38 = vshll.u32 %v9091_v0, 16  ;;  %5822 = vmatpush3.bf16.msra.mxu0 %v6336_v33  ;;  %v6342_v3 = vld [vmem:[%s8803_s1 + $0x5b8] sm:$0xff]   ;;  %v8120_v17 = vadd.f32 %v5382_v6, %v3385_v2  ;;  %v5319_v11 = vpop.f32.mrb[36].mxu0  ;;  %v4890_v13 = vcombine.low %v8081_v21, %v8083_v48 }
 0x13e   :  { %5886 = vmatpush3.bf16.msra.mxu1 %v6338_v45  ;;  %v8124_v42 = vor.u32 %v939_v16, %v935_v55  ;;  %5823 = vmatprep.subr.bf16.mxu0 %v6339_v22  ;;  %v5320_v25 = vpop.f32.mrb[37].mxu0  ;;  %v8131_v33 = vor.u32 %v974_v10, %v970_v5  ;;  %v963_v45 = vshrl.u32 %v9126_v14, 16  ;;  %v991_v4 = vshrl.u32 %v9091_v0, 16 }
 0x13f   :  { %v5383_v7 = vpop.f32.mrb[36].mxu1  ;;  %5887 = vmatprep.subr.bf16.mxu1 %v6341_v1  ;;  %v8135_v34 = vor.u32 %v436_v37, %v435_v31  ;;  %v5321_v6 = vadd.f32 %v5320_v25, %v5319_v11  ;;  %v5322_v55 = vpop.f32.mrb[38].mxu0  ;;  %v967_v1 = vrot.slane %v965_v43, 1  ;;  %v8140_v24 = vcombine.low %v6374_v57, %v6374_v57  ;;  %v6375_v31 = vld [vmem:[%s8804_s0 + $0x28] sm:$0xf] }
 0x140   :  { %v5384_v29 = vpop.f32.mrb[37].mxu1  ;;  %9127 = vst [vmem:[#allocation15_spill] sm:$0xff] %v8131_v33  ;;  %v5323_v2 = vpop.f32.mrb[39].mxu0  ;;  %v8142_v10 = vor.u32 %v1002_v39, %v998_v20  ;;  %v995_v14 = vrot.slane %v993_v38, 1  ;;  %v1042_v0 = vshll.u32 %v7956_v60, 16  ;;  %v8148_v37 = vcombine.low %v6375_v31, %v6375_v31  ;;  %v9129_v20 = vld [vmem:[#allocation44_spill] sm:$0xff] }
 0x141   :  { %v5385_v16 = vadd.f32 %v5384_v29, %v5383_v7  ;;  %v5386_v22 = vpop.f32.mrb[38].mxu1  ;;  %5824 = vmatpush3.bf16.msra.mxu0 %v6340_v49  ;;  %v3390_v43 = vadd.f32 %v5321_v6, %v7760_v23  ;;  %v5324_v11 = vadd.f32 %v5323_v2, %v5322_v55  ;;  %v1028_v25 = vshll.u32 %v7773_v30, 16  ;;  %v9130_v38 = vld [vmem:[#allocation31_spill] sm:$0xff] }
 0x142   :  { %v5387_v5 = vpop.f32.mrb[39].mxu1  ;;  %9128 = vst [vmem:[#allocation26_spill] sm:$0xff] %v8142_v10  ;;  %5888 = vmatpush3.bf16.msra.mxu1 %v6342_v3  ;;  %5993 = vmatprep.subr.bf16.mxu0 %v8129_v26  ;;  %v4889_v39 = vcombine.low %v8110_v46, %v8124_v42  ;;  %v4905_v49 = vcombine.low %v9130_v38, %v7815_v19  ;;  %v1040_v23 = vshrl.u32 %v7956_v60, 16  ;;  %v1056_v3 = vshll.u32 %v8135_v34, 16  ;;  %v9131_v29 = vld [vmem:[#allocation23_spill] sm:$0xff] }
 0x143   :  { %v5388_v7 = vadd.f32 %v5387_v5, %v5386_v22  ;;  %3994 = vmatmul.mubr.bf16.gmra.mrb[144].mxu0 %v9129_v20  ;;  %v3393_v6 = vadd.f32 %v5324_v11, %v9131_v29  ;;  %v8164_v55 = vadd.f32 %v5385_v16, %v3390_v43  ;;  %v8166_v22 = vor.u32 %v967_v1, %v963_v45 }
 0x144   :  { %4091 = vmatmul.mubr.bf16.gmra.mrb[144].mxu1 %v4872_v58  ;;  %4001 = vmatprep.mubr.bf16.mxu0 %v4888_v36  ;;  %v459_v61 = vshrl.u32 %v8140_v24, 16  ;;  %v4907_v58 = vcombine.low %v8131_v33, %v8142_v10  ;;  %v8171_v57 = vor.u32 %v995_v14, %v991_v4  ;;  %v1044_v2 = vrot.slane %v1042_v0, 1  ;;  %v6376_v4 = vld [vmem:[%s8804_s0 + $0x30] sm:$0xf]  ;;  %v6377_v0 = vld [vmem:[%s8804_s0 + $0x38] sm:$0xf] }
 0x145   :  { %4098 = vmatprep.mubr.bf16.mxu1 %v4890_v13  ;;  %v466_v5 = vshrl.u32 %v8148_v37, 16  ;;  %v8174_v31 = vadd.f32 %v5388_v7, %v3393_v6  ;;  %v5325_v20 = vpop.f32.mrb[40].mxu0  ;;  %v1026_v16 = vshrl.u32 %v7773_v30, 16  ;;  %v1030_v36 = vrot.slane %v1028_v25, 1 }
 0x146   :  { %v431_v13 = vrot.slane %v7834_v27, 1  ;;  %v5326_v45 = vpop.f32.mrb[41].mxu0  ;;  %v1054_v43 = vshrl.u32 %v8135_v34, 16  ;;  %v1058_v29 = vrot.slane %v1056_v3, 1  ;;  %v8182_v14 = vcombine.low %v6376_v4, %v6376_v4 }
 0x147   :  { %v5389_v11 = vpop.f32.mrb[40].mxu1  ;;  %v8187_v7 = vcombine.low %v6377_v0, %v6377_v0  ;;  %v5327_v30 = vadd.f32 %v5326_v45, %v5325_v20  ;;  %v5328_v25 = vpop.f32.mrb[42].mxu0  ;;  %v461_v10 = vrot.slane %v459_v61, 7  ;;  %v462_v34 = vshll.u32 %v8140_v24, 16  ;;  %v9134_v45 = vld [vmem:[#allocation14_spill] sm:$0xff] }
 0x148   :  { %v5390_v1 = vpop.f32.mrb[41].mxu1  ;;  %v5329_v3 = vpop.f32.mrb[43].mxu0  ;;  %v8190_v33 = vor.u32 %v1044_v2, %v1040_v23  ;;  %v1021_v4 = vshll.u32 %v7812_v28, 16  ;;  %v468_v53 = vrot.slane %v466_v5, 7  ;;  %v469_v21 = vshll.u32 %v8148_v37, 16 }
 0x149   :  { %v5391_v27 = vadd.f32 %v5390_v1, %v5389_v11  ;;  %v5392_v6 = vpop.f32.mrb[42].mxu1  ;;  %v3398_v19 = vadd.f32 %v5327_v30, %v9133_v50  ;;  %v5330_v0 = vadd.f32 %v5329_v3, %v5328_v25  ;;  %v1049_v20 = vshll.u32 %v431_v13, 16  ;;  %v9137_v11 = vld [vmem:[#allocation39_spill] sm:$0xff] }
 0x14a   :  { %v5393_v48 = vpop.f32.mrb[43].mxu1  ;;  %9132 = vst [vmem:[#allocation17_spill] sm:$0xff] %v8190_v33  ;;  %v8196_v61 = vor.u32 %v1030_v36, %v1026_v16  ;;  %v8198_v24 = vor.u32 %v1058_v29, %v1054_v43  ;;  %v473_v23 = vshrl.u32 %v8182_v14, 16  ;;  %v480_v2 = vshrl.u32 %v8187_v7, 16  ;;  %v9139_v30 = vld [vmem:[#allocation47_spill] sm:$0xff] }
 0x14b   :  { %v5394_v38 = vadd.f32 %v5393_v48, %v5392_v6  ;;  %4002 = vmatmul.mubr.bf16.gmra.mrb[148].mxu0 %v9134_v45  ;;  %v3401_v5 = vadd.f32 %v5330_v0, %v9137_v11  ;;  %v8203_v1 = vadd.f32 %v5391_v27, %v3398_v19  ;;  %v8205_v50 = vor.u32 %v462_v34, %v461_v10 }
 0x14c   :  { %4099 = vmatmul.mubr.bf16.gmra.mrb[148].mxu1 %v4889_v39  ;;  %9135 = vst [vmem:[#allocation20_spill] sm:$0xff] %v8196_v61  ;;  %9136 = vst [vmem:[#allocation25_spill] sm:$0xff] %v8198_v24  ;;  %4009 = vmatprep.mubr.bf16.mxu0 %v4905_v49  ;;  %v4906_v48 = vcombine.low %v8166_v22, %v8171_v57  ;;  %v1019_v37 = vshrl.u32 %v7812_v28, 16  ;;  %v1023_v39 = vrot.slane %v1021_v4, 1  ;;  %v1047_v25 = vshrl.u32 %v431_v13, 16 }
 0x14d   :  { %4106 = vmatprep.mubr.bf16.mxu1 %v4907_v58  ;;  %v8210_v16 = vor.u32 %v469_v21, %v468_v53  ;;  %v8212_v36 = vadd.f32 %v5394_v38, %v3401_v5  ;;  %v5331_v43 = vpop.f32.mrb[44].mxu0  ;;  %v4922_v19 = vcombine.low %v9139_v30, %v8190_v33  ;;  %v1051_v49 = vrot.slane %v1049_v20, 1  ;;  %v6378_v13 = vld [vmem:[%s8804_s0 + $0x50] sm:$0xf] }
 0x14e   :  { %v5332_v58 = vpop.f32.mrb[45].mxu0  ;;  %v475_v27 = vrot.slane %v473_v23, 7  ;;  %v476_v6 = vshll.u32 %v8182_v14, 16  ;;  %v482_v34 = vrot.slane %v480_v2, 7  ;;  %v483_v28 = vshll.u32 %v8187_v7, 16  ;;  %v9140_v5 = vld [vmem:[#allocation48_spill] sm:$0xff] }
 0x14f   :  { %9138 = vst [vmem:[#allocation21_spill] sm:$0xff] %v8212_v36  ;;  %v5395_v29 = vpop.f32.mrb[44].mxu1  ;;  %v5333_v3 = vadd.f32 %v5332_v58, %v5331_v43  ;;  %v5334_v21 = vpop.f32.mrb[46].mxu0  ;;  %v4924_v4 = vcombine.low %v8196_v61, %v8198_v24  ;;  %v622_v0 = vshll.u32 %v8205_v50, 16  ;;  %v8224_v20 = vcombine.low %v6378_v13, %v6378_v13  ;;  %v6379_v2 = vld [vmem:[%s8804_s0 + $0x48] sm:$0xf] }
 0x150   :  { %v5396_v10 = vpop.f32.mrb[45].mxu1  ;;  %v5335_v45 = vpop.f32.mrb[47].mxu0  ;;  %v8226_v23 = vor.u32 %v1023_v39, %v1019_v37  ;;  %v650_v7 = vshll.u32 %v8210_v16, 16  ;;  %v8232_v11 = vcombine.low %v6379_v2, %v6379_v2  ;;  %v9141_v13 = vld [vmem:[#allocation24_spill] sm:$0xff]  ;;  %v8237_v24 = vor.u32 %v1051_v49, %v1047_v25  ;;  %v9143_v61 = vld [vmem:[#allocation11_spill] sm:$0xff] }
 0x151   :  { %v5397_v53 = vadd.f32 %v5396_v10, %v5395_v29  ;;  %v5398_v38 = vpop.f32.mrb[46].mxu1  ;;  %v3406_v43 = vadd.f32 %v5333_v3, %v9140_v5  ;;  %v5336_v29 = vadd.f32 %v5335_v45, %v5334_v21  ;;  %v487_v10 = vshrl.u32 %v7892_v9, 16  ;;  %v40_v49 = vld [vmem:[%s8804_s0 + $0x58] sm:$0xf] }
 0x152   :  { %v5399_v14 = vpop.f32.mrb[47].mxu1  ;;  %9142 = vst [vmem:[#allocation55_spill] sm:$0xff] %v8237_v24  ;;  %v8239_v37 = vor.u32 %v476_v6, %v475_v27  ;;  %v8241_v39 = vor.u32 %v483_v28, %v482_v34  ;;  %v620_v3 = vshrl.u32 %v8205_v50, 16  ;;  %v624_v21 = vrot.slane %v622_v0, 1 }
 0x153   :  { %v5400_v58 = vadd.f32 %v5399_v14, %v5398_v38  ;;  %4010 = vmatmul.mubr.bf16.gmra.mrb[152].mxu0 %v9141_v13  ;;  %v3409_v33 = vadd.f32 %v5336_v29, %v9143_v61  ;;  %v8244_v30 = vadd.f32 %v5397_v53, %v3406_v43  ;;  %v501_v38 = vshrl.u32 %v8224_v20, 16 }
 0x154   :  { %4107 = vmatmul.mubr.bf16.gmra.mrb[152].mxu1 %v4906_v48  ;;  %4017 = vmatprep.mubr.bf16.mxu0 %v4922_v19  ;;  %v648_v45 = vshrl.u32 %v8210_v16, 16  ;;  %v652_v48 = vrot.slane %v650_v7, 1  ;;  %v494_v25 = vshrl.u32 %v8232_v11, 16  ;;  %v9146_v19 = vld [vmem:[#allocation3_spill] sm:$0xff]  ;;  %v489_v50 = vrot.slane %v487_v10, 7 }
 0x155   :  { %9144 = vst [vmem:[#allocation35_spill] sm:$0xff] %v8244_v30  ;;  %4114 = vmatprep.mubr.bf16.mxu1 %v4924_v4  ;;  %v8253_v27 = vadd.f32 %v5400_v58, %v3409_v33  ;;  %v5337_v61 = vpop.f32.mrb[48].mxu0  ;;  %v4921_v34 = vcombine.low %v9146_v19, %v7956_v60  ;;  %v490_v28 = vshll.u32 %v7892_v9, 16  ;;  %v41_v16 = vld [vmem:[%s8804_s0 + $0x5c] sm:$0x3]  ;;  %v4923_v0 = vcombine.low %v8226_v23, %v8237_v24 }
 0x156   :  { %v5338_v53 = vpop.f32.mrb[49].mxu0  ;;  %v4801_v33 = vcombine.low %v7853_v18, %v7878_v8  ;;  %v678_v14 = vshll.u32 %v8239_v37, 16  ;;  %v706_v7 = vshll.u32 %v8241_v39, 16  ;;  %v625_v29 = vor.u32 %v624_v21, %v620_v3 }
 0x157   :  { %9145 = vst [vmem:[#allocation56_spill] sm:$0xff] %v8253_v27  ;;  %v5401_v6 = vpop.f32.mrb[48].mxu1  ;;  %v5339_v2 = vadd.f32 %v5338_v53, %v5337_v61  ;;  %v5340_v5 = vpop.f32.mrb[50].mxu0  ;;  %v497_v58 = vshll.u32 %v8232_v11, 16  ;;  %v653_v19 = vor.u32 %v652_v48, %v648_v45  ;;  %v496_v27 = vrot.slane %v494_v25, 7  ;;  %v9147_v48 = vld [vmem:[#allocation19_spill] sm:$0xff] }
 0x158   :  { %v5402_v4 = vpop.f32.mrb[49].mxu1  ;;  %v5341_v10 = vpop.f32.mrb[51].mxu0  ;;  %v8268_v30 = vcombine.low %v40_v49, %v41_v16  ;;  %v8270_v24 = vcombine.low %v40_v49, %v40_v49  ;;  %v8273_v36 = vor.u32 %v490_v28, %v489_v50  ;;  %v676_v3 = vshrl.u32 %v8239_v37, 16 }
 0x159   :  { %v5403_v43 = vadd.f32 %v5402_v4, %v5401_v6  ;;  %v5404_v9 = vpop.f32.mrb[50].mxu1  ;;  %v3414_v18 = vadd.f32 %v5339_v2, %v7864_v41  ;;  %v5342_v8 = vadd.f32 %v5341_v10, %v5340_v5  ;;  %v680_v21 = vrot.slane %v678_v14, 1  ;;  %v9148_v6 = vld [vmem:[#allocation18_spill] sm:$0xff] }
 0x15a   :  { %v5405_v13 = vpop.f32.mrb[51].mxu1  ;;  %v704_v11 = vshrl.u32 %v8241_v39, 16  ;;  %v708_v61 = vrot.slane %v706_v7, 1  ;;  %v504_v45 = vshll.u32 %v8224_v20, 16  ;;  %v503_v41 = vrot.slane %v501_v38, 7  ;;  %v9149_v20 = vld [vmem:[#allocation22_spill] sm:$0xff] }
 0x15b   :  { %v5406_v60 = vadd.f32 %v5405_v13, %v5404_v9  ;;  %4018 = vmatmul.mubr.bf16.gmra.mrb[156].mxu0 %v4921_v34  ;;  %v3417_v25 = vadd.f32 %v5342_v8, %v9147_v48  ;;  %v8279_v49 = vadd.f32 %v5403_v43, %v3414_v18  ;;  %v8282_v50 = vor.u32 %v497_v58, %v496_v27 }
 0x15c   :  { %4115 = vmatmul.mubr.bf16.gmra.mrb[156].mxu1 %v4923_v0  ;;  %4155 = vmatprep.mubr.bf16.mxu0 %v9148_v6  ;;  %v8934_v34 = vshll.u32 %v8268_v30, 16  ;;  %v508_v37 = vshrl.u32 %v8270_v24, 16  ;;  %v4798_v53 = vcombine.low %v625_v29, %v653_v19  ;;  %v4818_v4 = vcombine.low %v9149_v20, %v7924_v32  ;;  %v6380_v32 = vld [vmem:[%s8804_s0 + $0x80] sm:$0xf] }
 0x15d   :  { %4252 = vmatprep.mubr.bf16.mxu1 %v4801_v33  ;;  %v8286_v28 = vadd.f32 %v5406_v60, %v3417_v25  ;;  %v5343_v39 = vpop.f32.mrb[52].mxu0  ;;  %v734_v0 = vshll.u32 %v8273_v36, 16  ;;  %v8291_v33 = vor.u32 %v680_v21, %v676_v3  ;;  %v8293_v38 = vor.u32 %v708_v61, %v704_v11  ;;  %v9150_v3 = vld [vmem:[#allocation32_spill] sm:$0xff]  ;;  %v6353_v25 = vld [vmem:[%s8803_s1 + $0x608] sm:$0xff]   ;;  %v6381_v6 = vld [vmem:[%s8804_s0 + $0xa0] sm:$0xf] }
 0x15e   :  { %v5344_v14 = vpop.f32.mrb[53].mxu0  ;;  %v732_v27 = vshrl.u32 %v8273_v36, 16  ;;  %v590_v2 = vrot.slane %v8268_v30, 1  ;;  %v8935_v29 = vshrl.u32 %v8268_v30, 16  ;;  %v8301_v58 = vcombine.low %v6380_v32, %v6380_v32 }
 0x15f   :  { %v5407_v16 = vpop.f32.mrb[52].mxu1  ;;  %v5345_v60 = vadd.f32 %v5344_v14, %v5343_v39  ;;  %v5346_v5 = vpop.f32.mrb[54].mxu0  ;;  %v762_v19 = vshll.u32 %v8282_v50, 16  ;;  %v581_v36 = vrot.slane %v8934_v34, 1  ;;  %v510_v18 = vrot.slane %v508_v37, 7  ;;  %v9152_v37 = vld [vmem:[#allocation41_spill] sm:$0xff] }
 0x160   :  { %v5408_v7 = vpop.f32.mrb[53].mxu1  ;;  %v5347_v10 = vpop.f32.mrb[55].mxu0  ;;  %v511_v8 = vshll.u32 %v8270_v24, 16  ;;  %v736_v48 = vrot.slane %v734_v0, 1  ;;  %v8314_v39 = vcombine.low %v6381_v6, %v6381_v6  ;;  %v832_v24 = vshll.u32 %v590_v2, 16 }
 0x161   :  { %v5409_v43 = vadd.f32 %v5408_v7, %v5407_v16  ;;  %v5410_v9 = vpop.f32.mrb[54].mxu1  ;;  %v3422_v21 = vadd.f32 %v5345_v60, %v9150_v3  ;;  %v5348_v11 = vadd.f32 %v5347_v10, %v5346_v5  ;;  %v9151_v16 = vld [vmem:[#allocation34_spill] sm:$0xff]  ;;  %v6382_v0 = vld [vmem:[%s8804_s0 + $0x88] sm:$0xf]  ;;  %v9154_v7 = vld [vmem:[#allocation40_spill] sm:$0xff]  ;;  %v515_v32 = vshrl.u32 %v8301_v58, 16 }
 0x162   :  { %v5411_v13 = vpop.f32.mrb[55].mxu1  ;;  %v9153_v20 = vcombine.low %v9151_v16, %v9152_v37  ;;  %v8322_v14 = vcombine.low %v6382_v0, %v6382_v0  ;;  %v764_v10 = vrot.slane %v762_v19, 1  ;;  %v8334_v3 = vor.u32 %v504_v45, %v503_v41  ;;  %v6356_v45 = vld [vmem:[%s8803_s1 + $0x610] sm:$0xff]  }
 0x163   :  { %v5412_v61 = vadd.f32 %v5411_v13, %v5410_v9  ;;  %4156 = vmatmul.mubr.bf16.vlgmr.msra.gmra.mrb[160].mxu0 %v4798_v53  ;;  %v3425_v60 = vadd.f32 %v5348_v11, %v9154_v7  ;;  %v8325_v5 = vadd.f32 %v5409_v43, %v3422_v21  ;;  %v9155_v9 = vld [vmem:[#allocation28_spill] sm:$0xff]  ;;  %v760_v53 = vshrl.u32 %v8282_v50, 16 }
 0x164   :  { %4253 = vmatmul.mubr.bf16.vlgmr.msra.gmra.mrb[160].mxu1 %v9153_v20  ;;  %4163 = vmatprep.mubr.bf16.mxu0 %v9155_v9  ;;  %v8332_v13 = vor.u32 %v581_v36, %v8935_v29  ;;  %v8336_v6 = vor.u32 %v511_v8, %v510_v18  ;;  %v4815_v50 = vcombine.low %v8291_v33, %v8293_v38  ;;  %v834_v18 = vrot.slane %v832_v24, 1  ;;  %v6383_v33 = vld [vmem:[%s8804_s0 + $0x90] sm:$0xf] }
 0x165   :  { %4260 = vmatprep.mubr.bf16.mxu1 %v4818_v4  ;;  %5994 = vmatpush3.bf16.msra.mxu0 %v8129_v26  ;;  %v8339_v43 = vadd.f32 %v5412_v61, %v3425_v60  ;;  %v5349_v21 = vpop.f32.mrb[56].mxu0  ;;  %v8343_v4 = vor.u32 %v736_v48, %v732_v27  ;;  %v4835_v19 = vcombine.low %v7926_v52, %v7999_v62  ;;  %v830_v26 = vshrl.u32 %v590_v2, 16  ;;  %v9156_v60 = vld [vmem:[#allocation7_spill] sm:$0xff] }
 0x166   :  { %5995 = vmatprep.subr.bf16.mxu0 %v6353_v25  ;;  %v5350_v41 = vpop.f32.mrb[57].mxu0  ;;  %v522_v8 = vshrl.u32 %v8322_v14, 16  ;;  %v8354_v38 = vcombine.low %v6383_v33, %v6383_v33  ;;  %v517_v48 = vrot.slane %v515_v32, 7  ;;  %v518_v16 = vshll.u32 %v8301_v58, 16  ;;  %v6384_v32 = vld [vmem:[%s8804_s0 + $0x98] sm:$0xf] }
 0x167   :  { %v5413_v11 = vpop.f32.mrb[56].mxu1  ;;  %v5351_v27 = vadd.f32 %v5350_v41, %v5349_v21  ;;  %v5352_v61 = vpop.f32.mrb[58].mxu0  ;;  %v8357_v0 = vor.u32 %v764_v10, %v760_v53  ;;  %v790_v2 = vshll.u32 %v8334_v3, 16  ;;  %v818_v24 = vshll.u32 %v8336_v6, 16  ;;  %v6357_v53 = vld [vmem:[%s8803_s1 + $0x618] sm:$0xff]  }
 0x168   :  { %v5414_v36 = vpop.f32.mrb[57].mxu1  ;;  %v5353_v37 = vpop.f32.mrb[59].mxu0  ;;  %v825_v7 = vshll.u32 %v8332_v13, 16  ;;  %v8366_v58 = vcombine.low %v6384_v32, %v6384_v32  ;;  %v9157_v10 = vld [vmem:[#allocation13_spill] sm:$0xff]  ;;  %v524_v33 = vrot.slane %v522_v8, 7  ;;  %v788_v32 = vshrl.u32 %v8334_v3, 16 }
 0x169   :  { %v5415_v52 = vadd.f32 %v5414_v36, %v5413_v11  ;;  %v5416_v62 = vpop.f32.mrb[58].mxu1  ;;  %5996 = vmatpush3.bf16.msra.mxu0 %v6353_v25  ;;  %v3430_v9 = vadd.f32 %v5351_v27, %v9156_v60  ;;  %v5354_v21 = vadd.f32 %v5353_v37, %v5352_v61  ;;  %v9158_v11 = vld [vmem:[#allocation8_spill] sm:$0xff]  ;;  %v835_v25 = vor.u32 %v834_v18, %v830_v26  ;;  %v9161_v60 = vld [vmem:[#allocation30_spill] sm:$0xff] }
 0x16a   :  { %v5417_v20 = vpop.f32.mrb[59].mxu1  ;;  %5997 = vmatprep.subr.bf16.mxu0 %v6356_v45  ;;  %v9159_v36 = vcombine.low %v9157_v10, %v9158_v11  ;;  %v525_v27 = vshll.u32 %v8322_v14, 16  ;;  %v529_v61 = vshrl.u32 %v8354_v38, 16  ;;  %v4832_v10 = vcombine.low %v8343_v4, %v8357_v0  ;;  %v6359_v4 = vld [vmem:[%s8803_s1 + $0x620] sm:$0xff]  }
 0x16b   :  { %v5418_v41 = vadd.f32 %v5417_v20, %v5416_v62  ;;  %4164 = vmatmul.mubr.bf16.gmra.mrb[164].mxu0 %v4815_v50  ;;  %v9160_v62 = vld [vmem:[#allocation51_spill] sm:$0xff]  ;;  %v8377_v20 = vadd.f32 %v5415_v52, %v3430_v9  ;;  %v8381_v50 = vor.u32 %v518_v16, %v517_v48  ;;  %v792_v26 = vrot.slane %v790_v2, 1 }
 0x16c   :  { %4261 = vmatmul.mubr.bf16.gmra.mrb[164].mxu1 %v9159_v36  ;;  %v3433_v37 = vadd.f32 %v5354_v21, %v9160_v62  ;;  %4171 = vmatprep.mubr.bf16.mxu0 %v9161_v60  ;;  %v816_v18 = vshrl.u32 %v8336_v6, 16  ;;  %v820_v14 = vrot.slane %v818_v24, 1  ;;  %v4850_v9 = vcombine.low %v7839_v56, %v8332_v13 }
 0x16d   :  { %4268 = vmatprep.mubr.bf16.mxu1 %v4835_v19  ;;  %5998 = vmatpush3.bf16.msra.mxu0 %v6356_v45  ;;  %v5355_v21 = vpop.f32.mrb[60].mxu0  ;;  %v823_v19 = vshrl.u32 %v8332_v13, 16  ;;  %v536_v3 = vshrl.u32 %v8366_v58, 16  ;;  %v827_v16 = vrot.slane %v825_v7, 1  ;;  %v8395_v45 = vor.u32 %v525_v27, %v524_v33  ;;  %v6385_v7 = vld [vmem:[%s8804_s0 + $0xa8] sm:$0xf] }
 0x16e   :  { %v8386_v8 = vadd.f32 %v5418_v41, %v3433_v37  ;;  %5999 = vmatprep.subr.bf16.mxu0 %v6357_v53  ;;  %v5356_v48 = vpop.f32.mrb[61].mxu0  ;;  %v531_v0 = vrot.slane %v529_v61, 7  ;;  %v532_v2 = vshll.u32 %v8354_v38, 16  ;;  %v4852_v13 = vcombine.low %v8013_v51, %v835_v25  ;;  %v6360_v25 = vld [vmem:[%s8803_s1 + $0x628] sm:$0xff]  }
 0x16f   :  { %v5419_v52 = vpop.f32.mrb[60].mxu1  ;;  %v5357_v24 = vadd.f32 %v5356_v48, %v5355_v21  ;;  %v5358_v41 = vpop.f32.mrb[62].mxu0  ;;  %v867_v36 = vshll.u32 %v8381_v50, 16  ;;  %v793_v60 = vor.u32 %v792_v26, %v788_v32  ;;  %v821_v34 = vor.u32 %v820_v14, %v816_v18  ;;  %v9162_v32 = vld [vmem:[#allocation9_spill] sm:$0xff] }
 0x170   :  { %v5420_v6 = vpop.f32.mrb[61].mxu1  ;;  %v5359_v62 = vpop.f32.mrb[63].mxu0  ;;  %v539_v29 = vshll.u32 %v8366_v58, 16  ;;  %v8404_v38 = vcombine.low %v6385_v7, %v6385_v7  ;;  %v538_v51 = vrot.slane %v536_v3, 7  ;;  %v9163_v58 = vcombine.low %v9162_v32, %v7677_v35  ;;  %v6386_v35 = vld [vmem:[%s8804_s0 + $0xb0] sm:$0xf] }
 0x171   :  { %v5421_v56 = vadd.f32 %v5420_v6, %v5419_v52  ;;  %v5422_v11 = vpop.f32.mrb[62].mxu1  ;;  %6000 = vmatpush3.bf16.msra.mxu0 %v6357_v53  ;;  %v3438_v33 = vadd.f32 %v5357_v24, %v8043_v44  ;;  %v5360_v27 = vadd.f32 %v5359_v62, %v5358_v41  ;;  %v828_v53 = vor.u32 %v827_v16, %v823_v19 }
 0x172   :  { %v5423_v37 = vpop.f32.mrb[63].mxu1  ;;  %6001 = vmatprep.subr.bf16.mxu0 %v6359_v4  ;;  %v895_v26 = vshll.u32 %v8395_v45, 16  ;;  %v8414_v18 = vor.u32 %v532_v2, %v531_v0  ;;  %v865_v21 = vshrl.u32 %v8381_v50, 16  ;;  %v869_v52 = vrot.slane %v867_v36, 1  ;;  %v6363_v50 = vld [vmem:[%s8803_s1 + $0x630] sm:$0xff]  }
 0x173   :  { %v5424_v61 = vadd.f32 %v5423_v37, %v5422_v11  ;;  %4172 = vmatmul.mubr.bf16.gmra.mrb[168].mxu0 %v4832_v10  ;;  %v3441_v44 = vadd.f32 %v5360_v27, %v8059_v40  ;;  %v8417_v14 = vadd.f32 %v5421_v56, %v3438_v33  ;;  %v543_v10 = vshrl.u32 %v8314_v39, 16  ;;  %v64_v37 = vld [vmem:[%s8804_s0 + $0xb8] sm:$0xf] }
 0x174   :  { %4269 = vmatmul.mubr.bf16.gmra.mrb[168].mxu1 %v9163_v58  ;;  %4179 = vmatprep.mubr.bf16.mxu0 %v4850_v9  ;;  %v550_v3 = vshrl.u32 %v8404_v38, 16  ;;  %v8425_v19 = vcombine.low %v6386_v35, %v6386_v35  ;;  %v4849_v9 = vcombine.low %v793_v60, %v821_v34  ;;  %v8429_v16 = vor.u32 %v539_v29, %v538_v51  ;;  %v6364_v58 = vld [vmem:[%s8803_s1 + $0x638] sm:$0xff]  }
 0x175   :  { %4276 = vmatprep.mubr.bf16.mxu1 %v4852_v13  ;;  %6002 = vmatpush3.bf16.msra.mxu0 %v6359_v4  ;;  %v8427_v48 = vadd.f32 %v5424_v61, %v3441_v44  ;;  %v5441_v40 = vpop.f32.mrb[64].mxu0  ;;  %v4851_v2 = vcombine.low %v7939_v59, %v828_v53  ;;  %v893_v24 = vshrl.u32 %v8395_v45, 16  ;;  %v897_v41 = vrot.slane %v895_v26, 1  ;;  %v65_v59 = vld [vmem:[%s8804_s0 + $0xbc] sm:$0x3] }
 0x176   :  { %6003 = vmatprep.subr.bf16.mxu0 %v6360_v25  ;;  %v5442_v0 = vpop.f32.mrb[65].mxu0  ;;  %v923_v56 = vshll.u32 %v8414_v18, 16  ;;  %v870_v29 = vor.u32 %v869_v52, %v865_v21  ;;  %v4877_v62 = vcombine.low %v8048_v15, %v8110_v46  ;;  %v545_v7 = vrot.slane %v543_v10, 7  ;;  %v9164_v44 = vld [vmem:[#allocation45_spill] sm:$0xff] }
 0x177   :  { %v5505_v6 = vpop.f32.mrb[64].mxu1  ;;  %v5443_v11 = vadd.f32 %v5442_v0, %v5441_v40  ;;  %v5444_v13 = vpop.f32.mrb[66].mxu0  ;;  %v546_v33 = vshll.u32 %v8314_v39, 16  ;;  %v552_v27 = vrot.slane %v550_v3, 7  ;;  %v553_v61 = vshll.u32 %v8404_v38, 16 }
 0x178   :  { %v5506_v4 = vpop.f32.mrb[65].mxu1  ;;  %v5445_v45 = vpop.f32.mrb[67].mxu0  ;;  %v951_v32 = vshll.u32 %v8429_v16, 16  ;;  %v898_v53 = vor.u32 %v897_v41, %v893_v24  ;;  %v8452_v26 = vcombine.low %v64_v37, %v65_v59  ;;  %v8454_v39 = vcombine.low %v64_v37, %v64_v37 }
 0x179   :  { %v5507_v36 = vadd.f32 %v5506_v4, %v5505_v6  ;;  %v5508_v34 = vpop.f32.mrb[66].mxu1  ;;  %6004 = vmatpush3.bf16.msra.mxu0 %v6360_v25  ;;  %v3576_v51 = vadd.f32 %v5443_v11, %v8105_v63  ;;  %v5446_v15 = vadd.f32 %v5445_v45, %v5444_v13  ;;  %v557_v38 = vshrl.u32 %v8425_v19, 16 }
 0x17a   :  { %v5509_v60 = vpop.f32.mrb[67].mxu1  ;;  %6005 = vmatprep.subr.bf16.mxu0 %v6363_v50  ;;  %v921_v21 = vshrl.u32 %v8414_v18, 16  ;;  %v925_v52 = vrot.slane %v923_v56, 1  ;;  %v8462_v10 = vor.u32 %v546_v33, %v545_v7  ;;  %v8464_v3 = vor.u32 %v553_v61, %v552_v27 }
 0x17b   :  { %v5510_v46 = vadd.f32 %v5509_v60, %v5508_v34  ;;  %4180 = vmatmul.mubr.bf16.gmra.mrb[172].mxu0 %v4849_v9  ;;  %v3579_v63 = vadd.f32 %v5446_v15, %v8120_v17  ;;  %v8458_v25 = vadd.f32 %v5507_v36, %v3576_v51  ;;  %v949_v9 = vshrl.u32 %v8429_v16, 16 }
 0x17c   :  { %4277 = vmatmul.mubr.bf16.gmra.mrb[172].mxu1 %v4851_v2  ;;  %4187 = vmatprep.mubr.bf16.mxu0 %v9164_v44  ;;  %v953_v17 = vrot.slane %v951_v32, 1  ;;  %v560_v0 = vshll.u32 %v8425_v19, 16  ;;  %v4874_v24 = vcombine.low %v870_v29, %v898_v53  ;;  %v586_v18 = vshll.u32 %v8452_v26, 16 }
 0x17d   :  { %4284 = vmatprep.mubr.bf16.mxu1 %v4877_v62  ;;  %6006 = vmatpush3.bf16.msra.mxu0 %v6363_v50  ;;  %v8466_v35 = vadd.f32 %v5510_v46, %v3579_v63  ;;  %v5447_v40 = vpop.f32.mrb[68].mxu0  ;;  %v564_v41 = vshrl.u32 %v8454_v39, 16  ;;  %v4894_v36 = vcombine.low %v8124_v42, %v8166_v22  ;;  %v591_v16 = vrot.slane %v8452_v26, 1 }
 0x17e   :  { %6007 = vmatprep.subr.bf16.mxu0 %v6364_v58  ;;  %v5448_v4 = vpop.f32.mrb[69].mxu0  ;;  %v559_v34 = vrot.slane %v557_v38, 7  ;;  %v926_v19 = vor.u32 %v925_v52, %v921_v21  ;;  %v979_v59 = vshll.u32 %v8462_v10, 16  ;;  %v1007_v29 = vshll.u32 %v8464_v3, 16 }
 0x17f   :  { %v5511_v6 = vpop.f32.mrb[68].mxu1  ;;  %v5449_v56 = vadd.f32 %v5448_v4, %v5447_v40  ;;  %v5450_v11 = vpop.f32.mrb[70].mxu0  ;;  %v954_v33 = vor.u32 %v953_v17, %v949_v9  ;;  %v9165_v42 = vcombine.low %v7755_v12, %v7757_v47  ;;  %v584_v22 = vshrl.u32 %v8452_v26, 16  ;;  %v9189_v26 = vld [vmem:[#allocation16_spill] sm:$0xff] }
 0x180   :  { %v5512_v2 = vpop.f32.mrb[69].mxu1  ;;  %v5451_v62 = vpop.f32.mrb[71].mxu0  ;;  %v588_v27 = vrot.slane %v586_v18, 1  ;;  %v566_v61 = vrot.slane %v564_v41, 7  ;;  %v567_v51 = vshll.u32 %v8454_v39, 16  ;;  %v1077_v32 = vshll.u32 %v591_v16, 16 }
 0x181   :  { %v5513_v50 = vadd.f32 %v5512_v2, %v5511_v6  ;;  %v5514_v13 = vpop.f32.mrb[70].mxu1  ;;  %6008 = vmatpush3.bf16.msra.mxu0 %v6364_v58  ;;  %v3584_v45 = vadd.f32 %v5449_v56, %v8164_v55  ;;  %v5452_v60 = vadd.f32 %v5451_v62, %v5450_v11  ;;  %v9166_v55 = vld [vmem:[#allocation50_spill] sm:$0xff]  ;;  %v977_v58 = vshrl.u32 %v8462_v10, 16 }
 0x182   :  { %v5515_v37 = vpop.f32.mrb[71].mxu1  ;;  %v981_v12 = vrot.slane %v979_v59, 1  ;;  %v1005_v47 = vshrl.u32 %v8464_v3, 16  ;;  %v1009_v53 = vrot.slane %v1007_v29, 1  ;;  %v562_v21 = vor.u32 %v560_v0, %v559_v34  ;;  %v9170_v29 = vld [vmem:[#allocation5_spill] sm:$0xff] }
 0x183   :  { %v5516_v7 = vadd.f32 %v5515_v37, %v5514_v13  ;;  %4188 = vmatmul.mubr.bf16.gmra.mrb[176].mxu0 %v4874_v24  ;;  %v3587_v15 = vadd.f32 %v5452_v60, %v8174_v31  ;;  %v8486_v46 = vadd.f32 %v5513_v50, %v3584_v45  ;;  %v4891_v31 = vcombine.low %v926_v19, %v954_v33  ;;  %v9169_v19 = vld [vmem:[#allocation21_spill] sm:$0xff] }
 0x184   :  { %4285 = vmatmul.mubr.bf16.gmra.mrb[176].mxu1 %v9165_v42  ;;  %4195 = vmatprep.mubr.bf16.mxu0 %v9166_v55  ;;  %v4911_v40 = vcombine.low %v8171_v57, %v8226_v23  ;;  %v589_v6 = vor.u32 %v588_v27, %v584_v22  ;;  %v569_v9 = vor.u32 %v567_v51, %v566_v61  ;;  %v1075_v2 = vshrl.u32 %v591_v16, 16  ;;  %v9167_v57 = vld [vmem:[#allocation31_spill] sm:$0xff] }
 0x185   :  { %4292 = vmatprep.mubr.bf16.mxu1 %v4894_v36  ;;  %v8491_v38 = vadd.f32 %v5516_v7, %v3587_v15  ;;  %v5453_v63 = vpop.f32.mrb[72].mxu0  ;;  %v1079_v24 = vrot.slane %v1077_v32, 1  ;;  %v982_v11 = vor.u32 %v981_v12, %v977_v58  ;;  %v1010_v0 = vor.u32 %v1009_v53, %v1005_v47 }
 0x186   :  { %v5454_v39 = vpop.f32.mrb[73].mxu0  ;;  %v1035_v34 = vshll.u32 %v562_v21, 16  ;;  %v9168_v23 = vcombine.low %v7776_v54, %v9167_v57  ;;  %v1063_v62 = vshll.u32 %v569_v9, 16  ;;  %v1070_v37 = vshll.u32 %v589_v6, 16 }
 0x187   :  { %v5517_v44 = vpop.f32.mrb[72].mxu1  ;;  %v5455_v10 = vadd.f32 %v5454_v39, %v5453_v63  ;;  %v5456_v17 = vpop.f32.mrb[74].mxu0  ;;  %v1080_v45 = vor.u32 %v1079_v24, %v1075_v2  ;;  %v4908_v33 = vcombine.low %v982_v11, %v1010_v0  ;;  %v1033_v42 = vshrl.u32 %v562_v21, 16  ;;  %v9171_v63 = vld [vmem:[#allocation43_spill] sm:$0xff] }
 0x188   :  { %v5518_v52 = vpop.f32.mrb[73].mxu1  ;;  %v5457_v41 = vpop.f32.mrb[75].mxu0  ;;  %v1037_v27 = vrot.slane %v1035_v34, 1  ;;  %v1061_v51 = vshrl.u32 %v569_v9, 16  ;;  %v1065_v15 = vrot.slane %v1063_v62, 1  ;;  %v1068_v55 = vshrl.u32 %v589_v6, 16 }
 0x189   :  { %v5519_v4 = vadd.f32 %v5518_v52, %v5517_v44  ;;  %v5520_v3 = vpop.f32.mrb[74].mxu1  ;;  %v3592_v50 = vadd.f32 %v5455_v10, %v8203_v1  ;;  %v5458_v13 = vadd.f32 %v5457_v41, %v5456_v17  ;;  %v1072_v32 = vrot.slane %v1070_v37, 1  ;;  %v9172_v39 = vld [vmem:[#allocation55_spill] sm:$0xff]  ;;  %v9174_v9 = vld [vmem:[#allocation36_spill] sm:$0xff] }
 0x18a   :  { %v5521_v56 = vpop.f32.mrb[75].mxu1  ;;  %v4926_v44 = vcombine.low %v9171_v63, %v589_v6  ;;  %v4928_v52 = vcombine.low %v9172_v39, %v1080_v45  ;;  %v9173_v10 = vld [vmem:[#allocation35_spill] sm:$0xff]  ;;  %v1066_v41 = vor.u32 %v1065_v15, %v1061_v51  ;;  %v9177_v11 = vshrl.u32 %v8268_v30, 16 }
 0x18b   :  { %v5522_v36 = vadd.f32 %v5521_v56, %v5520_v3  ;;  %4196 = vmatmul.mubr.bf16.gmra.mrb[180].mxu0 %v4891_v31  ;;  %v3595_v59 = vadd.f32 %v5458_v13, %v9169_v19  ;;  %v8502_v16 = vadd.f32 %v5519_v4, %v3592_v50  ;;  %v1038_v3 = vor.u32 %v1037_v27, %v1033_v42  ;;  %v9175_v2 = vld [vmem:[#allocation47_spill] sm:$0xff]  ;;  %v9179_v13 = vld [vmem:[#allocation56_spill] sm:$0xff] }
 0x18c   :  { %4293 = vmatmul.mubr.bf16.gmra.mrb[180].mxu1 %v9168_v23  ;;  %4203 = vmatprep.mubr.bf16.mxu0 %v9170_v29  ;;  %v9176_v24 = vcombine.low %v9174_v9, %v9175_v2  ;;  %v1073_v56 = vor.u32 %v1072_v32, %v1068_v55  ;;  %v592_v0 = vrot.slane %v9177_v11, 1  ;;  %v9178_v6 = vshll.u32 %v8268_v30, 16  ;;  %v9180_v29 = vld [vmem:[#allocation17_spill] sm:$0xff]  ;;  %v9181_v27 = vld [vmem:[#allocation12_spill] sm:$0xff] }
 0x18d   :  { %4300 = vmatprep.mubr.bf16.mxu1 %v4911_v40  ;;  %v8505_v60 = vadd.f32 %v5522_v36, %v3595_v59  ;;  %v5459_v1 = vpop.f32.mrb[76].mxu0  ;;  %v4925_v59 = vcombine.low %v1038_v3, %v1066_v41  ;;  %v9183_v3 = vld [vmem:[#allocation46_spill] sm:$0xff]  ;;  %v9184_v9 = vld [vmem:[#allocation29_spill] sm:$0xff] }
 0x18e   :  { %v5460_v61 = vpop.f32.mrb[77].mxu0  ;;  %v593_v50 = vrot.slane %v9178_v6, 2  ;;  %v4927_v45 = vcombine.low %v9180_v29, %v1073_v56  ;;  %v4836_v2 = vcombine.low %v9184_v9, %v9183_v3  ;;  %v9186_v6 = vld [vmem:[#allocation2_spill] sm:$0xff] }
 0x18f   :  { %v5523_v7 = vpop.f32.mrb[76].mxu1  ;;  %v5461_v58 = vadd.f32 %v5460_v61, %v5459_v1  ;;  %v5462_v12 = vpop.f32.mrb[78].mxu0  ;;  %v9182_v61 = vld [vmem:[#allocation42_spill] sm:$0xff] }
 0x190   :  { %v5524_v54 = vpop.f32.mrb[77].mxu1  ;;  %v5463_v31 = vpop.f32.mrb[79].mxu0  ;;  %v594_v1 = vor.u32 %v593_v50, %v592_v0  ;;  %v9185_v0 = vld [vmem:[#allocation10_spill] sm:$0xff] }
 0x191   :  { %v5525_v47 = vadd.f32 %v5524_v54, %v5523_v7  ;;  %v5526_v53 = vpop.f32.mrb[78].mxu1  ;;  %v3600_v17 = vadd.f32 %v5461_v58, %v9173_v10  ;;  %v5464_v21 = vadd.f32 %v5463_v31, %v5462_v12  ;;  %v4802_v54 = vcombine.low %v9182_v61, %v9181_v27 }
 0x192   :  { %v5527_v40 = vpop.f32.mrb[79].mxu1  ;;  %v839_v12 = vshll.u32 %v594_v1, 16  ;;  %v9187_v50 = vcombine.low %v9185_v0, %v9186_v6 }
 0x193   :  { %v5528_v4 = vadd.f32 %v5527_v40, %v5526_v53  ;;  %4204 = vmatmul.mubr.bf16.gmra.mrb[184].mxu0 %v4908_v33  ;;  %v3603_v36 = vadd.f32 %v5464_v21, %v9179_v13  ;;  %v8518_v34 = vadd.f32 %v5525_v47, %v3600_v17  ;;  %v837_v40 = vshrl.u32 %v594_v1, 16  ;;  %v9188_v1 = vld [vmem:[#allocation49_spill] sm:$0xff] }
 0x194   :  { %4301 = vmatmul.mubr.bf16.gmra.mrb[184].mxu1 %v9176_v24  ;;  %4211 = vmatprep.mubr.bf16.mxu0 %v4926_v44  ;;  %v841_v10 = vrot.slane %v839_v12, 1 }
 0x195   :  { %4308 = vmatprep.mubr.bf16.mxu1 %v4928_v52  ;;  %v8520_v57 = vadd.f32 %v5528_v4, %v3603_v36  ;;  %v5465_v23 = vpop.f32.mrb[80].mxu0  ;;  %v595_v36 = vrot.slane %v584_v22, 1 }
 0x196   :  { %v5466_v37 = vpop.f32.mrb[81].mxu0  ;;  %v842_v13 = vor.u32 %v841_v10, %v837_v40  ;;  %v9191_v40 = vld [vmem:[#allocation15_spill] sm:$0xff]  ;;  %v9192_v10 = vld [vmem:[#allocation54_spill] sm:$0xff] }
 0x197   :  { %v5529_v62 = vpop.f32.mrb[80].mxu1  ;;  %v5467_v7 = vadd.f32 %v5466_v37, %v5465_v23  ;;  %v5468_v33 = vpop.f32.mrb[82].mxu0  ;;  %v596_v23 = vrot.slane %v586_v18, 2  ;;  %v9190_v18 = vld [vmem:[#allocation4_spill] sm:$0xff] }
 0x198   :  { %v5530_v19 = vpop.f32.mrb[81].mxu1  ;;  %v5469_v51 = vpop.f32.mrb[83].mxu0  ;;  %v4878_v61 = vcombine.low %v9190_v18, %v9189_v26 }
 0x199   :  { %v5531_v30 = vadd.f32 %v5530_v19, %v5529_v62  ;;  %v5532_v42 = vpop.f32.mrb[82].mxu1  ;;  %v3608_v55 = vadd.f32 %v5467_v7, %v8279_v49  ;;  %v5470_v32 = vadd.f32 %v5469_v51, %v5468_v33  ;;  %v4853_v7 = vcombine.low %v9188_v1, %v842_v13 }
 0x19a   :  { %v5533_v15 = vpop.f32.mrb[83].mxu1  ;;  %v597_v33 = vor.u32 %v596_v23, %v595_v36 }
 0x19b   :  { %v5534_v58 = vadd.f32 %v5533_v15, %v5532_v42  ;;  %4212 = vmatmul.mubr.bf16.gmra.mrb[188].mxu0 %v4925_v59  ;;  %v3611_v47 = vadd.f32 %v5470_v32, %v8286_v28  ;;  %v8527_v53 = vadd.f32 %v5531_v30, %v3608_v55 }
 0x19c   :  { %4309 = vmatmul.mubr.bf16.gmra.mrb[188].mxu1 %v4927_v45  ;;  %6009 = vmatprep.mubr.bf16.mxu0 %v4802_v54  ;;  %v1084_v32 = vshll.u32 %v597_v33, 16 }
 0x19d   :  { %v8529_v63 = vadd.f32 %v5534_v58, %v3611_v47  ;;  %v5471_v44 = vpop.f32.mrb[84].mxu0 }
 0x19e   :  { %v5472_v52 = vpop.f32.mrb[85].mxu0 }
 0x19f   :  { %v5535_v39 = vpop.f32.mrb[84].mxu1  ;;  %v5473_v17 = vadd.f32 %v5472_v52, %v5471_v44  ;;  %v5474_v49 = vpop.f32.mrb[86].mxu0 }
 0x1a0   :  { %v5536_v31 = vpop.f32.mrb[85].mxu1  ;;  %v5475_v24 = vpop.f32.mrb[87].mxu0 }
 0x1a1   :  { %v5537_v21 = vadd.f32 %v5536_v31, %v5535_v39  ;;  %v5538_v4 = vpop.f32.mrb[86].mxu1  ;;  %v3616_v41 = vadd.f32 %v5473_v17, %v8325_v5  ;;  %v5476_v56 = vadd.f32 %v5475_v24, %v5474_v49  ;;  %v4895_v17 = vcombine.low %v9192_v10, %v9191_v40 }
 0x1a2   :  { %v5539_v28 = vpop.f32.mrb[87].mxu1  ;;  %v1082_v49 = vshrl.u32 %v597_v33, 16 }
 0x1a3   :  { %v5540_v11 = vadd.f32 %v5539_v28, %v5538_v4  ;;  %6010 = vmatmul.mubr.bf16.vlgmr.msra.gmra.mrb[192].mxu0 %v9187_v50  ;;  %v3619_v62 = vadd.f32 %v5476_v56, %v8339_v43  ;;  %v8542_v37 = vadd.f32 %v5537_v21, %v3616_v41 }
 0x1a4   :  { %6013 = vmatprep.mubr.bf16.mxu0 %v4836_v2  ;;  %v9193_v2 = vld [vmem:[#allocation20_spill] sm:$0xff] }
 0x1a5   :  { %v8544_v19 = vadd.f32 %v5540_v11, %v3619_v62  ;;  %v5477_v5 = vpop.f32.mrb[88].mxu0 }
 0x1a6   :  { %v5478_v29 = vpop.f32.mrb[89].mxu0 }
 0x1a7   :  { %v5541_v59 = vpop.f32.mrb[88].mxu1  ;;  %v5479_v30 = vadd.f32 %v5478_v29, %v5477_v5  ;;  %v5480_v42 = vpop.f32.mrb[90].mxu0  ;;  %v9195_v29 = vld [vmem:[#allocation25_spill] sm:$0xff] }
 0x1a8   :  { %v5542_v45 = vpop.f32.mrb[89].mxu1  ;;  %v5481_v43 = vpop.f32.mrb[91].mxu0 }
 0x1a9   :  { %v5543_v22 = vadd.f32 %v5542_v45, %v5541_v59  ;;  %v5544_v27 = vpop.f32.mrb[90].mxu1  ;;  %v3624_v51 = vadd.f32 %v5479_v30, %v8377_v20  ;;  %v5482_v15 = vadd.f32 %v5481_v43, %v5480_v42  ;;  %v1086_v20 = vrot.slane %v1084_v32, 1 }
 0x1aa   :  { %v5545_v54 = vpop.f32.mrb[91].mxu1 }
 0x1ab   :  { %v5546_v55 = vadd.f32 %v5545_v54, %v5544_v27  ;;  %6014 = vmatmul.mubr.bf16.gmra.mrb[196].mxu0 %v4853_v7  ;;  %v3627_v58 = vadd.f32 %v5482_v15, %v8386_v8  ;;  %v8551_v12 = vadd.f32 %v5543_v22, %v3624_v51  ;;  %v9194_v8 = vld [vmem:[#allocation26_spill] sm:$0xff]  ;;  %v1087_v6 = vor.u32 %v1086_v20, %v1082_v49 }
 0x1ac   :  { %6017 = vmatprep.mubr.bf16.mxu0 %v4878_v61  ;;  %v4912_v24 = vcombine.low %v9194_v8, %v9193_v2 }
 0x1ad   :  { %v8553_v47 = vadd.f32 %v5546_v55, %v3627_v58  ;;  %v5483_v44 = vpop.f32.mrb[92].mxu0  ;;  %v4929_v45 = vcombine.low %v9195_v29, %v1087_v6 }
 0x1ae   :  { %v5484_v52 = vpop.f32.mrb[93].mxu0 }
 0x1af   :  { %v5547_v39 = vpop.f32.mrb[92].mxu1  ;;  %v5485_v21 = vadd.f32 %v5484_v52, %v5483_v44  ;;  %v5486_v4 = vpop.f32.mrb[94].mxu0 }
 0x1b0   :  { %v5548_v31 = vpop.f32.mrb[93].mxu1  ;;  %v5487_v28 = vpop.f32.mrb[95].mxu0 }
 0x1b1   :  { %v5549_v3 = vadd.f32 %v5548_v31, %v5547_v39  ;;  %v5550_v9 = vpop.f32.mrb[94].mxu1  ;;  %v3632_v56 = vadd.f32 %v5485_v21, %v8417_v14  ;;  %v5488_v11 = vadd.f32 %v5487_v28, %v5486_v4 }
 0x1b2   :  { %v5551_v41 = vpop.f32.mrb[95].mxu1 }
 0x1b3   :  { %v5552_v0 = vadd.f32 %v5551_v41, %v5550_v9  ;;  %6018 = vmatmul.mubr.bf16.gmra.mrb[200].mxu0 %v4895_v17  ;;  %v3635_v50 = vadd.f32 %v5488_v11, %v8427_v48  ;;  %v8561_v13 = vadd.f32 %v5549_v3, %v3632_v56 }
 0x1b4   :  { %6021 = vmatprep.mubr.bf16.mxu0 %v4912_v24 }
 0x1b5   :  { %v8563_v36 = vadd.f32 %v5552_v0, %v3635_v50  ;;  %v5569_v23 = vpop.f32.mrb[96].mxu0 }
 0x1b6   :  { %v5570_v5 = vpop.f32.mrb[97].mxu0 }
 0x1b7   :  { %v5633_v62 = vpop.f32.mrb[96].mxu1  ;;  %v5571_v1 = vadd.f32 %v5570_v5, %v5569_v23  ;;  %v5572_v7 = vpop.f32.mrb[98].mxu0 }
 0x1b8   :  { %v5634_v59 = vpop.f32.mrb[97].mxu1  ;;  %v5573_v30 = vpop.f32.mrb[99].mxu0 }
 0x1b9   :  { %v5635_v14 = vadd.f32 %v5634_v59, %v5633_v62  ;;  %v5636_v33 = vpop.f32.mrb[98].mxu1  ;;  %v3770_v22 = vadd.f32 %v5571_v1, %v8458_v25  ;;  %v5574_v48 = vadd.f32 %v5573_v30, %v5572_v7 }
 0x1ba   :  { %v5637_v42 = vpop.f32.mrb[99].mxu1 }
 0x1bb   :  { %v5638_v27 = vadd.f32 %v5637_v42, %v5636_v33  ;;  %6022 = vmatmul.mubr.bf16.gmra.mrb[204].mxu0 %v4929_v45  ;;  %v3773_v26 = vadd.f32 %v5574_v48, %v8466_v35  ;;  %v8568_v18 = vadd.f32 %v5635_v14, %v3770_v22 }
 0x1bd   :  { %v8570_v61 = vadd.f32 %v5638_v27, %v3773_v26  ;;  %v5575_v43 = vpop.f32.mrb[100].mxu0 }
 0x1be   :  { %v5576_v51 = vpop.f32.mrb[101].mxu0 }
 0x1bf   :  { %v5639_v54 = vpop.f32.mrb[100].mxu1  ;;  %v5577_v55 = vadd.f32 %v5576_v51, %v5575_v43  ;;  %v5578_v32 = vpop.f32.mrb[102].mxu0 }
 0x1c0   :  { %v5640_v15 = vpop.f32.mrb[101].mxu1  ;;  %v5579_v39 = vpop.f32.mrb[103].mxu0 }
 0x1c1   :  { %v5641_v58 = vadd.f32 %v5640_v15, %v5639_v54  ;;  %v5642_v44 = vpop.f32.mrb[102].mxu1  ;;  %v3778_v25 = vadd.f32 %v5577_v55, %v8486_v46  ;;  %v5580_v31 = vadd.f32 %v5579_v39, %v5578_v32 }
 0x1c2   :  { %v5643_v52 = vpop.f32.mrb[103].mxu1 }
 0x1c3   :  { %v5644_v40 = vadd.f32 %v5643_v52, %v5642_v44  ;;  %v3781_v35 = vadd.f32 %v5580_v31, %v8491_v38  ;;  %v8574_v10 = vadd.f32 %v5641_v58, %v3778_v25 }
 0x1c5   :  { %v8576_v17 = vadd.f32 %v5644_v40, %v3781_v35  ;;  %v5581_v49 = vpop.f32.mrb[104].mxu0 }
 0x1c6   :  { %v5582_v21 = vpop.f32.mrb[105].mxu0 }
 0x1c7   :  { %v5645_v20 = vpop.f32.mrb[104].mxu1  ;;  %v5583_v3 = vadd.f32 %v5582_v21, %v5581_v49  ;;  %v5584_v9 = vpop.f32.mrb[106].mxu0 }
 0x1c8   :  { %v5646_v4 = vpop.f32.mrb[105].mxu1  ;;  %v5585_v24 = vpop.f32.mrb[107].mxu0 }
 0x1c9   :  { %v5647_v2 = vadd.f32 %v5646_v4, %v5645_v20  ;;  %v5648_v8 = vpop.f32.mrb[106].mxu1  ;;  %v3786_v46 = vadd.f32 %v5583_v3, %v8502_v16  ;;  %v5586_v41 = vadd.f32 %v5585_v24, %v5584_v9 }
 0x1ca   :  { %v5649_v28 = vpop.f32.mrb[107].mxu1 }
 0x1cb   :  { %v5650_v56 = vadd.f32 %v5649_v28, %v5648_v8  ;;  %v3789_v38 = vadd.f32 %v5586_v41, %v8505_v60  ;;  %v8580_v11 = vadd.f32 %v5647_v2, %v3786_v46 }
 0x1cd   :  { %v8582_v0 = vadd.f32 %v5650_v56, %v3789_v38  ;;  %v5587_v6 = vpop.f32.mrb[108].mxu0 }
 0x1ce   :  { %v5588_v23 = vpop.f32.mrb[109].mxu0 }
 0x1cf   :  { %v5651_v50 = vpop.f32.mrb[108].mxu1  ;;  %v5589_v5 = vadd.f32 %v5588_v23, %v5587_v6  ;;  %v5590_v59 = vpop.f32.mrb[110].mxu0 }
 0x1d0   :  { %v5652_v62 = vpop.f32.mrb[109].mxu1  ;;  %v5591_v1 = vpop.f32.mrb[111].mxu0 }
 0x1d1   :  { %v5653_v29 = vadd.f32 %v5652_v62, %v5651_v50  ;;  %v5654_v45 = vpop.f32.mrb[110].mxu1  ;;  %v3794_v16 = vadd.f32 %v5589_v5, %v8518_v34  ;;  %v5592_v14 = vadd.f32 %v5591_v1, %v5590_v59 }
 0x1d2   :  { %v5655_v7 = vpop.f32.mrb[111].mxu1 }
 0x1d3   :  { %v5656_v33 = vadd.f32 %v5655_v7, %v5654_v45  ;;  %v3797_v60 = vadd.f32 %v5592_v14, %v8520_v57  ;;  %v8586_v30 = vadd.f32 %v5653_v29, %v3794_v16 }
 0x1d5   :  { %v8588_v42 = vadd.f32 %v5656_v33, %v3797_v60  ;;  %v5593_v22 = vpop.f32.mrb[112].mxu0 }
 0x1d6   :  { %v5594_v27 = vpop.f32.mrb[113].mxu0 }
 0x1d7   :  { %v5657_v48 = vpop.f32.mrb[112].mxu1  ;;  %v5595_v43 = vadd.f32 %v5594_v27, %v5593_v22  ;;  %v5596_v54 = vpop.f32.mrb[114].mxu0 }
 0x1d8   :  { %v5658_v26 = vpop.f32.mrb[113].mxu1  ;;  %v5597_v55 = vpop.f32.mrb[115].mxu0 }
 0x1d9   :  { %v5659_v51 = vadd.f32 %v5658_v26, %v5657_v48  ;;  %v5660_v15 = vpop.f32.mrb[114].mxu1  ;;  %v3802_v34 = vadd.f32 %v5595_v43, %v8527_v53  ;;  %v5598_v58 = vadd.f32 %v5597_v55, %v5596_v54 }
 0x1da   :  { %v5661_v32 = vpop.f32.mrb[115].mxu1 }
 0x1db   :  { %v5662_v44 = vadd.f32 %v5661_v32, %v5660_v15  ;;  %v3805_v57 = vadd.f32 %v5598_v58, %v8529_v63  ;;  %v8592_v39 = vadd.f32 %v5659_v51, %v3802_v34 }
 0x1dd   :  { %v8594_v52 = vadd.f32 %v5662_v44, %v3805_v57  ;;  %v5599_v25 = vpop.f32.mrb[116].mxu0 }
 0x1de   :  { %v5600_v40 = vpop.f32.mrb[117].mxu0 }
 0x1df   :  { %v5663_v31 = vpop.f32.mrb[116].mxu1  ;;  %v5601_v49 = vadd.f32 %v5600_v40, %v5599_v25  ;;  %v5602_v20 = vpop.f32.mrb[118].mxu0 }
 0x1e0   :  { %v5664_v35 = vpop.f32.mrb[117].mxu1  ;;  %v5603_v3 = vpop.f32.mrb[119].mxu0 }
 0x1e1   :  { %v5665_v21 = vadd.f32 %v5664_v35, %v5663_v31  ;;  %v5666_v4 = vpop.f32.mrb[118].mxu1  ;;  %v3810_v53 = vadd.f32 %v5601_v49, %v8542_v37  ;;  %v5604_v2 = vadd.f32 %v5603_v3, %v5602_v20 }
 0x1e2   :  { %v5667_v9 = vpop.f32.mrb[119].mxu1 }
 0x1e3   :  { %v5668_v8 = vadd.f32 %v5667_v9, %v5666_v4  ;;  %v3813_v63 = vadd.f32 %v5604_v2, %v8544_v19  ;;  %v8598_v24 = vadd.f32 %v5665_v21, %v3810_v53 }
 0x1e5   :  { %v8600_v28 = vadd.f32 %v5668_v8, %v3813_v63  ;;  %v5605_v46 = vpop.f32.mrb[120].mxu0 }
 0x1e6   :  { %v5606_v56 = vpop.f32.mrb[121].mxu0 }
 0x1e7   :  { %v5669_v41 = vpop.f32.mrb[120].mxu1  ;;  %v5607_v6 = vadd.f32 %v5606_v56, %v5605_v46  ;;  %v5608_v50 = vpop.f32.mrb[122].mxu0 }
 0x1e8   :  { %v5670_v38 = vpop.f32.mrb[121].mxu1  ;;  %v5609_v5 = vpop.f32.mrb[123].mxu0 }
 0x1e9   :  { %v5671_v23 = vadd.f32 %v5670_v38, %v5669_v41  ;;  %v5672_v62 = vpop.f32.mrb[122].mxu1  ;;  %v3818_v37 = vadd.f32 %v5607_v6, %v8551_v12  ;;  %v5610_v29 = vadd.f32 %v5609_v5, %v5608_v50 }
 0x1ea   :  { %v5673_v59 = vpop.f32.mrb[123].mxu1 }
 0x1eb   :  { %v5674_v45 = vadd.f32 %v5673_v59, %v5672_v62  ;;  %v3821_v19 = vadd.f32 %v5610_v29, %v8553_v47  ;;  %v8604_v1 = vadd.f32 %v5671_v23, %v3818_v37 }
 0x1ed   :  { %v8606_v7 = vadd.f32 %v5674_v45, %v3821_v19  ;;  %v5611_v16 = vpop.f32.mrb[124].mxu0 }
 0x1ee   :  { %v5612_v33 = vpop.f32.mrb[125].mxu0 }
 0x1ef   :  { %v5675_v14 = vpop.f32.mrb[124].mxu1  ;;  %v5613_v22 = vadd.f32 %v5612_v33, %v5611_v16  ;;  %v5614_v48 = vpop.f32.mrb[126].mxu0 }
 0x1f0   :  { %v5676_v60 = vpop.f32.mrb[125].mxu1  ;;  %v5615_v43 = vpop.f32.mrb[127].mxu0 }
 0x1f1   :  { %v5677_v27 = vadd.f32 %v5676_v60, %v5675_v14  ;;  %v5678_v26 = vpop.f32.mrb[126].mxu1  ;;  %v3826_v12 = vadd.f32 %v5613_v22, %v8561_v13  ;;  %v5616_v51 = vadd.f32 %v5615_v43, %v5614_v48 }
 0x1f2   :  { %v5679_v54 = vpop.f32.mrb[127].mxu1 }
 0x1f3   :  { %v5680_v15 = vadd.f32 %v5679_v54, %v5678_v26  ;;  %v3829_v47 = vadd.f32 %v5616_v51, %v8563_v36  ;;  %v8610_v55 = vadd.f32 %v5677_v27, %v3826_v12 }
 0x1f5   :  { %v8612_v32 = vadd.f32 %v5680_v15, %v3829_v47  ;;  %v5697_v34 = vpop.f32.mrb[128].mxu0 }
 0x1f6   :  { %v5698_v44 = vpop.f32.mrb[129].mxu0 }
 0x1f7   :  { %v5761_v58 = vpop.f32.mrb[128].mxu1  ;;  %v5699_v25 = vadd.f32 %v5698_v44, %v5697_v34  ;;  %v5700_v31 = vpop.f32.mrb[130].mxu0 }
 0x1f8   :  { %v5762_v57 = vpop.f32.mrb[129].mxu1  ;;  %v5701_v49 = vpop.f32.mrb[131].mxu0 }
 0x1f9   :  { %v5763_v40 = vadd.f32 %v5762_v57, %v5761_v58  ;;  %v5764_v35 = vpop.f32.mrb[130].mxu1  ;;  %v3964_v13 = vadd.f32 %v5699_v25, %v8568_v18  ;;  %v5702_v21 = vadd.f32 %v5701_v49, %v5700_v31 }
 0x1fa   :  { %v5765_v20 = vpop.f32.mrb[131].mxu1 }
 0x1fb   :  { %v5766_v4 = vadd.f32 %v5765_v20, %v5764_v35  ;;  %v3967_v36 = vadd.f32 %v5702_v21, %v8570_v61  ;;  %v8616_v3 = vadd.f32 %v5763_v40, %v3964_v13 }
 0x1fd   :  { %v8618_v9 = vadd.f32 %v5766_v4, %v3967_v36 }
 0x1fe   :  { %v5703_v53 = vpop.f32.mrb[132].mxu0 }
 0x1ff   :  { %v5767_v2 = vpop.f32.mrb[132].mxu1  ;;  %v5704_v8 = vpop.f32.mrb[133].mxu0 }
 0x200   :  { %v5768_v63 = vpop.f32.mrb[133].mxu1  ;;  %v5705_v46 = vadd.f32 %v5704_v8, %v5703_v53  ;;  %v5706_v41 = vpop.f32.mrb[134].mxu0 }
 0x201   :  { %v5769_v56 = vadd.f32 %v5768_v63, %v5767_v2  ;;  %v5770_v38 = vpop.f32.mrb[134].mxu1  ;;  %v5707_v6 = vpop.f32.mrb[135].mxu0 }
 0x202   :  { %v5771_v50 = vpop.f32.mrb[135].mxu1  ;;  %v3972_v18 = vadd.f32 %v5705_v46, %v8574_v10  ;;  %v5708_v23 = vadd.f32 %v5707_v6, %v5706_v41 }
 0x203   :  { %v5772_v62 = vadd.f32 %v5771_v50, %v5770_v38  ;;  %v6365_v50 = vld [vmem:[%s8806_s3] sm:$0xff]  }
 0x204   :  { %v3975_v61 = vadd.f32 %v5708_v23, %v8576_v17  ;;  %v8622_v5 = vadd.f32 %v5769_v56, %v3972_v18  ;;  %6041 = vmatprep.mubr.bf16.mxu1 %v6365_v50 }
 0x206   :  { %v8624_v59 = vadd.f32 %v5772_v62, %v3975_v61  ;;  %v5709_v37 = vpop.f32.mrb[136].mxu0 }
 0x207   :  { %v5773_v29 = vpop.f32.mrb[136].mxu1  ;;  %v5710_v45 = vpop.f32.mrb[137].mxu0 }
 0x208   :  { %v5774_v19 = vpop.f32.mrb[137].mxu1  ;;  %v5711_v16 = vadd.f32 %v5710_v45, %v5709_v37  ;;  %v5712_v14 = vpop.f32.mrb[138].mxu0 }
 0x209   :  { %v5775_v33 = vadd.f32 %v5774_v19, %v5773_v29  ;;  %v5776_v60 = vpop.f32.mrb[138].mxu1  ;;  %v5713_v22 = vpop.f32.mrb[139].mxu0 }
 0x20a   :  { %v5777_v48 = vpop.f32.mrb[139].mxu1  ;;  %v3980_v10 = vadd.f32 %v5711_v16, %v8580_v11  ;;  %v5714_v27 = vadd.f32 %v5713_v22, %v5712_v14 }
 0x20b   :  { %v5778_v26 = vadd.f32 %v5777_v48, %v5776_v60 }
 0x20c   :  { %v3983_v17 = vadd.f32 %v5714_v27, %v8582_v0  ;;  %v8628_v43 = vadd.f32 %v5775_v33, %v3980_v10 }
 0x20e   :  { %v8630_v54 = vadd.f32 %v5778_v26, %v3983_v17  ;;  %v5715_v12 = vpop.f32.mrb[140].mxu0 }
 0x20f   :  { %v5779_v51 = vpop.f32.mrb[140].mxu1  ;;  %v5716_v15 = vpop.f32.mrb[141].mxu0 }
 0x210   :  { %v5780_v47 = vpop.f32.mrb[141].mxu1  ;;  %v5717_v34 = vadd.f32 %v5716_v15, %v5715_v12  ;;  %v5718_v58 = vpop.f32.mrb[142].mxu0 }
 0x211   :  { %v5781_v44 = vadd.f32 %v5780_v47, %v5779_v51  ;;  %v5782_v57 = vpop.f32.mrb[142].mxu1  ;;  %v5719_v25 = vpop.f32.mrb[143].mxu0 }
 0x212   :  { %v5783_v31 = vpop.f32.mrb[143].mxu1  ;;  %v3988_v11 = vadd.f32 %v5717_v34, %v8586_v30  ;;  %v5720_v40 = vadd.f32 %v5719_v25, %v5718_v58 }
 0x213   :  { %v5784_v35 = vadd.f32 %v5783_v31, %v5782_v57 }
 0x214   :  { %v3991_v0 = vadd.f32 %v5720_v40, %v8588_v42  ;;  %v8634_v49 = vadd.f32 %v5781_v44, %v3988_v11 }
 0x216   :  { %v8636_v20 = vadd.f32 %v5784_v35, %v3991_v0  ;;  %v5721_v13 = vpop.f32.mrb[144].mxu0 }
 0x217   :  { %v5785_v21 = vpop.f32.mrb[144].mxu1  ;;  %v5722_v4 = vpop.f32.mrb[145].mxu0 }
 0x218   :  { %v5786_v36 = vpop.f32.mrb[145].mxu1  ;;  %v5723_v53 = vadd.f32 %v5722_v4, %v5721_v13  ;;  %v5724_v2 = vpop.f32.mrb[146].mxu0 }
 0x219   :  { %v5787_v8 = vadd.f32 %v5786_v36, %v5785_v21  ;;  %v5788_v63 = vpop.f32.mrb[146].mxu1  ;;  %v5725_v46 = vpop.f32.mrb[147].mxu0 }
 0x21a   :  { %v5789_v41 = vpop.f32.mrb[147].mxu1  ;;  %v3996_v30 = vadd.f32 %v5723_v53, %v8592_v39  ;;  %v5726_v56 = vadd.f32 %v5725_v46, %v5724_v2  ;;  %v6366_v39 = vld [vmem:[%s8806_s3 + $0x10] sm:$0xff]  }
 0x21b   :  { %v5790_v38 = vadd.f32 %v5789_v41, %v5788_v63  ;;  %6061 = vmatprep.mubr.bf16.mxu0 %v6366_v39 }
 0x21c   :  { %v3999_v42 = vadd.f32 %v5726_v56, %v8594_v52  ;;  %v8640_v6 = vadd.f32 %v5787_v8, %v3996_v30 }
 0x21e   :  { %v8645_v18 = vadd.f32 %v5790_v38, %v3999_v42  ;;  %v5727_v23 = vpop.f32.mrb[148].mxu0 }
 0x21f   :  { %v5791_v62 = vpop.f32.mrb[148].mxu1  ;;  %v5728_v61 = vpop.f32.mrb[149].mxu0 }
 0x220   :  { %v5792_v37 = vpop.f32.mrb[149].mxu1  ;;  %v5729_v29 = vadd.f32 %v5728_v61, %v5727_v23  ;;  %v5730_v45 = vpop.f32.mrb[150].mxu0 }
 0x221   :  { %v5793_v52 = vadd.f32 %v5792_v37, %v5791_v62  ;;  %v5794_v19 = vpop.f32.mrb[150].mxu1  ;;  %v5731_v16 = vpop.f32.mrb[151].mxu0 }
 0x222   :  { %v5795_v14 = vpop.f32.mrb[151].mxu1  ;;  %v4004_v33 = vadd.f32 %v5729_v29, %v8598_v24  ;;  %v5732_v60 = vadd.f32 %v5731_v16, %v5730_v45 }
 0x223   :  { %v5796_v22 = vadd.f32 %v5795_v14, %v5794_v19 }
 0x224   :  { %v4007_v48 = vadd.f32 %v5732_v60, %v8600_v28  ;;  %v8652_v10 = vadd.f32 %v5793_v52, %v4004_v33 }
 0x226   :  { %v8654_v27 = vadd.f32 %v5796_v22, %v4007_v48  ;;  %v5733_v26 = vpop.f32.mrb[152].mxu0 }
 0x227   :  { %v5797_v17 = vpop.f32.mrb[152].mxu1  ;;  %v5734_v12 = vpop.f32.mrb[153].mxu0 }
 0x228   :  { %v5798_v51 = vpop.f32.mrb[153].mxu1  ;;  %v5735_v15 = vadd.f32 %v5734_v12, %v5733_v26  ;;  %v5736_v47 = vpop.f32.mrb[154].mxu0 }
 0x229   :  { %v5799_v34 = vadd.f32 %v5798_v51, %v5797_v17  ;;  %v5800_v58 = vpop.f32.mrb[154].mxu1  ;;  %v5737_v44 = vpop.f32.mrb[155].mxu0 }
 0x22a   :  { %v5801_v57 = vpop.f32.mrb[155].mxu1  ;;  %v4012_v24 = vadd.f32 %v5735_v15, %v8604_v1  ;;  %v5738_v25 = vadd.f32 %v5737_v44, %v5736_v47 }
 0x22b   :  { %v5802_v31 = vadd.f32 %v5801_v57, %v5800_v58 }
 0x22c   :  { %v4015_v28 = vadd.f32 %v5738_v25, %v8606_v7  ;;  %v8658_v11 = vadd.f32 %v5799_v34, %v4012_v24 }
 0x22e   :  { %v8660_v40 = vadd.f32 %v5802_v31, %v4015_v28  ;;  %v5739_v35 = vpop.f32.mrb[156].mxu0 }
 0x22f   :  { %v5803_v0 = vpop.f32.mrb[156].mxu1  ;;  %v5740_v13 = vpop.f32.mrb[157].mxu0 }
 0x230   :  { %v5804_v21 = vpop.f32.mrb[157].mxu1  ;;  %v5741_v4 = vadd.f32 %v5740_v13, %v5739_v35  ;;  %v5742_v36 = vpop.f32.mrb[158].mxu0 }
 0x231   :  { %v5805_v53 = vadd.f32 %v5804_v21, %v5803_v0  ;;  %v5806_v2 = vpop.f32.mrb[158].mxu1  ;;  %v5743_v8 = vpop.f32.mrb[159].mxu0 }
 0x232   :  { %v5807_v63 = vpop.f32.mrb[159].mxu1  ;;  %v4020_v1 = vadd.f32 %v5741_v4, %v8610_v55  ;;  %v5744_v46 = vadd.f32 %v5743_v8, %v5742_v36 }
 0x233   :  { %v5808_v41 = vadd.f32 %v5807_v63, %v5806_v2 }
 0x234   :  { %v4023_v7 = vadd.f32 %v5744_v46, %v8612_v32  ;;  %v8664_v30 = vadd.f32 %v5805_v53, %v4020_v1 }
 0x236   :  { %v8666_v56 = vadd.f32 %v5808_v41, %v4023_v7  ;;  %v5825_v38 = vpop.f32.mrb[160].mxu0 }
 0x237   :  { %v5889_v42 = vpop.f32.mrb[160].mxu1  ;;  %v5826_v50 = vpop.f32.mrb[161].mxu0 }
 0x238   :  { %v5890_v23 = vpop.f32.mrb[161].mxu1  ;;  %v5827_v62 = vadd.f32 %v5826_v50, %v5825_v38  ;;  %v5828_v61 = vpop.f32.mrb[162].mxu0 }
 0x239   :  { %v5891_v37 = vadd.f32 %v5890_v23, %v5889_v42  ;;  %v5892_v39 = vpop.f32.mrb[162].mxu1  ;;  %v5829_v29 = vpop.f32.mrb[163].mxu0 }
 0x23a   :  { %v5893_v45 = vpop.f32.mrb[163].mxu1  ;;  %v4158_v55 = vadd.f32 %v5827_v62, %v8616_v3  ;;  %v5830_v52 = vadd.f32 %v5829_v29, %v5828_v61 }
 0x23b   :  { %v5894_v19 = vadd.f32 %v5893_v45, %v5892_v39 }
 0x23c   :  { %v4161_v32 = vadd.f32 %v5830_v52, %v8618_v9  ;;  %v8670_v16 = vadd.f32 %v5891_v37, %v4158_v55 }
 0x23e   :  { %v5831_v14 = vpop.f32.mrb[164].mxu0  ;;  %v8672_v60 = vadd.f32 %v5894_v19, %v4161_v32 }
 0x23f   :  { %v5895_v33 = vpop.f32.mrb[164].mxu1  ;;  %v5832_v22 = vpop.f32.mrb[165].mxu0 }
 0x240   :  { %v5896_v48 = vpop.f32.mrb[165].mxu1  ;;  %v5833_v26 = vadd.f32 %v5832_v22, %v5831_v14  ;;  %v5834_v17 = vpop.f32.mrb[166].mxu0 }
 0x241   :  { %v5897_v12 = vadd.f32 %v5896_v48, %v5895_v33  ;;  %v5898_v51 = vpop.f32.mrb[166].mxu1  ;;  %v5835_v15 = vpop.f32.mrb[167].mxu0 }
 0x242   :  { %v5899_v47 = vpop.f32.mrb[167].mxu1  ;;  %v4166_v3 = vadd.f32 %v5833_v26, %v8622_v5  ;;  %v5836_v34 = vadd.f32 %v5835_v15, %v5834_v17 }
 0x243   :  { %v5900_v58 = vadd.f32 %v5899_v47, %v5898_v51 }
 0x244   :  { %v4169_v9 = vadd.f32 %v5836_v34, %v8624_v59  ;;  %v8676_v44 = vadd.f32 %v5897_v12, %v4166_v3 }
 0x246   :  { %v5837_v57 = vpop.f32.mrb[168].mxu0  ;;  %v8678_v25 = vadd.f32 %v5900_v58, %v4169_v9 }
 0x247   :  { %v5901_v24 = vpop.f32.mrb[168].mxu1  ;;  %v5838_v31 = vpop.f32.mrb[169].mxu0 }
 0x248   :  { %v5902_v28 = vpop.f32.mrb[169].mxu1  ;;  %v5839_v35 = vadd.f32 %v5838_v31, %v5837_v57  ;;  %v5840_v0 = vpop.f32.mrb[170].mxu0 }
 0x249   :  { %v5903_v13 = vadd.f32 %v5902_v28, %v5901_v24  ;;  %v5904_v21 = vpop.f32.mrb[170].mxu1  ;;  %v5841_v4 = vpop.f32.mrb[171].mxu0 }
 0x24a   :  { %v5905_v36 = vpop.f32.mrb[171].mxu1  ;;  %v4174_v5 = vadd.f32 %v5839_v35, %v8628_v43  ;;  %v5842_v53 = vadd.f32 %v5841_v4, %v5840_v0 }
 0x24b   :  { %v5906_v2 = vadd.f32 %v5905_v36, %v5904_v21 }
 0x24c   :  { %v4177_v59 = vadd.f32 %v5842_v53, %v8630_v54  ;;  %v8682_v8 = vadd.f32 %v5903_v13, %v4174_v5 }
 0x24e   :  { %v5843_v63 = vpop.f32.mrb[172].mxu0  ;;  %v8684_v46 = vadd.f32 %v5906_v2, %v4177_v59 }
 0x24f   :  { %v5907_v1 = vpop.f32.mrb[172].mxu1  ;;  %v5844_v41 = vpop.f32.mrb[173].mxu0 }
 0x250   :  { %v5908_v7 = vpop.f32.mrb[173].mxu1  ;;  %v5845_v38 = vadd.f32 %v5844_v41, %v5843_v63  ;;  %v5846_v42 = vpop.f32.mrb[174].mxu0 }
 0x251   :  { %v5909_v50 = vadd.f32 %v5908_v7, %v5907_v1  ;;  %v5910_v23 = vpop.f32.mrb[174].mxu1  ;;  %v5847_v62 = vpop.f32.mrb[175].mxu0 }
 0x252   :  { %v5911_v61 = vpop.f32.mrb[175].mxu1  ;;  %v4182_v43 = vadd.f32 %v5845_v38, %v8634_v49  ;;  %v5848_v37 = vadd.f32 %v5847_v62, %v5846_v42 }
 0x253   :  { %v5912_v39 = vadd.f32 %v5911_v61, %v5910_v23 }
 0x254   :  { %v4185_v54 = vadd.f32 %v5848_v37, %v8636_v20  ;;  %v8688_v29 = vadd.f32 %v5909_v50, %v4182_v43 }
 0x256   :  { %v5849_v45 = vpop.f32.mrb[176].mxu0  ;;  %v8690_v52 = vadd.f32 %v5912_v39, %v4185_v54 }
 0x257   :  { %v5913_v55 = vpop.f32.mrb[176].mxu1  ;;  %v5850_v19 = vpop.f32.mrb[177].mxu0 }
 0x258   :  { %v5914_v32 = vpop.f32.mrb[177].mxu1  ;;  %v5851_v14 = vadd.f32 %v5850_v19, %v5849_v45  ;;  %v5852_v33 = vpop.f32.mrb[178].mxu0 }
 0x259   :  { %v5915_v22 = vadd.f32 %v5914_v32, %v5913_v55  ;;  %v5916_v48 = vpop.f32.mrb[178].mxu1  ;;  %v5853_v26 = vpop.f32.mrb[179].mxu0 }
 0x25a   :  { %v5917_v17 = vpop.f32.mrb[179].mxu1  ;;  %v4190_v49 = vadd.f32 %v5851_v14, %v8640_v6  ;;  %v5854_v12 = vadd.f32 %v5853_v26, %v5852_v33 }
 0x25b   :  { %v5918_v51 = vadd.f32 %v5917_v17, %v5916_v48 }
 0x25c   :  { %v4193_v20 = vadd.f32 %v5854_v12, %v8645_v18  ;;  %v8694_v15 = vadd.f32 %v5915_v22, %v4190_v49 }
 0x25e   :  { %v5855_v47 = vpop.f32.mrb[180].mxu0  ;;  %v8696_v34 = vadd.f32 %v5918_v51, %v4193_v20 }
 0x25f   :  { %v5919_v3 = vpop.f32.mrb[180].mxu1  ;;  %v5856_v58 = vpop.f32.mrb[181].mxu0 }
 0x260   :  { %v5920_v9 = vpop.f32.mrb[181].mxu1  ;;  %v5857_v57 = vadd.f32 %v5856_v58, %v5855_v47  ;;  %v5858_v24 = vpop.f32.mrb[182].mxu0 }
 0x261   :  { %v5921_v31 = vadd.f32 %v5920_v9, %v5919_v3  ;;  %v5922_v28 = vpop.f32.mrb[182].mxu1  ;;  %v5859_v35 = vpop.f32.mrb[183].mxu0 }
 0x262   :  { %v5923_v0 = vpop.f32.mrb[183].mxu1  ;;  %v4198_v6 = vadd.f32 %v5857_v57, %v8652_v10  ;;  %v5860_v13 = vadd.f32 %v5859_v35, %v5858_v24 }
 0x263   :  { %v5924_v21 = vadd.f32 %v5923_v0, %v5922_v28 }
 0x264   :  { %v4201_v18 = vadd.f32 %v5860_v13, %v8654_v27  ;;  %v8700_v4 = vadd.f32 %v5921_v31, %v4198_v6 }
 0x266   :  { %v5861_v36 = vpop.f32.mrb[184].mxu0  ;;  %v8702_v53 = vadd.f32 %v5924_v21, %v4201_v18 }
 0x267   :  { %v5925_v5 = vpop.f32.mrb[184].mxu1  ;;  %v5862_v2 = vpop.f32.mrb[185].mxu0 }
 0x268   :  { %v5926_v59 = vpop.f32.mrb[185].mxu1  ;;  %v5863_v63 = vadd.f32 %v5862_v2, %v5861_v36  ;;  %v5864_v1 = vpop.f32.mrb[186].mxu0 }
 0x269   :  { %v5927_v41 = vadd.f32 %v5926_v59, %v5925_v5  ;;  %v5928_v7 = vpop.f32.mrb[186].mxu1  ;;  %v5865_v38 = vpop.f32.mrb[187].mxu0 }
 0x26a   :  { %v5929_v42 = vpop.f32.mrb[187].mxu1  ;;  %v4206_v10 = vadd.f32 %v5863_v63, %v8658_v11  ;;  %v5866_v50 = vadd.f32 %v5865_v38, %v5864_v1 }
 0x26b   :  { %v5930_v23 = vadd.f32 %v5929_v42, %v5928_v7 }
 0x26c   :  { %v4209_v27 = vadd.f32 %v5866_v50, %v8660_v40  ;;  %v8706_v62 = vadd.f32 %v5927_v41, %v4206_v10 }
 0x26e   :  { %v5867_v61 = vpop.f32.mrb[188].mxu0  ;;  %v8708_v37 = vadd.f32 %v5930_v23, %v4209_v27 }
 0x26f   :  { %v5931_v43 = vpop.f32.mrb[188].mxu1  ;;  %v5868_v39 = vpop.f32.mrb[189].mxu0 }
 0x270   :  { %v5932_v54 = vpop.f32.mrb[189].mxu1  ;;  %v5869_v45 = vadd.f32 %v5868_v39, %v5867_v61  ;;  %v5870_v55 = vpop.f32.mrb[190].mxu0 }
 0x271   :  { %v5933_v19 = vadd.f32 %v5932_v54, %v5931_v43  ;;  %v5934_v32 = vpop.f32.mrb[190].mxu1  ;;  %v5871_v14 = vpop.f32.mrb[191].mxu0 }
 0x272   :  { %v5935_v33 = vpop.f32.mrb[191].mxu1  ;;  %v4214_v11 = vadd.f32 %v5869_v45, %v8664_v30  ;;  %v5872_v22 = vadd.f32 %v5871_v14, %v5870_v55 }
 0x273   :  { %v5936_v48 = vadd.f32 %v5935_v33, %v5934_v32  ;;  %v6368_v33 = vld [vmem:[%s8806_s3 + $0x18] sm:$0xff]  }
 0x274   :  { %v4217_v40 = vadd.f32 %v5872_v22, %v8666_v56  ;;  %v4311_v26 = vadd.f32 %v5933_v19, %v4214_v11  ;;  %v6369_v11 = vld [vmem:[%s8806_s3 + $0x20] sm:$0xff]   ;;  %v6370_v22 = vld [vmem:[%s8806_s3 + $0x30] sm:$0xff]  }
 0x276   :  { %v6011_v17 = vpop.f32.mrb[192].mxu0  ;;  %v8712_v49 = vadd.f32 %v5936_v48, %v4217_v40  ;;  %v6371_v48 = vld [vmem:[%s8806_s3 + $0x28] sm:$0xff]   ;;  %v6372_v40 = vld [vmem:[%s8806_s3 + $0x38] sm:$0xff]  }
 0x277   :  { %v4360_v12 = vadd.f32 %v6011_v17, %v8676_v44  ;;  %v4351_v51 = vpop.f32.mrb[193].mxu0 }
 0x278   :  { %v4352_v20 = vadd.f32 %v4351_v51, %v8670_v16  ;;  %v6012_v47 = vpop.f32.mrb[194].mxu0 }
 0x279   :  { %v4363_v3 = vadd.f32 %v6012_v47, %v8678_v25  ;;  %v4354_v58 = vpop.f32.mrb[195].mxu0  ;;  %v4416_v30 = vmax.f32 %v4360_v12, 0.0 }
 0x27a   :  { %v4355_v9 = vadd.f32 %v4354_v58, %v8672_v60  ;;  %v4414_v24 = vmax.f32 %v4352_v20, 0.0 }
 0x27b   :  { %v4417_v57 = vmax.f32 %v4363_v3, 0.0 }
 0x27c   :  { %v4415_v31 = vmax.f32 %v4355_v9, 0.0 }
 0x27d   :  { %v8718_v56 = vpack.c.bf16 %v4417_v57, %v4416_v30 }
 0x27e   :  { %v8720_v28 = vpack.c.bf16 %v4415_v31, %v4414_v24  ;;  %v6015_v35 = vpop.f32.mrb[196].mxu0 }
 0x27f   :  { %v4376_v44 = vadd.f32 %v6015_v35, %v8688_v29  ;;  %v4367_v0 = vpop.f32.mrb[197].mxu0 }
 0x280   :  { %v4368_v16 = vadd.f32 %v4367_v0, %v8682_v8  ;;  %v6016_v6 = vpop.f32.mrb[198].mxu0  ;;  %6025 = vmatprep.subr.bf16.mxu1 %v8720_v28  ;;  %6045 = vmatprep.subr.bf16.mxu0 %v8720_v28 }
 0x281   :  { %v4379_v60 = vadd.f32 %v6016_v6, %v8690_v52  ;;  %v4370_v25 = vpop.f32.mrb[199].mxu0  ;;  %6026 = vmatpush3.bf16.msra.mxu1 %v8720_v28  ;;  %6046 = vmatpush3.bf16.msra.mxu0 %v8720_v28  ;;  %v4420_v29 = vmax.f32 %v4376_v44, 0.0 }
 0x282   :  { %v4371_v13 = vadd.f32 %v4370_v25, %v8684_v46  ;;  %6027 = vmatprep.subr.bf16.mxu1 %v8718_v56  ;;  %6047 = vmatprep.subr.bf16.mxu0 %v8718_v56  ;;  %v4418_v21 = vmax.f32 %v4368_v16, 0.0 }
 0x283   :  { %v4421_v8 = vmax.f32 %v4379_v60, 0.0 }
 0x284   :  { %v4419_v18 = vmax.f32 %v4371_v13, 0.0 }
 0x285   :  { %v8732_v36 = vpack.c.bf16 %v4421_v8, %v4420_v29  ;;  %6028 = vmatpush3.bf16.msra.mxu1 %v8718_v56  ;;  %6048 = vmatpush3.bf16.msra.mxu0 %v8718_v56 }
 0x286   :  { %v8736_v52 = vpack.c.bf16 %v4419_v18, %v4418_v21  ;;  %v6019_v5 = vpop.f32.mrb[200].mxu0 }
 0x287   :  { %v4392_v2 = vadd.f32 %v6019_v5, %v8700_v4  ;;  %v4383_v46 = vpop.f32.mrb[201].mxu0 }
 0x288   :  { %v4384_v59 = vadd.f32 %v4383_v46, %v8694_v15  ;;  %v6020_v63 = vpop.f32.mrb[202].mxu0  ;;  %6029 = vmatprep.subr.bf16.mxu1 %v8736_v52  ;;  %6049 = vmatprep.subr.bf16.mxu0 %v8736_v52 }
 0x289   :  { %v4395_v1 = vadd.f32 %v6020_v63, %v8702_v53  ;;  %v4386_v41 = vpop.f32.mrb[203].mxu0  ;;  %6030 = vmatpush3.bf16.msra.mxu1 %v8736_v52  ;;  %6050 = vmatpush3.bf16.msra.mxu0 %v8736_v52  ;;  %v4424_v4 = vmax.f32 %v4392_v2, 0.0 }
 0x28a   :  { %v4387_v7 = vadd.f32 %v4386_v41, %v8696_v34  ;;  %6031 = vmatprep.subr.bf16.mxu1 %v8732_v36  ;;  %6051 = vmatprep.subr.bf16.mxu0 %v8732_v36  ;;  %v4422_v38 = vmax.f32 %v4384_v59, 0.0 }
 0x28b   :  { %v4425_v15 = vmax.f32 %v4395_v1, 0.0 }
 0x28c   :  { %v4423_v42 = vmax.f32 %v4387_v7, 0.0 }
 0x28d   :  { %v8748_v10 = vpack.c.bf16 %v4425_v15, %v4424_v4  ;;  %6032 = vmatpush3.bf16.msra.mxu1 %v8732_v36  ;;  %6052 = vmatpush3.bf16.msra.mxu0 %v8732_v36 }
 0x28e   :  { %v4434_v53 = vpack.c.bf16 %v4423_v42, %v4422_v38  ;;  %v6023_v50 = vpop.f32.mrb[204].mxu0 }
 0x28f   :  { %v4408_v23 = vadd.f32 %v6023_v50, %v4311_v26  ;;  %v4399_v27 = vpop.f32.mrb[205].mxu0 }
 0x290   :  { %v4400_v34 = vadd.f32 %v4399_v27, %v8706_v62  ;;  %v6024_v61 = vpop.f32.mrb[206].mxu0  ;;  %6033 = vmatprep.subr.bf16.mxu1 %v4434_v53  ;;  %6053 = vmatprep.subr.bf16.mxu0 %v4434_v53 }
 0x291   :  { %v4411_v43 = vadd.f32 %v6024_v61, %v8712_v49  ;;  %v4402_v39 = vpop.f32.mrb[207].mxu0  ;;  %6034 = vmatpush3.bf16.msra.mxu1 %v4434_v53  ;;  %6054 = vmatpush3.bf16.msra.mxu0 %v4434_v53  ;;  %v4428_v45 = vmax.f32 %v4408_v23, 0.0 }
 0x292   :  { %v4403_v54 = vadd.f32 %v4402_v39, %v8708_v37  ;;  %6035 = vmatprep.subr.bf16.mxu1 %v8748_v10  ;;  %6055 = vmatprep.subr.bf16.mxu0 %v8748_v10  ;;  %v4426_v19 = vmax.f32 %v4400_v34, 0.0  ;;  %v6367_v37 = vld [vmem:[%s8806_s3 + $0x8] sm:$0xff]  }
 0x293   :  { %v4429_v55 = vmax.f32 %v4411_v43, 0.0 }
 0x294   :  { %v4427_v32 = vmax.f32 %v4403_v54, 0.0 }
 0x295   :  { %v4437_v14 = vpack.c.bf16 %v4429_v55, %v4428_v45  ;;  %6036 = vmatpush3.bf16.msra.mxu1 %v8748_v10  ;;  %6056 = vmatpush3.bf16.msra.mxu0 %v8748_v10 }
 0x296   :  { %v4436_v62 = vpack.c.bf16 %v4427_v32, %v4426_v19 }
 0x298   :  { %6037 = vmatprep.subr.bf16.mxu1 %v4436_v62  ;;  %6057 = vmatprep.subr.bf16.mxu0 %v4436_v62 }
 0x299   :  { %6038 = vmatpush3.bf16.msra.mxu1 %v4436_v62  ;;  %6058 = vmatpush3.bf16.msra.mxu0 %v4436_v62 }
 0x29a   :  { %6039 = vmatprep.subr.bf16.mxu1 %v4437_v14  ;;  %6059 = vmatprep.subr.bf16.mxu0 %v4437_v14 }
 0x29d   :  { %6040 = vmatpush3.bf16.msra.mxu1 %v4437_v14  ;;  %6060 = vmatpush3.bf16.msra.mxu0 %v4437_v14 }
 0x29e   :  { %6065 = vmatprep.subr.bf16.mxu1 %v8720_v28  ;;  %6085 = vmatprep.subr.bf16.mxu0 %v8720_v28 }
 0x2a0   :  { %6042 = vmatmul.mubr.bf16.vlgmr.msra.gmra.mrb[192].mxu1 %v6367_v37  ;;  %6062 = vmatmul.mubr.bf16.vlgmr.msra.gmra.mrb[208].mxu0 %v6368_v33 }
 0x2a1   :  { %6066 = vmatpush3.bf16.msra.mxu1 %v8720_v28  ;;  %6086 = vmatpush3.bf16.msra.mxu0 %v8720_v28 }
 0x2a2   :  { %6067 = vmatprep.subr.bf16.mxu1 %v8718_v56  ;;  %6087 = vmatprep.subr.bf16.mxu0 %v8718_v56 }
 0x2a3   :  { %6081 = vmatprep.mubr.bf16.mxu1 %v6369_v11  ;;  %6101 = vmatprep.mubr.bf16.mxu0 %v6370_v22 }
 0x2a5   :  { %6068 = vmatpush3.bf16.msra.mxu1 %v8718_v56  ;;  %6088 = vmatpush3.bf16.msra.mxu0 %v8718_v56 }
 0x2a6   :  { %6069 = vmatprep.subr.bf16.mxu1 %v8736_v52  ;;  %6089 = vmatprep.subr.bf16.mxu0 %v8736_v52 }
 0x2a9   :  { %6070 = vmatpush3.bf16.msra.mxu1 %v8736_v52  ;;  %6090 = vmatpush3.bf16.msra.mxu0 %v8736_v52 }
 0x2aa   :  { %6071 = vmatprep.subr.bf16.mxu1 %v8732_v36  ;;  %6091 = vmatprep.subr.bf16.mxu0 %v8732_v36 }
 0x2ad   :  { %6072 = vmatpush3.bf16.msra.mxu1 %v8732_v36  ;;  %6092 = vmatpush3.bf16.msra.mxu0 %v8732_v36 }
 0x2ae   :  { %6073 = vmatprep.subr.bf16.mxu1 %v4434_v53  ;;  %6093 = vmatprep.subr.bf16.mxu0 %v4434_v53 }
 0x2b1   :  { %6074 = vmatpush3.bf16.msra.mxu1 %v4434_v53  ;;  %6094 = vmatpush3.bf16.msra.mxu0 %v4434_v53 }
 0x2b2   :  { %6075 = vmatprep.subr.bf16.mxu1 %v8748_v10  ;;  %6095 = vmatprep.subr.bf16.mxu0 %v8748_v10 }
 0x2b5   :  { %6076 = vmatpush3.bf16.msra.mxu1 %v8748_v10  ;;  %6096 = vmatpush3.bf16.msra.mxu0 %v8748_v10 }
 0x2b6   :  { %6077 = vmatprep.subr.bf16.mxu1 %v4436_v62  ;;  %6097 = vmatprep.subr.bf16.mxu0 %v4436_v62 }
 0x2b9   :  { %6078 = vmatpush3.bf16.msra.mxu1 %v4436_v62  ;;  %6098 = vmatpush3.bf16.msra.mxu0 %v4436_v62 }
 0x2ba   :  { %6079 = vmatprep.subr.bf16.mxu1 %v4437_v14  ;;  %6099 = vmatprep.subr.bf16.mxu0 %v4437_v14 }
 0x2bd   :  { %6080 = vmatpush3.bf16.msra.mxu1 %v4437_v14  ;;  %6100 = vmatpush3.bf16.msra.mxu0 %v4437_v14 }
 0x2c0   :  { %6082 = vmatmul.mubr.bf16.vlgmr.msra.gmra.mrb[196].mxu1 %v6371_v48  ;;  %6102 = vmatmul.mubr.bf16.vlgmr.msra.gmra.mrb[212].mxu0 %v6372_v40 }
 0x373   :  { %v6043_v26 = vpop.f32.mrb[192].mxu1  ;;  %v6063_v17 = vpop.f32.mrb[208].mxu0 }
 0x374   :  { %v4703_v49 = vmax.f32 %v6043_v26, %v6063_v17  ;;  %v4488_v12 = vpop.f32.mrb[193].mxu1  ;;  %v4554_v51 = vpop.f32.mrb[209].mxu0 }
 0x375   :  { %v4701_v20 = vmax.f32 %v4488_v12, %v4554_v51  ;;  %v6044_v47 = vpop.f32.mrb[194].mxu1  ;;  %v6064_v3 = vpop.f32.mrb[210].mxu0 }
 0x376   :  { %v4704_v58 = vmax.f32 %v6044_v47, %v6064_v3  ;;  %v4491_v9 = vpop.f32.mrb[195].mxu1  ;;  %v4557_v30 = vpop.f32.mrb[211].mxu0 }
 0x377   :  { %v4702_v57 = vmax.f32 %v4491_v9, %v4557_v30 }
 0x393   :  { %v6083_v24 = vpop.f32.mrb[196].mxu1  ;;  %v6103_v31 = vpop.f32.mrb[212].mxu0 }
 0x394   :  { %v4707_v56 = vmax.f32 %v6083_v24, %v6103_v31  ;;  %v4620_v28 = vpop.f32.mrb[197].mxu1  ;;  %v4686_v35 = vpop.f32.mrb[213].mxu0 }
 0x395   :  { %v4705_v44 = vmax.f32 %v4620_v28, %v4686_v35  ;;  %v6084_v0 = vpop.f32.mrb[198].mxu1  ;;  %v6104_v16 = vpop.f32.mrb[214].mxu0 }
 0x396   :  { %v4711_v6 = vmax.f32 %v4703_v49, %v4707_v56  ;;  %v4708_v60 = vmax.f32 %v6084_v0, %v6104_v16  ;;  %v4623_v25 = vpop.f32.mrb[199].mxu1  ;;  %v4689_v13 = vpop.f32.mrb[215].mxu0 }
 0x397   :  { %v4709_v29 = vmax.f32 %v4701_v20, %v4705_v44  ;;  %v4706_v8 = vmax.f32 %v4623_v25, %v4689_v13 }
 0x398   :  { %v4712_v21 = vmax.f32 %v4704_v58, %v4708_v60 }
 0x399   :  { %v4710_v18 = vmax.f32 %v4702_v57, %v4706_v8 }
 0x39a   :  { %v5166_v36 = vpack.c.bf16 %v4712_v21, %v4711_v6 }
 0x39b   :  { %v5161_v52 = vpack.c.bf16 %v4710_v18, %v4709_v29 }
 0x39c   :  { %5168 = vst [vmem:[%s8807_s4 + $0x8] sm:$0xff] %v5166_v36  }
 0x39d   :  { %5162 = vst [vmem:[%s8807_s4] sm:$0xff] %v5161_v52  }

// kernel: forward.3
= control target key start
LH: loop header
LB: loop body
LE: loop exit
PB: predicated region body
PF: predicated region fallthrough
CT: control target
= control target key end

     0   :  { %10 = vsyncpa [#allocation3], 0  ;;  %s10437_s0 = inlined_call_operand.vmem [shape: bf16[2,28,28], index: 0, kind: input, shape index: {}]   ;;  %s10438_s1 = inlined_call_operand.hbm [shape: bf16[5,28,3072], index: 1, kind: input, shape index: {}]   ;;  %s10439_s2 = inlined_call_operand.hbm [shape: f32[1,3072], index: 2, kind: input, shape index: {}]   ;;  %s10440_s3 = inlined_call_operand.vmem [shape: bf16[24,48], index: 3, kind: input, shape index: {}]   ;;  %s10441_s4 = inlined_call_operand.vmem [shape: bf16[24,48], index: 4, kind: input, shape index: {}]   ;;  %s10442_s5 = inlined_call_operand.vmem [shape: bf16[24,1536], index: 5, kind: output, shape index: {}]  }
   0x1   :  { %11 = vsyncpa [#allocation5], 0  ;;  %s8776_s18 = smov [#allocation2]   ;;  %s8728_s22 = scalar_lea.hbm %s10438_s1, 30720 }
   0x2   :  { %s19_s19 = sshll.u32 %s8776_s18, 4  ;;  %p8729_p0 = scmp.ne.s32.totalorder %s10438_s1, %s8728_s22  ;;  %s20_s19 = int_to_ptr.vmem [resolvable:$true] %s19_s19 }
   0x3   :  { %p8732_p1 = scmp.lt.u32.totalorder %s8728_s22, %s10438_s1 }
   0x5   :  { %p8734_p2 = pnand %p8732_p1, %p8729_p0 }
   0x7   :  { %8737 = shalt.err (!%p8734_p2)
}
   0x8   :  { %s8738_s27 = scalar_lea.vmem %s20_s19, 30720  ;;  %p8743_p4 = scmp.lt.s32.totalorder %s20_s19, %s20_s19 }
   0x9   :  { %p8739_p3 = scmp.ne.s32.totalorder %s20_s19, %s8738_s27  ;;  %p8744_p5 = scmp.lt.s32.totalorder %s8738_s27, %s8738_s27 }
   0xb   :  { %p8745_p6 = por %p8744_p5, %p8743_p4 }
   0xd   :  { %p8746_p7 = pnand %p8745_p6, %p8739_p3 }
   0xf   :  { %8749 = shalt.err (!%p8746_p7)
}
  0x10   :  { %s8777_s28 = smov 1536   ;;  %s8778_s29 = smov 96  }
  0x11   :  { %25 = dma.hbm_to_vmem [thread:$0]  %s10438_s1, 30720, %s20_s19, [#allocation3], %s8777_s28, %s8777_s28, %s8778_s29  }
  0x12   :  { %s8779_s7 = smov [#allocation4]   ;;  %s8750_s11 = scalar_lea.hbm %s10439_s2, 384 }
  0x13   :  { %s32_s8 = sshll.u32 %s8779_s7, 4  ;;  %p8751_p8 = scmp.ne.s32.totalorder %s10439_s2, %s8750_s11  ;;  %s33_s8 = int_to_ptr.vmem [resolvable:$true] %s32_s8 }
  0x14   :  { %p8754_p9 = scmp.lt.u32.totalorder %s8750_s11, %s10439_s2 }
  0x16   :  { %p8756_p10 = pnand %p8754_p9, %p8751_p8 }
  0x18   :  { %8759 = shalt.err (!%p8756_p10)
}
  0x19   :  { %s8760_s16 = scalar_lea.vmem %s33_s8, 384  ;;  %p8765_p12 = scmp.lt.s32.totalorder %s33_s8, %s33_s8 }
  0x1a   :  { %p8761_p11 = scmp.ne.s32.totalorder %s33_s8, %s8760_s16  ;;  %p8766_p13 = scmp.lt.s32.totalorder %s8760_s16, %s8760_s16 }
  0x1c   :  { %p8767_p0 = por %p8766_p13, %p8765_p12 }
  0x1e   :  { %p8768_p1 = pnand %p8767_p0, %p8761_p11 }
  0x20   :  { %8771 = shalt.err (!%p8768_p1)
}
  0x21   :  { %35 = dma.hbm_to_vmem [thread:$0]  %s10439_s2, 384, %s33_s8, [#allocation5]  }
  0x22   :  { %8772 = dma.done.wait [#allocation3], 30720  }
  0x23   :  { %8773 = vsyncadd [#allocation3], 4294936576 }
  0x24   :  { %8774 = dma.done.wait [#allocation5], 384  }
  0x25   :  { %8775 = vsyncadd [#allocation5], 4294966912  ;;  %v8780_v0 = vmov 0   ;;  %v175_v1 = vld [vmem:[#allocation2 + $0x180] sm:$0xff]  ;;  %v176_v3 = vld [vmem:[#allocation2 + $0x188] sm:$0xff]  ;;  %vm458_vm0 = vcmask 1045504  }
  0x26   :  { %563 = vmatprep.mubr.bf16.mxu0 %v8780_v0  ;;  %626 = vmatprep.mubr.bf16.mxu1 %v8780_v0  ;;  %v187_v2 = vld [vmem:[#allocation2 + $0x1e0] sm:$0xff]  ;;  %vm103_vm1 = vsmask.f32 3328  ;;  %v188_v5 = vld [vmem:[#allocation2 + $0x1e8] sm:$0xff]  ;;  %vm104_vm2 = vsmask.f32 7440 }
  0x27   :  { %v7564_v4 = vcombine.high %v175_v1, %v187_v2  ;;  %v7563_v6 = vcombine.low %v175_v1, %v187_v2  ;;  %v199_v7 = vld [vmem:[#allocation2 + $0x240] sm:$0xff]  ;;  %v7566_v9 = vcombine.high %v176_v3, %v188_v5  ;;  %v7565_v10 = vcombine.low %v176_v3, %v188_v5  ;;  %v200_v12 = vld [vmem:[#allocation2 + $0x248] sm:$0xff]  ;;  %v8857_v25 = vld [vmem:[#allocation2 + $0x198] sm:$0xff] }
  0x28   :  { %v211_v8 = vld [vmem:[#allocation2 + $0x2a0] sm:$0x33]  ;;  %v212_v13 = vld [vmem:[#allocation2 + $0x2a8] sm:$0x33]  ;;  %v8859_v26 = vld [vmem:[#allocation2 + $0x1f8] sm:$0xff]  ;;  %vm448_vm3 = vcmask 228352  }
  0x29   :  { %v7588_v11 = vcombine.high %v199_v7, %v211_v8  ;;  %v7587_v14 = vcombine.low %v199_v7, %v211_v8  ;;  %v8840_v15 = vld [vmem:[%s10437_s0] sm:$0xf]  ;;  %531 = vmatprep.subr.bf16.mxu0 %v7564_v4  ;;  %v7590_v16 = vcombine.high %v200_v12, %v212_v13  ;;  %v7589_v17 = vcombine.low %v200_v12, %v212_v13  ;;  %v8845_v18 = vld [vmem:[%s10437_s0 + $0x4] sm:$0xf]  ;;  %v8850_v19 = vld [vmem:[%s10437_s0 + $0x8] sm:$0xf] }
  0x2a   :  { %v107_v20 = vshrl.u32 %v8840_v15, 16  ;;  %v110_v21 = vshll.u32 %v8840_v15, 16  ;;  %594 = vmatprep.subr.bf16.mxu1 %v7566_v9  ;;  %532 = vmatpush1.bf16.msra.mxu0 %v7563_v6  ;;  %v116_v22 = vshll.u32 %v8845_v18, 16  ;;  %v120_v23 = vshrl.u32 %v8845_v18, 16  ;;  %v177_v30 = vld [vmem:[#allocation2 + $0x190] sm:$0xff]  ;;  %vm8895_vm4 = vmor %vm103_vm1, %vm104_vm2  ;;  %v202_v48 = vld [vmem:[#allocation2 + $0x258] sm:$0xff] }
  0x2b   :  { %v126_v24 = vshll.u32 %v8850_v19, 16  ;;  %595 = vmatpush1.bf16.msra.mxu1 %v7565_v10  ;;  %7611 = vmatprep.subr.msk.bf16.mxu0 %vm458_vm0, %v7588_v11  ;;  %v460_v27 = vsel %vm458_vm0, %v7587_v14, 0  ;;  %v189_v31 = vld [vmem:[#allocation2 + $0x1f0] sm:$0xff]  ;;  %v466_v32 = vsel %vm458_vm0, %v7589_v17, 0  ;;  %v7570_v35 = vcombine.high %v8857_v25, %v8859_v26  ;;  %v8878_v36 = vld [vmem:[%s10437_s0 + $0xc] sm:$0x3] }
  0x2c   :  { %v109_v28 = vrot.slane %v107_v20, 4  ;;  %v112_v29 = vrot.slane %v110_v21, 5  ;;  %7615 = vmatprep.subr.msk.bf16.mxu1 %vm458_vm0, %v7590_v16  ;;  %v118_v33 = vrot.slane %v116_v22, 5  ;;  %v122_v34 = vrot.slane %v120_v23, 4  ;;  %v8885_v40 = vld [vmem:[%s10437_s0 + $0x10] sm:$0xf] }
  0x2d   :  { %v128_v38 = vrot.slane %v126_v24, 5  ;;  %v7568_v39 = vcombine.high %v177_v30, %v189_v31  ;;  %v8890_v41 = vld [vmem:[%s10437_s0 + $0x14] sm:$0xf]  ;;  %v130_v42 = vshrl.u32 %v8850_v19, 16  ;;  %v136_v45 = vshll.u32 %v8878_v36, 16  ;;  %v180_v16 = vld [vmem:[#allocation2 + $0x1a8] sm:$0xff] }
  0x2e   :  { %v113_v37 = vor.u32 %v112_v29, %v109_v28  ;;  %534 = vmatpush1.bf16.msra.mxu0 %v460_v27  ;;  %v123_v44 = vor.u32 %v122_v34, %v118_v33  ;;  %v141_v46 = vshrl.u32 %v8885_v40, 16  ;;  %v144_v47 = vshll.u32 %v8885_v40, 16  ;;  %v214_v49 = vld [vmem:[#allocation2 + $0x2b8] sm:$0x33]  ;;  %v201_v54 = vld [vmem:[#allocation2 + $0x250] sm:$0xff]  ;;  %v192_v17 = vld [vmem:[#allocation2 + $0x208] sm:$0xff] }
  0x2f   :  { %597 = vmatpush1.bf16.msra.mxu1 %v466_v32  ;;  %v7569_v51 = vcombine.low %v8857_v25, %v8859_v26  ;;  %657 = vmatprep.subr.bf16.mxu0 %v7568_v39  ;;  %v132_v52 = vrot.slane %v130_v42, 4  ;;  %v150_v53 = vshll.u32 %v8890_v41, 16  ;;  %v213_v55 = vld [vmem:[#allocation2 + $0x2b0] sm:$0x33]  ;;  %v7567_v57 = vcombine.low %v177_v30, %v189_v31  ;;  %v8914_v60 = vld [vmem:[%s10437_s0 + $0x18] sm:$0xf] }
  0x30   :  { %v114_v50 = vrot.slane %v113_v37, 4  ;;  %v124_v56 = vrot.slane %v123_v44, 4  ;;  %720 = vmatprep.subr.bf16.mxu1 %v7570_v35  ;;  %v143_v58 = vrot.slane %v141_v46, 4  ;;  %v146_v59 = vrot.slane %v144_v47, 5  ;;  %v8929_v8 = vld [vmem:[%s10437_s0 + $0x1c] sm:$0x3] }
  0x31   :  { %v133_v62 = vor.u32 %v132_v52, %v128_v38  ;;  %v138_v63 = vrot.slane %v136_v45, 5  ;;  %v152_v1 = vrot.slane %v150_v53, 5  ;;  %v7593_v4 = vcombine.low %v202_v48, %v214_v49  ;;  %v179_v27 = vld [vmem:[#allocation2 + $0x1a0] sm:$0xff]  ;;  %v3705_v36 = vld [vmem:[#allocation2 + $0x550] sm:$0xff] }
  0x32   :  { %v119_v61 = vsel %vm8895_vm4, %v114_v50, %v118_v33  ;;  %v129_v2 = vsel %vm8895_vm4, %v124_v56, %v128_v38  ;;  %v147_v3 = vor.u32 %v146_v59, %v143_v58  ;;  %v7591_v5 = vcombine.low %v201_v54, %v213_v55  ;;  %v191_v28 = vld [vmem:[#allocation2 + $0x200] sm:$0xff]  ;;  %v216_v56 = vld [vmem:[#allocation2 + $0x2c8] sm:$0x33] }
  0x33   :  { %v8924_v6 = vcombine.low %v119_v61, %v129_v2  ;;  %v134_v7 = vrot.slane %v133_v62, 4  ;;  %v154_v9 = vshrl.u32 %v8890_v41, 16  ;;  %v160_v10 = vshll.u32 %v8914_v60, 16  ;;  %v215_v58 = vld [vmem:[#allocation2 + $0x2c0] sm:$0x33] }
  0x34   :  { %v148_v11 = vrot.slane %v147_v3, 4  ;;  %v7594_v12 = vcombine.high %v202_v48, %v214_v49  ;;  %v7592_v13 = vcombine.high %v201_v54, %v213_v55  ;;  %v164_v14 = vshrl.u32 %v8914_v60, 16  ;;  %v204_v55 = vld [vmem:[#allocation2 + $0x268] sm:$0xff]  ;;  %v194_v3 = vld [vmem:[#allocation2 + $0x218] sm:$0xff] }
  0x35   :  { %7612 = vmatmul.mubr.msk.bf16.vlgmr.msra.gmra.mrb[0].mxu0 %vm448_vm3, %v8924_v6  ;;  %7616 = vmatmul.mubr.msk.bf16.vlgmr.msra.gmra.mrb[0].mxu1 %vm448_vm3, %v8924_v6  ;;  %v156_v25 = vrot.slane %v154_v9, 4  ;;  %v162_v26 = vrot.slane %v160_v10, 5  ;;  %v139_v29 = vsel %vm8895_vm4, %v134_v7, %v138_v63  ;;  %v170_v32 = vshll.u32 %v8929_v8, 16  ;;  %v182_v63 = vld [vmem:[#allocation2 + $0x1b8] sm:$0xff] }
  0x36   :  { %721 = vmatpush1.bf16.msra.mxu1 %v7569_v51  ;;  %658 = vmatpush1.bf16.msra.mxu0 %v7567_v57  ;;  %v153_v30 = vsel %vm8895_vm4, %v148_v11, %v152_v1  ;;  %v166_v31 = vrot.slane %v164_v14, 4  ;;  %v478_v33 = vsel %vm458_vm0, %v7593_v4, 0  ;;  %v472_v34 = vsel %vm458_vm0, %v7591_v5, 0  ;;  %v203_v57 = vld [vmem:[#allocation2 + $0x260] sm:$0xff]  ;;  %v181_v4 = vld [vmem:[#allocation2 + $0x1b0] sm:$0xff] }
  0x37   :  { %573 = vmatprep.mubr.bf16.mxu0 %v8780_v0  ;;  %636 = vmatprep.mubr.bf16.mxu1 %v8780_v0  ;;  %v157_v35 = vor.u32 %v156_v25, %v152_v1  ;;  %v7574_v37 = vcombine.high %v180_v16, %v192_v17  ;;  %v7572_v39 = vcombine.high %v179_v27, %v191_v28  ;;  %v172_v50 = vrot.slane %v170_v32, 5  ;;  %v193_v5 = vld [vmem:[#allocation2 + $0x210] sm:$0xff] }
  0x38   :  { %7623 = vmatprep.subr.msk.bf16.mxu1 %vm458_vm0, %v7594_v12  ;;  %7619 = vmatprep.subr.msk.bf16.mxu0 %vm458_vm0, %v7592_v13  ;;  %v167_v38 = vor.u32 %v166_v31, %v162_v26  ;;  %v8955_v44 = vcombine.low %v139_v29, %v153_v30  ;;  %v7573_v59 = vcombine.low %v180_v16, %v192_v17  ;;  %v206_v16 = vld [vmem:[#allocation2 + $0x278] sm:$0xff]  ;;  %v205_v25 = vld [vmem:[#allocation2 + $0x270] sm:$0xff]  ;;  %v184_v31 = vld [vmem:[#allocation2 + $0x1c8] sm:$0xff]  ;;  %vm2357_vm5 = vcmask 1042432  }
  0x39   :  { %v158_v48 = vrot.slane %v157_v35, 4  ;;  %v7571_v61 = vcombine.low %v179_v27, %v191_v28  ;;  %v7597_v43 = vcombine.low %v204_v55, %v216_v56  ;;  %v7595_v62 = vcombine.low %v203_v57, %v215_v58  ;;  %v218_v17 = vld [vmem:[#allocation2 + $0x2d8] sm:$0x33]  ;;  %v196_v35 = vld [vmem:[#allocation2 + $0x228] sm:$0xff] }
  0x3a   :  { %723 = vmatpush1.bf16.msra.mxu1 %v478_v33  ;;  %660 = vmatpush1.bf16.msra.mxu0 %v472_v34  ;;  %v168_v49 = vrot.slane %v167_v38, 4  ;;  %v7598_v1 = vcombine.high %v204_v55, %v216_v56  ;;  %v7596_v2 = vcombine.high %v203_v57, %v215_v58  ;;  %v7578_v12 = vcombine.high %v182_v63, %v194_v3  ;;  %v195_v38 = vld [vmem:[#allocation2 + $0x220] sm:$0xff] }
  0x3b   :  { %846 = vmatprep.subr.bf16.mxu1 %v7574_v37  ;;  %783 = vmatprep.subr.bf16.mxu0 %v7572_v39  ;;  %v163_v51 = vsel %vm8895_vm4, %v158_v48, %v162_v26  ;;  %v490_v7 = vsel %vm458_vm0, %v7597_v43, 0  ;;  %v484_v11 = vsel %vm458_vm0, %v7595_v62, 0  ;;  %v7576_v13 = vcombine.high %v181_v4, %v193_v5  ;;  %v217_v26 = vld [vmem:[#allocation2 + $0x2d0] sm:$0x33]  ;;  %v183_v37 = vld [vmem:[#allocation2 + $0x1c0] sm:$0xff]  ;;  %v186_v43 = vld [vmem:[#allocation2 + $0x1d8] sm:$0xff] }
  0x3c   :  { %v173_v52 = vsel %vm8895_vm4, %v168_v49, %v172_v50  ;;  %v7577_v27 = vcombine.low %v182_v63, %v194_v3  ;;  %v7575_v28 = vcombine.low %v181_v4, %v193_v5  ;;  %v7601_v29 = vcombine.low %v206_v16, %v218_v17  ;;  %v207_v55 = vld [vmem:[#allocation2 + $0x280] sm:$0xff]  ;;  %v197_v3 = vld [vmem:[#allocation2 + $0x230] sm:$0xff] }
  0x3d   :  { %7613 = vmatmul.mubr.msk.bf16.gmra.mrb[4].mxu0 %vm448_vm3, %v8955_v44  ;;  %7617 = vmatmul.mubr.msk.bf16.gmra.mrb[4].mxu1 %vm448_vm3, %v8955_v44  ;;  %v8969_v54 = vcombine.low %v163_v51, %v173_v52  ;;  %v7599_v30 = vcombine.low %v205_v25, %v217_v26  ;;  %v7602_v33 = vcombine.high %v206_v16, %v218_v17  ;;  %v208_v51 = vld [vmem:[#allocation2 + $0x288] sm:$0xff]  ;;  %v219_v56 = vld [vmem:[#allocation2 + $0x2e0] sm:$0x33]  ;;  %v209_v16 = vld [vmem:[#allocation2 + $0x290] sm:$0xff]  ;;  %vm2358_vm6 = vcmask 1046532  }
  0x3e   :  { %583 = vmatprep.mubr.bf16.mxu0 %v8780_v0  ;;  %646 = vmatprep.mubr.bf16.mxu1 %v8780_v0  ;;  %v7600_v34 = vcombine.high %v205_v25, %v217_v26  ;;  %v502_v39 = vsel %vm458_vm0, %v7601_v29, 0  ;;  %v7582_v49 = vcombine.high %v184_v31, %v196_v35  ;;  %v7580_v50 = vcombine.high %v183_v37, %v195_v38  ;;  %v220_v52 = vld [vmem:[#allocation2 + $0x2e8] sm:$0x33]  ;;  %v221_v17 = vld [vmem:[#allocation2 + $0x2f0] sm:$0x33]  ;;  %vm9243_vm7 = vmor %vm2357_vm5, %vm2358_vm6 }
  0x3f   :  { %v496_v48 = vsel %vm458_vm0, %v7599_v30, 0  ;;  %v7581_v57 = vcombine.low %v184_v31, %v196_v35  ;;  %v7579_v58 = vcombine.low %v183_v37, %v195_v38  ;;  %v7606_v62 = vcombine.high %v208_v51, %v220_v52  ;;  %v56_v29 = vld [vmem:[#allocation2 + $0x8] sm:$0xff]  ;;  %v67_v35 = vld [vmem:[#allocation2 + $0x60] sm:$0xff] }
  0x40   :  { %v7604_v63 = vcombine.high %v207_v55, %v219_v56  ;;  %v7608_v31 = vcombine.high %v209_v16, %v221_v17  ;;  %vm3635_vm8 = vsmask.f32 2304  ;;  %vm3636_vm9 = vsmask.f32 6416 }
  0x41   :  { %vm9445_vm10 = vmor %vm3635_vm8, %vm3636_vm9  ;;  %vm4933_vm11 = vcmask 1041408   ;;  %vm4934_vm12 = vcmask 1045508   ;;  %vm6744_vm14 = vcmask 392192  }
  0x42   :  { %vm9639_vm13 = vmor %vm4933_vm11, %vm4934_vm12 }
  0x45   :  { %7614 = vmatmul.mubr.msk.bf16.gmra.mrb[8].mxu0 %vm448_vm3, %v8969_v54  ;;  %7618 = vmatmul.mubr.msk.bf16.gmra.mrb[8].mxu1 %vm448_vm3, %v8969_v54 }
  0x46   :  { %689 = vmatprep.mubr.bf16.mxu0 %v8780_v0  ;;  %752 = vmatprep.mubr.bf16.mxu1 %v8780_v0 }
  0x4d   :  { %7620 = vmatmul.mubr.msk.bf16.vlgmr.msra.gmra.mrb[12].mxu0 %vm448_vm3, %v8924_v6  ;;  %7624 = vmatmul.mubr.msk.bf16.vlgmr.msra.gmra.mrb[12].mxu1 %vm448_vm3, %v8924_v6 }
  0x4e   :  { %847 = vmatpush1.bf16.msra.mxu1 %v7573_v59  ;;  %784 = vmatpush1.bf16.msra.mxu0 %v7571_v61  ;;  %v7605_v59 = vcombine.low %v208_v51, %v220_v52  ;;  %v7603_v61 = vcombine.low %v207_v55, %v219_v56  ;;  %v79_v51 = vld [vmem:[#allocation2 + $0xc0] sm:$0xff] }
  0x4f   :  { %699 = vmatprep.mubr.bf16.mxu0 %v8780_v0  ;;  %762 = vmatprep.mubr.bf16.mxu1 %v8780_v0  ;;  %v91_v52 = vld [vmem:[#allocation2 + $0x120] sm:$0x33] }
  0x50   :  { %7631 = vmatprep.subr.msk.bf16.mxu1 %vm458_vm0, %v7598_v1  ;;  %7627 = vmatprep.subr.msk.bf16.mxu0 %vm458_vm0, %v7596_v2  ;;  %v198_v1 = vld [vmem:[#allocation2 + $0x238] sm:$0xff]  ;;  %v185_v2 = vld [vmem:[#allocation2 + $0x1d0] sm:$0xff]  ;;  %v514_v4 = vsel %vm458_vm0, %v7605_v59, 0  ;;  %v508_v5 = vsel %vm458_vm0, %v7603_v61, 0 }
  0x51   :  { %v7585_v25 = vcombine.low %v186_v43, %v198_v1  ;;  %v7583_v26 = vcombine.low %v185_v2, %v197_v3  ;;  %v58_v59 = vld [vmem:[#allocation2 + $0x18] sm:$0xff] }
  0x52   :  { %849 = vmatpush1.bf16.msra.mxu1 %v490_v7  ;;  %786 = vmatpush1.bf16.msra.mxu0 %v484_v11  ;;  %v7586_v7 = vcombine.high %v186_v43, %v198_v1  ;;  %v7584_v11 = vcombine.high %v185_v2, %v197_v3  ;;  %v7687_v43 = vcombine.high %v79_v51, %v91_v52  ;;  %v69_v1 = vld [vmem:[#allocation2 + $0x70] sm:$0xff] }
  0x53   :  { %972 = vmatprep.subr.bf16.mxu1 %v7578_v12  ;;  %909 = vmatprep.subr.bf16.mxu0 %v7576_v13  ;;  %v210_v12 = vld [vmem:[#allocation2 + $0x298] sm:$0xff] }
  0x54   :  { %v222_v13 = vld [vmem:[#allocation2 + $0x2f8] sm:$0x33] }
  0x55   :  { %7621 = vmatmul.mubr.msk.bf16.gmra.mrb[16].mxu0 %vm448_vm3, %v8955_v44  ;;  %7625 = vmatmul.mubr.msk.bf16.gmra.mrb[16].mxu1 %vm448_vm3, %v8955_v44  ;;  %v7610_v30 = vcombine.high %v210_v12, %v222_v13 }
  0x56   :  { %709 = vmatprep.mubr.bf16.mxu0 %v8780_v0  ;;  %772 = vmatprep.mubr.bf16.mxu1 %v8780_v0 }
  0x5d   :  { %7622 = vmatmul.mubr.msk.bf16.gmra.mrb[20].mxu0 %vm448_vm3, %v8969_v54  ;;  %7626 = vmatmul.mubr.msk.bf16.gmra.mrb[20].mxu1 %vm448_vm3, %v8969_v54 }
  0x5e   :  { %815 = vmatprep.mubr.bf16.mxu0 %v8780_v0  ;;  %878 = vmatprep.mubr.bf16.mxu1 %v8780_v0 }
  0x65   :  { %7628 = vmatmul.mubr.msk.bf16.vlgmr.msra.gmra.mrb[24].mxu0 %vm448_vm3, %v8924_v6  ;;  %7632 = vmatmul.mubr.msk.bf16.vlgmr.msra.gmra.mrb[24].mxu1 %vm448_vm3, %v8924_v6 }
  0x66   :  { %973 = vmatpush1.bf16.msra.mxu1 %v7577_v27  ;;  %910 = vmatpush1.bf16.msra.mxu0 %v7575_v28  ;;  %v7609_v27 = vcombine.low %v210_v12, %v222_v13  ;;  %v7607_v28 = vcombine.low %v209_v16, %v221_v17  ;;  %v93_v12 = vld [vmem:[#allocation2 + $0x130] sm:$0x33] }
  0x67   :  { %825 = vmatprep.mubr.bf16.mxu0 %v8780_v0  ;;  %888 = vmatprep.mubr.bf16.mxu1 %v8780_v0 }
  0x68   :  { %7639 = vmatprep.subr.msk.bf16.mxu1 %vm458_vm0, %v7602_v33  ;;  %7635 = vmatprep.subr.msk.bf16.mxu0 %vm458_vm0, %v7600_v34  ;;  %v68_v33 = vld [vmem:[#allocation2 + $0x68] sm:$0xff]  ;;  %v55_v34 = vld [vmem:[#allocation2] sm:$0xff]  ;;  %v526_v37 = vsel %vm458_vm0, %v7609_v27, 0  ;;  %v520_v38 = vsel %vm458_vm0, %v7607_v28, 0 }
  0x69   :  { %v7664_v55 = vcombine.low %v56_v29, %v68_v33  ;;  %v7662_v56 = vcombine.low %v55_v34, %v67_v35 }
  0x6a   :  { %975 = vmatpush1.bf16.msra.mxu1 %v502_v39  ;;  %912 = vmatpush1.bf16.msra.mxu0 %v496_v48  ;;  %v7665_v39 = vcombine.high %v56_v29, %v68_v33  ;;  %v7663_v48 = vcombine.high %v55_v34, %v67_v35  ;;  %v59_v29 = vld [vmem:[#allocation2 + $0x20] sm:$0xff] }
  0x6b   :  { %1098 = vmatprep.subr.bf16.mxu1 %v7582_v49  ;;  %1035 = vmatprep.subr.bf16.mxu0 %v7580_v50  ;;  %v80_v49 = vld [vmem:[#allocation2 + $0xc8] sm:$0xff] }
  0x6c   :  { %v92_v50 = vld [vmem:[#allocation2 + $0x128] sm:$0x33] }
  0x6d   :  { %7629 = vmatmul.mubr.msk.bf16.gmra.mrb[28].mxu0 %vm448_vm3, %v8955_v44  ;;  %7633 = vmatmul.mubr.msk.bf16.gmra.mrb[28].mxu1 %vm448_vm3, %v8955_v44  ;;  %v7689_v61 = vcombine.high %v80_v49, %v92_v50 }
  0x6e   :  { %835 = vmatprep.mubr.bf16.mxu0 %v8780_v0  ;;  %898 = vmatprep.mubr.bf16.mxu1 %v8780_v0 }
  0x75   :  { %7630 = vmatmul.mubr.msk.bf16.gmra.mrb[32].mxu0 %vm448_vm3, %v8969_v54  ;;  %7634 = vmatmul.mubr.msk.bf16.gmra.mrb[32].mxu1 %vm448_vm3, %v8969_v54 }
  0x76   :  { %941 = vmatprep.mubr.bf16.mxu0 %v8780_v0  ;;  %1004 = vmatprep.mubr.bf16.mxu1 %v8780_v0 }
  0x7d   :  { %7636 = vmatmul.mubr.msk.bf16.vlgmr.msra.gmra.mrb[36].mxu0 %vm448_vm3, %v8924_v6  ;;  %7640 = vmatmul.mubr.msk.bf16.vlgmr.msra.gmra.mrb[36].mxu1 %vm448_vm3, %v8924_v6 }
  0x7e   :  { %1099 = vmatpush1.bf16.msra.mxu1 %v7581_v57  ;;  %1036 = vmatpush1.bf16.msra.mxu0 %v7579_v58  ;;  %v7688_v57 = vcombine.low %v80_v49, %v92_v50  ;;  %v7686_v58 = vcombine.low %v79_v51, %v91_v52  ;;  %v83_v49 = vld [vmem:[#allocation2 + $0xe0] sm:$0xff] }
  0x7f   :  { %951 = vmatprep.mubr.bf16.mxu0 %v8780_v0  ;;  %1014 = vmatprep.mubr.bf16.mxu1 %v8780_v0  ;;  %v95_v50 = vld [vmem:[#allocation2 + $0x140] sm:$0x33] }
  0x80   :  { %7647 = vmatprep.subr.msk.bf16.mxu1 %vm458_vm0, %v7606_v62  ;;  %7643 = vmatprep.subr.msk.bf16.mxu0 %vm458_vm0, %v7604_v63  ;;  %v70_v62 = vld [vmem:[#allocation2 + $0x78] sm:$0xff]  ;;  %v57_v63 = vld [vmem:[#allocation2 + $0x10] sm:$0xff]  ;;  %v1534_v2 = vsel %vm458_vm0, %v7688_v57, 0  ;;  %v1528_v3 = vsel %vm458_vm0, %v7686_v58, 0 }
  0x81   :  { %v7668_v13 = vcombine.low %v58_v59, %v70_v62  ;;  %v7666_v16 = vcombine.low %v57_v63, %v69_v1  ;;  %v62_v57 = vld [vmem:[#allocation2 + $0x38] sm:$0xff] }
  0x82   :  { %1101 = vmatpush1.bf16.msra.mxu1 %v514_v4  ;;  %1038 = vmatpush1.bf16.msra.mxu0 %v508_v5  ;;  %v7669_v4 = vcombine.high %v58_v59, %v70_v62  ;;  %v7667_v5 = vcombine.high %v57_v63, %v69_v1  ;;  %v7695_v59 = vcombine.high %v83_v49, %v95_v50  ;;  %v73_v62 = vld [vmem:[#allocation2 + $0x90] sm:$0xff] }
  0x83   :  { %1224 = vmatprep.subr.bf16.mxu1 %v7586_v7  ;;  %1161 = vmatprep.subr.bf16.mxu0 %v7584_v11  ;;  %v94_v7 = vld [vmem:[#allocation2 + $0x138] sm:$0x33]  ;;  %v81_v11 = vld [vmem:[#allocation2 + $0xd0] sm:$0xff] }
  0x84   :  { %v7691_v28 = vcombine.high %v81_v11, %v93_v12 }
  0x85   :  { %7637 = vmatmul.mubr.msk.bf16.gmra.mrb[40].mxu0 %vm448_vm3, %v8955_v44  ;;  %7641 = vmatmul.mubr.msk.bf16.gmra.mrb[40].mxu1 %vm448_vm3, %v8955_v44 }
  0x86   :  { %961 = vmatprep.mubr.bf16.mxu0 %v8780_v0  ;;  %1024 = vmatprep.mubr.bf16.mxu1 %v8780_v0 }
  0x8d   :  { %7638 = vmatmul.mubr.msk.bf16.gmra.mrb[44].mxu0 %vm448_vm3, %v8969_v54  ;;  %7642 = vmatmul.mubr.msk.bf16.gmra.mrb[44].mxu1 %vm448_vm3, %v8969_v54 }
  0x8e   :  { %1067 = vmatprep.mubr.bf16.mxu0 %v8780_v0  ;;  %1130 = vmatprep.mubr.bf16.mxu1 %v8780_v0 }
  0x95   :  { %7644 = vmatmul.mubr.msk.bf16.vlgmr.msra.gmra.mrb[48].mxu0 %vm448_vm3, %v8924_v6  ;;  %7648 = vmatmul.mubr.msk.bf16.vlgmr.msra.gmra.mrb[48].mxu1 %vm448_vm3, %v8924_v6 }
  0x96   :  { %1225 = vmatpush1.bf16.msra.mxu1 %v7585_v25  ;;  %1162 = vmatpush1.bf16.msra.mxu0 %v7583_v26  ;;  %v7690_v25 = vcombine.low %v81_v11, %v93_v12  ;;  %v60_v26 = vld [vmem:[#allocation2 + $0x28] sm:$0xff] }
  0x97   :  { %1077 = vmatprep.mubr.bf16.mxu0 %v8780_v0  ;;  %1140 = vmatprep.mubr.bf16.mxu1 %v8780_v0 }
  0x98   :  { %7655 = vmatprep.subr.msk.bf16.mxu1 %vm458_vm0, %v7610_v30  ;;  %7651 = vmatprep.subr.msk.bf16.mxu0 %vm458_vm0, %v7608_v31  ;;  %v71_v30 = vld [vmem:[#allocation2 + $0x80] sm:$0xff]  ;;  %v1540_v33 = vsel %vm458_vm0, %v7690_v25, 0 }
  0x99   :  { %v7671_v35 = vcombine.high %v59_v29, %v71_v30  ;;  %v7670_v52 = vcombine.low %v59_v29, %v71_v30 }
  0x9a   :  { %1227 = vmatpush1.bf16.msra.mxu1 %v526_v37  ;;  %1164 = vmatpush1.bf16.msra.mxu0 %v520_v38  ;;  %v9103_v37 = vcombine.low %v8850_v19, %v8885_v40  ;;  %v9113_v38 = vcombine.low %v8890_v41, %v8914_v60  ;;  %v3659_v19 = vrot.slane %v144_v47, 6  ;;  %v3662_v40 = vrot.slane %v154_v9, 5 }
  0x9b   :  { %1662 = vmatprep.subr.bf16.mxu1 %v7665_v39  ;;  %1599 = vmatprep.subr.bf16.mxu0 %v7663_v48  ;;  %v84_v39 = vld [vmem:[#allocation2 + $0xe8] sm:$0xff]  ;;  %v3663_v47 = vrot.slane %v150_v53, 6  ;;  %v3667_v41 = vrot.slane %v164_v14, 5  ;;  %v3668_v53 = vrot.slane %v160_v10, 6 }
  0x9c   :  { %v96_v48 = vld [vmem:[#allocation2 + $0x148] sm:$0x33] }
  0x9d   :  { %7645 = vmatmul.mubr.msk.bf16.gmra.mrb[52].mxu0 %vm448_vm3, %v8955_v44  ;;  %7649 = vmatmul.mubr.msk.bf16.gmra.mrb[52].mxu1 %vm448_vm3, %v8955_v44  ;;  %v7697_v58 = vcombine.high %v84_v39, %v96_v48  ;;  %v3669_v14 = vor.u32 %v3668_v53, %v3667_v41  ;;  %v3712_v53 = vld [vmem:[#allocation2 + $0x588] sm:$0xff] }
  0x9e   :  { %1087 = vmatprep.mubr.bf16.mxu0 %v8780_v0  ;;  %1150 = vmatprep.mubr.bf16.mxu1 %v8780_v0 }
  0xa5   :  { %7646 = vmatmul.mubr.msk.bf16.gmra.mrb[56].mxu0 %vm448_vm3, %v8969_v54  ;;  %7650 = vmatmul.mubr.msk.bf16.gmra.mrb[56].mxu1 %vm448_vm3, %v8969_v54 }
  0xa6   :  { %1193 = vmatprep.mubr.bf16.mxu0 %v8780_v0  ;;  %1256 = vmatprep.mubr.bf16.mxu1 %v8780_v0 }
  0xad   :  { %7652 = vmatmul.mubr.msk.bf16.vlgmr.msra.gmra.mrb[60].mxu0 %vm448_vm3, %v8924_v6  ;;  %7656 = vmatmul.mubr.msk.bf16.vlgmr.msra.gmra.mrb[60].mxu1 %vm448_vm3, %v8924_v6  ;;  %v82_v6 = vld [vmem:[#allocation2 + $0xd8] sm:$0xff] }
  0xae   :  { %1663 = vmatpush1.bf16.msra.mxu1 %v7664_v55  ;;  %1600 = vmatpush1.bf16.msra.mxu0 %v7662_v56  ;;  %v7692_v17 = vcombine.low %v82_v6, %v94_v7  ;;  %v7693_v27 = vcombine.high %v82_v6, %v94_v7  ;;  %v7696_v55 = vcombine.low %v84_v39, %v96_v48  ;;  %v85_v6 = vld [vmem:[#allocation2 + $0xf0] sm:$0xff]  ;;  %v87_v39 = vld [vmem:[#allocation2 + $0x100] sm:$0xff] }
  0xaf   :  { %1203 = vmatprep.mubr.bf16.mxu0 %v8780_v0  ;;  %1266 = vmatprep.mubr.bf16.mxu1 %v8780_v0  ;;  %v7694_v56 = vcombine.low %v83_v49, %v95_v50  ;;  %v97_v7 = vld [vmem:[#allocation2 + $0x150] sm:$0x33]  ;;  %v99_v48 = vld [vmem:[#allocation2 + $0x160] sm:$0x33] }
  0xb0   :  { %7714 = vmatprep.subr.msk.bf16.mxu1 %vm458_vm0, %v7689_v61  ;;  %7710 = vmatprep.subr.msk.bf16.mxu0 %vm458_vm0, %v7687_v43  ;;  %v1546_v31 = vsel %vm458_vm0, %v7692_v17, 0  ;;  %v74_v61 = vld [vmem:[#allocation2 + $0x98] sm:$0xff]  ;;  %v61_v43 = vld [vmem:[#allocation2 + $0x30] sm:$0xff]  ;;  %v1558_v63 = vsel %vm458_vm0, %v7696_v55, 0  ;;  %v64_v17 = vld [vmem:[#allocation2 + $0x48] sm:$0xff] }
  0xb1   :  { %v1552_v1 = vsel %vm458_vm0, %v7694_v56, 0  ;;  %v7676_v11 = vcombine.low %v62_v57, %v74_v61  ;;  %v7674_v12 = vcombine.low %v61_v43, %v73_v62  ;;  %v66_v55 = vld [vmem:[#allocation2 + $0x58] sm:$0xff] }
  0xb2   :  { %1665 = vmatpush1.bf16.msra.mxu1 %v1534_v2  ;;  %1602 = vmatpush1.bf16.msra.mxu0 %v1528_v3  ;;  %v7677_v2 = vcombine.high %v62_v57, %v74_v61  ;;  %v7675_v3 = vcombine.high %v61_v43, %v73_v62  ;;  %v7703_v57 = vcombine.high %v87_v39, %v99_v48  ;;  %v77_v61 = vld [vmem:[#allocation2 + $0xb0] sm:$0xff] }
  0xb3   :  { %1788 = vmatprep.subr.bf16.mxu1 %v7669_v4  ;;  %1725 = vmatprep.subr.bf16.mxu0 %v7667_v5  ;;  %v86_v4 = vld [vmem:[#allocation2 + $0xf8] sm:$0xff] }
  0xb4   :  { %v98_v5 = vld [vmem:[#allocation2 + $0x158] sm:$0x33] }
  0xb5   :  { %7653 = vmatmul.mubr.msk.bf16.gmra.mrb[64].mxu0 %vm448_vm3, %v8955_v44  ;;  %7657 = vmatmul.mubr.msk.bf16.gmra.mrb[64].mxu1 %vm448_vm3, %v8955_v44  ;;  %v9089_v44 = vcombine.low %v8840_v15, %v8845_v18  ;;  %v7701_v25 = vcombine.high %v86_v4, %v98_v5  ;;  %v3647_v15 = vrot.slane %v130_v42, 5  ;;  %v3658_v42 = vrot.slane %v141_v46, 5 }
  0xb6   :  { %1213 = vmatprep.mubr.bf16.mxu0 %v8780_v0  ;;  %1276 = vmatprep.mubr.bf16.mxu1 %v8780_v0 }
  0xb7   :  { %v3660_v46 = vor.u32 %v3659_v19, %v3658_v42 }
  0xbd   :  { %7654 = vmatmul.mubr.msk.bf16.gmra.mrb[68].mxu0 %vm448_vm3, %v8969_v54  ;;  %7658 = vmatmul.mubr.msk.bf16.gmra.mrb[68].mxu1 %vm448_vm3, %v8969_v54  ;;  %v72_v54 = vld [vmem:[#allocation2 + $0x88] sm:$0xff] }
  0xbe   :  { %1631 = vmatprep.mubr.bf16.mxu0 %v8780_v0  ;;  %1694 = vmatprep.mubr.bf16.mxu1 %v8780_v0  ;;  %v7673_v34 = vcombine.high %v60_v26, %v72_v54  ;;  %v7672_v51 = vcombine.low %v60_v26, %v72_v54  ;;  %v7699_v26 = vcombine.high %v85_v6, %v97_v7  ;;  %v75_v54 = vld [vmem:[#allocation2 + $0xa0] sm:$0xff] }
  0xc5   :  { %7711 = vmatmul.mubr.msk.bf16.vlgmr.msra.gmra.mrb[0].mxu0 %vm448_vm3, %v9089_v44  ;;  %7715 = vmatmul.mubr.msk.bf16.vlgmr.msra.gmra.mrb[0].mxu1 %vm448_vm3, %v9089_v44 }
  0xc6   :  { %1789 = vmatpush1.bf16.msra.mxu1 %v7668_v13  ;;  %1726 = vmatpush1.bf16.msra.mxu0 %v7666_v16  ;;  %v7700_v13 = vcombine.low %v86_v4, %v98_v5  ;;  %v7698_v16 = vcombine.low %v85_v6, %v97_v7  ;;  %v89_v4 = vld [vmem:[#allocation2 + $0x110] sm:$0xff] }
  0xc7   :  { %1641 = vmatprep.mubr.bf16.mxu0 %v8780_v0  ;;  %1704 = vmatprep.mubr.bf16.mxu1 %v8780_v0  ;;  %v101_v5 = vld [vmem:[#allocation2 + $0x170] sm:$0x33] }
  0xc8   :  { %7722 = vmatprep.subr.msk.bf16.mxu1 %vm458_vm0, %v7693_v27  ;;  %7718 = vmatprep.subr.msk.bf16.mxu0 %vm458_vm0, %v7691_v28  ;;  %v76_v27 = vld [vmem:[#allocation2 + $0xa8] sm:$0xff]  ;;  %v63_v28 = vld [vmem:[#allocation2 + $0x40] sm:$0xff]  ;;  %v1570_v29 = vsel %vm458_vm0, %v7700_v13, 0  ;;  %v1564_v30 = vsel %vm458_vm0, %v7698_v16, 0 }
  0xc9   :  { %v7680_v49 = vcombine.low %v64_v17, %v76_v27  ;;  %v7678_v50 = vcombine.low %v63_v28, %v75_v54  ;;  %v2382_v13 = vld [vmem:[#allocation2 + $0x308] sm:$0xff] }
  0xca   :  { %1791 = vmatpush1.bf16.msra.mxu1 %v1546_v31  ;;  %1728 = vmatpush1.bf16.msra.mxu0 %v1540_v33  ;;  %v7681_v31 = vcombine.high %v64_v17, %v76_v27  ;;  %v7679_v33 = vcombine.high %v63_v28, %v75_v54  ;;  %v7707_v17 = vcombine.high %v89_v4, %v101_v5  ;;  %v2393_v27 = vld [vmem:[#allocation2 + $0x360] sm:$0xff] }
  0xcb   :  { %1914 = vmatprep.subr.bf16.mxu1 %v7673_v34  ;;  %1851 = vmatprep.subr.bf16.mxu0 %v7671_v35  ;;  %v88_v34 = vld [vmem:[#allocation2 + $0x108] sm:$0xff] }
  0xcc   :  { %v100_v35 = vld [vmem:[#allocation2 + $0x168] sm:$0x33] }
  0xcd   :  { %7712 = vmatmul.mubr.msk.bf16.gmra.mrb[4].mxu0 %vm448_vm3, %v9103_v37  ;;  %7716 = vmatmul.mubr.msk.bf16.gmra.mrb[4].mxu1 %vm448_vm3, %v9103_v37  ;;  %v7705_v56 = vcombine.high %v88_v34, %v100_v35 }
  0xce   :  { %1651 = vmatprep.mubr.bf16.mxu0 %v8780_v0  ;;  %1714 = vmatprep.mubr.bf16.mxu1 %v8780_v0 }
  0xd5   :  { %7713 = vmatmul.mubr.msk.bf16.gmra.mrb[8].mxu0 %vm448_vm3, %v9113_v38  ;;  %7717 = vmatmul.mubr.msk.bf16.gmra.mrb[8].mxu1 %vm448_vm3, %v9113_v38 }
  0xd6   :  { %1757 = vmatprep.mubr.bf16.mxu0 %v8780_v0  ;;  %1820 = vmatprep.mubr.bf16.mxu1 %v8780_v0 }
  0xdd   :  { %7719 = vmatmul.mubr.msk.bf16.vlgmr.msra.gmra.mrb[12].mxu0 %vm448_vm3, %v9089_v44  ;;  %7723 = vmatmul.mubr.msk.bf16.vlgmr.msra.gmra.mrb[12].mxu1 %vm448_vm3, %v9089_v44 }
  0xde   :  { %1915 = vmatpush1.bf16.msra.mxu1 %v7672_v51  ;;  %1852 = vmatpush1.bf16.msra.mxu0 %v7670_v52  ;;  %v7704_v51 = vcombine.low %v88_v34, %v100_v35  ;;  %v7702_v52 = vcombine.low %v87_v39, %v99_v48  ;;  %v2405_v34 = vld [vmem:[#allocation2 + $0x3c0] sm:$0xff] }
  0xdf   :  { %1767 = vmatprep.mubr.bf16.mxu0 %v8780_v0  ;;  %1830 = vmatprep.mubr.bf16.mxu1 %v8780_v0  ;;  %v2417_v35 = vld [vmem:[#allocation2 + $0x420] sm:$0x33] }
  0xe0   :  { %7730 = vmatprep.subr.msk.bf16.mxu1 %vm458_vm0, %v7697_v58  ;;  %7726 = vmatprep.subr.msk.bf16.mxu0 %vm458_vm0, %v7695_v59  ;;  %v78_v58 = vld [vmem:[#allocation2 + $0xb8] sm:$0xff]  ;;  %v65_v59 = vld [vmem:[#allocation2 + $0x50] sm:$0xff]  ;;  %v1582_v43 = vsel %vm458_vm0, %v7704_v51, 0  ;;  %v1576_v62 = vsel %vm458_vm0, %v7702_v52, 0 }
  0xe1   :  { %v7684_v6 = vcombine.low %v66_v55, %v78_v58  ;;  %v7682_v7 = vcombine.low %v65_v59, %v77_v61  ;;  %v9209_v51 = vld [vmem:[#allocation2 + $0x318] sm:$0xff] }
  0xe2   :  { %1917 = vmatpush1.bf16.msra.mxu1 %v1558_v63  ;;  %1854 = vmatpush1.bf16.msra.mxu0 %v1552_v1  ;;  %v7685_v63 = vcombine.high %v66_v55, %v78_v58  ;;  %v7683_v1 = vcombine.high %v65_v59, %v77_v61  ;;  %v7788_v55 = vcombine.high %v2405_v34, %v2417_v35  ;;  %v2395_v58 = vld [vmem:[#allocation2 + $0x370] sm:$0xff] }
  0xe3   :  { %2040 = vmatprep.subr.bf16.mxu1 %v7677_v2  ;;  %1977 = vmatprep.subr.bf16.mxu0 %v7675_v3  ;;  %v90_v2 = vld [vmem:[#allocation2 + $0x118] sm:$0xff] }
  0xe4   :  { %v102_v3 = vld [vmem:[#allocation2 + $0x178] sm:$0x33] }
  0xe5   :  { %7720 = vmatmul.mubr.msk.bf16.gmra.mrb[16].mxu0 %vm448_vm3, %v9103_v37  ;;  %7724 = vmatmul.mubr.msk.bf16.gmra.mrb[16].mxu1 %vm448_vm3, %v9103_v37  ;;  %v7709_v16 = vcombine.high %v90_v2, %v102_v3 }
  0xe6   :  { %1777 = vmatprep.mubr.bf16.mxu0 %v8780_v0  ;;  %1840 = vmatprep.mubr.bf16.mxu1 %v8780_v0 }
  0xed   :  { %7721 = vmatmul.mubr.msk.bf16.gmra.mrb[20].mxu0 %vm448_vm3, %v9113_v38  ;;  %7725 = vmatmul.mubr.msk.bf16.gmra.mrb[20].mxu1 %vm448_vm3, %v9113_v38 }
  0xee   :  { %1883 = vmatprep.mubr.bf16.mxu0 %v8780_v0  ;;  %1946 = vmatprep.mubr.bf16.mxu1 %v8780_v0 }
  0xf5   :  { %7727 = vmatmul.mubr.msk.bf16.vlgmr.msra.gmra.mrb[24].mxu0 %vm448_vm3, %v9089_v44  ;;  %7731 = vmatmul.mubr.msk.bf16.vlgmr.msra.gmra.mrb[24].mxu1 %vm448_vm3, %v9089_v44 }
  0xf6   :  { %2041 = vmatpush1.bf16.msra.mxu1 %v7676_v11  ;;  %1978 = vmatpush1.bf16.msra.mxu0 %v7674_v12  ;;  %v7708_v11 = vcombine.low %v90_v2, %v102_v3  ;;  %v7706_v12 = vcombine.low %v89_v4, %v101_v5 }
  0xf7   :  { %1893 = vmatprep.mubr.bf16.mxu0 %v8780_v0  ;;  %1956 = vmatprep.mubr.bf16.mxu1 %v8780_v0 }
  0xf8   :  { %7738 = vmatprep.subr.msk.bf16.mxu1 %vm458_vm0, %v7701_v25  ;;  %7734 = vmatprep.subr.msk.bf16.mxu0 %vm458_vm0, %v7699_v26  ;;  %v2394_v25 = vld [vmem:[#allocation2 + $0x368] sm:$0xff]  ;;  %v2381_v26 = vld [vmem:[#allocation2 + $0x300] sm:$0xff]  ;;  %v1594_v28 = vsel %vm458_vm0, %v7708_v11, 0  ;;  %v1588_v54 = vsel %vm458_vm0, %v7706_v12, 0  ;;  %v2408_v11 = vld [vmem:[#allocation2 + $0x3d8] sm:$0xff] }
  0xf9   :  { %v7765_v39 = vcombine.low %v2382_v13, %v2394_v25  ;;  %v7763_v48 = vcombine.low %v2381_v26, %v2393_v27  ;;  %v2420_v12 = vld [vmem:[#allocation2 + $0x438] sm:$0x33] }
  0xfa   :  { %2043 = vmatpush1.bf16.msra.mxu1 %v1570_v29  ;;  %1980 = vmatpush1.bf16.msra.mxu0 %v1564_v30  ;;  %v7766_v29 = vcombine.high %v2382_v13, %v2394_v25  ;;  %v7764_v30 = vcombine.high %v2381_v26, %v2393_v27  ;;  %v2407_v13 = vld [vmem:[#allocation2 + $0x3d0] sm:$0xff]  ;;  %v9265_v27 = vld [vmem:[%s10437_s0 + $0xc] sm:$0x3] }
  0xfb   :  { %2166 = vmatprep.subr.bf16.mxu1 %v7681_v31  ;;  %2103 = vmatprep.subr.bf16.mxu0 %v7679_v33  ;;  %v2406_v31 = vld [vmem:[#allocation2 + $0x3c8] sm:$0xff] }
  0xfc   :  { %v2418_v33 = vld [vmem:[#allocation2 + $0x428] sm:$0x33] }
  0xfd   :  { %7728 = vmatmul.mubr.msk.bf16.gmra.mrb[28].mxu0 %vm448_vm3, %v9103_v37  ;;  %7732 = vmatmul.mubr.msk.bf16.gmra.mrb[28].mxu1 %vm448_vm3, %v9103_v37  ;;  %v7790_v52 = vcombine.high %v2406_v31, %v2418_v33 }
  0xfe   :  { %1903 = vmatprep.mubr.bf16.mxu0 %v8780_v0  ;;  %1966 = vmatprep.mubr.bf16.mxu1 %v8780_v0 }
 0x105   :  { %7729 = vmatmul.mubr.msk.bf16.gmra.mrb[32].mxu0 %vm448_vm3, %v9113_v38  ;;  %7733 = vmatmul.mubr.msk.bf16.gmra.mrb[32].mxu1 %vm448_vm3, %v9113_v38 }
 0x106   :  { %2009 = vmatprep.mubr.bf16.mxu0 %v8780_v0  ;;  %2072 = vmatprep.mubr.bf16.mxu1 %v8780_v0 }
 0x10d   :  { %7735 = vmatmul.mubr.msk.bf16.vlgmr.msra.gmra.mrb[36].mxu0 %vm448_vm3, %v9089_v44  ;;  %7739 = vmatmul.mubr.msk.bf16.vlgmr.msra.gmra.mrb[36].mxu1 %vm448_vm3, %v9089_v44 }
 0x10e   :  { %2167 = vmatpush1.bf16.msra.mxu1 %v7680_v49  ;;  %2104 = vmatpush1.bf16.msra.mxu0 %v7678_v50  ;;  %v7789_v49 = vcombine.low %v2406_v31, %v2418_v33  ;;  %v7787_v50 = vcombine.low %v2405_v34, %v2417_v35  ;;  %v7793_v33 = vcombine.low %v2408_v11, %v2420_v12  ;;  %v2386_v35 = vld [vmem:[#allocation2 + $0x328] sm:$0xff] }
 0x10f   :  { %2019 = vmatprep.mubr.bf16.mxu0 %v8780_v0  ;;  %2082 = vmatprep.mubr.bf16.mxu1 %v8780_v0 }
 0x110   :  { %7746 = vmatprep.subr.msk.bf16.mxu1 %vm458_vm0, %v7705_v56  ;;  %7742 = vmatprep.subr.msk.bf16.mxu0 %vm458_vm0, %v7703_v57  ;;  %v9211_v56 = vld [vmem:[#allocation2 + $0x378] sm:$0xff]  ;;  %v9213_v57 = vld [vmem:[#allocation2 + $0x310] sm:$0xff]  ;;  %v2670_v59 = vsel %vm458_vm0, %v7789_v49, 0  ;;  %v2664_v61 = vsel %vm458_vm0, %v7787_v50, 0  ;;  %v2398_v49 = vld [vmem:[#allocation2 + $0x388] sm:$0xff] }
 0x111   :  { %v7769_v25 = vcombine.low %v9209_v51, %v9211_v56  ;;  %v2385_v50 = vld [vmem:[#allocation2 + $0x320] sm:$0xff] }
 0x112   :  { %2169 = vmatpush1.bf16.msra.mxu1 %v1582_v43  ;;  %2106 = vmatpush1.bf16.msra.mxu0 %v1576_v62  ;;  %v7770_v43 = vcombine.high %v9209_v51, %v9211_v56  ;;  %v7768_v62 = vcombine.high %v9213_v57, %v2395_v58  ;;  %v2397_v51 = vld [vmem:[#allocation2 + $0x380] sm:$0xff]  ;;  %v8717_v56 = vld [vmem:[%s10437_s0 + $0x18] sm:$0xf] }
 0x113   :  { %2292 = vmatprep.subr.bf16.mxu1 %v7685_v63  ;;  %2229 = vmatprep.subr.bf16.mxu0 %v7683_v1  ;;  %v8712_v1 = vld [vmem:[%s10437_s0] sm:$0xf] }
 0x114   :  { %v7758_v2 = vrot.slane %v8712_v1, 9  ;;  %v9296_v1 = vld [vmem:[%s10437_s0 + $0x1c] sm:$0x3] }
 0x115   :  { %7736 = vmatmul.mubr.msk.bf16.gmra.mrb[40].mxu0 %vm448_vm3, %v9103_v37  ;;  %7740 = vmatmul.mubr.msk.bf16.gmra.mrb[40].mxu1 %vm448_vm3, %v9103_v37  ;;  %v3672_v9 = vshrl.u32 %v9296_v1, 16 }
 0x116   :  { %2029 = vmatprep.mubr.bf16.mxu0 %v8780_v0  ;;  %2092 = vmatprep.mubr.bf16.mxu1 %v8780_v0 }
 0x11d   :  { %7737 = vmatmul.mubr.msk.bf16.gmra.mrb[44].mxu0 %vm448_vm3, %v9113_v38  ;;  %7741 = vmatmul.mubr.msk.bf16.gmra.mrb[44].mxu1 %vm448_vm3, %v9113_v38 }
 0x11e   :  { %2135 = vmatprep.mubr.bf16.mxu0 %v8780_v0  ;;  %2198 = vmatprep.mubr.bf16.mxu1 %v8780_v0 }
 0x125   :  { %7743 = vmatmul.mubr.msk.bf16.vlgmr.msra.gmra.mrb[48].mxu0 %vm448_vm3, %v9089_v44  ;;  %7747 = vmatmul.mubr.msk.bf16.vlgmr.msra.gmra.mrb[48].mxu1 %vm448_vm3, %v9089_v44 }
 0x126   :  { %2293 = vmatpush1.bf16.msra.mxu1 %v7684_v6  ;;  %2230 = vmatpush1.bf16.msra.mxu0 %v7682_v7 }
 0x127   :  { %2145 = vmatprep.mubr.bf16.mxu0 %v8780_v0  ;;  %2208 = vmatprep.mubr.bf16.mxu1 %v8780_v0 }
 0x128   :  { %7754 = vmatprep.subr.msk.bf16.mxu1 %vm458_vm0, %v7709_v16  ;;  %7750 = vmatprep.subr.msk.bf16.mxu0 %vm458_vm0, %v7707_v17  ;;  %v2419_v16 = vld [vmem:[#allocation2 + $0x430] sm:$0x33] }
 0x129   :  { %v7791_v34 = vcombine.low %v2407_v13, %v2419_v16 }
 0x12a   :  { %2295 = vmatpush1.bf16.msra.mxu1 %v1594_v28  ;;  %2232 = vmatpush1.bf16.msra.mxu0 %v1588_v54  ;;  %v2368_v28 = vrot.slane %v9265_v27, 5  ;;  %v8715_v54 = vld [vmem:[%s10437_s0 + $0x10] sm:$0xf] }
 0x12b   :  { %2798 = vmatprep.subr.bf16.mxu1 %v7766_v29  ;;  %2735 = vmatprep.subr.bf16.mxu0 %v7764_v30  ;;  %v7759_v29 = vrot.slane %v8715_v54, 9  ;;  %v8716_v30 = vld [vmem:[%s10437_s0 + $0x14] sm:$0xf]  ;;  %v2400_v54 = vld [vmem:[#allocation2 + $0x398] sm:$0xff] }
 0x12c   :  { %v2372_v31 = vrot.slane %v8716_v30, 5  ;;  %v2399_v30 = vld [vmem:[#allocation2 + $0x390] sm:$0xff] }
 0x12d   :  { %7744 = vmatmul.mubr.msk.bf16.gmra.mrb[52].mxu0 %vm448_vm3, %v9103_v37  ;;  %7748 = vmatmul.mubr.msk.bf16.gmra.mrb[52].mxu1 %vm448_vm3, %v9103_v37 }
 0x12e   :  { %2155 = vmatprep.mubr.bf16.mxu0 %v8780_v0  ;;  %2218 = vmatprep.mubr.bf16.mxu1 %v8780_v0 }
 0x135   :  { %7745 = vmatmul.mubr.msk.bf16.gmra.mrb[56].mxu0 %vm448_vm3, %v9113_v38  ;;  %7749 = vmatmul.mubr.msk.bf16.gmra.mrb[56].mxu1 %vm448_vm3, %v9113_v38 }
 0x136   :  { %2261 = vmatprep.mubr.bf16.mxu0 %v8780_v0  ;;  %2324 = vmatprep.mubr.bf16.mxu1 %v8780_v0 }
 0x13d   :  { %7751 = vmatmul.mubr.msk.bf16.vlgmr.msra.gmra.mrb[60].mxu0 %vm448_vm3, %v9089_v44  ;;  %7755 = vmatmul.mubr.msk.bf16.vlgmr.msra.gmra.mrb[60].mxu1 %vm448_vm3, %v9089_v44  ;;  %v8711_v44 = vld [vmem:[%s10437_s0 + $0x4] sm:$0xf] }
 0x13e   :  { %2799 = vmatpush1.bf16.msra.mxu1 %v7765_v39  ;;  %2736 = vmatpush1.bf16.msra.mxu0 %v7763_v48  ;;  %v2362_v63 = vrot.slane %v8711_v44, 5  ;;  %v7794_v39 = vcombine.high %v2408_v11, %v2420_v12  ;;  %v7792_v48 = vcombine.high %v2407_v13, %v2419_v16  ;;  %v2374_v44 = vrot.slane %v2372_v31, 4  ;;  %v2409_v11 = vld [vmem:[#allocation2 + $0x3e0] sm:$0xff] }
 0x13f   :  { %2271 = vmatprep.mubr.bf16.mxu0 %v8780_v0  ;;  %2334 = vmatprep.mubr.bf16.mxu1 %v8780_v0  ;;  %v2421_v12 = vld [vmem:[#allocation2 + $0x440] sm:$0x33]  ;;  %v7773_v13 = vcombine.low %v2386_v35, %v2398_v49  ;;  %v7771_v16 = vcombine.low %v2385_v50, %v2397_v51 }
 0x140   :  { %7815 = vmatprep.subr.msk.bf16.mxu1 %vm458_vm0, %v7790_v52  ;;  %7811 = vmatprep.subr.msk.bf16.mxu0 %vm458_vm0, %v7788_v55  ;;  %v2364_v3 = vrot.slane %v2362_v63, 4  ;;  %v2363_v6 = vsel %vm9243_vm7, %v7758_v2, %v2362_v63  ;;  %v2373_v55 = vsel %vm9243_vm7, %v7759_v29, %v2372_v31  ;;  %v2378_v2 = vrot.slane %v9296_v1, 5  ;;  %v2387_v29 = vld [vmem:[#allocation2 + $0x330] sm:$0xff] }
 0x141   :  { %v3674_v1 = vrot.slane %v3672_v9, 5  ;;  %v3724_v9 = vld [vmem:[#allocation2 + $0x5e8] sm:$0x33] }
 0x142   :  { %2801 = vmatpush1.bf16.msra.mxu1 %v2670_v59  ;;  %2738 = vmatpush1.bf16.msra.mxu0 %v2664_v61  ;;  %v2676_v59 = vsel %vm458_vm0, %v7791_v34, 0  ;;  %v7774_v61 = vcombine.high %v2386_v35, %v2398_v49  ;;  %v7776_v35 = vcombine.high %v2387_v29, %v2399_v30  ;;  %v2411_v49 = vld [vmem:[#allocation2 + $0x3f0] sm:$0xff] }
 0x143   :  { %2924 = vmatprep.subr.bf16.mxu1 %v7770_v43  ;;  %2861 = vmatprep.subr.bf16.mxu0 %v7768_v62  ;;  %v7772_v43 = vcombine.high %v2385_v50, %v2397_v51  ;;  %v2423_v50 = vld [vmem:[#allocation2 + $0x450] sm:$0x33] }
 0x145   :  { %7752 = vmatmul.mubr.msk.bf16.gmra.mrb[64].mxu0 %vm448_vm3, %v9103_v37  ;;  %7756 = vmatmul.mubr.msk.bf16.gmra.mrb[64].mxu1 %vm448_vm3, %v9103_v37  ;;  %v8713_v37 = vld [vmem:[%s10437_s0 + $0x8] sm:$0xf] }
 0x146   :  { %2281 = vmatprep.mubr.bf16.mxu0 %v8780_v0  ;;  %2344 = vmatprep.mubr.bf16.mxu1 %v8780_v0  ;;  %v2365_v4 = vrot.slane %v8713_v37, 5 }
 0x148   :  { %v2366_v7 = vsel %vm9243_vm7, %v2364_v3, %v2365_v4  ;;  %v2367_v26 = vrot.slane %v2365_v4, 4 }
 0x149   :  { %v9257_v17 = vcombine.low %v2363_v6, %v2366_v7  ;;  %v2410_v6 = vld [vmem:[#allocation2 + $0x3e8] sm:$0xff] }
 0x14a   :  { %v2369_v52 = vsel %vm9243_vm7, %v2367_v26, %v2368_v28  ;;  %v2422_v7 = vld [vmem:[#allocation2 + $0x448] sm:$0x33]  ;;  %v7796_v28 = vcombine.high %v2409_v11, %v2421_v12 }
 0x14b   :  { %v9291_v62 = vcombine.low %v2369_v52, %v2373_v55  ;;  %v7797_v5 = vcombine.low %v2410_v6, %v2422_v7  ;;  %v7798_v26 = vcombine.high %v2410_v6, %v2422_v7  ;;  %v7775_v52 = vcombine.low %v2387_v29, %v2399_v30  ;;  %v2414_v6 = vld [vmem:[#allocation2 + $0x408] sm:$0xff]  ;;  %v2391_v29 = vld [vmem:[#allocation2 + $0x350] sm:$0xff] }
 0x14c   :  { %v2426_v7 = vld [vmem:[#allocation2 + $0x468] sm:$0x33]  ;;  %v2403_v30 = vld [vmem:[#allocation2 + $0x3b0] sm:$0xff] }
 0x14d   :  { %7753 = vmatmul.mubr.msk.bf16.gmra.mrb[68].mxu0 %vm448_vm3, %v9113_v38  ;;  %7757 = vmatmul.mubr.msk.bf16.gmra.mrb[68].mxu1 %vm448_vm3, %v9113_v38  ;;  %v7767_v38 = vcombine.low %v9213_v57, %v2395_v58  ;;  %v2375_v57 = vrot.slane %v8717_v56, 5  ;;  %v2682_v58 = vsel %vm458_vm0, %v7793_v33, 0  ;;  %v2694_v31 = vsel %vm458_vm0, %v7797_v5, 0 }
 0x14e   :  { %2767 = vmatprep.mubr.bf16.mxu0 %v8780_v0  ;;  %2830 = vmatprep.mubr.bf16.mxu1 %v8780_v0  ;;  %v7799_v56 = vcombine.low %v2411_v49, %v2423_v50  ;;  %v7805_v5 = vcombine.low %v2414_v6, %v2426_v7 }
 0x14f   :  { %v2377_v63 = vrot.slane %v2375_v57, 4  ;;  %v2376_v3 = vsel %vm9243_vm7, %v2374_v44, %v2375_v57  ;;  %v2390_v57 = vld [vmem:[#allocation2 + $0x348] sm:$0xff]  ;;  %v2401_v44 = vld [vmem:[#allocation2 + $0x3a0] sm:$0xff] }
 0x151   :  { %v2379_v37 = vsel %vm9243_vm7, %v2377_v63, %v2378_v2  ;;  %v2700_v2 = vsel %vm458_vm0, %v7799_v56, 0 }
 0x152   :  { %v9309_v4 = vcombine.low %v2376_v3, %v2379_v37 }
 0x155   :  { %7812 = vmatmul.mubr.msk.bf16.vlgmr.msra.gmra.mrb[0].mxu0 %vm448_vm3, %v9257_v17  ;;  %7816 = vmatmul.mubr.msk.bf16.vlgmr.msra.gmra.mrb[0].mxu1 %vm448_vm3, %v9257_v17 }
 0x156   :  { %2925 = vmatpush1.bf16.msra.mxu1 %v7769_v25  ;;  %2862 = vmatpush1.bf16.msra.mxu0 %v7767_v38  ;;  %v7795_v25 = vcombine.low %v2409_v11, %v2421_v12  ;;  %v2388_v38 = vld [vmem:[#allocation2 + $0x338] sm:$0xff]  ;;  %v2413_v11 = vld [vmem:[#allocation2 + $0x400] sm:$0xff] }
 0x157   :  { %2777 = vmatprep.mubr.bf16.mxu0 %v8780_v0  ;;  %2840 = vmatprep.mubr.bf16.mxu1 %v8780_v0  ;;  %v7778_v34 = vcombine.high %v2388_v38, %v2400_v54  ;;  %v7777_v51 = vcombine.low %v2388_v38, %v2400_v54  ;;  %v2425_v12 = vld [vmem:[#allocation2 + $0x460] sm:$0x33]  ;;  %v2392_v38 = vld [vmem:[#allocation2 + $0x358] sm:$0xff] }
 0x158   :  { %7823 = vmatprep.subr.msk.bf16.mxu1 %vm458_vm0, %v7794_v39  ;;  %7819 = vmatprep.subr.msk.bf16.mxu0 %vm458_vm0, %v7792_v48  ;;  %v2688_v33 = vsel %vm458_vm0, %v7795_v25, 0  ;;  %v2412_v39 = vld [vmem:[#allocation2 + $0x3f8] sm:$0xff]  ;;  %v7803_v25 = vcombine.low %v2413_v11, %v2425_v12 }
 0x159   :  { %v2424_v48 = vld [vmem:[#allocation2 + $0x458] sm:$0x33] }
 0x15a   :  { %2927 = vmatpush1.bf16.msra.mxu1 %v2682_v58  ;;  %2864 = vmatpush1.bf16.msra.mxu0 %v2676_v59  ;;  %v7801_v55 = vcombine.low %v2412_v39, %v2424_v48  ;;  %v7802_v58 = vcombine.high %v2412_v39, %v2424_v48  ;;  %v7800_v59 = vcombine.high %v2411_v49, %v2423_v50  ;;  %v2404_v54 = vld [vmem:[#allocation2 + $0x3b8] sm:$0xff]  ;;  %v2415_v49 = vld [vmem:[#allocation2 + $0x410] sm:$0xff] }
 0x15b   :  { %3050 = vmatprep.subr.bf16.mxu1 %v7774_v61  ;;  %2987 = vmatprep.subr.bf16.mxu0 %v7772_v43  ;;  %v2402_v61 = vld [vmem:[#allocation2 + $0x3a8] sm:$0xff]  ;;  %v2389_v43 = vld [vmem:[#allocation2 + $0x340] sm:$0xff]  ;;  %v2416_v39 = vld [vmem:[#allocation2 + $0x418] sm:$0xff] }
 0x15c   :  { %v2706_v63 = vsel %vm458_vm0, %v7801_v55, 0  ;;  %v7782_v3 = vcombine.high %v2390_v57, %v2402_v61  ;;  %v7780_v37 = vcombine.high %v2389_v43, %v2401_v44  ;;  %v2428_v48 = vld [vmem:[#allocation2 + $0x478] sm:$0x33]  ;;  %v2427_v50 = vld [vmem:[#allocation2 + $0x470] sm:$0x33] }
 0x15d   :  { %7813 = vmatmul.mubr.msk.bf16.gmra.mrb[4].mxu0 %vm448_vm3, %v9291_v62  ;;  %7817 = vmatmul.mubr.msk.bf16.gmra.mrb[4].mxu1 %vm448_vm3, %v9291_v62  ;;  %v7809_v55 = vcombine.low %v2416_v39, %v2428_v48  ;;  %v7807_v56 = vcombine.low %v2415_v49, %v2427_v50 }
 0x15e   :  { %2787 = vmatprep.mubr.bf16.mxu0 %v8780_v0  ;;  %2850 = vmatprep.mubr.bf16.mxu1 %v8780_v0 }
 0x165   :  { %7814 = vmatmul.mubr.msk.bf16.gmra.mrb[8].mxu0 %vm448_vm3, %v9309_v4  ;;  %7818 = vmatmul.mubr.msk.bf16.gmra.mrb[8].mxu1 %vm448_vm3, %v9309_v4 }
 0x166   :  { %2893 = vmatprep.mubr.bf16.mxu0 %v8780_v0  ;;  %2956 = vmatprep.mubr.bf16.mxu1 %v8780_v0 }
 0x16d   :  { %7820 = vmatmul.mubr.msk.bf16.vlgmr.msra.gmra.mrb[12].mxu0 %vm448_vm3, %v9257_v17  ;;  %7824 = vmatmul.mubr.msk.bf16.vlgmr.msra.gmra.mrb[12].mxu1 %vm448_vm3, %v9257_v17 }
 0x16e   :  { %3051 = vmatpush1.bf16.msra.mxu1 %v7773_v13  ;;  %2988 = vmatpush1.bf16.msra.mxu0 %v7771_v16  ;;  %v7781_v13 = vcombine.low %v2390_v57, %v2402_v61  ;;  %v7779_v16 = vcombine.low %v2389_v43, %v2401_v44  ;;  %v3680_v57 = vld [vmem:[#allocation2 + $0x488] sm:$0xff]  ;;  %v3679_v43 = vld [vmem:[#allocation2 + $0x480] sm:$0xff] }
 0x16f   :  { %2903 = vmatprep.mubr.bf16.mxu0 %v8780_v0  ;;  %2966 = vmatprep.mubr.bf16.mxu1 %v8780_v0  ;;  %v3692_v61 = vld [vmem:[#allocation2 + $0x4e8] sm:$0xff]  ;;  %v3691_v44 = vld [vmem:[#allocation2 + $0x4e0] sm:$0xff] }
 0x170   :  { %7831 = vmatprep.subr.msk.bf16.mxu1 %vm458_vm0, %v7798_v26  ;;  %7827 = vmatprep.subr.msk.bf16.mxu0 %vm458_vm0, %v7796_v28  ;;  %v7806_v26 = vcombine.high %v2414_v6, %v2426_v7  ;;  %v7804_v28 = vcombine.high %v2413_v11, %v2425_v12  ;;  %v3704_v6 = vld [vmem:[#allocation2 + $0x548] sm:$0xff]  ;;  %v3703_v11 = vld [vmem:[#allocation2 + $0x540] sm:$0xff] }
 0x171   :  { %v3716_v7 = vld [vmem:[#allocation2 + $0x5a8] sm:$0x33]  ;;  %v3715_v12 = vld [vmem:[#allocation2 + $0x5a0] sm:$0x33] }
 0x172   :  { %3053 = vmatpush1.bf16.msra.mxu1 %v2694_v31  ;;  %2990 = vmatpush1.bf16.msra.mxu0 %v2688_v33  ;;  %v2718_v31 = vsel %vm458_vm0, %v7805_v5, 0  ;;  %v2712_v33 = vsel %vm458_vm0, %v7803_v25, 0  ;;  %v7888_v5 = vcombine.low %v3704_v6, %v3716_v7  ;;  %v7886_v25 = vcombine.low %v3703_v11, %v3715_v12 }
 0x173   :  { %3176 = vmatprep.subr.bf16.mxu1 %v7778_v34  ;;  %3113 = vmatprep.subr.bf16.mxu0 %v7776_v35  ;;  %v7786_v34 = vcombine.high %v2392_v38, %v2404_v54  ;;  %v7784_v35 = vcombine.high %v2391_v29, %v2403_v30 }
 0x175   :  { %7821 = vmatmul.mubr.msk.bf16.gmra.mrb[16].mxu0 %vm448_vm3, %v9291_v62  ;;  %7825 = vmatmul.mubr.msk.bf16.gmra.mrb[16].mxu1 %vm448_vm3, %v9291_v62 }
 0x176   :  { %2913 = vmatprep.mubr.bf16.mxu0 %v8780_v0  ;;  %2976 = vmatprep.mubr.bf16.mxu1 %v8780_v0 }
 0x17d   :  { %7822 = vmatmul.mubr.msk.bf16.gmra.mrb[20].mxu0 %vm448_vm3, %v9309_v4  ;;  %7826 = vmatmul.mubr.msk.bf16.gmra.mrb[20].mxu1 %vm448_vm3, %v9309_v4 }
 0x17e   :  { %3019 = vmatprep.mubr.bf16.mxu0 %v8780_v0  ;;  %3082 = vmatprep.mubr.bf16.mxu1 %v8780_v0 }
 0x185   :  { %7828 = vmatmul.mubr.msk.bf16.vlgmr.msra.gmra.mrb[24].mxu0 %vm448_vm3, %v9257_v17  ;;  %7832 = vmatmul.mubr.msk.bf16.vlgmr.msra.gmra.mrb[24].mxu1 %vm448_vm3, %v9257_v17 }
 0x186   :  { %3177 = vmatpush1.bf16.msra.mxu1 %v7777_v51  ;;  %3114 = vmatpush1.bf16.msra.mxu0 %v7775_v52  ;;  %v7785_v51 = vcombine.low %v2392_v38, %v2404_v54  ;;  %v7783_v52 = vcombine.low %v2391_v29, %v2403_v30  ;;  %v9405_v38 = vld [vmem:[#allocation2 + $0x498] sm:$0xff]  ;;  %v9409_v29 = vld [vmem:[#allocation2 + $0x490] sm:$0xff] }
 0x187   :  { %3029 = vmatprep.mubr.bf16.mxu0 %v8780_v0  ;;  %3092 = vmatprep.mubr.bf16.mxu1 %v8780_v0  ;;  %v9407_v54 = vld [vmem:[#allocation2 + $0x4f8] sm:$0xff]  ;;  %v9411_v30 = vld [vmem:[#allocation2 + $0x4f0] sm:$0xff] }
 0x188   :  { %7839 = vmatprep.subr.msk.bf16.mxu1 %vm458_vm0, %v7802_v58  ;;  %7835 = vmatprep.subr.msk.bf16.mxu0 %vm458_vm0, %v7800_v59  ;;  %v7810_v58 = vcombine.high %v2416_v39, %v2428_v48  ;;  %v7808_v59 = vcombine.high %v2415_v49, %v2427_v50  ;;  %v3639_v39 = vrot.slane %v110_v21, 6  ;;  %v3642_v48 = vrot.slane %v120_v23, 5 }
 0x189   :  { %v3643_v49 = vrot.slane %v116_v22, 6  ;;  %v3697_v22 = vld [vmem:[#allocation2 + $0x510] sm:$0xff] }
 0x18a   :  { %3179 = vmatpush1.bf16.msra.mxu1 %v2706_v63  ;;  %3116 = vmatpush1.bf16.msra.mxu0 %v2700_v2  ;;  %v2730_v63 = vsel %vm458_vm0, %v7809_v55, 0  ;;  %v2724_v2 = vsel %vm458_vm0, %v7807_v56, 0  ;;  %v3706_v56 = vld [vmem:[#allocation2 + $0x558] sm:$0xff] }
 0x18b   :  { %3302 = vmatprep.subr.bf16.mxu1 %v7782_v3  ;;  %3239 = vmatprep.subr.bf16.mxu0 %v7780_v37  ;;  %v7865_v3 = vcombine.high %v3680_v57, %v3692_v61  ;;  %v7863_v37 = vcombine.high %v3679_v43, %v3691_v44 }
 0x18d   :  { %7829 = vmatmul.mubr.msk.bf16.gmra.mrb[28].mxu0 %vm448_vm3, %v9291_v62  ;;  %7833 = vmatmul.mubr.msk.bf16.gmra.mrb[28].mxu1 %vm448_vm3, %v9291_v62 }
 0x18e   :  { %3039 = vmatprep.mubr.bf16.mxu0 %v8780_v0  ;;  %3102 = vmatprep.mubr.bf16.mxu1 %v8780_v0 }
 0x195   :  { %7830 = vmatmul.mubr.msk.bf16.gmra.mrb[32].mxu0 %vm448_vm3, %v9309_v4  ;;  %7834 = vmatmul.mubr.msk.bf16.gmra.mrb[32].mxu1 %vm448_vm3, %v9309_v4 }
 0x196   :  { %3145 = vmatprep.mubr.bf16.mxu0 %v8780_v0  ;;  %3208 = vmatprep.mubr.bf16.mxu1 %v8780_v0 }
 0x19d   :  { %7836 = vmatmul.mubr.msk.bf16.vlgmr.msra.gmra.mrb[36].mxu0 %vm448_vm3, %v9257_v17  ;;  %7840 = vmatmul.mubr.msk.bf16.vlgmr.msra.gmra.mrb[36].mxu1 %vm448_vm3, %v9257_v17 }
 0x19e   :  { %3303 = vmatpush1.bf16.msra.mxu1 %v7781_v13  ;;  %3240 = vmatpush1.bf16.msra.mxu0 %v7779_v16  ;;  %v7864_v13 = vcombine.low %v3680_v57, %v3692_v61  ;;  %v7862_v16 = vcombine.low %v3679_v43, %v3691_v44  ;;  %v7868_v57 = vcombine.low %v9405_v38, %v9407_v54  ;;  %v3661_v44 = vrot.slane %v3660_v46, 4 }
 0x19f   :  { %3155 = vmatprep.mubr.bf16.mxu0 %v8780_v0  ;;  %3218 = vmatprep.mubr.bf16.mxu1 %v8780_v0 }
 0x1a0   :  { %7847 = vmatprep.subr.msk.bf16.mxu1 %vm458_vm0, %v7806_v26  ;;  %7843 = vmatprep.subr.msk.bf16.mxu0 %vm458_vm0, %v7804_v28  ;;  %v7889_v26 = vcombine.high %v3704_v6, %v3716_v7  ;;  %v7887_v28 = vcombine.high %v3703_v11, %v3715_v12  ;;  %v3696_v11 = vld [vmem:[#allocation2 + $0x508] sm:$0xff]  ;;  %v3683_v12 = vld [vmem:[#allocation2 + $0x4a0] sm:$0xff] }
 0x1a2   :  { %3305 = vmatpush1.bf16.msra.mxu1 %v2718_v31  ;;  %3242 = vmatpush1.bf16.msra.mxu0 %v2712_v33  ;;  %v3968_v31 = vsel %vm458_vm0, %v7888_v5, 0  ;;  %v3962_v33 = vsel %vm458_vm0, %v7886_v25, 0 }
 0x1a3   :  { %3428 = vmatprep.subr.bf16.mxu1 %v7786_v34  ;;  %3365 = vmatprep.subr.bf16.mxu0 %v7784_v35  ;;  %v7869_v34 = vcombine.high %v9405_v38, %v9407_v54  ;;  %v7867_v35 = vcombine.high %v9409_v29, %v9411_v30 }
 0x1a5   :  { %7837 = vmatmul.mubr.msk.bf16.gmra.mrb[40].mxu0 %vm448_vm3, %v9291_v62  ;;  %7841 = vmatmul.mubr.msk.bf16.gmra.mrb[40].mxu1 %vm448_vm3, %v9291_v62 }
 0x1a6   :  { %3165 = vmatprep.mubr.bf16.mxu0 %v8780_v0  ;;  %3228 = vmatprep.mubr.bf16.mxu1 %v8780_v0 }
 0x1ad   :  { %7838 = vmatmul.mubr.msk.bf16.gmra.mrb[44].mxu0 %vm448_vm3, %v9309_v4  ;;  %7842 = vmatmul.mubr.msk.bf16.gmra.mrb[44].mxu1 %vm448_vm3, %v9309_v4 }
 0x1ae   :  { %3271 = vmatprep.mubr.bf16.mxu0 %v8780_v0  ;;  %3334 = vmatprep.mubr.bf16.mxu1 %v8780_v0 }
 0x1b5   :  { %7844 = vmatmul.mubr.msk.bf16.vlgmr.msra.gmra.mrb[48].mxu0 %vm448_vm3, %v9257_v17  ;;  %7848 = vmatmul.mubr.msk.bf16.vlgmr.msra.gmra.mrb[48].mxu1 %vm448_vm3, %v9257_v17 }
 0x1b6   :  { %3429 = vmatpush1.bf16.msra.mxu1 %v7785_v51  ;;  %3366 = vmatpush1.bf16.msra.mxu0 %v7783_v52  ;;  %v3644_v51 = vor.u32 %v3643_v49, %v3642_v48 }
 0x1b7   :  { %3281 = vmatprep.mubr.bf16.mxu0 %v8780_v0  ;;  %3344 = vmatprep.mubr.bf16.mxu1 %v8780_v0 }
 0x1b8   :  { %7855 = vmatprep.subr.msk.bf16.mxu1 %vm458_vm0, %v7810_v58  ;;  %7851 = vmatprep.subr.msk.bf16.mxu0 %vm458_vm0, %v7808_v59  ;;  %v3646_v21 = vrot.slane %v3644_v51, 4  ;;  %v3718_v58 = vld [vmem:[#allocation2 + $0x5b8] sm:$0x33]  ;;  %v7866_v59 = vcombine.low %v9409_v29, %v9411_v30 }
 0x1b9   :  { %v7893_v6 = vcombine.high %v3706_v56, %v3718_v58 }
 0x1ba   :  { %3431 = vmatpush1.bf16.msra.mxu1 %v2730_v63  ;;  %3368 = vmatpush1.bf16.msra.mxu0 %v2724_v2  ;;  %v3664_v63 = vor.u32 %v3663_v47, %v3662_v40  ;;  %v7892_v2 = vcombine.low %v3706_v56, %v3718_v58 }
 0x1bb   :  { %4096 = vmatprep.subr.bf16.mxu1 %v7865_v3  ;;  %4033 = vmatprep.subr.bf16.mxu0 %v7863_v37  ;;  %v3684_v37 = vld [vmem:[#allocation2 + $0x4a8] sm:$0xff] }
 0x1bc   :  { %v3665_v10 = vsel %vm9445_vm10, %v3661_v44, %v3664_v63  ;;  %v3980_v5 = vsel %vm458_vm0, %v7892_v2, 0  ;;  %v7873_v38 = vcombine.high %v3684_v37, %v3696_v11  ;;  %v3666_v8 = vrot.slane %v3664_v63, 4  ;;  %v3711_v2 = vld [vmem:[#allocation2 + $0x580] sm:$0xff] }
 0x1bd   :  { %7845 = vmatmul.mubr.msk.bf16.gmra.mrb[52].mxu0 %vm448_vm3, %v9291_v62  ;;  %7849 = vmatmul.mubr.msk.bf16.gmra.mrb[52].mxu1 %vm448_vm3, %v9291_v62 }
 0x1be   :  { %3291 = vmatprep.mubr.bf16.mxu0 %v8780_v0  ;;  %3354 = vmatprep.mubr.bf16.mxu1 %v8780_v0  ;;  %v3670_v29 = vsel %vm9445_vm10, %v3666_v8, %v3669_v14  ;;  %v3726_v8 = vld [vmem:[#allocation2 + $0x5f8] sm:$0x33] }
 0x1c5   :  { %7846 = vmatmul.mubr.msk.bf16.gmra.mrb[56].mxu0 %vm448_vm3, %v9309_v4  ;;  %7850 = vmatmul.mubr.msk.bf16.gmra.mrb[56].mxu1 %vm448_vm3, %v9309_v4 }
 0x1c6   :  { %3397 = vmatprep.mubr.bf16.mxu0 %v8780_v0  ;;  %3460 = vmatprep.mubr.bf16.mxu1 %v8780_v0 }
 0x1cd   :  { %7852 = vmatmul.mubr.msk.bf16.vlgmr.msra.gmra.mrb[60].mxu0 %vm448_vm3, %v9257_v17  ;;  %7856 = vmatmul.mubr.msk.bf16.vlgmr.msra.gmra.mrb[60].mxu1 %vm448_vm3, %v9257_v17  ;;  %v3638_v17 = vrot.slane %v107_v20, 5  ;;  %v3648_v20 = vrot.slane %v126_v24, 6 }
 0x1ce   :  { %4097 = vmatpush1.bf16.msra.mxu1 %v7864_v13  ;;  %4034 = vmatpush1.bf16.msra.mxu0 %v7862_v16  ;;  %v3695_v13 = vld [vmem:[#allocation2 + $0x500] sm:$0xff]  ;;  %v3675_v16 = vrot.slane %v170_v32, 6  ;;  %v3671_v32 = vrot.slane %v3669_v14, 4  ;;  %v3689_v14 = vld [vmem:[#allocation2 + $0x4d0] sm:$0xff] }
 0x1cf   :  { %3407 = vmatprep.mubr.bf16.mxu0 %v8780_v0  ;;  %3470 = vmatprep.mubr.bf16.mxu1 %v8780_v0  ;;  %v3640_v50 = vor.u32 %v3639_v39, %v3638_v17  ;;  %v3649_v23 = vor.u32 %v3648_v20, %v3647_v15  ;;  %v3719_v17 = vld [vmem:[#allocation2 + $0x5c0] sm:$0x33]  ;;  %v7872_v39 = vcombine.low %v3684_v37, %v3696_v11 }
 0x1d0   :  { %7914 = vmatprep.subr.msk.bf16.mxu1 %vm458_vm0, %v7889_v26  ;;  %7910 = vmatprep.subr.msk.bf16.mxu0 %vm458_vm0, %v7887_v28  ;;  %v7871_v26 = vcombine.high %v3683_v12, %v3695_v13  ;;  %v3676_v54 = vor.u32 %v3675_v16, %v3674_v1  ;;  %v7870_v48 = vcombine.low %v3683_v12, %v3695_v13  ;;  %v3690_v12 = vld [vmem:[#allocation2 + $0x4d8] sm:$0xff]  ;;  %v3701_v1 = vld [vmem:[#allocation2 + $0x530] sm:$0xff] }
 0x1d1   :  { %v3641_v18 = vrot.slane %v3640_v50, 4  ;;  %v3650_v52 = vsel %vm9445_vm10, %v3646_v21, %v3649_v23  ;;  %v3651_v61 = vrot.slane %v3649_v23, 4  ;;  %v3685_v21 = vld [vmem:[#allocation2 + $0x4b0] sm:$0xff]  ;;  %v7905_v13 = vcombine.high %v3712_v53, %v3724_v9 }
 0x1d2   :  { %4099 = vmatpush1.bf16.msra.mxu1 %v3968_v31  ;;  %4036 = vmatpush1.bf16.msra.mxu0 %v3962_v33  ;;  %v3677_v30 = vsel %vm9445_vm10, %v3671_v32, %v3676_v54  ;;  %v3708_v33 = vld [vmem:[#allocation2 + $0x568] sm:$0xff]  ;;  %v7875_v19 = vcombine.high %v3685_v21, %v3697_v22  ;;  %v7874_v40 = vcombine.low %v3685_v21, %v3697_v22  ;;  %v3713_v32 = vld [vmem:[#allocation2 + $0x590] sm:$0xff] }
 0x1d3   :  { %4222 = vmatprep.subr.bf16.mxu1 %v7869_v34  ;;  %4159 = vmatprep.subr.bf16.mxu0 %v7867_v35  ;;  %v3645_v24 = vsel %vm9445_vm10, %v3641_v18, %v3644_v51  ;;  %v9509_v31 = vcombine.low %v3670_v29, %v3677_v30  ;;  %v3720_v34 = vld [vmem:[#allocation2 + $0x5c8] sm:$0x33]  ;;  %v3707_v35 = vld [vmem:[#allocation2 + $0x560] sm:$0xff]  ;;  %v3686_v51 = vld [vmem:[#allocation2 + $0x4b8] sm:$0xff]  ;;  %v7882_v30 = vcombine.low %v3689_v14, %v3701_v1 }
 0x1d4   :  { %v7896_v49 = vcombine.low %v3708_v33, %v3720_v34  ;;  %v7894_v50 = vcombine.low %v3707_v35, %v3719_v17  ;;  %v7897_v15 = vcombine.high %v3708_v33, %v3720_v34  ;;  %v7895_v20 = vcombine.high %v3707_v35, %v3719_v17  ;;  %v3698_v18 = vld [vmem:[#allocation2 + $0x518] sm:$0xff]  ;;  %v3725_v54 = vld [vmem:[#allocation2 + $0x5f0] sm:$0x33]  ;;  %v4958_v35 = vld [vmem:[#allocation2 + $0x608] sm:$0xff] }
 0x1d5   :  { %7853 = vmatmul.mubr.msk.bf16.gmra.mrb[64].mxu0 %vm448_vm3, %v9291_v62  ;;  %7857 = vmatmul.mubr.msk.bf16.gmra.mrb[64].mxu1 %vm448_vm3, %v9291_v62  ;;  %v3652_v62 = vshrl.u32 %v9265_v27, 16  ;;  %v3655_v27 = vrot.slane %v136_v45, 6  ;;  %v3717_v45 = vld [vmem:[#allocation2 + $0x5b0] sm:$0x33]  ;;  %v7877_v42 = vcombine.high %v3686_v51, %v3698_v18  ;;  %v7876_v46 = vcombine.low %v3686_v51, %v3698_v18  ;;  %v4982_v21 = vld [vmem:[#allocation2 + $0x6c8] sm:$0xff] }
 0x1d6   :  { %3417 = vmatprep.mubr.bf16.mxu0 %v8780_v0  ;;  %3480 = vmatprep.mubr.bf16.mxu1 %v8780_v0  ;;  %v7890_v3 = vcombine.low %v3705_v36, %v3717_v45  ;;  %v7891_v7 = vcombine.high %v3705_v36, %v3717_v45  ;;  %v3992_v23 = vsel %vm458_vm0, %v7896_v49, 0  ;;  %v3700_v45 = vld [vmem:[#allocation2 + $0x528] sm:$0xff]  ;;  %v7906_v34 = vcombine.low %v3713_v32, %v3725_v54  ;;  %v4957_v49 = vld [vmem:[#allocation2 + $0x600] sm:$0xff] }
 0x1d7   :  { %v3654_v55 = vrot.slane %v3652_v62, 5  ;;  %v3986_v62 = vsel %vm458_vm0, %v7894_v50, 0  ;;  %v4969_v50 = vld [vmem:[#allocation2 + $0x660] sm:$0xff]  ;;  %v4994_v22 = vld [vmem:[#allocation2 + $0x728] sm:$0x33] }
 0x1d8   :  { %v3974_v25 = vsel %vm458_vm0, %v7890_v3, 0  ;;  %v3723_v3 = vld [vmem:[#allocation2 + $0x5e0] sm:$0x33]  ;;  %v7964_v18 = vcombine.high %v4957_v49, %v4969_v50 }
 0x1d9   :  { %v3656_v43 = vor.u32 %v3655_v27, %v3654_v55  ;;  %v3709_v55 = vld [vmem:[#allocation2 + $0x570] sm:$0xff]  ;;  %v7902_v11 = vcombine.low %v3711_v2, %v3723_v3 }
 0x1da   :  { %v3721_v27 = vld [vmem:[#allocation2 + $0x5d0] sm:$0x33] }
 0x1db   :  { %v3657_v60 = vsel %vm9445_vm10, %v3651_v61, %v3656_v43  ;;  %v7898_v56 = vcombine.low %v3709_v55, %v3721_v27  ;;  %v7899_v36 = vcombine.high %v3709_v55, %v3721_v27  ;;  %v3699_v61 = vld [vmem:[#allocation2 + $0x520] sm:$0xff]  ;;  %v9605_v55 = vld [vmem:[#allocation2 + $0x618] sm:$0xff]  ;;  %v7990_v27 = vcombine.high %v4982_v21, %v4994_v22 }
 0x1dc   :  { %v9497_v28 = vcombine.low %v3657_v60, %v3665_v10  ;;  %v7903_v60 = vcombine.high %v3711_v2, %v3723_v3  ;;  %v3702_v10 = vld [vmem:[#allocation2 + $0x538] sm:$0xff] }
 0x1dd   :  { %7854 = vmatmul.mubr.msk.bf16.gmra.mrb[68].mxu0 %vm448_vm3, %v9309_v4  ;;  %7858 = vmatmul.mubr.msk.bf16.gmra.mrb[68].mxu1 %vm448_vm3, %v9309_v4  ;;  %v9470_v4 = vcombine.low %v3645_v24, %v3650_v52  ;;  %v3710_v24 = vld [vmem:[#allocation2 + $0x578] sm:$0xff]  ;;  %v3998_v44 = vsel %vm458_vm0, %v7898_v56, 0  ;;  %v7884_v29 = vcombine.low %v3690_v12, %v3702_v10  ;;  %v4971_v56 = vld [vmem:[#allocation2 + $0x670] sm:$0xff] }
 0x1de   :  { %4065 = vmatprep.mubr.bf16.mxu0 %v8780_v0  ;;  %4128 = vmatprep.mubr.bf16.mxu1 %v8780_v0  ;;  %v3722_v52 = vld [vmem:[#allocation2 + $0x5d8] sm:$0x33] }
 0x1df   :  { %v7900_v47 = vcombine.low %v3710_v24, %v3722_v52  ;;  %v7901_v58 = vcombine.high %v3710_v24, %v3722_v52  ;;  %v7989_v24 = vcombine.low %v4982_v21, %v4994_v22  ;;  %v4984_v2 = vld [vmem:[#allocation2 + $0x6d8] sm:$0xff] }
 0x1e0   :  { %v4996_v3 = vld [vmem:[#allocation2 + $0x738] sm:$0x33] }
 0x1e1   :  { %v4004_v43 = vsel %vm458_vm0, %v7900_v47, 0  ;;  %v9609_v47 = vld [vmem:[#allocation2 + $0x610] sm:$0xff] }
 0x1e5   :  { %7911 = vmatmul.mubr.msk.bf16.vlgmr.msra.gmra.mrb[0].mxu0 %vm448_vm3, %v9470_v4  ;;  %7915 = vmatmul.mubr.msk.bf16.vlgmr.msra.gmra.mrb[0].mxu1 %vm448_vm3, %v9470_v4 }
 0x1e6   :  { %4223 = vmatpush1.bf16.msra.mxu1 %v7868_v57  ;;  %4160 = vmatpush1.bf16.msra.mxu0 %v7866_v59  ;;  %v3688_v57 = vld [vmem:[#allocation2 + $0x4c8] sm:$0xff]  ;;  %v3687_v59 = vld [vmem:[#allocation2 + $0x4c0] sm:$0xff] }
 0x1e7   :  { %4075 = vmatprep.mubr.bf16.mxu0 %v8780_v0  ;;  %4138 = vmatprep.mubr.bf16.mxu1 %v8780_v0  ;;  %v7881_v63 = vcombine.high %v3688_v57, %v3700_v45  ;;  %v7879_v41 = vcombine.high %v3687_v59, %v3699_v61  ;;  %v7880_v37 = vcombine.low %v3688_v57, %v3700_v45  ;;  %v5246_v57 = vsel %vm458_vm0, %v7989_v24, 0  ;;  %v4997_v24 = vld [vmem:[#allocation2 + $0x740] sm:$0x33] }
 0x1e8   :  { %7922 = vmatprep.subr.msk.bf16.mxu1 %vm458_vm0, %v7893_v6  ;;  %7918 = vmatprep.subr.msk.bf16.mxu0 %vm458_vm0, %v7891_v7  ;;  %v7878_v6 = vcombine.low %v3687_v59, %v3699_v61  ;;  %v7904_v7 = vcombine.low %v3712_v53, %v3724_v9  ;;  %v7968_v45 = vcombine.high %v9609_v47, %v4971_v56  ;;  %v8720_v61 = vld [vmem:[%s10437_s0] sm:$0xf] }
 0x1ea   :  { %4225 = vmatpush1.bf16.msra.mxu1 %v3980_v5  ;;  %4162 = vmatpush1.bf16.msra.mxu0 %v3974_v25  ;;  %v4016_v16 = vsel %vm458_vm0, %v7904_v7, 0  ;;  %v4010_v5 = vsel %vm458_vm0, %v7902_v11, 0  ;;  %v7885_v25 = vcombine.high %v3690_v12, %v3702_v10  ;;  %v8723_v10 = vld [vmem:[%s10437_s0 + $0x10] sm:$0xf] }
 0x1eb   :  { %4348 = vmatprep.subr.bf16.mxu1 %v7873_v38  ;;  %4285 = vmatprep.subr.bf16.mxu0 %v7871_v26  ;;  %v7883_v38 = vcombine.high %v3689_v14, %v3701_v1  ;;  %v3714_v26 = vld [vmem:[#allocation2 + $0x598] sm:$0xff]  ;;  %v7959_v14 = vrot.slane %v8723_v10, 10  ;;  %v8724_v1 = vld [vmem:[%s10437_s0 + $0x14] sm:$0xf] }
 0x1ec   :  { %v7908_v33 = vcombine.low %v3714_v26, %v3726_v8  ;;  %v7909_v17 = vcombine.high %v3714_v26, %v3726_v8  ;;  %v7994_v26 = vcombine.high %v4984_v2, %v4996_v3 }
 0x1ed   :  { %7912 = vmatmul.mubr.msk.bf16.gmra.mrb[4].mxu0 %vm448_vm3, %v9497_v28  ;;  %7916 = vmatmul.mubr.msk.bf16.gmra.mrb[4].mxu1 %vm448_vm3, %v9497_v28 }
 0x1ee   :  { %4085 = vmatprep.mubr.bf16.mxu0 %v8780_v0  ;;  %4148 = vmatprep.mubr.bf16.mxu1 %v8780_v0  ;;  %v4028_v51 = vsel %vm458_vm0, %v7908_v33, 0 }
 0x1f5   :  { %7913 = vmatmul.mubr.msk.bf16.gmra.mrb[8].mxu0 %vm448_vm3, %v9509_v31  ;;  %7917 = vmatmul.mubr.msk.bf16.gmra.mrb[8].mxu1 %vm448_vm3, %v9509_v31 }
 0x1f6   :  { %4191 = vmatprep.mubr.bf16.mxu0 %v8780_v0  ;;  %4254 = vmatprep.mubr.bf16.mxu1 %v8780_v0 }
 0x1fd   :  { %7919 = vmatmul.mubr.msk.bf16.vlgmr.msra.gmra.mrb[12].mxu0 %vm448_vm3, %v9470_v4  ;;  %7923 = vmatmul.mubr.msk.bf16.vlgmr.msra.gmra.mrb[12].mxu1 %vm448_vm3, %v9470_v4 }
 0x1fe   :  { %4349 = vmatpush1.bf16.msra.mxu1 %v7872_v39  ;;  %4286 = vmatpush1.bf16.msra.mxu0 %v7870_v48  ;;  %v7907_v39 = vcombine.high %v3713_v32, %v3725_v54  ;;  %v4970_v48 = vld [vmem:[#allocation2 + $0x668] sm:$0xff]  ;;  %v4961_v54 = vld [vmem:[#allocation2 + $0x620] sm:$0xff] }
 0x1ff   :  { %4201 = vmatprep.mubr.bf16.mxu0 %v8780_v0  ;;  %4264 = vmatprep.mubr.bf16.mxu1 %v8780_v0  ;;  %v4974_v32 = vld [vmem:[#allocation2 + $0x688] sm:$0xff] }
 0x200   :  { %7930 = vmatprep.subr.msk.bf16.mxu1 %vm458_vm0, %v7897_v15  ;;  %7926 = vmatprep.subr.msk.bf16.mxu0 %vm458_vm0, %v7895_v20  ;;  %v4022_v15 = vsel %vm458_vm0, %v7906_v34, 0  ;;  %v7966_v20 = vcombine.high %v4958_v35, %v4970_v48  ;;  %v8725_v34 = vld [vmem:[%s10437_s0 + $0x18] sm:$0xf] }
 0x202   :  { %4351 = vmatpush1.bf16.msra.mxu1 %v3992_v23  ;;  %4288 = vmatpush1.bf16.msra.mxu0 %v3986_v62  ;;  %v4981_v23 = vld [vmem:[#allocation2 + $0x6c0] sm:$0xff] }
 0x203   :  { %4474 = vmatprep.subr.bf16.mxu1 %v7877_v42  ;;  %4411 = vmatprep.subr.bf16.mxu0 %v7875_v19  ;;  %v4993_v62 = vld [vmem:[#allocation2 + $0x720] sm:$0x33]  ;;  %v7965_v42 = vcombine.low %v4958_v35, %v4970_v48  ;;  %v7963_v19 = vcombine.low %v4957_v49, %v4969_v50  ;;  %v4951_v35 = vrot.slane %v8725_v34, 6  ;;  %v4967_v34 = vld [vmem:[#allocation2 + $0x650] sm:$0xff] }
 0x204   :  { %v7987_v52 = vcombine.low %v4981_v23, %v4993_v62 }
 0x205   :  { %7920 = vmatmul.mubr.msk.bf16.gmra.mrb[16].mxu0 %vm448_vm3, %v9497_v28  ;;  %7924 = vmatmul.mubr.msk.bf16.gmra.mrb[16].mxu1 %vm448_vm3, %v9497_v28 }
 0x206   :  { %4211 = vmatprep.mubr.bf16.mxu0 %v8780_v0  ;;  %4274 = vmatprep.mubr.bf16.mxu1 %v8780_v0 }
 0x20d   :  { %7921 = vmatmul.mubr.msk.bf16.gmra.mrb[20].mxu0 %vm448_vm3, %v9509_v31  ;;  %7925 = vmatmul.mubr.msk.bf16.gmra.mrb[20].mxu1 %vm448_vm3, %v9509_v31 }
 0x20e   :  { %4317 = vmatprep.mubr.bf16.mxu0 %v8780_v0  ;;  %4380 = vmatprep.mubr.bf16.mxu1 %v8780_v0 }
 0x215   :  { %7927 = vmatmul.mubr.msk.bf16.vlgmr.msra.gmra.mrb[24].mxu0 %vm448_vm3, %v9470_v4  ;;  %7931 = vmatmul.mubr.msk.bf16.vlgmr.msra.gmra.mrb[24].mxu1 %vm448_vm3, %v9470_v4 }
 0x216   :  { %4475 = vmatpush1.bf16.msra.mxu1 %v7876_v46  ;;  %4412 = vmatpush1.bf16.msra.mxu0 %v7874_v40  ;;  %v7988_v46 = vcombine.high %v4981_v23, %v4993_v62  ;;  %v9607_v40 = vld [vmem:[#allocation2 + $0x678] sm:$0xff]  ;;  %v4986_v62 = vld [vmem:[#allocation2 + $0x6e8] sm:$0xff] }
 0x217   :  { %4327 = vmatprep.mubr.bf16.mxu0 %v8780_v0  ;;  %4390 = vmatprep.mubr.bf16.mxu1 %v8780_v0  ;;  %v7969_v11 = vcombine.low %v9605_v55, %v9607_v40 }
 0x218   :  { %7938 = vmatprep.subr.msk.bf16.mxu1 %vm458_vm0, %v7901_v58  ;;  %7934 = vmatprep.subr.msk.bf16.mxu0 %vm458_vm0, %v7899_v36  ;;  %v5240_v58 = vsel %vm458_vm0, %v7987_v52, 0  ;;  %v7970_v36 = vcombine.high %v9605_v55, %v9607_v40  ;;  %v4964_v40 = vld [vmem:[#allocation2 + $0x638] sm:$0xff] }
 0x21a   :  { %4477 = vmatpush1.bf16.msra.mxu1 %v4004_v43  ;;  %4414 = vmatpush1.bf16.msra.mxu0 %v3998_v44  ;;  %v7958_v43 = vrot.slane %v8720_v61, 10 }
 0x21b   :  { %4600 = vmatprep.subr.bf16.mxu1 %v7881_v63  ;;  %4537 = vmatprep.subr.bf16.mxu0 %v7879_v41 }
 0x21d   :  { %7928 = vmatmul.mubr.msk.bf16.gmra.mrb[28].mxu0 %vm448_vm3, %v9497_v28  ;;  %7932 = vmatmul.mubr.msk.bf16.gmra.mrb[28].mxu1 %vm448_vm3, %v9497_v28 }
 0x21e   :  { %4337 = vmatprep.mubr.bf16.mxu0 %v8780_v0  ;;  %4400 = vmatprep.mubr.bf16.mxu1 %v8780_v0 }
 0x225   :  { %7929 = vmatmul.mubr.msk.bf16.gmra.mrb[32].mxu0 %vm448_vm3, %v9509_v31  ;;  %7933 = vmatmul.mubr.msk.bf16.gmra.mrb[32].mxu1 %vm448_vm3, %v9509_v31 }
 0x226   :  { %4443 = vmatprep.mubr.bf16.mxu0 %v8780_v0  ;;  %4506 = vmatprep.mubr.bf16.mxu1 %v8780_v0 }
 0x22d   :  { %7935 = vmatmul.mubr.msk.bf16.vlgmr.msra.gmra.mrb[36].mxu0 %vm448_vm3, %v9470_v4  ;;  %7939 = vmatmul.mubr.msk.bf16.vlgmr.msra.gmra.mrb[36].mxu1 %vm448_vm3, %v9470_v4 }
 0x22e   :  { %4601 = vmatpush1.bf16.msra.mxu1 %v7880_v37  ;;  %4538 = vmatpush1.bf16.msra.mxu0 %v7878_v6  ;;  %v4983_v37 = vld [vmem:[#allocation2 + $0x6d0] sm:$0xff] }
 0x22f   :  { %4453 = vmatprep.mubr.bf16.mxu0 %v8780_v0  ;;  %4516 = vmatprep.mubr.bf16.mxu1 %v8780_v0  ;;  %v4995_v6 = vld [vmem:[#allocation2 + $0x730] sm:$0x33] }
 0x230   :  { %7946 = vmatprep.subr.msk.bf16.mxu1 %vm458_vm0, %v7905_v13  ;;  %7942 = vmatprep.subr.msk.bf16.mxu0 %vm458_vm0, %v7903_v60  ;;  %v8722_v13 = vld [vmem:[%s10437_s0 + $0xc] sm:$0x3]  ;;  %v7992_v8 = vcombine.high %v4983_v37, %v4995_v6 }
 0x231   :  { %v4944_v60 = vrot.slane %v8722_v13, 6 }
 0x232   :  { %4603 = vmatpush1.bf16.msra.mxu1 %v4016_v16  ;;  %4540 = vmatpush1.bf16.msra.mxu0 %v4010_v5  ;;  %v4948_v16 = vrot.slane %v8724_v1, 6  ;;  %v7993_v5 = vcombine.low %v4984_v2, %v4996_v3  ;;  %v4966_v3 = vld [vmem:[#allocation2 + $0x648] sm:$0xff] }
 0x233   :  { %4726 = vmatprep.subr.bf16.mxu1 %v7885_v25  ;;  %4663 = vmatprep.subr.bf16.mxu0 %v7883_v38  ;;  %v7991_v25 = vcombine.low %v4983_v37, %v4995_v6  ;;  %v4962_v38 = vld [vmem:[#allocation2 + $0x628] sm:$0xff] }
 0x234   :  { %v4949_v33 = vsel %vm9639_vm13, %v7959_v14, %v4948_v16  ;;  %v7974_v48 = vcombine.high %v4962_v38, %v4974_v32  ;;  %v7973_v52 = vcombine.low %v4962_v38, %v4974_v32  ;;  %v4990_v1 = vld [vmem:[#allocation2 + $0x708] sm:$0xff] }
 0x235   :  { %7936 = vmatmul.mubr.msk.bf16.gmra.mrb[40].mxu0 %vm448_vm3, %v9497_v28  ;;  %7940 = vmatmul.mubr.msk.bf16.gmra.mrb[40].mxu1 %vm448_vm3, %v9497_v28 }
 0x236   :  { %4463 = vmatprep.mubr.bf16.mxu0 %v8780_v0  ;;  %4526 = vmatprep.mubr.bf16.mxu1 %v8780_v0 }
 0x23d   :  { %7937 = vmatmul.mubr.msk.bf16.gmra.mrb[44].mxu0 %vm448_vm3, %v9509_v31  ;;  %7941 = vmatmul.mubr.msk.bf16.gmra.mrb[44].mxu1 %vm448_vm3, %v9509_v31 }
 0x23e   :  { %4569 = vmatprep.mubr.bf16.mxu0 %v8780_v0  ;;  %4632 = vmatprep.mubr.bf16.mxu1 %v8780_v0 }
 0x245   :  { %7943 = vmatmul.mubr.msk.bf16.vlgmr.msra.gmra.mrb[48].mxu0 %vm448_vm3, %v9470_v4  ;;  %7947 = vmatmul.mubr.msk.bf16.vlgmr.msra.gmra.mrb[48].mxu1 %vm448_vm3, %v9470_v4 }
 0x246   :  { %4727 = vmatpush1.bf16.msra.mxu1 %v7884_v29  ;;  %4664 = vmatpush1.bf16.msra.mxu0 %v7882_v30  ;;  %v4973_v29 = vld [vmem:[#allocation2 + $0x680] sm:$0xff] }
 0x247   :  { %4579 = vmatprep.mubr.bf16.mxu0 %v8780_v0  ;;  %4642 = vmatprep.mubr.bf16.mxu1 %v8780_v0  ;;  %v7972_v49 = vcombine.high %v4961_v54, %v4973_v29  ;;  %v7971_v55 = vcombine.low %v4961_v54, %v4973_v29  ;;  %v4968_v54 = vld [vmem:[#allocation2 + $0x658] sm:$0xff] }
 0x248   :  { %7954 = vmatprep.subr.msk.bf16.mxu1 %vm458_vm0, %v7909_v17  ;;  %7950 = vmatprep.subr.msk.bf16.mxu0 %vm458_vm0, %v7907_v39  ;;  %v5258_v17 = vsel %vm458_vm0, %v7993_v5, 0  ;;  %v5252_v39 = vsel %vm458_vm0, %v7991_v25, 0  ;;  %v4989_v5 = vld [vmem:[#allocation2 + $0x700] sm:$0xff] }
 0x249   :  { %v5001_v25 = vld [vmem:[#allocation2 + $0x760] sm:$0x33] }
 0x24a   :  { %4729 = vmatpush1.bf16.msra.mxu1 %v4028_v51  ;;  %4666 = vmatpush1.bf16.msra.mxu0 %v4022_v15  ;;  %v4950_v51 = vrot.slane %v4948_v16, 4  ;;  %v4953_v15 = vrot.slane %v4951_v35, 4  ;;  %v5002_v16 = vld [vmem:[#allocation2 + $0x768] sm:$0x33]  ;;  %v8003_v32 = vcombine.low %v4989_v5, %v5001_v25 }
 0x24b   :  { %5374 = vmatprep.subr.bf16.mxu1 %v7966_v20  ;;  %5311 = vmatprep.subr.bf16.mxu0 %v7964_v18  ;;  %v8726_v20 = vld [vmem:[%s10437_s0 + $0x1c] sm:$0x3]  ;;  %v8006_v29 = vcombine.high %v4990_v1, %v5002_v16 }
 0x24c   :  { %v4954_v18 = vrot.slane %v8726_v20, 6  ;;  %v4952_v21 = vsel %vm9639_vm13, %v4950_v51, %v4951_v35  ;;  %v4979_v35 = vld [vmem:[#allocation2 + $0x6b0] sm:$0xff]  ;;  %v4992_v51 = vld [vmem:[#allocation2 + $0x718] sm:$0xff] }
 0x24d   :  { %7944 = vmatmul.mubr.msk.bf16.gmra.mrb[52].mxu0 %vm448_vm3, %v9497_v28  ;;  %7948 = vmatmul.mubr.msk.bf16.gmra.mrb[52].mxu1 %vm448_vm3, %v9497_v28  ;;  %v4991_v20 = vld [vmem:[#allocation2 + $0x710] sm:$0xff] }
 0x24e   :  { %4589 = vmatprep.mubr.bf16.mxu0 %v8780_v0  ;;  %4652 = vmatprep.mubr.bf16.mxu1 %v8780_v0  ;;  %v4955_v22 = vsel %vm9639_vm13, %v4953_v15, %v4954_v18  ;;  %v5004_v15 = vld [vmem:[#allocation2 + $0x778] sm:$0x33]  ;;  %v5003_v18 = vld [vmem:[#allocation2 + $0x770] sm:$0x33] }
 0x24f   :  { %v9699_v23 = vcombine.low %v4952_v21, %v4955_v22  ;;  %v7983_v22 = vcombine.low %v4967_v34, %v4979_v35 }
 0x255   :  { %7945 = vmatmul.mubr.msk.bf16.gmra.mrb[56].mxu0 %vm448_vm3, %v9509_v31  ;;  %7949 = vmatmul.mubr.msk.bf16.gmra.mrb[56].mxu1 %vm448_vm3, %v9509_v31 }
 0x256   :  { %4695 = vmatprep.mubr.bf16.mxu0 %v8780_v0  ;;  %4758 = vmatprep.mubr.bf16.mxu1 %v8780_v0 }
 0x25d   :  { %7951 = vmatmul.mubr.msk.bf16.vlgmr.msra.gmra.mrb[60].mxu0 %vm448_vm3, %v9470_v4  ;;  %7955 = vmatmul.mubr.msk.bf16.vlgmr.msra.gmra.mrb[60].mxu1 %vm448_vm3, %v9470_v4  ;;  %v8719_v4 = vld [vmem:[%s10437_s0 + $0x4] sm:$0xf] }
 0x25e   :  { %5375 = vmatpush1.bf16.msra.mxu1 %v7965_v42  ;;  %5312 = vmatpush1.bf16.msra.mxu0 %v7963_v19  ;;  %v4938_v59 = vrot.slane %v8719_v4, 6  ;;  %v4998_v42 = vld [vmem:[#allocation2 + $0x748] sm:$0x33]  ;;  %v4985_v19 = vld [vmem:[#allocation2 + $0x6e0] sm:$0xff] }
 0x25f   :  { %4705 = vmatprep.mubr.bf16.mxu0 %v8780_v0  ;;  %4768 = vmatprep.mubr.bf16.mxu1 %v8780_v0 }
 0x260   :  { %8015 = vmatprep.subr.msk.bf16.mxu1 %vm458_vm0, %v7990_v27  ;;  %8011 = vmatprep.subr.msk.bf16.mxu0 %vm458_vm0, %v7988_v46  ;;  %v4940_v44 = vrot.slane %v4938_v59, 4  ;;  %v4939_v53 = vsel %vm9639_vm13, %v7958_v43, %v4938_v59  ;;  %v7997_v27 = vcombine.low %v4986_v62, %v4998_v42  ;;  %v7995_v46 = vcombine.low %v4985_v19, %v4997_v24  ;;  %v4988_v43 = vld [vmem:[#allocation2 + $0x6f8] sm:$0xff] }
 0x262   :  { %5377 = vmatpush1.bf16.msra.mxu1 %v5246_v57  ;;  %5314 = vmatpush1.bf16.msra.mxu0 %v5240_v58  ;;  %v4976_v57 = vld [vmem:[#allocation2 + $0x698] sm:$0xff]  ;;  %v4963_v58 = vld [vmem:[#allocation2 + $0x630] sm:$0xff]  ;;  %v5264_v4 = vsel %vm458_vm0, %v7995_v46, 0 }
 0x263   :  { %5500 = vmatprep.subr.bf16.mxu1 %v7970_v36  ;;  %5437 = vmatprep.subr.bf16.mxu0 %v7968_v45  ;;  %v4975_v36 = vld [vmem:[#allocation2 + $0x690] sm:$0xff]  ;;  %v5270_v45 = vsel %vm458_vm0, %v7997_v27, 0  ;;  %v7978_v59 = vcombine.high %v4964_v40, %v4976_v57  ;;  %v7977_v41 = vcombine.low %v4964_v40, %v4976_v57  ;;  %v9821_v40 = vld [vmem:[#allocation4] sm:$0xff] }
 0x264   :  { %v7976_v61 = vcombine.high %v4963_v58, %v4975_v36 }
 0x265   :  { %7952 = vmatmul.mubr.msk.bf16.gmra.mrb[64].mxu0 %vm448_vm3, %v9497_v28  ;;  %7956 = vmatmul.mubr.msk.bf16.gmra.mrb[64].mxu1 %vm448_vm3, %v9497_v28  ;;  %v8721_v28 = vld [vmem:[%s10437_s0 + $0x8] sm:$0xf] }
 0x266   :  { %4715 = vmatprep.mubr.bf16.mxu0 %v8780_v0  ;;  %4778 = vmatprep.mubr.bf16.mxu1 %v8780_v0  ;;  %v4941_v63 = vrot.slane %v8721_v28, 6  ;;  %v4987_v28 = vld [vmem:[#allocation2 + $0x6f0] sm:$0xff] }
 0x268   :  { %v4942_v9 = vsel %vm9639_vm13, %v4940_v44, %v4941_v63  ;;  %v4943_v12 = vrot.slane %v4941_v63, 4  ;;  %v5000_v44 = vld [vmem:[#allocation2 + $0x758] sm:$0x33]  ;;  %v4999_v63 = vld [vmem:[#allocation2 + $0x750] sm:$0x33] }
 0x269   :  { %v9653_v7 = vcombine.low %v4939_v53, %v4942_v9  ;;  %v7975_v53 = vcombine.low %v4963_v58, %v4975_v36  ;;  %v8001_v9 = vcombine.low %v4988_v43, %v5000_v44  ;;  %v7999_v2 = vcombine.low %v4987_v28, %v4999_v63 }
 0x26a   :  { %v4945_v30 = vsel %vm9639_vm13, %v4943_v12, %v4944_v60  ;;  %v8002_v37 = vcombine.high %v4988_v43, %v5000_v44  ;;  %v8000_v6 = vcombine.high %v4987_v28, %v4999_v63  ;;  %v4977_v12 = vld [vmem:[#allocation2 + $0x6a0] sm:$0xff] }
 0x26b   :  { %v9684_v50 = vcombine.low %v4945_v30, %v4949_v33  ;;  %v5282_v13 = vsel %vm458_vm0, %v8001_v9, 0  ;;  %v5276_v60 = vsel %vm458_vm0, %v7999_v2, 0  ;;  %v8004_v30 = vcombine.high %v4989_v5, %v5001_v25  ;;  %v4980_v33 = vld [vmem:[#allocation2 + $0x6b8] sm:$0xff] }
 0x26c   :  { %v7985_v21 = vcombine.low %v4968_v54, %v4980_v33 }
 0x26d   :  { %7953 = vmatmul.mubr.msk.bf16.gmra.mrb[68].mxu0 %vm448_vm3, %v9509_v31  ;;  %7957 = vmatmul.mubr.msk.bf16.gmra.mrb[68].mxu1 %vm448_vm3, %v9509_v31  ;;  %v7967_v31 = vcombine.low %v9609_v47, %v4971_v56  ;;  %v7998_v47 = vcombine.high %v4986_v62, %v4998_v42  ;;  %v7996_v56 = vcombine.high %v4985_v19, %v4997_v24 }
 0x26e   :  { %5343 = vmatprep.mubr.bf16.mxu0 %v8780_v0  ;;  %5406 = vmatprep.mubr.bf16.mxu1 %v8780_v0  ;;  %v8009_v62 = vcombine.low %v4992_v51, %v5004_v15  ;;  %v8007_v42 = vcombine.low %v4991_v20, %v5003_v18  ;;  %v8010_v19 = vcombine.high %v4992_v51, %v5004_v15 }
 0x26f   :  { %v8008_v24 = vcombine.high %v4991_v20, %v5003_v18 }
 0x275   :  { %8012 = vmatmul.mubr.msk.bf16.vlgmr.msra.gmra.mrb[0].mxu0 %vm448_vm3, %v9653_v7  ;;  %8016 = vmatmul.mubr.msk.bf16.vlgmr.msra.gmra.mrb[0].mxu1 %vm448_vm3, %v9653_v7 }
 0x276   :  { %5501 = vmatpush1.bf16.msra.mxu1 %v7969_v11  ;;  %5438 = vmatpush1.bf16.msra.mxu0 %v7967_v31  ;;  %v4978_v11 = vld [vmem:[#allocation2 + $0x6a8] sm:$0xff]  ;;  %v4965_v31 = vld [vmem:[#allocation2 + $0x640] sm:$0xff] }
 0x277   :  { %5353 = vmatprep.mubr.bf16.mxu0 %v8780_v0  ;;  %5416 = vmatprep.mubr.bf16.mxu1 %v8780_v0  ;;  %v7982_v10 = vcombine.high %v4966_v3, %v4978_v11  ;;  %v7980_v14 = vcombine.high %v4965_v31, %v4977_v12  ;;  %v7981_v38 = vcombine.low %v4966_v3, %v4978_v11 }
 0x278   :  { %8023 = vmatprep.subr.msk.bf16.mxu1 %vm458_vm0, %v7994_v26  ;;  %8019 = vmatprep.subr.msk.bf16.mxu0 %vm458_vm0, %v7992_v8  ;;  %v7979_v26 = vcombine.low %v4965_v31, %v4977_v12  ;;  %v8005_v8 = vcombine.low %v4990_v1, %v5002_v16 }
 0x27a   :  { %5503 = vmatpush1.bf16.msra.mxu1 %v5258_v17  ;;  %5440 = vmatpush1.bf16.msra.mxu0 %v5252_v39  ;;  %v5294_v17 = vsel %vm458_vm0, %v8005_v8, 0  ;;  %v5288_v39 = vsel %vm458_vm0, %v8003_v32, 0 }
 0x27b   :  { %5626 = vmatprep.subr.bf16.mxu1 %v7974_v48  ;;  %5563 = vmatprep.subr.bf16.mxu0 %v7972_v49  ;;  %v7986_v48 = vcombine.high %v4968_v54, %v4980_v33  ;;  %v7984_v49 = vcombine.high %v4967_v34, %v4979_v35 }
 0x27d   :  { %8013 = vmatmul.mubr.msk.bf16.gmra.mrb[4].mxu0 %vm448_vm3, %v9684_v50  ;;  %8017 = vmatmul.mubr.msk.bf16.gmra.mrb[4].mxu1 %vm448_vm3, %v9684_v50 }
 0x27e   :  { %5363 = vmatprep.mubr.bf16.mxu0 %v8780_v0  ;;  %5426 = vmatprep.mubr.bf16.mxu1 %v8780_v0 }
 0x285   :  { %8014 = vmatmul.mubr.msk.bf16.gmra.mrb[8].mxu0 %vm448_vm3, %v9699_v23  ;;  %8018 = vmatmul.mubr.msk.bf16.gmra.mrb[8].mxu1 %vm448_vm3, %v9699_v23 }
 0x286   :  { %5469 = vmatprep.mubr.bf16.mxu0 %v8780_v0  ;;  %5532 = vmatprep.mubr.bf16.mxu1 %v8780_v0 }
 0x28d   :  { %8020 = vmatmul.mubr.msk.bf16.vlgmr.msra.gmra.mrb[12].mxu0 %vm448_vm3, %v9653_v7  ;;  %8024 = vmatmul.mubr.msk.bf16.vlgmr.msra.gmra.mrb[12].mxu1 %vm448_vm3, %v9653_v7 }
 0x28e   :  { %5627 = vmatpush1.bf16.msra.mxu1 %v7973_v52  ;;  %5564 = vmatpush1.bf16.msra.mxu0 %v7971_v55  ;;  %v5306_v52 = vsel %vm458_vm0, %v8009_v62, 0  ;;  %v5300_v55 = vsel %vm458_vm0, %v8007_v42, 0 }
 0x28f   :  { %5479 = vmatprep.mubr.bf16.mxu0 %v8780_v0  ;;  %5542 = vmatprep.mubr.bf16.mxu1 %v8780_v0 }
 0x290   :  { %8031 = vmatprep.subr.msk.bf16.mxu1 %vm458_vm0, %v7998_v47  ;;  %8027 = vmatprep.subr.msk.bf16.mxu0 %vm458_vm0, %v7996_v56 }
 0x292   :  { %5629 = vmatpush1.bf16.msra.mxu1 %v5270_v45  ;;  %5566 = vmatpush1.bf16.msra.mxu0 %v5264_v4 }
 0x293   :  { %5752 = vmatprep.subr.bf16.mxu1 %v7978_v59  ;;  %5689 = vmatprep.subr.bf16.mxu0 %v7976_v61 }
 0x295   :  { %8021 = vmatmul.mubr.msk.bf16.gmra.mrb[16].mxu0 %vm448_vm3, %v9684_v50  ;;  %8025 = vmatmul.mubr.msk.bf16.gmra.mrb[16].mxu1 %vm448_vm3, %v9684_v50 }
 0x296   :  { %5489 = vmatprep.mubr.bf16.mxu0 %v8780_v0  ;;  %5552 = vmatprep.mubr.bf16.mxu1 %v8780_v0 }
 0x29d   :  { %8022 = vmatmul.mubr.msk.bf16.gmra.mrb[20].mxu0 %vm448_vm3, %v9699_v23  ;;  %8026 = vmatmul.mubr.msk.bf16.gmra.mrb[20].mxu1 %vm448_vm3, %v9699_v23 }
 0x29e   :  { %5595 = vmatprep.mubr.bf16.mxu0 %v8780_v0  ;;  %5658 = vmatprep.mubr.bf16.mxu1 %v8780_v0 }
 0x2a5   :  { %8028 = vmatmul.mubr.msk.bf16.vlgmr.msra.gmra.mrb[24].mxu0 %vm448_vm3, %v9653_v7  ;;  %8032 = vmatmul.mubr.msk.bf16.vlgmr.msra.gmra.mrb[24].mxu1 %vm448_vm3, %v9653_v7 }
 0x2a6   :  { %5753 = vmatpush1.bf16.msra.mxu1 %v7977_v41  ;;  %5690 = vmatpush1.bf16.msra.mxu0 %v7975_v53 }
 0x2a7   :  { %5605 = vmatprep.mubr.bf16.mxu0 %v8780_v0  ;;  %5668 = vmatprep.mubr.bf16.mxu1 %v8780_v0 }
 0x2a8   :  { %8039 = vmatprep.subr.msk.bf16.mxu1 %vm458_vm0, %v8002_v37  ;;  %8035 = vmatprep.subr.msk.bf16.mxu0 %vm458_vm0, %v8000_v6 }
 0x2aa   :  { %5755 = vmatpush1.bf16.msra.mxu1 %v5282_v13  ;;  %5692 = vmatpush1.bf16.msra.mxu0 %v5276_v60 }
 0x2ab   :  { %5878 = vmatprep.subr.bf16.mxu1 %v7982_v10  ;;  %5815 = vmatprep.subr.bf16.mxu0 %v7980_v14 }
 0x2ad   :  { %8029 = vmatmul.mubr.msk.bf16.gmra.mrb[28].mxu0 %vm448_vm3, %v9684_v50  ;;  %8033 = vmatmul.mubr.msk.bf16.gmra.mrb[28].mxu1 %vm448_vm3, %v9684_v50 }
 0x2ae   :  { %5615 = vmatprep.mubr.bf16.mxu0 %v8780_v0  ;;  %5678 = vmatprep.mubr.bf16.mxu1 %v8780_v0 }
 0x2b5   :  { %8030 = vmatmul.mubr.msk.bf16.gmra.mrb[32].mxu0 %vm448_vm3, %v9699_v23  ;;  %8034 = vmatmul.mubr.msk.bf16.gmra.mrb[32].mxu1 %vm448_vm3, %v9699_v23 }
 0x2b6   :  { %5721 = vmatprep.mubr.bf16.mxu0 %v8780_v0  ;;  %5784 = vmatprep.mubr.bf16.mxu1 %v8780_v0 }
 0x2bd   :  { %8036 = vmatmul.mubr.msk.bf16.vlgmr.msra.gmra.mrb[36].mxu0 %vm448_vm3, %v9653_v7  ;;  %8040 = vmatmul.mubr.msk.bf16.vlgmr.msra.gmra.mrb[36].mxu1 %vm448_vm3, %v9653_v7 }
 0x2be   :  { %5879 = vmatpush1.bf16.msra.mxu1 %v7981_v38  ;;  %5816 = vmatpush1.bf16.msra.mxu0 %v7979_v26 }
 0x2bf   :  { %5731 = vmatprep.mubr.bf16.mxu0 %v8780_v0  ;;  %5794 = vmatprep.mubr.bf16.mxu1 %v8780_v0 }
 0x2c0   :  { %8047 = vmatprep.subr.msk.bf16.mxu1 %vm458_vm0, %v8006_v29  ;;  %8043 = vmatprep.subr.msk.bf16.mxu0 %vm458_vm0, %v8004_v30 }
 0x2c2   :  { %5881 = vmatpush1.bf16.msra.mxu1 %v5294_v17  ;;  %5818 = vmatpush1.bf16.msra.mxu0 %v5288_v39 }
 0x2c3   :  { %6004 = vmatprep.subr.bf16.mxu1 %v7986_v48  ;;  %5941 = vmatprep.subr.bf16.mxu0 %v7984_v49 }
 0x2c5   :  { %8037 = vmatmul.mubr.msk.bf16.gmra.mrb[40].mxu0 %vm448_vm3, %v9684_v50  ;;  %8041 = vmatmul.mubr.msk.bf16.gmra.mrb[40].mxu1 %vm448_vm3, %v9684_v50 }
 0x2c6   :  { %5741 = vmatprep.mubr.bf16.mxu0 %v8780_v0  ;;  %5804 = vmatprep.mubr.bf16.mxu1 %v8780_v0 }
 0x2cd   :  { %8038 = vmatmul.mubr.msk.bf16.gmra.mrb[44].mxu0 %vm448_vm3, %v9699_v23  ;;  %8042 = vmatmul.mubr.msk.bf16.gmra.mrb[44].mxu1 %vm448_vm3, %v9699_v23 }
 0x2ce   :  { %5847 = vmatprep.mubr.bf16.mxu0 %v8780_v0  ;;  %5910 = vmatprep.mubr.bf16.mxu1 %v8780_v0 }
 0x2d5   :  { %8044 = vmatmul.mubr.msk.bf16.vlgmr.msra.gmra.mrb[48].mxu0 %vm448_vm3, %v9653_v7  ;;  %8048 = vmatmul.mubr.msk.bf16.vlgmr.msra.gmra.mrb[48].mxu1 %vm448_vm3, %v9653_v7 }
 0x2d6   :  { %6005 = vmatpush1.bf16.msra.mxu1 %v7985_v21  ;;  %5942 = vmatpush1.bf16.msra.mxu0 %v7983_v22 }
 0x2d7   :  { %5857 = vmatprep.mubr.bf16.mxu0 %v8780_v0  ;;  %5920 = vmatprep.mubr.bf16.mxu1 %v8780_v0 }
 0x2d8   :  { %8055 = vmatprep.subr.msk.bf16.mxu1 %vm458_vm0, %v8010_v19  ;;  %8051 = vmatprep.subr.msk.bf16.mxu0 %vm458_vm0, %v8008_v24 }
 0x2da   :  { %6007 = vmatpush1.bf16.msra.mxu1 %v5306_v52  ;;  %5944 = vmatpush1.bf16.msra.mxu0 %v5300_v55 }
 0x2dd   :  { %8045 = vmatmul.mubr.msk.bf16.gmra.mrb[52].mxu0 %vm448_vm3, %v9684_v50  ;;  %8049 = vmatmul.mubr.msk.bf16.gmra.mrb[52].mxu1 %vm448_vm3, %v9684_v50 }
 0x2de   :  { %5867 = vmatprep.mubr.bf16.mxu0 %v8780_v0  ;;  %5930 = vmatprep.mubr.bf16.mxu1 %v8780_v0 }
 0x2e5   :  { %8046 = vmatmul.mubr.msk.bf16.gmra.mrb[56].mxu0 %vm448_vm3, %v9699_v23  ;;  %8050 = vmatmul.mubr.msk.bf16.gmra.mrb[56].mxu1 %vm448_vm3, %v9699_v23 }
 0x2e6   :  { %5973 = vmatprep.mubr.bf16.mxu0 %v8780_v0  ;;  %6036 = vmatprep.mubr.bf16.mxu1 %v8780_v0 }
 0x2ed   :  { %8052 = vmatmul.mubr.msk.bf16.vlgmr.msra.gmra.mrb[60].mxu0 %vm448_vm3, %v9653_v7  ;;  %8056 = vmatmul.mubr.msk.bf16.vlgmr.msra.gmra.mrb[60].mxu1 %vm448_vm3, %v9653_v7  ;;  %v6217_v7 = vlaneseq }
 0x2ee   :  { %5983 = vmatprep.mubr.bf16.mxu0 %v8780_v0  ;;  %6046 = vmatprep.mubr.bf16.mxu1 %v8780_v0 }
 0x2ef   :  { %v9813_v27 = vshrl.u32 %v6217_v7, 7 }
 0x2f1   :  { %v9816_v46 = vsub.s32 0, %v9813_v27  ;;  %v9824_v47 = vsub.s32 1, %v9813_v27  ;;  %v9868_v7 = vsub.s32 4, %v9813_v27 }
 0x2f3   :  { %v9831_v56 = vrot.slane %v9821_v40, %v9816_v46  ;;  %v9839_v58 = vrot.slane %v9821_v40, %v9824_v47 }
 0x2f5   :  { %8053 = vmatmul.mubr.msk.bf16.gmra.mrb[64].mxu0 %vm448_vm3, %v9684_v50  ;;  %8057 = vmatmul.mubr.msk.bf16.gmra.mrb[64].mxu1 %vm448_vm3, %v9684_v50  ;;  %v9819_v50 = vsub.s32 2, %v9813_v27 }
 0x2f6   :  { %5993 = vmatprep.mubr.bf16.mxu0 %v8780_v0  ;;  %6056 = vmatprep.mubr.bf16.mxu1 %v8780_v0 }
 0x2f7   :  { %v9835_v57 = vrot.slane %v9821_v40, %v9819_v50 }
 0x2fd   :  { %8054 = vmatmul.mubr.msk.bf16.gmra.mrb[68].mxu0 %vm448_vm3, %v9699_v23  ;;  %8058 = vmatmul.mubr.msk.bf16.gmra.mrb[68].mxu1 %vm448_vm3, %v9699_v23  ;;  %v9827_v23 = vsub.s32 3, %v9813_v27 }
 0x2fe   :  { %6783 = vmatprep.mubr.bf16.mxu0 %v8780_v0  ;;  %6834 = vmatprep.mubr.bf16.mxu1 %v8780_v0 }
 0x2ff   :  { %v9843_v36 = vrot.slane %v9821_v40, %v9827_v23 }
 0x348   :  { %v5345_v45 = vpop.f32.mrb[0].mxu0  ;;  %v5408_v4 = vpop.f32.mrb[0].mxu1 }
 0x349   :  { %v6337_v59 = vadd.f32 %v9831_v56, %v5345_v45  ;;  %v6339_v61 = vadd.f32 %v9835_v57, %v5408_v4  ;;  %v5347_v43 = vpop.f32.mrb[1].mxu0  ;;  %v5410_v44 = vpop.f32.mrb[1].mxu1  ;;  %v9871_v45 = vsub.s32 6, %v9813_v27 }
 0x34a   :  { %v6338_v28 = vadd.f32 %v9839_v58, %v5347_v43  ;;  %v6340_v63 = vadd.f32 %v9843_v36, %v5410_v44  ;;  %v5349_v41 = vpop.f32.mrb[2].mxu0  ;;  %v5412_v53 = vpop.f32.mrb[2].mxu1 }
 0x34b   :  { %v6481_v9 = vmax.f32 %v6337_v59, 0.0  ;;  %v6483_v2 = vmax.f32 %v6339_v61, 0.0  ;;  %v6361_v3 = vadd.f32 %v9831_v56, %v5349_v41  ;;  %v6363_v37 = vadd.f32 %v9835_v57, %v5412_v53  ;;  %v5351_v6 = vpop.f32.mrb[3].mxu0  ;;  %v5414_v11 = vpop.f32.mrb[3].mxu1 }
 0x34c   :  { %v6482_v31 = vmax.f32 %v6338_v28, 0.0  ;;  %v6484_v12 = vmax.f32 %v6340_v63, 0.0  ;;  %v6362_v13 = vadd.f32 %v9839_v58, %v5351_v6  ;;  %v6364_v60 = vadd.f32 %v9843_v36, %v5414_v11 }
 0x34d   :  { %v6505_v10 = vmax.f32 %v6361_v3, 0.0  ;;  %v6507_v14 = vmax.f32 %v6363_v37, 0.0  ;;  %v9874_v53 = vsub.s32 5, %v9813_v27  ;;  %v9883_v11 = vrot.slane %v9821_v40, %v9868_v7 }
 0x34e   :  { %v6625_v1 = vmax.f32 %v6481_v9, %v6482_v31  ;;  %v6631_v16 = vmax.f32 %v6483_v2, %v6484_v12  ;;  %v6506_v5 = vmax.f32 %v6362_v13, 0.0  ;;  %v6508_v25 = vmax.f32 %v6364_v60, 0.0 }
 0x34f   :  { %v9877_v9 = vsub.s32 7, %v9813_v27  ;;  %v9887_v31 = vrot.slane %v9821_v40, %v9871_v45 }
 0x350   :  { %v6626_v38 = vmax.f32 %v6505_v10, %v6506_v5  ;;  %v6632_v26 = vmax.f32 %v6507_v14, %v6508_v25  ;;  %v5355_v8 = vpop.f32.mrb[4].mxu0  ;;  %v5418_v32 = vpop.f32.mrb[4].mxu1 }
 0x351   :  { %v6385_v54 = vadd.f32 %v9831_v56, %v5355_v8  ;;  %v6387_v29 = vadd.f32 %v9835_v57, %v5418_v32  ;;  %v5357_v30 = vpop.f32.mrb[5].mxu0  ;;  %v5420_v33 = vpop.f32.mrb[5].mxu1 }
 0x352   :  { %v9855_v34 = vpack.c.bf16 %v6626_v38, %v6625_v1  ;;  %v6386_v35 = vadd.f32 %v9839_v58, %v5357_v30  ;;  %v6388_v17 = vadd.f32 %v9843_v36, %v5420_v33  ;;  %v5359_v39 = vpop.f32.mrb[6].mxu0  ;;  %v5422_v48 = vpop.f32.mrb[6].mxu1  ;;  %v9859_v49 = vpack.c.bf16 %v6632_v26, %v6631_v16 }
 0x353   :  { %v6529_v51 = vmax.f32 %v6385_v54, 0.0  ;;  %v6531_v15 = vmax.f32 %v6387_v29, 0.0  ;;  %v6409_v20 = vadd.f32 %v9831_v56, %v5359_v39  ;;  %v6411_v18 = vadd.f32 %v9835_v57, %v5422_v48  ;;  %v5361_v21 = vpop.f32.mrb[7].mxu0  ;;  %v5424_v22 = vpop.f32.mrb[7].mxu1 }
 0x354   :  { %v6530_v62 = vmax.f32 %v6386_v35, 0.0  ;;  %v6532_v42 = vmax.f32 %v6388_v17, 0.0  ;;  %v6410_v19 = vadd.f32 %v9839_v58, %v5361_v21  ;;  %v6412_v24 = vadd.f32 %v9843_v36, %v5424_v22  ;;  %6751 = vmatprep.subr.bf16.mxu0 %v9859_v49 }
 0x355   :  { %v6553_v52 = vmax.f32 %v6409_v20, 0.0  ;;  %v6555_v55 = vmax.f32 %v6411_v18, 0.0  ;;  %6752 = vmatpush1.bf16.msra.mxu0 %v9855_v34  ;;  %v9903_v35 = vrot.slane %v9821_v40, %v9874_v53 }
 0x356   :  { %v6627_v4 = vmax.f32 %v6529_v51, %v6530_v62  ;;  %v6633_v59 = vmax.f32 %v6531_v15, %v6532_v42  ;;  %v6554_v61 = vmax.f32 %v6410_v19, 0.0  ;;  %v6556_v43 = vmax.f32 %v6412_v24, 0.0 }
 0x358   :  { %v6628_v44 = vmax.f32 %v6553_v52, %v6554_v61  ;;  %v6634_v28 = vmax.f32 %v6555_v55, %v6556_v43  ;;  %v5365_v63 = vpop.f32.mrb[8].mxu0  ;;  %v5428_v41 = vpop.f32.mrb[8].mxu1 }
 0x359   :  { %v6433_v2 = vadd.f32 %v9831_v56, %v5365_v63  ;;  %v6435_v3 = vadd.f32 %v9835_v57, %v5428_v41  ;;  %v5367_v37 = vpop.f32.mrb[9].mxu0  ;;  %v5430_v6 = vpop.f32.mrb[9].mxu1 }
 0x35a   :  { %v9889_v12 = vpack.c.bf16 %v6628_v44, %v6627_v4  ;;  %v6434_v13 = vadd.f32 %v9839_v58, %v5367_v37  ;;  %v6436_v27 = vadd.f32 %v9843_v36, %v5430_v6  ;;  %v5369_v60 = vpop.f32.mrb[10].mxu0  ;;  %v5432_v10 = vpop.f32.mrb[10].mxu1  ;;  %v9893_v14 = vpack.c.bf16 %v6634_v28, %v6633_v59 }
 0x35b   :  { %v6577_v1 = vmax.f32 %v6433_v2, 0.0  ;;  %v6579_v16 = vmax.f32 %v6435_v3, 0.0  ;;  %v6457_v5 = vadd.f32 %v9831_v56, %v5369_v60  ;;  %v6459_v25 = vadd.f32 %v9835_v57, %v5432_v10  ;;  %v5371_v38 = vpop.f32.mrb[11].mxu0  ;;  %v5434_v26 = vpop.f32.mrb[11].mxu1  ;;  %v9925_v3 = vld [vmem:[%s10440_s3] sm:$0xff]  }
 0x35c   :  { %v6578_v8 = vmax.f32 %v6434_v13, 0.0  ;;  %v6580_v32 = vmax.f32 %v6436_v27, 0.0  ;;  %v6458_v54 = vadd.f32 %v9839_v58, %v5371_v38  ;;  %v6460_v29 = vadd.f32 %v9843_v36, %v5434_v26  ;;  %6753 = vmatprep.subr.bf16.mxu0 %v9893_v14 }
 0x35d   :  { %v6601_v30 = vmax.f32 %v6457_v5, 0.0  ;;  %v6603_v33 = vmax.f32 %v6459_v25, 0.0  ;;  %6754 = vmatpush1.bf16.msra.mxu0 %v9889_v12  ;;  %v9907_v56 = vrot.slane %v9821_v40, %v9877_v9 }
 0x35e   :  { %v6629_v57 = vmax.f32 %v6577_v1, %v6578_v8  ;;  %v6635_v17 = vmax.f32 %v6579_v16, %v6580_v32  ;;  %v6602_v39 = vmax.f32 %v6458_v54, 0.0  ;;  %v6604_v58 = vmax.f32 %v6460_v29, 0.0 }
 0x360   :  { %v6630_v48 = vmax.f32 %v6601_v30, %v6602_v39  ;;  %v6636_v36 = vmax.f32 %v6603_v33, %v6604_v58  ;;  %v5471_v51 = vpop.f32.mrb[12].mxu0  ;;  %v5534_v15 = vpop.f32.mrb[12].mxu1 }
 0x361   :  { %v6341_v20 = vadd.f32 %v9883_v11, %v5471_v51  ;;  %v6343_v18 = vadd.f32 %v9887_v31, %v5534_v15  ;;  %v5473_v21 = vpop.f32.mrb[13].mxu0  ;;  %v5536_v22 = vpop.f32.mrb[13].mxu1 }
 0x362   :  { %v9911_v62 = vpack.c.bf16 %v6630_v48, %v6629_v57  ;;  %v6342_v42 = vadd.f32 %v9903_v35, %v5473_v21  ;;  %v6344_v40 = vadd.f32 %v9907_v56, %v5536_v22  ;;  %v5475_v19 = vpop.f32.mrb[14].mxu0  ;;  %v5538_v24 = vpop.f32.mrb[14].mxu1  ;;  %v9915_v52 = vpack.c.bf16 %v6636_v36, %v6635_v17 }
 0x363   :  { %v6485_v55 = vmax.f32 %v6341_v20, 0.0  ;;  %v6487_v4 = vmax.f32 %v6343_v18, 0.0  ;;  %v6365_v59 = vadd.f32 %v9883_v11, %v5475_v19  ;;  %v6367_v61 = vadd.f32 %v9887_v31, %v5538_v24  ;;  %v5477_v43 = vpop.f32.mrb[15].mxu0  ;;  %v5540_v44 = vpop.f32.mrb[15].mxu1 }
 0x364   :  { %v6486_v28 = vmax.f32 %v6342_v42, 0.0  ;;  %v6488_v63 = vmax.f32 %v6344_v40, 0.0  ;;  %v6366_v41 = vadd.f32 %v9903_v35, %v5477_v43  ;;  %v6368_v2 = vadd.f32 %v9907_v56, %v5540_v44  ;;  %6755 = vmatprep.subr.bf16.mxu0 %v9915_v52  ;;  %v9947_v42 = vld [vmem:[%s10440_s3 + $0x8] ss:$0 sps:$4 sm:$0xff]  }
 0x365   :  { %v6509_v37 = vmax.f32 %v6365_v59, 0.0  ;;  %v6511_v6 = vmax.f32 %v6367_v61, 0.0  ;;  %6756 = vmatpush1.bf16.msra.mxu0 %v9911_v62  ;;  %v9950_v61 = vld [vmem:[#allocation4 + $0x8] sm:$0xff] }
 0x366   :  { %v6637_v13 = vmax.f32 %v6485_v55, %v6486_v28  ;;  %v6643_v27 = vmax.f32 %v6487_v4, %v6488_v63  ;;  %v6510_v60 = vmax.f32 %v6366_v41, 0.0  ;;  %v6512_v10 = vmax.f32 %v6368_v2, 0.0 }
 0x368   :  { %v6638_v1 = vmax.f32 %v6509_v37, %v6510_v60  ;;  %v6644_v16 = vmax.f32 %v6511_v6, %v6512_v10  ;;  %v5481_v5 = vpop.f32.mrb[16].mxu0  ;;  %v5544_v25 = vpop.f32.mrb[16].mxu1  ;;  %8061 = vmatmul.mubr.msk.bf16.vlgmr.msra.gmra.mrb[72].mxu0 %vm6744_vm14, %v9925_v3 }
 0x369   :  { %v6389_v38 = vadd.f32 %v9883_v11, %v5481_v5  ;;  %v6391_v26 = vadd.f32 %v9887_v31, %v5544_v25  ;;  %v5483_v8 = vpop.f32.mrb[17].mxu0  ;;  %v5546_v32 = vpop.f32.mrb[17].mxu1  ;;  %6793 = vmatprep.mubr.bf16.mxu0 %v8780_v0 }
 0x36a   :  { %v9933_v54 = vpack.c.bf16 %v6638_v1, %v6637_v13  ;;  %v6390_v29 = vadd.f32 %v9903_v35, %v5483_v8  ;;  %v6392_v30 = vadd.f32 %v9907_v56, %v5546_v32  ;;  %v5485_v33 = vpop.f32.mrb[18].mxu0  ;;  %v5548_v57 = vpop.f32.mrb[18].mxu1  ;;  %v9937_v17 = vpack.c.bf16 %v6644_v16, %v6643_v27 }
 0x36b   :  { %v6533_v39 = vmax.f32 %v6389_v38, 0.0  ;;  %v6535_v58 = vmax.f32 %v6391_v26, 0.0  ;;  %v6413_v48 = vadd.f32 %v9883_v11, %v5485_v33  ;;  %v6415_v36 = vadd.f32 %v9887_v31, %v5548_v57  ;;  %v5487_v51 = vpop.f32.mrb[19].mxu0  ;;  %v5550_v15 = vpop.f32.mrb[19].mxu1 }
 0x36c   :  { %v6534_v20 = vmax.f32 %v6390_v29, 0.0  ;;  %v6536_v18 = vmax.f32 %v6392_v30, 0.0  ;;  %v6414_v21 = vadd.f32 %v9903_v35, %v5487_v51  ;;  %v6416_v22 = vadd.f32 %v9907_v56, %v5550_v15  ;;  %6802 = vmatprep.subr.bf16.mxu1 %v9937_v17 }
 0x36d   :  { %v6557_v40 = vmax.f32 %v6413_v48, 0.0  ;;  %v6559_v19 = vmax.f32 %v6415_v36, 0.0  ;;  %6803 = vmatpush1.bf16.msra.mxu1 %v9933_v54  ;;  %v9958_v13 = vrot.slane %v9950_v61, %v9816_v46  ;;  %v9962_v27 = vrot.slane %v9950_v61, %v9819_v50 }
 0x36e   :  { %v6639_v24 = vmax.f32 %v6533_v39, %v6534_v20  ;;  %v6645_v55 = vmax.f32 %v6535_v58, %v6536_v18  ;;  %v6558_v4 = vmax.f32 %v6414_v21, 0.0  ;;  %v6560_v59 = vmax.f32 %v6416_v22, 0.0 }
 0x36f   :  { %v9979_v51 = vrot.slane %v9950_v61, %v9824_v47 }
 0x370   :  { %v6640_v43 = vmax.f32 %v6557_v40, %v6558_v4  ;;  %v6646_v44 = vmax.f32 %v6559_v19, %v6560_v59  ;;  %v5491_v28 = vpop.f32.mrb[20].mxu0  ;;  %v5554_v63 = vpop.f32.mrb[20].mxu1  ;;  %8062 = vmatmul.mubr.msk.bf16.gmra.mrb[76].mxu0 %vm6744_vm14, %v9947_v42 }
 0x371   :  { %v6437_v41 = vadd.f32 %v9883_v11, %v5491_v28  ;;  %v6439_v2 = vadd.f32 %v9887_v31, %v5554_v63  ;;  %v5493_v37 = vpop.f32.mrb[21].mxu0  ;;  %v5556_v6 = vpop.f32.mrb[21].mxu1  ;;  %6885 = vmatprep.mubr.bf16.mxu0 %v8780_v0 }
 0x372   :  { %v9965_v60 = vpack.c.bf16 %v6640_v43, %v6639_v24  ;;  %v6438_v10 = vadd.f32 %v9903_v35, %v5493_v37  ;;  %v6440_v1 = vadd.f32 %v9907_v56, %v5556_v6  ;;  %v5495_v16 = vpop.f32.mrb[22].mxu0  ;;  %v5558_v5 = vpop.f32.mrb[22].mxu1  ;;  %v9969_v25 = vpack.c.bf16 %v6646_v44, %v6645_v55 }
 0x373   :  { %v6581_v38 = vmax.f32 %v6437_v41, 0.0  ;;  %v6583_v26 = vmax.f32 %v6439_v2, 0.0  ;;  %v6461_v8 = vadd.f32 %v9883_v11, %v5495_v16  ;;  %v6463_v32 = vadd.f32 %v9887_v31, %v5558_v5  ;;  %v5497_v29 = vpop.f32.mrb[23].mxu0  ;;  %v5560_v30 = vpop.f32.mrb[23].mxu1 }
 0x374   :  { %v6582_v33 = vmax.f32 %v6438_v10, 0.0  ;;  %v6584_v57 = vmax.f32 %v6440_v1, 0.0  ;;  %v6462_v39 = vadd.f32 %v9903_v35, %v5497_v29  ;;  %v6464_v58 = vadd.f32 %v9907_v56, %v5560_v30  ;;  %6804 = vmatprep.subr.bf16.mxu1 %v9969_v25 }
 0x375   :  { %v6605_v48 = vmax.f32 %v6461_v8, 0.0  ;;  %v6607_v36 = vmax.f32 %v6463_v32, 0.0  ;;  %6805 = vmatpush1.bf16.msra.mxu1 %v9965_v60  ;;  %v9983_v11 = vrot.slane %v9950_v61, %v9827_v23 }
 0x376   :  { %v6641_v31 = vmax.f32 %v6581_v38, %v6582_v33  ;;  %v6647_v15 = vmax.f32 %v6583_v26, %v6584_v57  ;;  %v6606_v20 = vmax.f32 %v6462_v39, 0.0  ;;  %v6608_v35 = vmax.f32 %v6464_v58, 0.0 }
 0x378   :  { %v6642_v18 = vmax.f32 %v6605_v48, %v6606_v20  ;;  %v6648_v56 = vmax.f32 %v6607_v36, %v6608_v35  ;;  %v5597_v21 = vpop.f32.mrb[24].mxu0  ;;  %v5660_v22 = vpop.f32.mrb[24].mxu1 }
 0x379   :  { %v6345_v40 = vadd.f32 %v9958_v13, %v5597_v21  ;;  %v6347_v19 = vadd.f32 %v9962_v27, %v5660_v22  ;;  %v5599_v24 = vpop.f32.mrb[25].mxu0  ;;  %v5662_v55 = vpop.f32.mrb[25].mxu1 }
 0x37a   :  { %v9987_v4 = vpack.c.bf16 %v6642_v18, %v6641_v31  ;;  %v6346_v59 = vadd.f32 %v9979_v51, %v5599_v24  ;;  %v6348_v43 = vadd.f32 %v9983_v11, %v5662_v55  ;;  %v5601_v44 = vpop.f32.mrb[26].mxu0  ;;  %v5664_v28 = vpop.f32.mrb[26].mxu1  ;;  %v9991_v63 = vpack.c.bf16 %v6648_v56, %v6647_v15 }
 0x37b   :  { %v6489_v41 = vmax.f32 %v6345_v40, 0.0  ;;  %v6491_v2 = vmax.f32 %v6347_v19, 0.0  ;;  %v6369_v37 = vadd.f32 %v9958_v13, %v5601_v44  ;;  %v6371_v6 = vadd.f32 %v9962_v27, %v5664_v28  ;;  %v5603_v10 = vpop.f32.mrb[27].mxu0  ;;  %v5666_v1 = vpop.f32.mrb[27].mxu1 }
 0x37c   :  { %v6490_v16 = vmax.f32 %v6346_v59, 0.0  ;;  %v6492_v5 = vmax.f32 %v6348_v43, 0.0  ;;  %v6370_v38 = vadd.f32 %v9979_v51, %v5603_v10  ;;  %v6372_v26 = vadd.f32 %v9983_v11, %v5666_v1  ;;  %6806 = vmatprep.subr.bf16.mxu1 %v9991_v63 }
 0x37d   :  { %v6513_v8 = vmax.f32 %v6369_v37, 0.0  ;;  %v6515_v32 = vmax.f32 %v6371_v6, 0.0  ;;  %6807 = vmatpush1.bf16.msra.mxu1 %v9987_v4 }
 0x37e   :  { %v6649_v29 = vmax.f32 %v6489_v41, %v6490_v16  ;;  %v6655_v30 = vmax.f32 %v6491_v2, %v6492_v5  ;;  %v6514_v33 = vmax.f32 %v6370_v38, 0.0  ;;  %v6516_v57 = vmax.f32 %v6372_v26, 0.0 }
 0x380   :  { %v6650_v39 = vmax.f32 %v6513_v8, %v6514_v33  ;;  %v6656_v58 = vmax.f32 %v6515_v32, %v6516_v57  ;;  %v5607_v48 = vpop.f32.mrb[28].mxu0  ;;  %v5670_v36 = vpop.f32.mrb[28].mxu1  ;;  %8063 = vmatmul.mubr.msk.bf16.vlgmr.msra.gmra.mrb[72].mxu1 %vm6744_vm14, %v9925_v3 }
 0x381   :  { %v6393_v31 = vadd.f32 %v9958_v13, %v5607_v48  ;;  %v6395_v15 = vadd.f32 %v9962_v27, %v5670_v36  ;;  %v5609_v20 = vpop.f32.mrb[29].mxu0  ;;  %v5672_v35 = vpop.f32.mrb[29].mxu1  ;;  %6844 = vmatprep.mubr.bf16.mxu1 %v8780_v0  ;;  %v10022_v48 = vrot.slane %v9950_v61, %v9868_v7  ;;  %v10026_v36 = vrot.slane %v9950_v61, %v9871_v45 }
 0x382   :  { %v10004_v18 = vpack.c.bf16 %v6650_v39, %v6649_v29  ;;  %v6394_v56 = vadd.f32 %v9979_v51, %v5609_v20  ;;  %v6396_v21 = vadd.f32 %v9983_v11, %v5672_v35  ;;  %v5611_v22 = vpop.f32.mrb[30].mxu0  ;;  %v5674_v40 = vpop.f32.mrb[30].mxu1  ;;  %v10008_v19 = vpack.c.bf16 %v6656_v58, %v6655_v30 }
 0x383   :  { %v6537_v24 = vmax.f32 %v6393_v31, 0.0  ;;  %v6539_v55 = vmax.f32 %v6395_v15, 0.0  ;;  %v6417_v59 = vadd.f32 %v9958_v13, %v5611_v22  ;;  %v6419_v43 = vadd.f32 %v9962_v27, %v5674_v40  ;;  %v5613_v44 = vpop.f32.mrb[31].mxu0  ;;  %v5676_v28 = vpop.f32.mrb[31].mxu1 }
 0x384   :  { %v6538_v41 = vmax.f32 %v6394_v56, 0.0  ;;  %v6540_v2 = vmax.f32 %v6396_v21, 0.0  ;;  %v6418_v37 = vadd.f32 %v9979_v51, %v5613_v44  ;;  %v6420_v6 = vadd.f32 %v9983_v11, %v5676_v28  ;;  %6853 = vmatprep.subr.bf16.mxu0 %v10008_v19 }
 0x385   :  { %v6561_v10 = vmax.f32 %v6417_v59, 0.0  ;;  %v6563_v1 = vmax.f32 %v6419_v43, 0.0  ;;  %6854 = vmatpush1.bf16.msra.mxu0 %v10004_v18 }
 0x386   :  { %v6651_v16 = vmax.f32 %v6537_v24, %v6538_v41  ;;  %v6657_v5 = vmax.f32 %v6539_v55, %v6540_v2  ;;  %v6562_v38 = vmax.f32 %v6418_v37, 0.0  ;;  %v6564_v26 = vmax.f32 %v6420_v6, 0.0 }
 0x388   :  { %v6652_v8 = vmax.f32 %v6561_v10, %v6562_v38  ;;  %v6658_v32 = vmax.f32 %v6563_v1, %v6564_v26  ;;  %v5617_v29 = vpop.f32.mrb[32].mxu0  ;;  %v5680_v30 = vpop.f32.mrb[32].mxu1  ;;  %8064 = vmatmul.mubr.msk.bf16.gmra.mrb[76].mxu1 %vm6744_vm14, %v9947_v42  ;;  %v10043_v10 = vrot.slane %v9950_v61, %v9874_v53 }
 0x389   :  { %v6441_v33 = vadd.f32 %v9958_v13, %v5617_v29  ;;  %v6443_v57 = vadd.f32 %v9962_v27, %v5680_v30  ;;  %v5619_v39 = vpop.f32.mrb[33].mxu0  ;;  %v5682_v58 = vpop.f32.mrb[33].mxu1  ;;  %6936 = vmatprep.mubr.bf16.mxu1 %v8780_v0 }
 0x38a   :  { %v10029_v31 = vpack.c.bf16 %v6652_v8, %v6651_v16  ;;  %v6442_v15 = vadd.f32 %v9979_v51, %v5619_v39  ;;  %v6444_v20 = vadd.f32 %v9983_v11, %v5682_v58  ;;  %v5621_v35 = vpop.f32.mrb[34].mxu0  ;;  %v5684_v56 = vpop.f32.mrb[34].mxu1  ;;  %v10033_v21 = vpack.c.bf16 %v6658_v32, %v6657_v5 }
 0x38b   :  { %v6585_v22 = vmax.f32 %v6441_v33, 0.0  ;;  %v6587_v40 = vmax.f32 %v6443_v57, 0.0  ;;  %v6465_v24 = vadd.f32 %v9958_v13, %v5621_v35  ;;  %v6467_v55 = vadd.f32 %v9962_v27, %v5684_v56  ;;  %v5623_v59 = vpop.f32.mrb[35].mxu0  ;;  %v5686_v43 = vpop.f32.mrb[35].mxu1 }
 0x38c   :  { %v6586_v44 = vmax.f32 %v6442_v15, 0.0  ;;  %v6588_v28 = vmax.f32 %v6444_v20, 0.0  ;;  %v6466_v41 = vadd.f32 %v9979_v51, %v5623_v59  ;;  %v6468_v2 = vadd.f32 %v9983_v11, %v5686_v43  ;;  %6855 = vmatprep.subr.bf16.mxu0 %v10033_v21 }
 0x38d   :  { %v6609_v37 = vmax.f32 %v6465_v24, 0.0  ;;  %v6611_v6 = vmax.f32 %v6467_v55, 0.0  ;;  %6856 = vmatpush1.bf16.msra.mxu0 %v10029_v31  ;;  %v10047_v13 = vrot.slane %v9950_v61, %v9877_v9 }
 0x38e   :  { %v6653_v27 = vmax.f32 %v6585_v22, %v6586_v44  ;;  %v6659_v1 = vmax.f32 %v6587_v40, %v6588_v28  ;;  %v6610_v16 = vmax.f32 %v6466_v41, 0.0  ;;  %v6612_v51 = vmax.f32 %v6468_v2, 0.0 }
 0x390   :  { %v6654_v5 = vmax.f32 %v6609_v37, %v6610_v16  ;;  %v6660_v11 = vmax.f32 %v6611_v6, %v6612_v51  ;;  %v5723_v38 = vpop.f32.mrb[36].mxu0  ;;  %v5786_v26 = vpop.f32.mrb[36].mxu1 }
 0x391   :  { %v6349_v8 = vadd.f32 %v10022_v48, %v5723_v38  ;;  %v6351_v32 = vadd.f32 %v10026_v36, %v5786_v26  ;;  %v5725_v29 = vpop.f32.mrb[37].mxu0  ;;  %v5788_v30 = vpop.f32.mrb[37].mxu1 }
 0x392   :  { %v10051_v33 = vpack.c.bf16 %v6654_v5, %v6653_v27  ;;  %v6350_v57 = vadd.f32 %v10043_v10, %v5725_v29  ;;  %v6352_v61 = vadd.f32 %v10047_v13, %v5788_v30  ;;  %v5727_v39 = vpop.f32.mrb[38].mxu0  ;;  %v5790_v58 = vpop.f32.mrb[38].mxu1  ;;  %v10055_v15 = vpack.c.bf16 %v6660_v11, %v6659_v1 }
 0x393   :  { %v6493_v20 = vmax.f32 %v6349_v8, 0.0  ;;  %v6495_v35 = vmax.f32 %v6351_v32, 0.0  ;;  %v6373_v56 = vadd.f32 %v10022_v48, %v5727_v39  ;;  %v6375_v22 = vadd.f32 %v10026_v36, %v5790_v58  ;;  %v5729_v40 = vpop.f32.mrb[39].mxu0  ;;  %v5792_v24 = vpop.f32.mrb[39].mxu1 }
 0x394   :  { %v6494_v55 = vmax.f32 %v6350_v57, 0.0  ;;  %v6496_v59 = vmax.f32 %v6352_v61, 0.0  ;;  %v6374_v43 = vadd.f32 %v10043_v10, %v5729_v40  ;;  %v6376_v44 = vadd.f32 %v10047_v13, %v5792_v24  ;;  %6857 = vmatprep.subr.bf16.mxu0 %v10055_v15 }
 0x395   :  { %v6517_v28 = vmax.f32 %v6373_v56, 0.0  ;;  %v6519_v41 = vmax.f32 %v6375_v22, 0.0  ;;  %6858 = vmatpush1.bf16.msra.mxu0 %v10051_v33 }
 0x396   :  { %v6661_v2 = vmax.f32 %v6493_v20, %v6494_v55  ;;  %v6667_v37 = vmax.f32 %v6495_v35, %v6496_v59  ;;  %v6518_v6 = vmax.f32 %v6374_v43, 0.0  ;;  %v6520_v27 = vmax.f32 %v6376_v44, 0.0 }
 0x398   :  { %v6662_v1 = vmax.f32 %v6517_v28, %v6518_v6  ;;  %v6668_v16 = vmax.f32 %v6519_v41, %v6520_v27  ;;  %v5733_v51 = vpop.f32.mrb[40].mxu0  ;;  %v5796_v5 = vpop.f32.mrb[40].mxu1  ;;  %8065 = vmatmul.mubr.msk.bf16.vlgmr.msra.gmra.mrb[80].mxu0 %vm6744_vm14, %v9925_v3  ;;  %v10080_v27 = vld [vmem:[#allocation4 + $0x10] sm:$0xff] }
 0x399   :  { %v6397_v11 = vadd.f32 %v10022_v48, %v5733_v51  ;;  %v6399_v38 = vadd.f32 %v10026_v36, %v5796_v5  ;;  %v5735_v26 = vpop.f32.mrb[41].mxu0  ;;  %v5798_v8 = vpop.f32.mrb[41].mxu1  ;;  %6895 = vmatprep.mubr.bf16.mxu0 %v8780_v0 }
 0x39a   :  { %v10068_v32 = vpack.c.bf16 %v6662_v1, %v6661_v2  ;;  %v6398_v29 = vadd.f32 %v10043_v10, %v5735_v26  ;;  %v6400_v30 = vadd.f32 %v10047_v13, %v5798_v8  ;;  %v5737_v57 = vpop.f32.mrb[42].mxu0  ;;  %v5800_v61 = vpop.f32.mrb[42].mxu1  ;;  %v10072_v39 = vpack.c.bf16 %v6668_v16, %v6667_v37 }
 0x39b   :  { %v6541_v58 = vmax.f32 %v6397_v11, 0.0  ;;  %v6543_v20 = vmax.f32 %v6399_v38, 0.0  ;;  %v6421_v35 = vadd.f32 %v10022_v48, %v5737_v57  ;;  %v6423_v56 = vadd.f32 %v10026_v36, %v5800_v61  ;;  %v5739_v22 = vpop.f32.mrb[43].mxu0  ;;  %v5802_v40 = vpop.f32.mrb[43].mxu1 }
 0x39c   :  { %v6542_v24 = vmax.f32 %v6398_v29, 0.0  ;;  %v6544_v55 = vmax.f32 %v6400_v30, 0.0  ;;  %v6422_v59 = vadd.f32 %v10043_v10, %v5739_v22  ;;  %v6424_v43 = vadd.f32 %v10047_v13, %v5802_v40  ;;  %6904 = vmatprep.subr.bf16.mxu1 %v10072_v39 }
 0x39d   :  { %v6565_v44 = vmax.f32 %v6421_v35, 0.0  ;;  %v6567_v28 = vmax.f32 %v6423_v56, 0.0  ;;  %6905 = vmatpush1.bf16.msra.mxu1 %v10068_v32  ;;  %v10088_v29 = vrot.slane %v10080_v27, %v9816_v46  ;;  %v10092_v30 = vrot.slane %v10080_v27, %v9819_v50 }
 0x39e   :  { %v6663_v41 = vmax.f32 %v6541_v58, %v6542_v24  ;;  %v6669_v2 = vmax.f32 %v6543_v20, %v6544_v55  ;;  %v6566_v37 = vmax.f32 %v6422_v59, 0.0  ;;  %v6568_v6 = vmax.f32 %v6424_v43, 0.0 }
 0x3a0   :  { %v6664_v1 = vmax.f32 %v6565_v44, %v6566_v37  ;;  %v6670_v16 = vmax.f32 %v6567_v28, %v6568_v6  ;;  %v5743_v51 = vpop.f32.mrb[44].mxu0  ;;  %v5806_v5 = vpop.f32.mrb[44].mxu1  ;;  %8066 = vmatmul.mubr.msk.bf16.gmra.mrb[84].mxu0 %vm6744_vm14, %v9947_v42 }
 0x3a1   :  { %v6445_v11 = vadd.f32 %v10022_v48, %v5743_v51  ;;  %v6447_v38 = vadd.f32 %v10026_v36, %v5806_v5  ;;  %v5745_v26 = vpop.f32.mrb[45].mxu0  ;;  %v5808_v8 = vpop.f32.mrb[45].mxu1  ;;  %6987 = vmatprep.mubr.bf16.mxu0 %v8780_v0 }
 0x3a2   :  { %v10095_v57 = vpack.c.bf16 %v6664_v1, %v6663_v41  ;;  %v6446_v61 = vadd.f32 %v10043_v10, %v5745_v26  ;;  %v6448_v58 = vadd.f32 %v10047_v13, %v5808_v8  ;;  %v5747_v20 = vpop.f32.mrb[46].mxu0  ;;  %v5810_v35 = vpop.f32.mrb[46].mxu1  ;;  %v10099_v56 = vpack.c.bf16 %v6670_v16, %v6669_v2 }
 0x3a3   :  { %v6589_v22 = vmax.f32 %v6445_v11, 0.0  ;;  %v6591_v40 = vmax.f32 %v6447_v38, 0.0  ;;  %v6469_v46 = vadd.f32 %v10022_v48, %v5747_v20  ;;  %v6471_v24 = vadd.f32 %v10026_v36, %v5810_v35  ;;  %v5749_v50 = vpop.f32.mrb[47].mxu0  ;;  %v5812_v55 = vpop.f32.mrb[47].mxu1 }
 0x3a4   :  { %v6590_v59 = vmax.f32 %v6446_v61, 0.0  ;;  %v6592_v43 = vmax.f32 %v6448_v58, 0.0  ;;  %v6470_v44 = vadd.f32 %v10043_v10, %v5749_v50  ;;  %v6472_v28 = vadd.f32 %v10047_v13, %v5812_v55  ;;  %6906 = vmatprep.subr.bf16.mxu1 %v10099_v56 }
 0x3a5   :  { %v6613_v41 = vmax.f32 %v6469_v46, 0.0  ;;  %v6615_v37 = vmax.f32 %v6471_v24, 0.0  ;;  %6907 = vmatpush1.bf16.msra.mxu1 %v10095_v57  ;;  %v10109_v2 = vrot.slane %v10080_v27, %v9824_v47  ;;  %v10113_v48 = vrot.slane %v10080_v27, %v9827_v23 }
 0x3a6   :  { %v6665_v36 = vmax.f32 %v6589_v22, %v6590_v59  ;;  %v6671_v6 = vmax.f32 %v6591_v40, %v6592_v43  ;;  %v6614_v1 = vmax.f32 %v6470_v44, 0.0  ;;  %v6616_v10 = vmax.f32 %v6472_v28, 0.0 }
 0x3a8   :  { %v6666_v16 = vmax.f32 %v6613_v41, %v6614_v1  ;;  %v6672_v13 = vmax.f32 %v6615_v37, %v6616_v10  ;;  %v5849_v51 = vpop.f32.mrb[48].mxu0  ;;  %v5912_v5 = vpop.f32.mrb[48].mxu1 }
 0x3a9   :  { %v6353_v11 = vadd.f32 %v10088_v29, %v5849_v51  ;;  %v6355_v38 = vadd.f32 %v10092_v30, %v5912_v5  ;;  %v5851_v26 = vpop.f32.mrb[49].mxu0  ;;  %v5914_v8 = vpop.f32.mrb[49].mxu1 }
 0x3aa   :  { %v10117_v47 = vpack.c.bf16 %v6666_v16, %v6665_v36  ;;  %v6354_v61 = vadd.f32 %v10109_v2, %v5851_v26  ;;  %v6356_v23 = vadd.f32 %v10113_v48, %v5914_v8  ;;  %v5853_v58 = vpop.f32.mrb[50].mxu0  ;;  %v5916_v20 = vpop.f32.mrb[50].mxu1  ;;  %v10121_v35 = vpack.c.bf16 %v6672_v13, %v6671_v6 }
 0x3ab   :  { %v6497_v22 = vmax.f32 %v6353_v11, 0.0  ;;  %v6499_v40 = vmax.f32 %v6355_v38, 0.0  ;;  %v6377_v46 = vadd.f32 %v10088_v29, %v5853_v58  ;;  %v6379_v24 = vadd.f32 %v10092_v30, %v5916_v20  ;;  %v5855_v50 = vpop.f32.mrb[51].mxu0  ;;  %v5918_v55 = vpop.f32.mrb[51].mxu1 }
 0x3ac   :  { %v6498_v59 = vmax.f32 %v6354_v61, 0.0  ;;  %v6500_v43 = vmax.f32 %v6356_v23, 0.0  ;;  %v6378_v44 = vadd.f32 %v10109_v2, %v5855_v50  ;;  %v6380_v28 = vadd.f32 %v10113_v48, %v5918_v55  ;;  %6908 = vmatprep.subr.bf16.mxu1 %v10121_v35 }
 0x3ad   :  { %v6521_v41 = vmax.f32 %v6377_v46, 0.0  ;;  %v6523_v37 = vmax.f32 %v6379_v24, 0.0  ;;  %6909 = vmatpush1.bf16.msra.mxu1 %v10117_v47 }
 0x3ae   :  { %v6673_v36 = vmax.f32 %v6497_v22, %v6498_v59  ;;  %v6679_v6 = vmax.f32 %v6499_v40, %v6500_v43  ;;  %v6522_v1 = vmax.f32 %v6378_v44, 0.0  ;;  %v6524_v10 = vmax.f32 %v6380_v28, 0.0 }
 0x3b0   :  { %v6674_v16 = vmax.f32 %v6521_v41, %v6522_v1  ;;  %v6680_v13 = vmax.f32 %v6523_v37, %v6524_v10  ;;  %v5859_v51 = vpop.f32.mrb[52].mxu0  ;;  %v5922_v5 = vpop.f32.mrb[52].mxu1  ;;  %8067 = vmatmul.mubr.msk.bf16.vlgmr.msra.gmra.mrb[80].mxu1 %vm6744_vm14, %v9925_v3 }
 0x3b1   :  { %v6401_v11 = vadd.f32 %v10088_v29, %v5859_v51  ;;  %v6403_v38 = vadd.f32 %v10092_v30, %v5922_v5  ;;  %v5861_v26 = vpop.f32.mrb[53].mxu0  ;;  %v5924_v8 = vpop.f32.mrb[53].mxu1  ;;  %6946 = vmatprep.mubr.bf16.mxu1 %v8780_v0 }
 0x3b2   :  { %v10134_v61 = vpack.c.bf16 %v6674_v16, %v6673_v36  ;;  %v6402_v23 = vadd.f32 %v10109_v2, %v5861_v26  ;;  %v6404_v58 = vadd.f32 %v10113_v48, %v5924_v8  ;;  %v5863_v20 = vpop.f32.mrb[54].mxu0  ;;  %v5926_v22 = vpop.f32.mrb[54].mxu1  ;;  %v10138_v40 = vpack.c.bf16 %v6680_v13, %v6679_v6 }
 0x3b3   :  { %v6545_v46 = vmax.f32 %v6401_v11, 0.0  ;;  %v6547_v24 = vmax.f32 %v6403_v38, 0.0  ;;  %v6425_v50 = vadd.f32 %v10088_v29, %v5863_v20  ;;  %v6427_v55 = vadd.f32 %v10092_v30, %v5926_v22  ;;  %v5865_v59 = vpop.f32.mrb[55].mxu0  ;;  %v5928_v43 = vpop.f32.mrb[55].mxu1 }
 0x3b4   :  { %v6546_v44 = vmax.f32 %v6402_v23, 0.0  ;;  %v6548_v28 = vmax.f32 %v6404_v58, 0.0  ;;  %v6426_v41 = vadd.f32 %v10109_v2, %v5865_v59  ;;  %v6428_v37 = vadd.f32 %v10113_v48, %v5928_v43  ;;  %6955 = vmatprep.subr.bf16.mxu0 %v10138_v40 }
 0x3b5   :  { %v6569_v36 = vmax.f32 %v6425_v50, 0.0  ;;  %v6571_v1 = vmax.f32 %v6427_v55, 0.0  ;;  %6956 = vmatpush1.bf16.msra.mxu0 %v10134_v61  ;;  %v10152_v20 = vrot.slane %v10080_v27, %v9868_v7  ;;  %v10156_v22 = vrot.slane %v10080_v27, %v9871_v45 }
 0x3b6   :  { %v6675_v6 = vmax.f32 %v6545_v46, %v6546_v44  ;;  %v6681_v10 = vmax.f32 %v6547_v24, %v6548_v28  ;;  %v6570_v16 = vmax.f32 %v6426_v41, 0.0  ;;  %v6572_v13 = vmax.f32 %v6428_v37, 0.0 }
 0x3b8   :  { %v6676_v51 = vmax.f32 %v6569_v36, %v6570_v16  ;;  %v6682_v5 = vmax.f32 %v6571_v1, %v6572_v13  ;;  %v5869_v11 = vpop.f32.mrb[56].mxu0  ;;  %v5932_v38 = vpop.f32.mrb[56].mxu1  ;;  %8068 = vmatmul.mubr.msk.bf16.gmra.mrb[84].mxu1 %vm6744_vm14, %v9947_v42 }
 0x3b9   :  { %v6449_v26 = vadd.f32 %v10088_v29, %v5869_v11  ;;  %v6451_v8 = vadd.f32 %v10092_v30, %v5932_v38  ;;  %v5871_v23 = vpop.f32.mrb[57].mxu0  ;;  %v5934_v58 = vpop.f32.mrb[57].mxu1  ;;  %7038 = vmatprep.mubr.bf16.mxu1 %v8780_v0 }
 0x3ba   :  { %v10159_v46 = vpack.c.bf16 %v6676_v51, %v6675_v6  ;;  %v6450_v24 = vadd.f32 %v10109_v2, %v5871_v23  ;;  %v6452_v50 = vadd.f32 %v10113_v48, %v5934_v58  ;;  %v5873_v55 = vpop.f32.mrb[58].mxu0  ;;  %v5936_v59 = vpop.f32.mrb[58].mxu1  ;;  %v10163_v43 = vpack.c.bf16 %v6682_v5, %v6681_v10 }
 0x3bb   :  { %v6593_v44 = vmax.f32 %v6449_v26, 0.0  ;;  %v6595_v28 = vmax.f32 %v6451_v8, 0.0  ;;  %v6473_v7 = vadd.f32 %v10088_v29, %v5873_v55  ;;  %v6475_v41 = vadd.f32 %v10092_v30, %v5936_v59  ;;  %v5875_v45 = vpop.f32.mrb[59].mxu0  ;;  %v5938_v37 = vpop.f32.mrb[59].mxu1 }
 0x3bc   :  { %v6594_v36 = vmax.f32 %v6450_v24, 0.0  ;;  %v6596_v1 = vmax.f32 %v6452_v50, 0.0  ;;  %v6474_v6 = vadd.f32 %v10109_v2, %v5875_v45  ;;  %v6476_v16 = vadd.f32 %v10113_v48, %v5938_v37  ;;  %6957 = vmatprep.subr.bf16.mxu0 %v10163_v43 }
 0x3bd   :  { %v6617_v13 = vmax.f32 %v6473_v7, 0.0  ;;  %v6619_v51 = vmax.f32 %v6475_v41, 0.0  ;;  %6958 = vmatpush1.bf16.msra.mxu0 %v10159_v46  ;;  %v10173_v10 = vrot.slane %v10080_v27, %v9874_v53  ;;  %v10177_v29 = vrot.slane %v10080_v27, %v9877_v9 }
 0x3be   :  { %v6677_v30 = vmax.f32 %v6593_v44, %v6594_v36  ;;  %v6683_v5 = vmax.f32 %v6595_v28, %v6596_v1  ;;  %v6618_v11 = vmax.f32 %v6474_v6, 0.0  ;;  %v6620_v2 = vmax.f32 %v6476_v16, 0.0 }
 0x3c0   :  { %v6678_v38 = vmax.f32 %v6617_v13, %v6618_v11  ;;  %v6684_v48 = vmax.f32 %v6619_v51, %v6620_v2  ;;  %v5975_v26 = vpop.f32.mrb[60].mxu0  ;;  %v6038_v8 = vpop.f32.mrb[60].mxu1 }
 0x3c1   :  { %v6357_v23 = vadd.f32 %v10152_v20, %v5975_v26  ;;  %v6359_v58 = vadd.f32 %v10156_v22, %v6038_v8  ;;  %v5977_v24 = vpop.f32.mrb[61].mxu0  ;;  %v6040_v50 = vpop.f32.mrb[61].mxu1 }
 0x3c2   :  { %v10181_v53 = vpack.c.bf16 %v6678_v38, %v6677_v30  ;;  %v6358_v55 = vadd.f32 %v10173_v10, %v5977_v24  ;;  %v6360_v9 = vadd.f32 %v10177_v29, %v6040_v50  ;;  %v5979_v27 = vpop.f32.mrb[62].mxu0  ;;  %v6042_v59 = vpop.f32.mrb[62].mxu1  ;;  %v10185_v44 = vpack.c.bf16 %v6684_v48, %v6683_v5 }
 0x3c3   :  { %v6501_v28 = vmax.f32 %v6357_v23, 0.0  ;;  %v6503_v7 = vmax.f32 %v6359_v58, 0.0  ;;  %v6381_v41 = vadd.f32 %v10152_v20, %v5979_v27  ;;  %v6383_v45 = vadd.f32 %v10156_v22, %v6042_v59  ;;  %v5981_v37 = vpop.f32.mrb[63].mxu0  ;;  %v6044_v36 = vpop.f32.mrb[63].mxu1 }
 0x3c4   :  { %v6502_v1 = vmax.f32 %v6358_v55, 0.0  ;;  %v6504_v6 = vmax.f32 %v6360_v9, 0.0  ;;  %v6382_v16 = vadd.f32 %v10173_v10, %v5981_v37  ;;  %v6384_v13 = vadd.f32 %v10177_v29, %v6044_v36  ;;  %6959 = vmatprep.subr.bf16.mxu0 %v10185_v44 }
 0x3c5   :  { %v6525_v51 = vmax.f32 %v6381_v41, 0.0  ;;  %v6527_v30 = vmax.f32 %v6383_v45, 0.0  ;;  %6960 = vmatpush1.bf16.msra.mxu0 %v10181_v53 }
 0x3c6   :  { %v6685_v5 = vmax.f32 %v6501_v28, %v6502_v1  ;;  %v6691_v11 = vmax.f32 %v6503_v7, %v6504_v6  ;;  %v6526_v2 = vmax.f32 %v6382_v16, 0.0  ;;  %v6528_v38 = vmax.f32 %v6384_v13, 0.0  ;;  %7074 = vmatprep.subr.bf16.mxu0 %v9859_v49 }
 0x3c8   :  { %v6686_v48 = vmax.f32 %v6525_v51, %v6526_v2  ;;  %v6692_v26 = vmax.f32 %v6527_v30, %v6528_v38  ;;  %v5985_v8 = vpop.f32.mrb[64].mxu0  ;;  %v6048_v23 = vpop.f32.mrb[64].mxu1  ;;  %8069 = vmatmul.mubr.msk.bf16.vlgmr.msra.gmra.mrb[88].mxu0 %vm6744_vm14, %v9925_v3 }
 0x3c9   :  { %v6405_v58 = vadd.f32 %v10152_v20, %v5985_v8  ;;  %v6407_v24 = vadd.f32 %v10156_v22, %v6048_v23  ;;  %v5987_v50 = vpop.f32.mrb[65].mxu0  ;;  %v6050_v55 = vpop.f32.mrb[65].mxu1  ;;  %7075 = vmatpush1.bf16.msra.mxu0 %v9855_v34  ;;  %6997 = vmatprep.mubr.bf16.mxu0 %v8780_v0 }
 0x3ca   :  { %v10200_v9 = vpack.c.bf16 %v6686_v48, %v6685_v5  ;;  %v6406_v49 = vadd.f32 %v10173_v10, %v5987_v50  ;;  %v6408_v27 = vadd.f32 %v10177_v29, %v6050_v55  ;;  %v5989_v59 = vpop.f32.mrb[66].mxu0  ;;  %v6052_v28 = vpop.f32.mrb[66].mxu1  ;;  %7076 = vmatprep.subr.bf16.mxu0 %v9893_v14  ;;  %v10205_v3 = vpack.c.bf16 %v6692_v26, %v6691_v11 }
 0x3cb   :  { %v6549_v7 = vmax.f32 %v6405_v58, 0.0  ;;  %v6551_v41 = vmax.f32 %v6407_v24, 0.0  ;;  %v6429_v45 = vadd.f32 %v10152_v20, %v5989_v59  ;;  %v6431_v34 = vadd.f32 %v10156_v22, %v6052_v28  ;;  %v5991_v37 = vpop.f32.mrb[67].mxu0  ;;  %v6054_v36 = vpop.f32.mrb[67].mxu1 }
 0x3cc   :  { %v6550_v1 = vmax.f32 %v6406_v49, 0.0  ;;  %v6552_v6 = vmax.f32 %v6408_v27, 0.0  ;;  %v6430_v16 = vadd.f32 %v10173_v10, %v5991_v37  ;;  %v6432_v13 = vadd.f32 %v10177_v29, %v6054_v36  ;;  %7006 = vmatprep.subr.bf16.mxu1 %v10205_v3 }
 0x3cd   :  { %v6573_v51 = vmax.f32 %v6429_v45, 0.0  ;;  %v6575_v14 = vmax.f32 %v6431_v34, 0.0  ;;  %7007 = vmatpush1.bf16.msra.mxu1 %v10200_v9  ;;  %7077 = vmatpush1.bf16.msra.mxu0 %v9889_v12 }
 0x3ce   :  { %v6687_v30 = vmax.f32 %v6549_v7, %v6550_v1  ;;  %v6693_v5 = vmax.f32 %v6551_v41, %v6552_v6  ;;  %v6574_v11 = vmax.f32 %v6430_v16, 0.0  ;;  %v6576_v2 = vmax.f32 %v6432_v13, 0.0  ;;  %7078 = vmatprep.subr.bf16.mxu0 %v9915_v52 }
 0x3d0   :  { %v6688_v38 = vmax.f32 %v6573_v51, %v6574_v11  ;;  %v6694_v48 = vmax.f32 %v6575_v14, %v6576_v2  ;;  %v5995_v26 = vpop.f32.mrb[68].mxu0  ;;  %v6058_v8 = vpop.f32.mrb[68].mxu1  ;;  %8070 = vmatmul.mubr.msk.bf16.gmra.mrb[92].mxu0 %vm6744_vm14, %v9947_v42  ;;  %v8710_v11 = vld [vmem:[%s10441_s4 + $0x8] ss:$0 sps:$4 sm:$0xff]  }
 0x3d1   :  { %v6453_v23 = vadd.f32 %v10152_v20, %v5995_v26  ;;  %v6455_v58 = vadd.f32 %v10156_v22, %v6058_v8  ;;  %v5997_v24 = vpop.f32.mrb[69].mxu0  ;;  %v6060_v50 = vpop.f32.mrb[69].mxu1  ;;  %7079 = vmatpush1.bf16.msra.mxu0 %v9911_v62  ;;  %7106 = vmatprep.mubr.bf16.mxu0 %v8780_v0 }
 0x3d2   :  { %v10221_v12 = vpack.c.bf16 %v6688_v38, %v6687_v30  ;;  %v6454_v52 = vadd.f32 %v10173_v10, %v5997_v24  ;;  %v6456_v55 = vadd.f32 %v10177_v29, %v6060_v50  ;;  %v5999_v49 = vpop.f32.mrb[70].mxu0  ;;  %v6062_v27 = vpop.f32.mrb[70].mxu1  ;;  %7176 = vmatprep.subr.bf16.mxu0 %v10008_v19  ;;  %v10226_v59 = vpack.c.bf16 %v6694_v48, %v6693_v5  ;;  %v10236_v19 = vld [vmem:[%s10441_s4] sm:$0xff]  }
 0x3d3   :  { %v6597_v28 = vmax.f32 %v6453_v23, 0.0  ;;  %v6599_v7 = vmax.f32 %v6455_v58, 0.0  ;;  %v6477_v41 = vadd.f32 %v10152_v20, %v5999_v49  ;;  %v6479_v62 = vadd.f32 %v10156_v22, %v6062_v27  ;;  %v6001_v45 = vpop.f32.mrb[71].mxu0  ;;  %v6064_v34 = vpop.f32.mrb[71].mxu1 }
 0x3d4   :  { %v6598_v37 = vmax.f32 %v6454_v52, 0.0  ;;  %v6600_v36 = vmax.f32 %v6456_v55, 0.0  ;;  %v6478_v1 = vadd.f32 %v10173_v10, %v6001_v45  ;;  %v6480_v6 = vadd.f32 %v10177_v29, %v6064_v34  ;;  %7008 = vmatprep.subr.bf16.mxu1 %v10226_v59 }
 0x3d5   :  { %v6621_v16 = vmax.f32 %v6477_v41, 0.0  ;;  %v6623_v13 = vmax.f32 %v6479_v62, 0.0  ;;  %7009 = vmatpush1.bf16.msra.mxu1 %v10221_v12 }
 0x3d6   :  { %v6689_v20 = vmax.f32 %v6597_v28, %v6598_v37  ;;  %v6695_v22 = vmax.f32 %v6599_v7, %v6600_v36  ;;  %v6622_v51 = vmax.f32 %v6478_v1, 0.0  ;;  %v6624_v14 = vmax.f32 %v6480_v6, 0.0 }
 0x3d8   :  { %v6690_v30 = vmax.f32 %v6621_v16, %v6622_v51  ;;  %v6696_v5 = vmax.f32 %v6623_v13, %v6624_v14  ;;  %8075 = vmatmul.mubr.msk.bf16.vlgmr.msra.gmra.mrb[96].mxu0 %vm6744_vm14, %v10236_v19 }
 0x3d9   :  { %7177 = vmatpush1.bf16.msra.mxu0 %v10004_v18  ;;  %7116 = vmatprep.mubr.bf16.mxu0 %v8780_v0  ;;  %v8727_v18 = vld [vmem:[%s10440_s3] sm:$0xff]  }
 0x3da   :  { %v6731_v10 = vpack.c.bf16 %v6690_v30, %v6689_v20  ;;  %7178 = vmatprep.subr.bf16.mxu0 %v10033_v21  ;;  %v6732_v29 = vpack.c.bf16 %v6696_v5, %v6695_v22 }
 0x3dc   :  { %7010 = vmatprep.subr.bf16.mxu1 %v6732_v29 }
 0x3dd   :  { %7179 = vmatpush1.bf16.msra.mxu0 %v10029_v31  ;;  %7011 = vmatpush1.bf16.msra.mxu1 %v6731_v10 }
 0x3de   :  { %7180 = vmatprep.subr.bf16.mxu0 %v10055_v15  ;;  %7125 = vmatprep.subr.bf16.mxu1 %v9937_v17 }
 0x3e0   :  { %8071 = vmatmul.mubr.msk.bf16.vlgmr.msra.gmra.mrb[88].mxu1 %vm6744_vm14, %v8727_v18  ;;  %8076 = vmatmul.mubr.msk.bf16.gmra.mrb[100].mxu0 %vm6744_vm14, %v8710_v11 }
 0x3e1   :  { %7181 = vmatpush1.bf16.msra.mxu0 %v10051_v33  ;;  %7126 = vmatpush1.bf16.msra.mxu1 %v9933_v54 }
 0x3e2   :  { %7278 = vmatprep.subr.bf16.mxu0 %v10138_v40  ;;  %7127 = vmatprep.subr.bf16.mxu1 %v9969_v25 }
 0x3e3   :  { %7048 = vmatprep.mubr.bf16.mxu1 %v8780_v0  ;;  %7208 = vmatprep.mubr.bf16.mxu0 %v8780_v0 }
 0x3e5   :  { %7128 = vmatpush1.bf16.msra.mxu1 %v9965_v60 }
 0x3e6   :  { %7129 = vmatprep.subr.bf16.mxu1 %v9991_v63 }
 0x3e8   :  { %8072 = vmatmul.mubr.msk.bf16.gmra.mrb[92].mxu1 %vm6744_vm14, %v9947_v42  ;;  %8079 = vmatmul.mubr.msk.bf16.vlgmr.msra.gmra.mrb[104].mxu0 %vm6744_vm14, %v10236_v19 }
 0x3e9   :  { %7279 = vmatpush1.bf16.msra.mxu0 %v10134_v61  ;;  %7130 = vmatpush1.bf16.msra.mxu1 %v9987_v4 }
 0x3ea   :  { %7280 = vmatprep.subr.bf16.mxu0 %v10163_v43  ;;  %7227 = vmatprep.subr.bf16.mxu1 %v10072_v39 }
 0x3eb   :  { %7157 = vmatprep.mubr.bf16.mxu1 %v8780_v0  ;;  %7218 = vmatprep.mubr.bf16.mxu0 %v8780_v0 }
 0x3ed   :  { %7281 = vmatpush1.bf16.msra.mxu0 %v10159_v46 }
 0x3ee   :  { %7282 = vmatprep.subr.bf16.mxu0 %v10185_v44 }
 0x3f0   :  { %8077 = vmatmul.mubr.msk.bf16.vlgmr.msra.gmra.mrb[96].mxu1 %vm6744_vm14, %v10236_v19  ;;  %8080 = vmatmul.mubr.msk.bf16.gmra.mrb[108].mxu0 %vm6744_vm14, %v8710_v11 }
 0x3f1   :  { %7228 = vmatpush1.bf16.msra.mxu1 %v10068_v32  ;;  %7283 = vmatpush1.bf16.msra.mxu0 %v10181_v53 }
 0x3f2   :  { %7229 = vmatprep.subr.bf16.mxu1 %v10099_v56  ;;  %7167 = vmatprep.mubr.bf16.mxu1 %v8780_v0 }
 0x3f3   :  { %7310 = vmatprep.mubr.bf16.mxu0 %v8780_v0 }
 0x3f5   :  { %7230 = vmatpush1.bf16.msra.mxu1 %v10095_v57 }
 0x3f6   :  { %7231 = vmatprep.subr.bf16.mxu1 %v10121_v35 }
 0x3f8   :  { %8078 = vmatmul.mubr.msk.bf16.gmra.mrb[100].mxu1 %vm6744_vm14, %v8710_v11  ;;  %8083 = vmatmul.mubr.msk.bf16.vlgmr.msra.gmra.mrb[112].mxu0 %vm6744_vm14, %v10236_v19 }
 0x3f9   :  { %7232 = vmatpush1.bf16.msra.mxu1 %v10117_v47  ;;  %7259 = vmatprep.mubr.bf16.mxu1 %v8780_v0 }
 0x3fa   :  { %7329 = vmatprep.subr.bf16.mxu1 %v10205_v3  ;;  %7320 = vmatprep.mubr.bf16.mxu0 %v8780_v0 }
 0x400   :  { %8081 = vmatmul.mubr.msk.bf16.vlgmr.msra.gmra.mrb[104].mxu1 %vm6744_vm14, %v10236_v19  ;;  %8084 = vmatmul.mubr.msk.bf16.gmra.mrb[116].mxu0 %vm6744_vm14, %v8710_v11 }
 0x401   :  { %7330 = vmatpush1.bf16.msra.mxu1 %v10200_v9  ;;  %7269 = vmatprep.mubr.bf16.mxu1 %v8780_v0 }
 0x402   :  { %7331 = vmatprep.subr.bf16.mxu1 %v10226_v59 }
 0x405   :  { %7332 = vmatpush1.bf16.msra.mxu1 %v10221_v12 }
 0x406   :  { %7333 = vmatprep.subr.bf16.mxu1 %v6732_v29 }
 0x408   :  { %8082 = vmatmul.mubr.msk.bf16.gmra.mrb[108].mxu1 %vm6744_vm14, %v8710_v11 }
 0x409   :  { %7334 = vmatpush1.bf16.msra.mxu1 %v6731_v10  ;;  %7361 = vmatprep.mubr.bf16.mxu1 %v8780_v0 }
 0x410   :  { %8085 = vmatmul.mubr.msk.bf16.vlgmr.msra.gmra.mrb[112].mxu1 %vm6744_vm14, %v10236_v19 }
 0x411   :  { %7371 = vmatprep.mubr.bf16.mxu1 %v8780_v0 }
 0x418   :  { %8086 = vmatmul.mubr.msk.bf16.gmra.mrb[116].mxu1 %vm6744_vm14, %v8710_v11 }
 0x43b   :  { %v6785_v54 = vpop.f32.mrb[72].mxu0 }
 0x43c   :  { %v6787_v17 = vpop.f32.mrb[73].mxu0 }
 0x43d   :  { %v6789_v42 = vpop.f32.mrb[74].mxu0 }
 0x43e   :  { %v6791_v60 = vpop.f32.mrb[75].mxu0 }
 0x443   :  { %v6795_v25 = vpop.f32.mrb[76].mxu0 }
 0x444   :  { %v6797_v4 = vpop.f32.mrb[77].mxu0 }
 0x445   :  { %v6799_v63 = vpop.f32.mrb[78].mxu0 }
 0x446   :  { %v6800_v31 = vpop.f32.mrb[79].mxu0 }
 0x453   :  { %v10305_v21 = vpop.f32.mrb[72].mxu1 }
 0x454   :  { %v10307_v33 = vpop.f32.mrb[73].mxu1 }
 0x455   :  { %v10309_v15 = vpop.f32.mrb[74].mxu1 }
 0x456   :  { %v10311_v32 = vpop.f32.mrb[75].mxu1 }
 0x45b   :  { %v10313_v39 = vpop.f32.mrb[76].mxu1 }
 0x45c   :  { %v10315_v0 = vpop.f32.mrb[77].mxu1 }
 0x45d   :  { %v6850_v57 = vpop.f32.mrb[78].mxu1 }
 0x45e   :  { %v6851_v56 = vpop.f32.mrb[79].mxu1 }
 0x46b   :  { %v6887_v47 = vpop.f32.mrb[80].mxu0 }
 0x46c   :  { %v6889_v35 = vpop.f32.mrb[81].mxu0 }
 0x46d   :  { %v6891_v61 = vpop.f32.mrb[82].mxu0 }
 0x46e   :  { %v6893_v40 = vpop.f32.mrb[83].mxu0 }
 0x473   :  { %v10317_v46 = vpop.f32.mrb[84].mxu0 }
 0x474   :  { %v10319_v43 = vpop.f32.mrb[85].mxu0 }
 0x475   :  { %v6901_v53 = vpop.f32.mrb[86].mxu0 }
 0x476   :  { %v6902_v44 = vpop.f32.mrb[87].mxu0 }
 0x483   :  { %v10321_v9 = vpop.f32.mrb[80].mxu1 }
 0x484   :  { %v10323_v3 = vpop.f32.mrb[81].mxu1 }
 0x485   :  { %v10325_v2 = vpop.f32.mrb[82].mxu1 }
 0x486   :  { %v10327_v38 = vpop.f32.mrb[83].mxu1 }
 0x48b   :  { %v10329_v48 = vpop.f32.mrb[84].mxu1 }
 0x48c   :  { %v10331_v26 = vpop.f32.mrb[85].mxu1 }
 0x48d   :  { %v6952_v8 = vpop.f32.mrb[86].mxu1 }
 0x48e   :  { %v6953_v23 = vpop.f32.mrb[87].mxu1 }
 0x49b   :  { %v10333_v58 = vpop.f32.mrb[88].mxu0 }
 0x49c   :  { %v10335_v24 = vpop.f32.mrb[89].mxu0 }
 0x49d   :  { %v10337_v50 = vpop.f32.mrb[90].mxu0 }
 0x49e   :  { %v10339_v12 = vpop.f32.mrb[91].mxu0 }
 0x4a3   :  { %v10341_v52 = vpop.f32.mrb[92].mxu0 }
 0x4a4   :  { %v10343_v55 = vpop.f32.mrb[93].mxu0 }
 0x4a5   :  { %v7003_v49 = vpop.f32.mrb[94].mxu0 }
 0x4a6   :  { %v7004_v27 = vpop.f32.mrb[95].mxu0 }
 0x4ab   :  { %v7108_v59 = vpop.f32.mrb[96].mxu0 }
 0x4ac   :  { %v7380_v28 = vmax.f32 %v6785_v54, %v7108_v59  ;;  %v7110_v7 = vpop.f32.mrb[97].mxu0 }
 0x4ad   :  { %v7381_v41 = vmax.f32 %v6787_v17, %v7110_v7  ;;  %v7112_v62 = vpop.f32.mrb[98].mxu0 }
 0x4ae   :  { %v7392_v45 = vmax.f32 %v6789_v42, %v7112_v62  ;;  %v7114_v34 = vpop.f32.mrb[99].mxu0 }
 0x4af   :  { %v8105_v37 = vpack.c.bf16 %v7381_v41, %v7380_v28  ;;  %v7393_v36 = vmax.f32 %v6791_v60, %v7114_v34 }
 0x4b1   :  { %7536 = vst [vmem:[%s10442_s5] sm:$0xff] %v8105_v37  ;;  %v8111_v1 = vpack.c.bf16 %v7393_v36, %v7392_v45 }
 0x4b3   :  { %7542 = vst [vmem:[%s10442_s5 + $0x30] sm:$0xff] %v8111_v1  ;;  %v10351_v6 = vpop.f32.mrb[88].mxu1  ;;  %v7118_v19 = vpop.f32.mrb[100].mxu0 }
 0x4b4   :  { %v7404_v16 = vmax.f32 %v6795_v25, %v7118_v19  ;;  %v10353_v13 = vpop.f32.mrb[89].mxu1  ;;  %v7120_v20 = vpop.f32.mrb[101].mxu0 }
 0x4b5   :  { %v7405_v22 = vmax.f32 %v6797_v4, %v7120_v20  ;;  %v10355_v51 = vpop.f32.mrb[90].mxu1  ;;  %v7122_v14 = vpop.f32.mrb[102].mxu0 }
 0x4b6   :  { %v10357_v30 = vpop.f32.mrb[91].mxu1  ;;  %v7123_v5 = vpop.f32.mrb[103].mxu0 }
 0x4b7   :  { %v8117_v10 = vpack.c.bf16 %v7405_v22, %v7404_v16 }
 0x4b9   :  { %7548 = vst [vmem:[%s10442_s5 + $0x60] sm:$0xff] %v8117_v10 }
 0x4bb   :  { %v10362_v29 = vpop.f32.mrb[92].mxu1  ;;  %v7210_v11 = vpop.f32.mrb[104].mxu0 }
 0x4bc   :  { %v7384_v18 = vmax.f32 %v6887_v47, %v7210_v11  ;;  %v10364_v54 = vpop.f32.mrb[93].mxu1  ;;  %v7212_v17 = vpop.f32.mrb[105].mxu0 }
 0x4bd   :  { %v7385_v42 = vmax.f32 %v6889_v35, %v7212_v17  ;;  %v7054_v60 = vpop.f32.mrb[94].mxu1  ;;  %v7214_v25 = vpop.f32.mrb[106].mxu0 }
 0x4be   :  { %v7396_v4 = vmax.f32 %v6891_v61, %v7214_v25  ;;  %v7055_v63 = vpop.f32.mrb[95].mxu1  ;;  %v7216_v31 = vpop.f32.mrb[107].mxu0 }
 0x4bf   :  { %v8107_v57 = vpack.c.bf16 %v7385_v42, %v7384_v18  ;;  %v7397_v56 = vmax.f32 %v6893_v40, %v7216_v31 }
 0x4c1   :  { %7538 = vst [vmem:[%s10442_s5 + $0x10] sm:$0xff] %v8107_v57  ;;  %v8113_v53 = vpack.c.bf16 %v7397_v56, %v7396_v4 }
 0x4c3   :  { %7544 = vst [vmem:[%s10442_s5 + $0x40] sm:$0xff] %v8113_v53  ;;  %v7159_v47 = vpop.f32.mrb[96].mxu1  ;;  %v7220_v44 = vpop.f32.mrb[108].mxu0 }
 0x4c4   :  { %v7382_v35 = vmax.f32 %v10305_v21, %v7159_v47  ;;  %v7408_v8 = vmax.f32 %v10317_v46, %v7220_v44  ;;  %v7161_v61 = vpop.f32.mrb[97].mxu1  ;;  %v7222_v23 = vpop.f32.mrb[109].mxu0 }
 0x4c5   :  { %v7383_v49 = vmax.f32 %v10307_v33, %v7161_v61  ;;  %v7409_v40 = vmax.f32 %v10319_v43, %v7222_v23  ;;  %v7163_v27 = vpop.f32.mrb[98].mxu1  ;;  %v7224_v59 = vpop.f32.mrb[110].mxu0 }
 0x4c6   :  { %v7394_v28 = vmax.f32 %v10309_v15, %v7163_v27  ;;  %v7165_v7 = vpop.f32.mrb[99].mxu1  ;;  %v7225_v41 = vpop.f32.mrb[111].mxu0 }
 0x4c7   :  { %v8106_v62 = vpack.c.bf16 %v7383_v49, %v7382_v35  ;;  %v8119_v45 = vpack.c.bf16 %v7409_v40, %v7408_v8  ;;  %v7395_v34 = vmax.f32 %v10311_v32, %v7165_v7 }
 0x4c9   :  { %7537 = vst [vmem:[%s10442_s5 + $0x8] sm:$0xff] %v8106_v62  ;;  %7550 = vst [vmem:[%s10442_s5 + $0x70] sm:$0xff] %v8119_v45  ;;  %v8112_v21 = vpack.c.bf16 %v7395_v34, %v7394_v28 }
 0x4cb   :  { %7543 = vst [vmem:[%s10442_s5 + $0x38] sm:$0xff] %v8112_v21  ;;  %v7169_v33 = vpop.f32.mrb[100].mxu1  ;;  %v7312_v15 = vpop.f32.mrb[112].mxu0 }
 0x4cc   :  { %v7406_v46 = vmax.f32 %v10313_v39, %v7169_v33  ;;  %v7388_v43 = vmax.f32 %v10333_v58, %v7312_v15  ;;  %v7171_v32 = vpop.f32.mrb[101].mxu1  ;;  %v7314_v37 = vpop.f32.mrb[113].mxu0 }
 0x4cd   :  { %v7407_v36 = vmax.f32 %v10315_v0, %v7171_v32  ;;  %v7389_v1 = vmax.f32 %v10335_v24, %v7314_v37  ;;  %v7173_v19 = vpop.f32.mrb[102].mxu1  ;;  %v7316_v16 = vpop.f32.mrb[114].mxu0 }
 0x4ce   :  { %v7400_v20 = vmax.f32 %v10337_v50, %v7316_v16  ;;  %v7174_v22 = vpop.f32.mrb[103].mxu1  ;;  %v7318_v14 = vpop.f32.mrb[115].mxu0 }
 0x4cf   :  { %v8118_v5 = vpack.c.bf16 %v7407_v36, %v7406_v46  ;;  %v8109_v10 = vpack.c.bf16 %v7389_v1, %v7388_v43  ;;  %v7401_v11 = vmax.f32 %v10339_v12, %v7318_v14 }
 0x4d1   :  { %7549 = vst [vmem:[%s10442_s5 + $0x68] sm:$0xff] %v8118_v5  ;;  %7540 = vst [vmem:[%s10442_s5 + $0x20] sm:$0xff] %v8109_v10  ;;  %v8115_v39 = vpack.c.bf16 %v7401_v11, %v7400_v20 }
 0x4d3   :  { %7546 = vst [vmem:[%s10442_s5 + $0x50] sm:$0xff] %v8115_v39  ;;  %v7261_v0 = vpop.f32.mrb[104].mxu1  ;;  %v7322_v58 = vpop.f32.mrb[116].mxu0 }
 0x4d4   :  { %v7386_v24 = vmax.f32 %v10321_v9, %v7261_v0  ;;  %v7412_v50 = vmax.f32 %v10341_v52, %v7322_v58  ;;  %v7263_v12 = vpop.f32.mrb[105].mxu1  ;;  %v7324_v18 = vpop.f32.mrb[117].mxu0 }
 0x4d5   :  { %v7387_v17 = vmax.f32 %v10323_v3, %v7263_v12  ;;  %v7413_v42 = vmax.f32 %v10343_v55, %v7324_v18  ;;  %v7265_v60 = vpop.f32.mrb[106].mxu1  ;;  %v7326_v25 = vpop.f32.mrb[118].mxu0 }
 0x4d6   :  { %v7398_v4 = vmax.f32 %v10325_v2, %v7265_v60  ;;  %v7267_v63 = vpop.f32.mrb[107].mxu1  ;;  %v7327_v31 = vpop.f32.mrb[119].mxu0 }
 0x4d7   :  { %v8108_v57 = vpack.c.bf16 %v7387_v17, %v7386_v24  ;;  %v8121_v56 = vpack.c.bf16 %v7413_v42, %v7412_v50  ;;  %v7399_v53 = vmax.f32 %v10327_v38, %v7267_v63 }
 0x4d9   :  { %7539 = vst [vmem:[%s10442_s5 + $0x18] sm:$0xff] %v8108_v57  ;;  %7552 = vst [vmem:[%s10442_s5 + $0x80] sm:$0xff] %v8121_v56  ;;  %v8114_v9 = vpack.c.bf16 %v7399_v53, %v7398_v4 }
 0x4db   :  { %7545 = vst [vmem:[%s10442_s5 + $0x48] sm:$0xff] %v8114_v9  ;;  %v7271_v3 = vpop.f32.mrb[108].mxu1 }
 0x4dc   :  { %v7410_v2 = vmax.f32 %v10329_v48, %v7271_v3  ;;  %v7273_v52 = vpop.f32.mrb[109].mxu1 }
 0x4dd   :  { %v7411_v55 = vmax.f32 %v10331_v26, %v7273_v52  ;;  %v7275_v38 = vpop.f32.mrb[110].mxu1 }
 0x4de   :  { %v7276_v47 = vpop.f32.mrb[111].mxu1 }
 0x4df   :  { %v8120_v44 = vpack.c.bf16 %v7411_v55, %v7410_v2 }
 0x4e1   :  { %7551 = vst [vmem:[%s10442_s5 + $0x78] sm:$0xff] %v8120_v44 }
 0x4e3   :  { %v7363_v35 = vpop.f32.mrb[112].mxu1 }
 0x4e4   :  { %v7390_v8 = vmax.f32 %v10351_v6, %v7363_v35  ;;  %v7365_v61 = vpop.f32.mrb[113].mxu1 }
 0x4e5   :  { %v7391_v23 = vmax.f32 %v10353_v13, %v7365_v61  ;;  %v7367_v49 = vpop.f32.mrb[114].mxu1 }
 0x4e6   :  { %v7402_v40 = vmax.f32 %v10355_v51, %v7367_v49  ;;  %v7369_v48 = vpop.f32.mrb[115].mxu1 }
 0x4e7   :  { %v8110_v27 = vpack.c.bf16 %v7391_v23, %v7390_v8  ;;  %v7403_v26 = vmax.f32 %v10357_v30, %v7369_v48 }
 0x4e9   :  { %7541 = vst [vmem:[%s10442_s5 + $0x28] sm:$0xff] %v8110_v27  ;;  %v8116_v59 = vpack.c.bf16 %v7403_v26, %v7402_v40 }
 0x4eb   :  { %7547 = vst [vmem:[%s10442_s5 + $0x58] sm:$0xff] %v8116_v59  ;;  %v7373_v6 = vpop.f32.mrb[116].mxu1 }
 0x4ec   :  { %v7414_v28 = vmax.f32 %v10362_v29, %v7373_v6  ;;  %v7375_v13 = vpop.f32.mrb[117].mxu1 }
 0x4ed   :  { %v7415_v7 = vmax.f32 %v10364_v54, %v7375_v13  ;;  %v7377_v51 = vpop.f32.mrb[118].mxu1 }
 0x4ee   :  { %v7378_v41 = vpop.f32.mrb[119].mxu1 }
 0x4ef   :  { %v8122_v62 = vpack.c.bf16 %v7415_v7, %v7414_v28 }
 0x4f1   :  { %7553 = vst [vmem:[%s10442_s5 + $0x88] sm:$0xff] %v8122_v62 }
 0x4f2   :  { %7558 = vsyncpa [#allocation3], 1 }
 0x4f3   :  { %7559 = vsyncpa [#allocation5], 1 }

</bundles_post_ra>
